<compile_context>
chip_gen: v6e
topology: v6e:2x2x1
jax: 0.10.0
libtpu: 0.0.40
codegen_flags: <defaults>
</compile_context>

<pallas_src>
import functools

import jax
import jax.numpy as jnp
from jax import lax
from jax.experimental import pallas as pl
from jax.experimental.pallas import tpu as pltpu


# ------------------------------------------------------------------------- helpers
def _round_up(a, b):
    return (a + b - 1) // b * b


def _pick_row_tile(n, target):
    """Row tile: multiple of 16 (bf16 sublane packing), <= ~target, giving at least
    2 grid steps whenever n > 16 (keeps both v7x TensorCores busy and lets the
    BlockSpec pipeline overlap DMA with compute)."""
    if n <= 16:
        return 16
    n_tiles = max(2, -(-n // target))
    return _round_up(-(-n // n_tiles), 16)


def _bn_fold(gamma, beta, mean, var, eps=1e-3):
    scale = gamma / jnp.sqrt(var + eps)
    bias = beta - mean * scale
    return scale, bias


# --------------------------------------------------------------- kernel 1: 1x1 bank
# One kernel computes all four 1x1 convolutions of the block on a (tm, Cin) row tile.
# Four lane-dense outputs (no post-hoc lane-misaligned slicing):
#   o0: branch1x1      (192, BN+ReLU)               f32  (final branch output)
#   o1: branch7x7_1    (c7,  BN+ReLU)               bf16 (feeds the (1,7)/(7,1) chain)
#   o2: branch7x7dbl_1 (c7,  BN+ReLU)               bf16 (feeds the 4-conv chain)
#   o3: branch_pool 1x1 conv RAW (BN+ReLU applied after the avg-pool; the 1x1 conv
#       commutes with the count_include_pad avg-pool because it has no bias)   f32
def _bank1x1_kernel(x_ref, w0_ref, w1_ref, w2_ref, w3_ref,
                    s0_ref, b0_ref, s1_ref, b1_ref, s2_ref, b2_ref,
                    o0_ref, o1_ref, o2_ref, o3_ref):
    x = x_ref[...].astype(jnp.bfloat16)          # bf16 MXU operands, f32 accumulate

    def branch(w_ref, s_ref, b_ref):
        z = jnp.dot(x, w_ref[...], preferred_element_type=jnp.float32)
        return jnp.maximum(z * s_ref[...] + b_ref[...], 0.0)

    o0_ref[...] = branch(w0_ref, s0_ref, b0_ref).astype(o0_ref.dtype)
    o1_ref[...] = branch(w1_ref, s1_ref, b1_ref).astype(o1_ref.dtype)
    o2_ref[...] = branch(w2_ref, s2_ref, b2_ref).astype(o2_ref.dtype)
    o3_ref[...] = jnp.dot(x, w3_ref[...],
                          preferred_element_type=jnp.float32).astype(o3_ref.dtype)


def bank1x1(xm, prep, *, tm):
    Mp, cin = xm.shape
    c7 = prep["w1"].shape[1]
    row = lambda i: (i, 0)
    bcast = lambda i: (0, 0)
    return pl.pallas_call(
        _bank1x1_kernel,
        out_shape=(
            jax.ShapeDtypeStruct((Mp, 192), jnp.float32),
            jax.ShapeDtypeStruct((Mp, c7), jnp.bfloat16),
            jax.ShapeDtypeStruct((Mp, c7), jnp.bfloat16),
            jax.ShapeDtypeStruct((Mp, 192), jnp.float32),
        ),
        grid=(Mp // tm,),
        in_specs=[
            pl.BlockSpec((tm, cin), row),
            pl.BlockSpec((cin, 192), bcast),
            pl.BlockSpec((cin, c7), bcast),
            pl.BlockSpec((cin, c7), bcast),
            pl.BlockSpec((cin, 192), bcast),
            pl.BlockSpec((1, 192), bcast), pl.BlockSpec((1, 192), bcast),
            pl.BlockSpec((1, c7), bcast), pl.BlockSpec((1, c7), bcast),
            pl.BlockSpec((1, c7), bcast), pl.BlockSpec((1, c7), bcast),
        ],
        out_specs=(
            pl.BlockSpec((tm, 192), row),
            pl.BlockSpec((tm, c7), row),
            pl.BlockSpec((tm, c7), row),
            pl.BlockSpec((tm, 192), row),
        ),
        compiler_params=pltpu.CompilerParams(dimension_semantics=("parallel",)),
    )(xm, prep["w0"], prep["w1"], prep["w2"], prep["w3"],
      prep["s0"], prep["bias0"], prep["s1"], prep["bias1"],
      prep["s2"], prep["bias2"])


# ---------------------------------------------------- kernel 2: 7-tap separable conv
# Input slab layout: (L+6, tr, C) — L is the conv axis (H or W, zero-padded by 3),
# tr a row tile of R = N*other_spatial, C = in channels (lane dim).
#   out[l, r, :] = relu( scale * sum_t  x[l+t, r, :] @ W[t]  + bias )
# Restructured: ONE long matmul per tap over the contiguous (L*tr, C) slab, 7 total.
def _conv7_kernel(x_ref, w_ref, s_ref, b_ref, o_ref, *, L):
    _, tr, c = x_ref.shape
    co = o_ref.shape[-1]
    acc = jnp.dot(x_ref[pl.ds(0, L)].astype(jnp.bfloat16).reshape(L * tr, c),
                  w_ref[0], preferred_element_type=jnp.float32)
    for t in range(1, 7):
        acc = acc + jnp.dot(
            x_ref[pl.ds(t, L)].astype(jnp.bfloat16).reshape(L * tr, c),
            w_ref[t], preferred_element_type=jnp.float32)
    z = jnp.maximum(acc * s_ref[...] + b_ref[...], 0.0)
    o_ref[...] = z.reshape(L, tr, co).astype(o_ref.dtype)


def _conv7_pallas(yt, w7, s, b, *, L, tr, out_dtype):
    lp6, rp, c = yt.shape
    co = w7.shape[-1]
    return pl.pallas_call(
        functools.partial(_conv7_kernel, L=L),
        out_shape=jax.ShapeDtypeStruct((L, rp, co), out_dtype),
        grid=(rp // tr,),
        in_specs=[
            pl.BlockSpec((lp6, tr, c), lambda i: (0, i, 0)),
            pl.BlockSpec((7, c, co), lambda i: (0, 0, 0)),
            pl.BlockSpec((1, co), lambda i: (0, 0)),
            pl.BlockSpec((1, co), lambda i: (0, 0)),
        ],
        out_specs=pl.BlockSpec((L, tr, co), lambda i: (0, i, 0)),
        compiler_params=pltpu.CompilerParams(dimension_semantics=("parallel",)),
    )(yt, w7, s, b)


def conv7_slab(y, w7, s, b, *, out_dtype):
    """y: (L, N, O, C) with L the conv axis. Returns (L, N, O, co)."""
    L, n, o, c = y.shape
    co = w7.shape[-1]
    R = n * o
    tr = _pick_row_tile(R, 128)
    rp = _round_up(R, tr)
    yt = y.reshape(L, R, c)
    yt = jnp.pad(yt, ((3, 3), (0, rp - R), (0, 0)))
    out = _conv7_pallas(yt, w7, s, b, L=L, tr=tr, out_dtype=out_dtype)
    return out[:, :R, :].reshape(L, n, o, co)


# --------------------------------------------- kernel 3: 3x3 avg-pool + BN + ReLU (VPU)
# Separable form: 3x1 vertical sums (leading-dim slices, layout-free) then 1x3
# horizontal sums; then the pool-branch BN affine + ReLU.
def _avgpool_kernel(x_ref, s_ref, b_ref, o_ref):
    _, hp2, wp2, _ = x_ref.shape
    H, W = hp2 - 2, wp2 - 2
    v = x_ref[0, 0:H, :, :] + x_ref[0, 1:H + 1, :, :] + x_ref[0, 2:H + 2, :, :]
    z = v[:, 0:W, :] + v[:, 1:W + 1, :] + v[:, 2:W + 2, :]
    z = z * (1.0 / 9.0) * s_ref[...] + b_ref[...]
    o_ref[0] = jnp.maximum(z, 0.0)


def avgpool_affine_relu(y_nhwc, s, b):
    N, H, W, C = y_nhwc.shape
    yp = jnp.pad(y_nhwc, ((0, 0), (1, 1), (1, 1), (0, 0)))
    return pl.pallas_call(
        _avgpool_kernel,
        out_shape=jax.ShapeDtypeStruct((N, H, W, C), jnp.float32),
        grid=(N,),
        in_specs=[
            pl.BlockSpec((1, H + 2, W + 2, C), lambda i: (i, 0, 0, 0)),
            pl.BlockSpec((1, C), lambda i: (0, 0)),
            pl.BlockSpec((1, C), lambda i: (0, 0)),
        ],
        out_specs=pl.BlockSpec((1, H, W, C), lambda i: (i, 0, 0, 0)),
        compiler_params=pltpu.CompilerParams(dimension_semantics=("parallel",)),
    )(yp, s, b)


# ------------------------------------------------------------------------- parameters
def init_params(key, in_channels, c7):
    def conv_bn(k, out_c, in_c, kh, kw):
        ks = jax.random.split(k, 5)
        fan_in = in_c * kh * kw
        return {
            "w": jax.random.normal(ks[0], (out_c, in_c, kh, kw), jnp.float32) * (fan_in ** -0.5),
            "gamma": 1.0 + 0.1 * jax.random.normal(ks[1], (out_c,), jnp.float32),
            "beta": 0.1 * jax.random.normal(ks[2], (out_c,), jnp.float32),
            "mean": 0.1 * jax.random.normal(ks[3], (out_c,), jnp.float32),
            "var": 0.5 + jnp.abs(jax.random.normal(ks[4], (out_c,), jnp.float32)),
        }

    ks = jax.random.split(key, 10)
    return {
        "b0":   conv_bn(ks[0], 192, in_channels, 1, 1),   # branch1x1
        "b1_1": conv_bn(ks[1], c7, in_channels, 1, 1),    # branch7x7_1
        "b1_2": conv_bn(ks[2], c7, c7, 1, 7),             # branch7x7_2
        "b1_3": conv_bn(ks[3], 192, c7, 7, 1),            # branch7x7_3
        "b2_1": conv_bn(ks[4], c7, in_channels, 1, 1),    # branch7x7dbl_1
        "b2_2": conv_bn(ks[5], c7, c7, 7, 1),             # branch7x7dbl_2
        "b2_3": conv_bn(ks[6], c7, c7, 1, 7),             # branch7x7dbl_3
        "b2_4": conv_bn(ks[7], c7, c7, 7, 1),             # branch7x7dbl_4
        "b2_5": conv_bn(ks[8], 192, c7, 1, 7),             # branch7x7dbl_5
        "b3":   conv_bn(ks[9], 192, in_channels, 1, 1),   # branch_pool conv
    }


def prepare_params(p):
    """One-time weight re-layout (bf16 MXU operands) + BN folding, hoisted out of
    the forward hot path."""
    def fold(cp):
        return _bn_fold(cp["gamma"], cp["beta"], cp["mean"], cp["var"])

    def w1x1(cp):                                   # (O, I, 1, 1) -> (I, O) bf16
        w = cp["w"]
        return w.reshape(w.shape[0], w.shape[1]).T.astype(jnp.bfloat16)

    def w7taps(cp):                                 # (O, I, 7, 1)/(O, I, 1, 7) -> (7, I, O) bf16
        w = cp["w"]
        taps = w[:, :, :, 0] if w.shape[2] == 7 else w[:, :, 0, :]
        return jnp.transpose(taps, (2, 1, 0)).astype(jnp.bfloat16)

    def sep(cp):
        s, b = fold(cp)
        return (w7taps(cp), s.reshape(1, -1), b.reshape(1, -1))

    s0, b0 = fold(p["b0"]); s1, b1 = fold(p["b1_1"])
    s2, b2 = fold(p["b2_1"]); s3, b3 = fold(p["b3"])
    return {
        "w0": w1x1(p["b0"]),   "s0": s0.reshape(1, -1), "bias0": b0.reshape(1, -1),
        "w1": w1x1(p["b1_1"]), "s1": s1.reshape(1, -1), "bias1": b1.reshape(1, -1),
        "w2": w1x1(p["b2_1"]), "s2": s2.reshape(1, -1), "bias2": b2.reshape(1, -1),
        "w3": w1x1(p["b3"]),
        "b1_2": sep(p["b1_2"]), "b1_3": sep(p["b1_3"]),
        "b2_2": sep(p["b2_2"]), "b2_3": sep(p["b2_3"]),
        "b2_4": sep(p["b2_4"]), "b2_5": sep(p["b2_5"]),
        "pool_s": s3.reshape(1, -1), "pool_b": b3.reshape(1, -1),
    }


# ---------------------------------------------------------------------------- forward
def inception_c_forward(x, prep):
    """x: (N, C, H, W) float32 (NCHW, as in PyTorch). Returns (N, 768, H, W)."""
    N, cin, H, W = x.shape

    # channel-last, pixel-major rows for the fused 1x1 bank
    x_nhwc = jnp.transpose(x, (0, 2, 3, 1))
    M = N * H * W
    xm = x_nhwc.reshape(M, cin)
    tm = _pick_row_tile(M, 512)
    Mp = _round_up(M, tm)
    if Mp != M:
        xm = jnp.pad(xm, ((0, Mp - M), (0, 0)))

    o1x1, y7, ydbl, ypool = bank1x1(xm, prep, tm=tm)
    c7 = y7.shape[1]
    b1x1 = o1x1[:M].reshape(N, H, W, 192)
    y7 = y7[:M].reshape(N, H, W, c7)
    ydbl = ydbl[:M].reshape(N, H, W, c7)
    ypool = ypool[:M].reshape(N, H, W, 192)

    # branch 7x7:  (1,7) along W, then (7,1) along H (composed transposes, bf16 glue)
    u = jnp.transpose(y7, (2, 0, 1, 3))                            # (W, N, H, c7)
    u = conv7_slab(u, *prep["b1_2"], out_dtype=jnp.bfloat16)       # (W, N, H, c7)
    u = jnp.transpose(u, (2, 1, 0, 3))                             # (H, N, W, c7)
    u = conv7_slab(u, *prep["b1_3"], out_dtype=jnp.float32)        # (H, N, W, 192)
    b7 = jnp.transpose(u, (1, 0, 2, 3))                            # (N, H, W, 192)

    # branch 7x7 double:  (7,1) -> (1,7) -> (7,1) -> (1,7)
    u = jnp.transpose(ydbl, (1, 0, 2, 3))                          # (H, N, W, c7)
    u = conv7_slab(u, *prep["b2_2"], out_dtype=jnp.bfloat16)       # (H, N, W, c7)
    u = jnp.transpose(u, (2, 1, 0, 3))                             # (W, N, H, c7)
    u = conv7_slab(u, *prep["b2_3"], out_dtype=jnp.bfloat16)       # (W, N, H, c7)
    u = jnp.transpose(u, (2, 1, 0, 3))                             # (H, N, W, c7)
    u = conv7_slab(u, *prep["b2_4"], out_dtype=jnp.bfloat16)       # (H, N, W, c7)
    u = jnp.transpose(u, (2, 1, 0, 3))                             # (W, N, H, c7)
    u = conv7_slab(u, *prep["b2_5"], out_dtype=jnp.float32)        # (W, N, H, 192)
    bd = jnp.transpose(u, (1, 2, 0, 3))                            # (N, H, W, 192)

    # branch pool: 3x3 avg-pool (count_include_pad) + BN + ReLU on the raw 1x1 output
    bp = avgpool_affine_relu(ypool, prep["pool_s"], prep["pool_b"])

    out = jnp.concatenate([b1x1, b7, bd, bp], axis=-1)             # (N, H, W, 768)
    return jnp.transpose(out, (0, 3, 1, 2))                        # NCHW like PyTorch


# -------------------------------------------------------------------------- reference
def reference_forward(x, p):
    """Pure-JAX/XLA f32 reference (eval-mode BN folding), NCHW."""
    def bconv(inp, cp, padding):
        y = lax.conv_general_dilated(inp, cp["w"], (1, 1), padding,
                                     dimension_numbers=("NCHW", "OIHW", "NCHW"))
        s, b = _bn_fold(cp["gamma"], cp["beta"], cp["mean"], cp["var"])
        return jnp.maximum(y * s.reshape(1, -1, 1, 1) + b.reshape(1, -1, 1, 1), 0.0)

    b1x1 = bconv(x, p["b0"], [(0, 0), (0, 0)])

    b7 = bconv(x, p["b1_1"], [(0, 0), (0, 0)])
    b7 = bconv(b7, p["b1_2"], [(0, 0), (3, 3)])
    b7 = bconv(b7, p["b1_3"], [(3, 3), (0, 0)])

    bd = bconv(x, p["b2_1"], [(0, 0), (0, 0)])
    bd = bconv(bd, p["b2_2"], [(3, 3), (0, 0)])
    bd = bconv(bd, p["b2_3"], [(0, 0), (3, 3)])
    bd = bconv(bd, p["b2_4"], [(3, 3), (0, 0)])
    bd = bconv(bd, p["b2_5"], [(0, 0), (3, 3)])

    bp = lax.reduce_window(x, 0.0, lax.add, (1, 1, 3, 3), (1, 1, 1, 1),
                           ((0, 0), (0, 0), (1, 1), (1, 1))) / 9.0
    bp = bconv(bp, p["b3"], [(0, 0), (0, 0)])

    return jnp.concatenate([b1x1, b7, bd, bp], axis=1)


# ------------------------------------------------------------------------------- main
if __name__ == "__main__":
    # Small shapes consistent with the module (InceptionC hard-codes 192-channel
    # branch outputs; in_channels / channels_7x7 / spatial are free).
    N, C_in, H, W = 2, 4, 16, 16
    c7 = 16

    key = jax.random.PRNGKey(0)
    kx, kp = jax.random.split(key)
    x = jax.random.normal(kx, (N, C_in, H, W), jnp.float32)

    params = init_params(kp, C_in, c7)
    prep = prepare_params(params)

    fwd = jax.jit(inception_c_forward)
    out = jax.block_until_ready(fwd(x, prep))
    assert out.shape == (N, 768, H, W), out.shape

    ref = jax.block_until_ready(reference_forward(x, params))
    # tolerance slightly loosened vs. the f32-only version: MXU operands are bf16
    # (f32 accumulate), and the 7x7dbl branch chains 5 bf16 matmuls.
    if not jnp.allclose(out, ref, rtol=2e-2, atol=3e-2):
        raise AssertionError(
            f"mismatch vs reference: max abs err = {float(jnp.max(jnp.abs(out - ref)))}"
        )

    print("KERNEL_OK")
</pallas_src>

<mosaic_0001>
module attributes {stable_mosaic.version = 11 : i64} {
  func.func @_bank1x1_kernel(%arg0: i32, %arg1: memref<256x4xf32, #tpu.memory_space<vmem>>, %arg2: memref<4x192xbf16, #tpu.memory_space<vmem>>, %arg3: memref<4x16xbf16, #tpu.memory_space<vmem>>, %arg4: memref<4x16xbf16, #tpu.memory_space<vmem>>, %arg5: memref<4x192xbf16, #tpu.memory_space<vmem>>, %arg6: memref<1x192xf32, #tpu.memory_space<vmem>>, %arg7: memref<1x192xf32, #tpu.memory_space<vmem>>, %arg8: memref<1x16xf32, #tpu.memory_space<vmem>>, %arg9: memref<1x16xf32, #tpu.memory_space<vmem>>, %arg10: memref<1x16xf32, #tpu.memory_space<vmem>>, %arg11: memref<1x16xf32, #tpu.memory_space<vmem>>, %arg12: memref<256x192xf32, #tpu.memory_space<vmem>>, %arg13: memref<256x16xbf16, #tpu.memory_space<vmem>>, %arg14: memref<256x16xbf16, #tpu.memory_space<vmem>>, %arg15: memref<256x192xf32, #tpu.memory_space<vmem>>) attributes {dimension_semantics = [#tpu.dimension_semantics<parallel>], iteration_bounds = array<i64: 2>, scalar_prefetch = 0 : i64, scratch_operands = 0 : i64, tpu.core_type = #tpu.core_type<tc>, window_params = [{transform_indices = @transform_0, window_bounds = array<i64: 256, 4>}, {pipeline_mode = #tpu.pipeline_mode<synchronous>, transform_indices = @transform_1, window_bounds = array<i64: 4, 192>}, {pipeline_mode = #tpu.pipeline_mode<synchronous>, transform_indices = @transform_2, window_bounds = array<i64: 4, 16>}, {pipeline_mode = #tpu.pipeline_mode<synchronous>, transform_indices = @transform_3, window_bounds = array<i64: 4, 16>}, {pipeline_mode = #tpu.pipeline_mode<synchronous>, transform_indices = @transform_4, window_bounds = array<i64: 4, 192>}, {pipeline_mode = #tpu.pipeline_mode<synchronous>, transform_indices = @transform_5, window_bounds = array<i64: 1, 192>}, {pipeline_mode = #tpu.pipeline_mode<synchronous>, transform_indices = @transform_6, window_bounds = array<i64: 1, 192>}, {pipeline_mode = #tpu.pipeline_mode<synchronous>, transform_indices = @transform_7, window_bounds = array<i64: 1, 16>}, {pipeline_mode = #tpu.pipeline_mode<synchronous>, transform_indices = @transform_8, window_bounds = array<i64: 1, 16>}, {pipeline_mode = #tpu.pipeline_mode<synchronous>, transform_indices = @transform_9, window_bounds = array<i64: 1, 16>}, {pipeline_mode = #tpu.pipeline_mode<synchronous>, transform_indices = @transform_10, window_bounds = array<i64: 1, 16>}, {transform_indices = @transform_11, window_bounds = array<i64: 256, 192>}, {transform_indices = @transform_12, window_bounds = array<i64: 256, 16>}, {transform_indices = @transform_13, window_bounds = array<i64: 256, 16>}, {transform_indices = @transform_14, window_bounds = array<i64: 256, 192>}]} {
    %c0 = arith.constant 0 : index
    %c0_0 = arith.constant 0 : index
    %0 = vector.load %arg1[%c0, %c0_0] : memref<256x4xf32, #tpu.memory_space<vmem>>, vector<256x4xf32>
    %1 = arith.truncf %0 : vector<256x4xf32> to vector<256x4xbf16>
    %c0_1 = arith.constant 0 : index
    %c0_2 = arith.constant 0 : index
    %2 = vector.load %arg2[%c0_1, %c0_2] : memref<4x192xbf16, #tpu.memory_space<vmem>>, vector<4x192xbf16>
    %cst = arith.constant dense<0.000000e+00> : vector<256x192xf32>
    %3 = tpu.matmul %1, %2, %cst {dimension_numbers = #tpu.dot_dimension_numbers<[1], [0], [0], [1], [0, 0, 1, 1], [], []>} : vector<256x4xbf16>, vector<4x192xbf16>, vector<256x192xf32> -> vector<256x192xf32>
    %c0_3 = arith.constant 0 : index
    %c0_4 = arith.constant 0 : index
    %4 = vector.load %arg6[%c0_3, %c0_4] : memref<1x192xf32, #tpu.memory_space<vmem>>, vector<1x192xf32>
    %5 = vector.broadcast %4 : vector<1x192xf32> to vector<256x192xf32>
    %6 = arith.mulf %3, %5 : vector<256x192xf32>
    %c0_5 = arith.constant 0 : index
    %c0_6 = arith.constant 0 : index
    %7 = vector.load %arg7[%c0_5, %c0_6] : memref<1x192xf32, #tpu.memory_space<vmem>>, vector<1x192xf32>
    %8 = vector.broadcast %7 : vector<1x192xf32> to vector<256x192xf32>
    %9 = arith.addf %6, %8 : vector<256x192xf32>
    %cst_7 = arith.constant 0.000000e+00 : f32
    %10 = vector.broadcast %cst_7 : f32 to vector<256x192xf32>
    %11 = arith.maximumf %9, %10 : vector<256x192xf32>
    %c0_8 = arith.constant 0 : index
    %c0_9 = arith.constant 0 : index
    %12 = vector.load %arg12[%c0_8, %c0_9] : memref<256x192xf32, #tpu.memory_space<vmem>>, vector<256x192xf32>
    tpu.vector_store %arg12[%c0_8, %c0_9], %11 {strides = array<i32>} : memref<256x192xf32, #tpu.memory_space<vmem>>, vector<256x192xf32>,
    %c0_10 = arith.constant 0 : index
    %c0_11 = arith.constant 0 : index
    %13 = vector.load %arg3[%c0_10, %c0_11] : memref<4x16xbf16, #tpu.memory_space<vmem>>, vector<4x16xbf16>
    %cst_12 = arith.constant dense<0.000000e+00> : vector<256x16xf32>
    %14 = tpu.matmul %1, %13, %cst_12 {dimension_numbers = #tpu.dot_dimension_numbers<[1], [0], [0], [1], [0, 0, 1, 1], [], []>} : vector<256x4xbf16>, vector<4x16xbf16>, vector<256x16xf32> -> vector<256x16xf32>
    %c0_13 = arith.constant 0 : index
    %c0_14 = arith.constant 0 : index
    %15 = vector.load %arg8[%c0_13, %c0_14] : memref<1x16xf32, #tpu.memory_space<vmem>>, vector<1x16xf32>
    %16 = vector.broadcast %15 : vector<1x16xf32> to vector<256x16xf32>
    %17 = arith.mulf %14, %16 : vector<256x16xf32>
    %c0_15 = arith.constant 0 : index
    %c0_16 = arith.constant 0 : index
    %18 = vector.load %arg9[%c0_15, %c0_16] : memref<1x16xf32, #tpu.memory_space<vmem>>, vector<1x16xf32>
    %19 = vector.broadcast %18 : vector<1x16xf32> to vector<256x16xf32>
    %20 = arith.addf %17, %19 : vector<256x16xf32>
    %cst_17 = arith.constant 0.000000e+00 : f32
    %21 = vector.broadcast %cst_17 : f32 to vector<256x16xf32>
    %22 = arith.maximumf %20, %21 : vector<256x16xf32>
    %23 = arith.truncf %22 : vector<256x16xf32> to vector<256x16xbf16>
    %c0_18 = arith.constant 0 : index
    %c0_19 = arith.constant 0 : index
    %24 = vector.load %arg13[%c0_18, %c0_19] : memref<256x16xbf16, #tpu.memory_space<vmem>>, vector<256x16xbf16>
    tpu.vector_store %arg13[%c0_18, %c0_19], %23 {strides = array<i32>} : memref<256x16xbf16, #tpu.memory_space<vmem>>, vector<256x16xbf16>,
    %c0_20 = arith.constant 0 : index
    %c0_21 = arith.constant 0 : index
    %25 = vector.load %arg4[%c0_20, %c0_21] : memref<4x16xbf16, #tpu.memory_space<vmem>>, vector<4x16xbf16>
    %cst_22 = arith.constant dense<0.000000e+00> : vector<256x16xf32>
    %26 = tpu.matmul %1, %25, %cst_22 {dimension_numbers = #tpu.dot_dimension_numbers<[1], [0], [0], [1], [0, 0, 1, 1], [], []>} : vector<256x4xbf16>, vector<4x16xbf16>, vector<256x16xf32> -> vector<256x16xf32>
    %c0_23 = arith.constant 0 : index
    %c0_24 = arith.constant 0 : index
    %27 = vector.load %arg10[%c0_23, %c0_24] : memref<1x16xf32, #tpu.memory_space<vmem>>, vector<1x16xf32>
    %28 = vector.broadcast %27 : vector<1x16xf32> to vector<256x16xf32>
    %29 = arith.mulf %26, %28 : vector<256x16xf32>
    %c0_25 = arith.constant 0 : index
    %c0_26 = arith.constant 0 : index
    %30 = vector.load %arg11[%c0_25, %c0_26] : memref<1x16xf32, #tpu.memory_space<vmem>>, vector<1x16xf32>
    %31 = vector.broadcast %30 : vector<1x16xf32> to vector<256x16xf32>
    %32 = arith.addf %29, %31 : vector<256x16xf32>
    %cst_27 = arith.constant 0.000000e+00 : f32
    %33 = vector.broadcast %cst_27 : f32 to vector<256x16xf32>
    %34 = arith.maximumf %32, %33 : vector<256x16xf32>
    %35 = arith.truncf %34 : vector<256x16xf32> to vector<256x16xbf16>
    %c0_28 = arith.constant 0 : index
    %c0_29 = arith.constant 0 : index
    %36 = vector.load %arg14[%c0_28, %c0_29] : memref<256x16xbf16, #tpu.memory_space<vmem>>, vector<256x16xbf16>
    tpu.vector_store %arg14[%c0_28, %c0_29], %35 {strides = array<i32>} : memref<256x16xbf16, #tpu.memory_space<vmem>>, vector<256x16xbf16>,
    %c0_30 = arith.constant 0 : index
    %c0_31 = arith.constant 0 : index
    %37 = vector.load %arg5[%c0_30, %c0_31] : memref<4x192xbf16, #tpu.memory_space<vmem>>, vector<4x192xbf16>
    %cst_32 = arith.constant dense<0.000000e+00> : vector<256x192xf32>
    %38 = tpu.matmul %1, %37, %cst_32 {dimension_numbers = #tpu.dot_dimension_numbers<[1], [0], [0], [1], [0, 0, 1, 1], [], []>} : vector<256x4xbf16>, vector<4x192xbf16>, vector<256x192xf32> -> vector<256x192xf32>
    %c0_33 = arith.constant 0 : index
    %c0_34 = arith.constant 0 : index
    %39 = vector.load %arg15[%c0_33, %c0_34] : memref<256x192xf32, #tpu.memory_space<vmem>>, vector<256x192xf32>
    tpu.vector_store %arg15[%c0_33, %c0_34], %38 {strides = array<i32>} : memref<256x192xf32, #tpu.memory_space<vmem>>, vector<256x192xf32>,
    return
  }
  func.func @transform_0(%arg0: i32) -> (i32, i32) {
    %c0_i32 = arith.constant 0 : i32
    %c0_i32_0 = arith.constant 0 : i32
    return %arg0, %c0_i32 : i32, i32
  }
  func.func @transform_1(%arg0: i32) -> (i32, i32) {
    %c0_i32 = arith.constant 0 : i32
    %c0_i32_0 = arith.constant 0 : i32
    %c0_i32_1 = arith.constant 0 : i32
    return %c0_i32, %c0_i32_0 : i32, i32
  }
  func.func @transform_2(%arg0: i32) -> (i32, i32) {
    %c0_i32 = arith.constant 0 : i32
    %c0_i32_0 = arith.constant 0 : i32
    %c0_i32_1 = arith.constant 0 : i32
    return %c0_i32, %c0_i32_0 : i32, i32
  }
  func.func @transform_3(%arg0: i32) -> (i32, i32) {
    %c0_i32 = arith.constant 0 : i32
    %c0_i32_0 = arith.constant 0 : i32
    %c0_i32_1 = arith.constant 0 : i32
    return %c0_i32, %c0_i32_0 : i32, i32
  }
  func.func @transform_4(%arg0: i32) -> (i32, i32) {
    %c0_i32 = arith.constant 0 : i32
    %c0_i32_0 = arith.constant 0 : i32
    %c0_i32_1 = arith.constant 0 : i32
    return %c0_i32, %c0_i32_0 : i32, i32
  }
  func.func @transform_5(%arg0: i32) -> (i32, i32) {
    %c0_i32 = arith.constant 0 : i32
    %c0_i32_0 = arith.constant 0 : i32
    %c0_i32_1 = arith.constant 0 : i32
    return %c0_i32, %c0_i32_0 : i32, i32
  }
  func.func @transform_6(%arg0: i32) -> (i32, i32) {
    %c0_i32 = arith.constant 0 : i32
    %c0_i32_0 = arith.constant 0 : i32
    %c0_i32_1 = arith.constant 0 : i32
    return %c0_i32, %c0_i32_0 : i32, i32
  }
  func.func @transform_7(%arg0: i32) -> (i32, i32) {
    %c0_i32 = arith.constant 0 : i32
    %c0_i32_0 = arith.constant 0 : i32
    %c0_i32_1 = arith.constant 0 : i32
    return %c0_i32, %c0_i32_0 : i32, i32
  }
  func.func @transform_8(%arg0: i32) -> (i32, i32) {
    %c0_i32 = arith.constant 0 : i32
    %c0_i32_0 = arith.constant 0 : i32
    %c0_i32_1 = arith.constant 0 : i32
    return %c0_i32, %c0_i32_0 : i32, i32
  }
  func.func @transform_9(%arg0: i32) -> (i32, i32) {
    %c0_i32 = arith.constant 0 : i32
    %c0_i32_0 = arith.constant 0 : i32
    %c0_i32_1 = arith.constant 0 : i32
    return %c0_i32, %c0_i32_0 : i32, i32
  }
  func.func @transform_10(%arg0: i32) -> (i32, i32) {
    %c0_i32 = arith.constant 0 : i32
    %c0_i32_0 = arith.constant 0 : i32
    %c0_i32_1 = arith.constant 0 : i32
    return %c0_i32, %c0_i32_0 : i32, i32
  }
  func.func @transform_11(%arg0: i32) -> (i32, i32) {
    %c0_i32 = arith.constant 0 : i32
    %c0_i32_0 = arith.constant 0 : i32
    return %arg0, %c0_i32 : i32, i32
  }
  func.func @transform_12(%arg0: i32) -> (i32, i32) {
    %c0_i32 = arith.constant 0 : i32
    %c0_i32_0 = arith.constant 0 : i32
    return %arg0, %c0_i32 : i32, i32
  }
  func.func @transform_13(%arg0: i32) -> (i32, i32) {
    %c0_i32 = arith.constant 0 : i32
    %c0_i32_0 = arith.constant 0 : i32
    return %arg0, %c0_i32 : i32, i32
  }
  func.func @transform_14(%arg0: i32) -> (i32, i32) {
    %c0_i32 = arith.constant 0 : i32
    %c0_i32_0 = arith.constant 0 : i32
    return %arg0, %c0_i32 : i32, i32
  }
}

module attributes {stable_mosaic.version = 11 : i64} {
  func.func @_conv7_kernel(%arg0: i32, %arg1: memref<22x16x16xbf16, #tpu.memory_space<vmem>>, %arg2: memref<7x16x16xbf16, #tpu.memory_space<vmem>>, %arg3: memref<1x16xf32, #tpu.memory_space<vmem>>, %arg4: memref<1x16xf32, #tpu.memory_space<vmem>>, %arg5: memref<16x16x16xbf16, #tpu.memory_space<vmem>>) attributes {dimension_semantics = [#tpu.dimension_semantics<parallel>], iteration_bounds = array<i64: 2>, scalar_prefetch = 0 : i64, scratch_operands = 0 : i64, tpu.core_type = #tpu.core_type<tc>, window_params = [{transform_indices = @transform_0, window_bounds = array<i64: 22, 16, 16>}, {pipeline_mode = #tpu.pipeline_mode<synchronous>, transform_indices = @transform_1, window_bounds = array<i64: 7, 16, 16>}, {pipeline_mode = #tpu.pipeline_mode<synchronous>, transform_indices = @transform_2, window_bounds = array<i64: 1, 16>}, {pipeline_mode = #tpu.pipeline_mode<synchronous>, transform_indices = @transform_3, window_bounds = array<i64: 1, 16>}, {transform_indices = @transform_4, window_bounds = array<i64: 16, 16, 16>}]} {
    %c0 = arith.constant 0 : index
    %c0_0 = arith.constant 0 : index
    %c0_1 = arith.constant 0 : index
    %0 = vector.load %arg1[%c0, %c0_0, %c0_1] : memref<22x16x16xbf16, #tpu.memory_space<vmem>>, vector<16x16x16xbf16>
    %1 = vector.shape_cast %0 : vector<16x16x16xbf16> to vector<256x16xbf16>
    %c0_2 = arith.constant 0 : index
    %c0_3 = arith.constant 0 : index
    %c0_4 = arith.constant 0 : index
    %2 = vector.load %arg2[%c0_2, %c0_3, %c0_4] : memref<7x16x16xbf16, #tpu.memory_space<vmem>>, vector<1x16x16xbf16>
    %3 = vector.shape_cast %2 : vector<1x16x16xbf16> to vector<16x16xbf16>
    %cst = arith.constant dense<0.000000e+00> : vector<256x16xf32>
    %4 = tpu.matmul %1, %3, %cst {dimension_numbers = #tpu.dot_dimension_numbers<[1], [0], [0], [1], [0, 0, 1, 1], [], []>} : vector<256x16xbf16>, vector<16x16xbf16>, vector<256x16xf32> -> vector<256x16xf32>
    %c1 = arith.constant 1 : index
    %c0_5 = arith.constant 0 : index
    %c0_6 = arith.constant 0 : index
    %5 = vector.load %arg1[%c1, %c0_5, %c0_6] : memref<22x16x16xbf16, #tpu.memory_space<vmem>>, vector<16x16x16xbf16>
    %6 = vector.shape_cast %5 : vector<16x16x16xbf16> to vector<256x16xbf16>
    %c1_7 = arith.constant 1 : index
    %c0_8 = arith.constant 0 : index
    %c0_9 = arith.constant 0 : index
    %7 = vector.load %arg2[%c1_7, %c0_8, %c0_9] : memref<7x16x16xbf16, #tpu.memory_space<vmem>>, vector<1x16x16xbf16>
    %8 = vector.shape_cast %7 : vector<1x16x16xbf16> to vector<16x16xbf16>
    %cst_10 = arith.constant dense<0.000000e+00> : vector<256x16xf32>
    %9 = tpu.matmul %6, %8, %cst_10 {dimension_numbers = #tpu.dot_dimension_numbers<[1], [0], [0], [1], [0, 0, 1, 1], [], []>} : vector<256x16xbf16>, vector<16x16xbf16>, vector<256x16xf32> -> vector<256x16xf32>
    %10 = arith.addf %4, %9 : vector<256x16xf32>
    %c2 = arith.constant 2 : index
    %c0_11 = arith.constant 0 : index
    %c0_12 = arith.constant 0 : index
    %11 = vector.load %arg1[%c2, %c0_11, %c0_12] : memref<22x16x16xbf16, #tpu.memory_space<vmem>>, vector<16x16x16xbf16>
    %12 = vector.shape_cast %11 : vector<16x16x16xbf16> to vector<256x16xbf16>
    %c2_13 = arith.constant 2 : index
    %c0_14 = arith.constant 0 : index
    %c0_15 = arith.constant 0 : index
    %13 = vector.load %arg2[%c2_13, %c0_14, %c0_15] : memref<7x16x16xbf16, #tpu.memory_space<vmem>>, vector<1x16x16xbf16>
    %14 = vector.shape_cast %13 : vector<1x16x16xbf16> to vector<16x16xbf16>
    %cst_16 = arith.constant dense<0.000000e+00> : vector<256x16xf32>
    %15 = tpu.matmul %12, %14, %cst_16 {dimension_numbers = #tpu.dot_dimension_numbers<[1], [0], [0], [1], [0, 0, 1, 1], [], []>} : vector<256x16xbf16>, vector<16x16xbf16>, vector<256x16xf32> -> vector<256x16xf32>
    %16 = arith.addf %10, %15 : vector<256x16xf32>
    %c3 = arith.constant 3 : index
    %c0_17 = arith.constant 0 : index
    %c0_18 = arith.constant 0 : index
    %17 = vector.load %arg1[%c3, %c0_17, %c0_18] : memref<22x16x16xbf16, #tpu.memory_space<vmem>>, vector<16x16x16xbf16>
    %18 = vector.shape_cast %17 : vector<16x16x16xbf16> to vector<256x16xbf16>
    %c3_19 = arith.constant 3 : index
    %c0_20 = arith.constant 0 : index
    %c0_21 = arith.constant 0 : index
    %19 = vector.load %arg2[%c3_19, %c0_20, %c0_21] : memref<7x16x16xbf16, #tpu.memory_space<vmem>>, vector<1x16x16xbf16>
    %20 = vector.shape_cast %19 : vector<1x16x16xbf16> to vector<16x16xbf16>
    %cst_22 = arith.constant dense<0.000000e+00> : vector<256x16xf32>
    %21 = tpu.matmul %18, %20, %cst_22 {dimension_numbers = #tpu.dot_dimension_numbers<[1], [0], [0], [1], [0, 0, 1, 1], [], []>} : vector<256x16xbf16>, vector<16x16xbf16>, vector<256x16xf32> -> vector<256x16xf32>
    %22 = arith.addf %16, %21 : vector<256x16xf32>
    %c4 = arith.constant 4 : index
    %c0_23 = arith.constant 0 : index
    %c0_24 = arith.constant 0 : index
    %23 = vector.load %arg1[%c4, %c0_23, %c0_24] : memref<22x16x16xbf16, #tpu.memory_space<vmem>>, vector<16x16x16xbf16>
    %24 = vector.shape_cast %23 : vector<16x16x16xbf16> to vector<256x16xbf16>
    %c4_25 = arith.constant 4 : index
    %c0_26 = arith.constant 0 : index
    %c0_27 = arith.constant 0 : index
    %25 = vector.load %arg2[%c4_25, %c0_26, %c0_27] : memref<7x16x16xbf16, #tpu.memory_space<vmem>>, vector<1x16x16xbf16>
    %26 = vector.shape_cast %25 : vector<1x16x16xbf16> to vector<16x16xbf16>
    %cst_28 = arith.constant dense<0.000000e+00> : vector<256x16xf32>
    %27 = tpu.matmul %24, %26, %cst_28 {dimension_numbers = #tpu.dot_dimension_numbers<[1], [0], [0], [1], [0, 0, 1, 1], [], []>} : vector<256x16xbf16>, vector<16x16xbf16>, vector<256x16xf32> -> vector<256x16xf32>
    %28 = arith.addf %22, %27 : vector<256x16xf32>
    %c5 = arith.constant 5 : index
    %c0_29 = arith.constant 0 : index
    %c0_30 = arith.constant 0 : index
    %29 = vector.load %arg1[%c5, %c0_29, %c0_30] : memref<22x16x16xbf16, #tpu.memory_space<vmem>>, vector<16x16x16xbf16>
    %30 = vector.shape_cast %29 : vector<16x16x16xbf16> to vector<256x16xbf16>
    %c5_31 = arith.constant 5 : index
    %c0_32 = arith.constant 0 : index
    %c0_33 = arith.constant 0 : index
    %31 = vector.load %arg2[%c5_31, %c0_32, %c0_33] : memref<7x16x16xbf16, #tpu.memory_space<vmem>>, vector<1x16x16xbf16>
    %32 = vector.shape_cast %31 : vector<1x16x16xbf16> to vector<16x16xbf16>
    %cst_34 = arith.constant dense<0.000000e+00> : vector<256x16xf32>
    %33 = tpu.matmul %30, %32, %cst_34 {dimension_numbers = #tpu.dot_dimension_numbers<[1], [0], [0], [1], [0, 0, 1, 1], [], []>} : vector<256x16xbf16>, vector<16x16xbf16>, vector<256x16xf32> -> vector<256x16xf32>
    %34 = arith.addf %28, %33 : vector<256x16xf32>
    %c6 = arith.constant 6 : index
    %c0_35 = arith.constant 0 : index
    %c0_36 = arith.constant 0 : index
    %35 = vector.load %arg1[%c6, %c0_35, %c0_36] : memref<22x16x16xbf16, #tpu.memory_space<vmem>>, vector<16x16x16xbf16>
    %36 = vector.shape_cast %35 : vector<16x16x16xbf16> to vector<256x16xbf16>
    %c6_37 = arith.constant 6 : index
    %c0_38 = arith.constant 0 : index
    %c0_39 = arith.constant 0 : index
    %37 = vector.load %arg2[%c6_37, %c0_38, %c0_39] : memref<7x16x16xbf16, #tpu.memory_space<vmem>>, vector<1x16x16xbf16>
    %38 = vector.shape_cast %37 : vector<1x16x16xbf16> to vector<16x16xbf16>
    %cst_40 = arith.constant dense<0.000000e+00> : vector<256x16xf32>
    %39 = tpu.matmul %36, %38, %cst_40 {dimension_numbers = #tpu.dot_dimension_numbers<[1], [0], [0], [1], [0, 0, 1, 1], [], []>} : vector<256x16xbf16>, vector<16x16xbf16>, vector<256x16xf32> -> vector<256x16xf32>
    %40 = arith.addf %34, %39 : vector<256x16xf32>
    %c0_41 = arith.constant 0 : index
    %c0_42 = arith.constant 0 : index
    %41 = vector.load %arg3[%c0_41, %c0_42] : memref<1x16xf32, #tpu.memory_space<vmem>>, vector<1x16xf32>
    %42 = vector.broadcast %41 : vector<1x16xf32> to vector<256x16xf32>
    %43 = arith.mulf %40, %42 : vector<256x16xf32>
    %c0_43 = arith.constant 0 : index
    %c0_44 = arith.constant 0 : index
    %44 = vector.load %arg4[%c0_43, %c0_44] : memref<1x16xf32, #tpu.memory_space<vmem>>, vector<1x16xf32>
    %45 = vector.broadcast %44 : vector<1x16xf32> to vector<256x16xf32>
    %46 = arith.addf %43, %45 : vector<256x16xf32>
    %cst_45 = arith.constant 0.000000e+00 : f32
    %47 = vector.broadcast %cst_45 : f32 to vector<256x16xf32>
    %48 = arith.maximumf %46, %47 : vector<256x16xf32>
    %49 = vector.shape_cast %48 : vector<256x16xf32> to vector<16x16x16xf32>
    %50 = arith.truncf %49 : vector<16x16x16xf32> to vector<16x16x16xbf16>
    %c0_46 = arith.constant 0 : index
    %c0_47 = arith.constant 0 : index
    %c0_48 = arith.constant 0 : index
    %51 = vector.load %arg5[%c0_46, %c0_47, %c0_48] : memref<16x16x16xbf16, #tpu.memory_space<vmem>>, vector<16x16x16xbf16>
    tpu.vector_store %arg5[%c0_46, %c0_47, %c0_48], %50 {strides = array<i32>} : memref<16x16x16xbf16, #tpu.memory_space<vmem>>, vector<16x16x16xbf16>,
    return
  }
  func.func @transform_0(%arg0: i32) -> (i32, i32, i32) {
    %c0_i32 = arith.constant 0 : i32
    %c0_i32_0 = arith.constant 0 : i32
    %c0_i32_1 = arith.constant 0 : i32
    return %c0_i32, %arg0, %c0_i32_0 : i32, i32, i32
  }
  func.func @transform_1(%arg0: i32) -> (i32, i32, i32) {
    %c0_i32 = arith.constant 0 : i32
    %c0_i32_0 = arith.constant 0 : i32
    %c0_i32_1 = arith.constant 0 : i32
    %c0_i32_2 = arith.constant 0 : i32
    return %c0_i32, %c0_i32_0, %c0_i32_1 : i32, i32, i32
  }
  func.func @transform_2(%arg0: i32) -> (i32, i32) {
    %c0_i32 = arith.constant 0 : i32
    %c0_i32_0 = arith.constant 0 : i32
    %c0_i32_1 = arith.constant 0 : i32
    return %c0_i32, %c0_i32_0 : i32, i32
  }
  func.func @transform_3(%arg0: i32) -> (i32, i32) {
    %c0_i32 = arith.constant 0 : i32
    %c0_i32_0 = arith.constant 0 : i32
    %c0_i32_1 = arith.constant 0 : i32
    return %c0_i32, %c0_i32_0 : i32, i32
  }
  func.func @transform_4(%arg0: i32) -> (i32, i32, i32) {
    %c0_i32 = arith.constant 0 : i32
    %c0_i32_0 = arith.constant 0 : i32
    %c0_i32_1 = arith.constant 0 : i32
    return %c0_i32, %arg0, %c0_i32_0 : i32, i32, i32
  }
}

module attributes {stable_mosaic.version = 11 : i64} {
  func.func @_conv7_kernel(%arg0: i32, %arg1: memref<22x16x16xbf16, #tpu.memory_space<vmem>>, %arg2: memref<7x16x16xbf16, #tpu.memory_space<vmem>>, %arg3: memref<1x16xf32, #tpu.memory_space<vmem>>, %arg4: memref<1x16xf32, #tpu.memory_space<vmem>>, %arg5: memref<16x16x16xbf16, #tpu.memory_space<vmem>>) attributes {dimension_semantics = [#tpu.dimension_semantics<parallel>], iteration_bounds = array<i64: 2>, scalar_prefetch = 0 : i64, scratch_operands = 0 : i64, tpu.core_type = #tpu.core_type<tc>, window_params = [{transform_indices = @transform_0, window_bounds = array<i64: 22, 16, 16>}, {pipeline_mode = #tpu.pipeline_mode<synchronous>, transform_indices = @transform_1, window_bounds = array<i64: 7, 16, 16>}, {pipeline_mode = #tpu.pipeline_mode<synchronous>, transform_indices = @transform_2, window_bounds = array<i64: 1, 16>}, {pipeline_mode = #tpu.pipeline_mode<synchronous>, transform_indices = @transform_3, window_bounds = array<i64: 1, 16>}, {transform_indices = @transform_4, window_bounds = array<i64: 16, 16, 16>}]} {
    %c0 = arith.constant 0 : index
    %c0_0 = arith.constant 0 : index
    %c0_1 = arith.constant 0 : index
    %0 = vector.load %arg1[%c0, %c0_0, %c0_1] : memref<22x16x16xbf16, #tpu.memory_space<vmem>>, vector<16x16x16xbf16>
    %1 = vector.shape_cast %0 : vector<16x16x16xbf16> to vector<256x16xbf16>
    %c0_2 = arith.constant 0 : index
    %c0_3 = arith.constant 0 : index
    %c0_4 = arith.constant 0 : index
    %2 = vector.load %arg2[%c0_2, %c0_3, %c0_4] : memref<7x16x16xbf16, #tpu.memory_space<vmem>>, vector<1x16x16xbf16>
    %3 = vector.shape_cast %2 : vector<1x16x16xbf16> to vector<16x16xbf16>
    %cst = arith.constant dense<0.000000e+00> : vector<256x16xf32>
    %4 = tpu.matmul %1, %3, %cst {dimension_numbers = #tpu.dot_dimension_numbers<[1], [0], [0], [1], [0, 0, 1, 1], [], []>} : vector<256x16xbf16>, vector<16x16xbf16>, vector<256x16xf32> -> vector<256x16xf32>
    %c1 = arith.constant 1 : index
    %c0_5 = arith.constant 0 : index
    %c0_6 = arith.constant 0 : index
    %5 = vector.load %arg1[%c1, %c0_5, %c0_6] : memref<22x16x16xbf16, #tpu.memory_space<vmem>>, vector<16x16x16xbf16>
    %6 = vector.shape_cast %5 : vector<16x16x16xbf16> to vector<256x16xbf16>
    %c1_7 = arith.constant 1 : index
    %c0_8 = arith.constant 0 : index
    %c0_9 = arith.constant 0 : index
    %7 = vector.load %arg2[%c1_7, %c0_8, %c0_9] : memref<7x16x16xbf16, #tpu.memory_space<vmem>>, vector<1x16x16xbf16>
    %8 = vector.shape_cast %7 : vector<1x16x16xbf16> to vector<16x16xbf16>
    %cst_10 = arith.constant dense<0.000000e+00> : vector<256x16xf32>
    %9 = tpu.matmul %6, %8, %cst_10 {dimension_numbers = #tpu.dot_dimension_numbers<[1], [0], [0], [1], [0, 0, 1, 1], [], []>} : vector<256x16xbf16>, vector<16x16xbf16>, vector<256x16xf32> -> vector<256x16xf32>
    %10 = arith.addf %4, %9 : vector<256x16xf32>
    %c2 = arith.constant 2 : index
    %c0_11 = arith.constant 0 : index
    %c0_12 = arith.constant 0 : index
    %11 = vector.load %arg1[%c2, %c0_11, %c0_12] : memref<22x16x16xbf16, #tpu.memory_space<vmem>>, vector<16x16x16xbf16>
    %12 = vector.shape_cast %11 : vector<16x16x16xbf16> to vector<256x16xbf16>
    %c2_13 = arith.constant 2 : index
    %c0_14 = arith.constant 0 : index
    %c0_15 = arith.constant 0 : index
    %13 = vector.load %arg2[%c2_13, %c0_14, %c0_15] : memref<7x16x16xbf16, #tpu.memory_space<vmem>>, vector<1x16x16xbf16>
    %14 = vector.shape_cast %13 : vector<1x16x16xbf16> to vector<16x16xbf16>
    %cst_16 = arith.constant dense<0.000000e+00> : vector<256x16xf32>
    %15 = tpu.matmul %12, %14, %cst_16 {dimension_numbers = #tpu.dot_dimension_numbers<[1], [0], [0], [1], [0, 0, 1, 1], [], []>} : vector<256x16xbf16>, vector<16x16xbf16>, vector<256x16xf32> -> vector<256x16xf32>
    %16 = arith.addf %10, %15 : vector<256x16xf32>
    %c3 = arith.constant 3 : index
    %c0_17 = arith.constant 0 : index
    %c0_18 = arith.constant 0 : index
    %17 = vector.load %arg1[%c3, %c0_17, %c0_18] : memref<22x16x16xbf16, #tpu.memory_space<vmem>>, vector<16x16x16xbf16>
    %18 = vector.shape_cast %17 : vector<16x16x16xbf16> to vector<256x16xbf16>
    %c3_19 = arith.constant 3 : index
    %c0_20 = arith.constant 0 : index
    %c0_21 = arith.constant 0 : index
    %19 = vector.load %arg2[%c3_19, %c0_20, %c0_21] : memref<7x16x16xbf16, #tpu.memory_space<vmem>>, vector<1x16x16xbf16>
    %20 = vector.shape_cast %19 : vector<1x16x16xbf16> to vector<16x16xbf16>
    %cst_22 = arith.constant dense<0.000000e+00> : vector<256x16xf32>
    %21 = tpu.matmul %18, %20, %cst_22 {dimension_numbers = #tpu.dot_dimension_numbers<[1], [0], [0], [1], [0, 0, 1, 1], [], []>} : vector<256x16xbf16>, vector<16x16xbf16>, vector<256x16xf32> -> vector<256x16xf32>
    %22 = arith.addf %16, %21 : vector<256x16xf32>
    %c4 = arith.constant 4 : index
    %c0_23 = arith.constant 0 : index
    %c0_24 = arith.constant 0 : index
    %23 = vector.load %arg1[%c4, %c0_23, %c0_24] : memref<22x16x16xbf16, #tpu.memory_space<vmem>>, vector<16x16x16xbf16>
    %24 = vector.shape_cast %23 : vector<16x16x16xbf16> to vector<256x16xbf16>
    %c4_25 = arith.constant 4 : index
    %c0_26 = arith.constant 0 : index
    %c0_27 = arith.constant 0 : index
    %25 = vector.load %arg2[%c4_25, %c0_26, %c0_27] : memref<7x16x16xbf16, #tpu.memory_space<vmem>>, vector<1x16x16xbf16>
    %26 = vector.shape_cast %25 : vector<1x16x16xbf16> to vector<16x16xbf16>
    %cst_28 = arith.constant dense<0.000000e+00> : vector<256x16xf32>
    %27 = tpu.matmul %24, %26, %cst_28 {dimension_numbers = #tpu.dot_dimension_numbers<[1], [0], [0], [1], [0, 0, 1, 1], [], []>} : vector<256x16xbf16>, vector<16x16xbf16>, vector<256x16xf32> -> vector<256x16xf32>
    %28 = arith.addf %22, %27 : vector<256x16xf32>
    %c5 = arith.constant 5 : index
    %c0_29 = arith.constant 0 : index
    %c0_30 = arith.constant 0 : index
    %29 = vector.load %arg1[%c5, %c0_29, %c0_30] : memref<22x16x16xbf16, #tpu.memory_space<vmem>>, vector<16x16x16xbf16>
    %30 = vector.shape_cast %29 : vector<16x16x16xbf16> to vector<256x16xbf16>
    %c5_31 = arith.constant 5 : index
    %c0_32 = arith.constant 0 : index
    %c0_33 = arith.constant 0 : index
    %31 = vector.load %arg2[%c5_31, %c0_32, %c0_33] : memref<7x16x16xbf16, #tpu.memory_space<vmem>>, vector<1x16x16xbf16>
    %32 = vector.shape_cast %31 : vector<1x16x16xbf16> to vector<16x16xbf16>
    %cst_34 = arith.constant dense<0.000000e+00> : vector<256x16xf32>
    %33 = tpu.matmul %30, %32, %cst_34 {dimension_numbers = #tpu.dot_dimension_numbers<[1], [0], [0], [1], [0, 0, 1, 1], [], []>} : vector<256x16xbf16>, vector<16x16xbf16>, vector<256x16xf32> -> vector<256x16xf32>
    %34 = arith.addf %28, %33 : vector<256x16xf32>
    %c6 = arith.constant 6 : index
    %c0_35 = arith.constant 0 : index
    %c0_36 = arith.constant 0 : index
    %35 = vector.load %arg1[%c6, %c0_35, %c0_36] : memref<22x16x16xbf16, #tpu.memory_space<vmem>>, vector<16x16x16xbf16>
    %36 = vector.shape_cast %35 : vector<16x16x16xbf16> to vector<256x16xbf16>
    %c6_37 = arith.constant 6 : index
    %c0_38 = arith.constant 0 : index
    %c0_39 = arith.constant 0 : index
    %37 = vector.load %arg2[%c6_37, %c0_38, %c0_39] : memref<7x16x16xbf16, #tpu.memory_space<vmem>>, vector<1x16x16xbf16>
    %38 = vector.shape_cast %37 : vector<1x16x16xbf16> to vector<16x16xbf16>
    %cst_40 = arith.constant dense<0.000000e+00> : vector<256x16xf32>
    %39 = tpu.matmul %36, %38, %cst_40 {dimension_numbers = #tpu.dot_dimension_numbers<[1], [0], [0], [1], [0, 0, 1, 1], [], []>} : vector<256x16xbf16>, vector<16x16xbf16>, vector<256x16xf32> -> vector<256x16xf32>
    %40 = arith.addf %34, %39 : vector<256x16xf32>
    %c0_41 = arith.constant 0 : index
    %c0_42 = arith.constant 0 : index
    %41 = vector.load %arg3[%c0_41, %c0_42] : memref<1x16xf32, #tpu.memory_space<vmem>>, vector<1x16xf32>
    %42 = vector.broadcast %41 : vector<1x16xf32> to vector<256x16xf32>
    %43 = arith.mulf %40, %42 : vector<256x16xf32>
    %c0_43 = arith.constant 0 : index
    %c0_44 = arith.constant 0 : index
    %44 = vector.load %arg4[%c0_43, %c0_44] : memref<1x16xf32, #tpu.memory_space<vmem>>, vector<1x16xf32>
    %45 = vector.broadcast %44 : vector<1x16xf32> to vector<256x16xf32>
    %46 = arith.addf %43, %45 : vector<256x16xf32>
    %cst_45 = arith.constant 0.000000e+00 : f32
    %47 = vector.broadcast %cst_45 : f32 to vector<256x16xf32>
    %48 = arith.maximumf %46, %47 : vector<256x16xf32>
    %49 = vector.shape_cast %48 : vector<256x16xf32> to vector<16x16x16xf32>
    %50 = arith.truncf %49 : vector<16x16x16xf32> to vector<16x16x16xbf16>
    %c0_46 = arith.constant 0 : index
    %c0_47 = arith.constant 0 : index
    %c0_48 = arith.constant 0 : index
    %51 = vector.load %arg5[%c0_46, %c0_47, %c0_48] : memref<16x16x16xbf16, #tpu.memory_space<vmem>>, vector<16x16x16xbf16>
    tpu.vector_store %arg5[%c0_46, %c0_47, %c0_48], %50 {strides = array<i32>} : memref<16x16x16xbf16, #tpu.memory_space<vmem>>, vector<16x16x16xbf16>,
    return
  }
  func.func @transform_0(%arg0: i32) -> (i32, i32, i32) {
    %c0_i32 = arith.constant 0 : i32
    %c0_i32_0 = arith.constant 0 : i32
    %c0_i32_1 = arith.constant 0 : i32
    return %c0_i32, %arg0, %c0_i32_0 : i32, i32, i32
  }
  func.func @transform_1(%arg0: i32) -> (i32, i32, i32) {
    %c0_i32 = arith.constant 0 : i32
    %c0_i32_0 = arith.constant 0 : i32
    %c0_i32_1 = arith.constant 0 : i32
    %c0_i32_2 = arith.constant 0 : i32
    return %c0_i32, %c0_i32_0, %c0_i32_1 : i32, i32, i32
  }
  func.func @transform_2(%arg0: i32) -> (i32, i32) {
    %c0_i32 = arith.constant 0 : i32
    %c0_i32_0 = arith.constant 0 : i32
    %c0_i32_1 = arith.constant 0 : i32
    return %c0_i32, %c0_i32_0 : i32, i32
  }
  func.func @transform_3(%arg0: i32) -> (i32, i32) {
    %c0_i32 = arith.constant 0 : i32
    %c0_i32_0 = arith.constant 0 : i32
    %c0_i32_1 = arith.constant 0 : i32
    return %c0_i32, %c0_i32_0 : i32, i32
  }
  func.func @transform_4(%arg0: i32) -> (i32, i32, i32) {
    %c0_i32 = arith.constant 0 : i32
    %c0_i32_0 = arith.constant 0 : i32
    %c0_i32_1 = arith.constant 0 : i32
    return %c0_i32, %arg0, %c0_i32_0 : i32, i32, i32
  }
}

module attributes {stable_mosaic.version = 11 : i64} {
  func.func @_conv7_kernel(%arg0: i32, %arg1: memref<22x16x16xbf16, #tpu.memory_space<vmem>>, %arg2: memref<7x16x192xbf16, #tpu.memory_space<vmem>>, %arg3: memref<1x192xf32, #tpu.memory_space<vmem>>, %arg4: memref<1x192xf32, #tpu.memory_space<vmem>>, %arg5: memref<16x16x192xf32, #tpu.memory_space<vmem>>) attributes {dimension_semantics = [#tpu.dimension_semantics<parallel>], iteration_bounds = array<i64: 2>, scalar_prefetch = 0 : i64, scratch_operands = 0 : i64, tpu.core_type = #tpu.core_type<tc>, window_params = [{transform_indices = @transform_0, window_bounds = array<i64: 22, 16, 16>}, {pipeline_mode = #tpu.pipeline_mode<synchronous>, transform_indices = @transform_1, window_bounds = array<i64: 7, 16, 192>}, {pipeline_mode = #tpu.pipeline_mode<synchronous>, transform_indices = @transform_2, window_bounds = array<i64: 1, 192>}, {pipeline_mode = #tpu.pipeline_mode<synchronous>, transform_indices = @transform_3, window_bounds = array<i64: 1, 192>}, {transform_indices = @transform_4, window_bounds = array<i64: 16, 16, 192>}]} {
    %c0 = arith.constant 0 : index
    %c0_0 = arith.constant 0 : index
    %c0_1 = arith.constant 0 : index
    %0 = vector.load %arg1[%c0, %c0_0, %c0_1] : memref<22x16x16xbf16, #tpu.memory_space<vmem>>, vector<16x16x16xbf16>
    %1 = vector.shape_cast %0 : vector<16x16x16xbf16> to vector<256x16xbf16>
    %c0_2 = arith.constant 0 : index
    %c0_3 = arith.constant 0 : index
    %c0_4 = arith.constant 0 : index
    %2 = vector.load %arg2[%c0_2, %c0_3, %c0_4] : memref<7x16x192xbf16, #tpu.memory_space<vmem>>, vector<1x16x192xbf16>
    %3 = vector.shape_cast %2 : vector<1x16x192xbf16> to vector<16x192xbf16>
    %cst = arith.constant dense<0.000000e+00> : vector<256x192xf32>
    %4 = tpu.matmul %1, %3, %cst {dimension_numbers = #tpu.dot_dimension_numbers<[1], [0], [0], [1], [0, 0, 1, 1], [], []>} : vector<256x16xbf16>, vector<16x192xbf16>, vector<256x192xf32> -> vector<256x192xf32>
    %c1 = arith.constant 1 : index
    %c0_5 = arith.constant 0 : index
    %c0_6 = arith.constant 0 : index
    %5 = vector.load %arg1[%c1, %c0_5, %c0_6] : memref<22x16x16xbf16, #tpu.memory_space<vmem>>, vector<16x16x16xbf16>
    %6 = vector.shape_cast %5 : vector<16x16x16xbf16> to vector<256x16xbf16>
    %c1_7 = arith.constant 1 : index
    %c0_8 = arith.constant 0 : index
    %c0_9 = arith.constant 0 : index
    %7 = vector.load %arg2[%c1_7, %c0_8, %c0_9] : memref<7x16x192xbf16, #tpu.memory_space<vmem>>, vector<1x16x192xbf16>
    %8 = vector.shape_cast %7 : vector<1x16x192xbf16> to vector<16x192xbf16>
    %cst_10 = arith.constant dense<0.000000e+00> : vector<256x192xf32>
    %9 = tpu.matmul %6, %8, %cst_10 {dimension_numbers = #tpu.dot_dimension_numbers<[1], [0], [0], [1], [0, 0, 1, 1], [], []>} : vector<256x16xbf16>, vector<16x192xbf16>, vector<256x192xf32> -> vector<256x192xf32>
    %10 = arith.addf %4, %9 : vector<256x192xf32>
    %c2 = arith.constant 2 : index
    %c0_11 = arith.constant 0 : index
    %c0_12 = arith.constant 0 : index
    %11 = vector.load %arg1[%c2, %c0_11, %c0_12] : memref<22x16x16xbf16, #tpu.memory_space<vmem>>, vector<16x16x16xbf16>
    %12 = vector.shape_cast %11 : vector<16x16x16xbf16> to vector<256x16xbf16>
    %c2_13 = arith.constant 2 : index
    %c0_14 = arith.constant 0 : index
    %c0_15 = arith.constant 0 : index
    %13 = vector.load %arg2[%c2_13, %c0_14, %c0_15] : memref<7x16x192xbf16, #tpu.memory_space<vmem>>, vector<1x16x192xbf16>
    %14 = vector.shape_cast %13 : vector<1x16x192xbf16> to vector<16x192xbf16>
    %cst_16 = arith.constant dense<0.000000e+00> : vector<256x192xf32>
    %15 = tpu.matmul %12, %14, %cst_16 {dimension_numbers = #tpu.dot_dimension_numbers<[1], [0], [0], [1], [0, 0, 1, 1], [], []>} : vector<256x16xbf16>, vector<16x192xbf16>, vector<256x192xf32> -> vector<256x192xf32>
    %16 = arith.addf %10, %15 : vector<256x192xf32>
    %c3 = arith.constant 3 : index
    %c0_17 = arith.constant 0 : index
    %c0_18 = arith.constant 0 : index
    %17 = vector.load %arg1[%c3, %c0_17, %c0_18] : memref<22x16x16xbf16, #tpu.memory_space<vmem>>, vector<16x16x16xbf16>
    %18 = vector.shape_cast %17 : vector<16x16x16xbf16> to vector<256x16xbf16>
    %c3_19 = arith.constant 3 : index
    %c0_20 = arith.constant 0 : index
    %c0_21 = arith.constant 0 : index
    %19 = vector.load %arg2[%c3_19, %c0_20, %c0_21] : memref<7x16x192xbf16, #tpu.memory_space<vmem>>, vector<1x16x192xbf16>
    %20 = vector.shape_cast %19 : vector<1x16x192xbf16> to vector<16x192xbf16>
    %cst_22 = arith.constant dense<0.000000e+00> : vector<256x192xf32>
    %21 = tpu.matmul %18, %20, %cst_22 {dimension_numbers = #tpu.dot_dimension_numbers<[1], [0], [0], [1], [0, 0, 1, 1], [], []>} : vector<256x16xbf16>, vector<16x192xbf16>, vector<256x192xf32> -> vector<256x192xf32>
    %22 = arith.addf %16, %21 : vector<256x192xf32>
    %c4 = arith.constant 4 : index
    %c0_23 = arith.constant 0 : index
    %c0_24 = arith.constant 0 : index
    %23 = vector.load %arg1[%c4, %c0_23, %c0_24] : memref<22x16x16xbf16, #tpu.memory_space<vmem>>, vector<16x16x16xbf16>
    %24 = vector.shape_cast %23 : vector<16x16x16xbf16> to vector<256x16xbf16>
    %c4_25 = arith.constant 4 : index
    %c0_26 = arith.constant 0 : index
    %c0_27 = arith.constant 0 : index
    %25 = vector.load %arg2[%c4_25, %c0_26, %c0_27] : memref<7x16x192xbf16, #tpu.memory_space<vmem>>, vector<1x16x192xbf16>
    %26 = vector.shape_cast %25 : vector<1x16x192xbf16> to vector<16x192xbf16>
    %cst_28 = arith.constant dense<0.000000e+00> : vector<256x192xf32>
    %27 = tpu.matmul %24, %26, %cst_28 {dimension_numbers = #tpu.dot_dimension_numbers<[1], [0], [0], [1], [0, 0, 1, 1], [], []>} : vector<256x16xbf16>, vector<16x192xbf16>, vector<256x192xf32> -> vector<256x192xf32>
    %28 = arith.addf %22, %27 : vector<256x192xf32>
    %c5 = arith.constant 5 : index
    %c0_29 = arith.constant 0 : index
    %c0_30 = arith.constant 0 : index
    %29 = vector.load %arg1[%c5, %c0_29, %c0_30] : memref<22x16x16xbf16, #tpu.memory_space<vmem>>, vector<16x16x16xbf16>
    %30 = vector.shape_cast %29 : vector<16x16x16xbf16> to vector<256x16xbf16>
    %c5_31 = arith.constant 5 : index
    %c0_32 = arith.constant 0 : index
    %c0_33 = arith.constant 0 : index
    %31 = vector.load %arg2[%c5_31, %c0_32, %c0_33] : memref<7x16x192xbf16, #tpu.memory_space<vmem>>, vector<1x16x192xbf16>
    %32 = vector.shape_cast %31 : vector<1x16x192xbf16> to vector<16x192xbf16>
    %cst_34 = arith.constant dense<0.000000e+00> : vector<256x192xf32>
    %33 = tpu.matmul %30, %32, %cst_34 {dimension_numbers = #tpu.dot_dimension_numbers<[1], [0], [0], [1], [0, 0, 1, 1], [], []>} : vector<256x16xbf16>, vector<16x192xbf16>, vector<256x192xf32> -> vector<256x192xf32>
    %34 = arith.addf %28, %33 : vector<256x192xf32>
    %c6 = arith.constant 6 : index
    %c0_35 = arith.constant 0 : index
    %c0_36 = arith.constant 0 : index
    %35 = vector.load %arg1[%c6, %c0_35, %c0_36] : memref<22x16x16xbf16, #tpu.memory_space<vmem>>, vector<16x16x16xbf16>
    %36 = vector.shape_cast %35 : vector<16x16x16xbf16> to vector<256x16xbf16>
    %c6_37 = arith.constant 6 : index
    %c0_38 = arith.constant 0 : index
    %c0_39 = arith.constant 0 : index
    %37 = vector.load %arg2[%c6_37, %c0_38, %c0_39] : memref<7x16x192xbf16, #tpu.memory_space<vmem>>, vector<1x16x192xbf16>
    %38 = vector.shape_cast %37 : vector<1x16x192xbf16> to vector<16x192xbf16>
    %cst_40 = arith.constant dense<0.000000e+00> : vector<256x192xf32>
    %39 = tpu.matmul %36, %38, %cst_40 {dimension_numbers = #tpu.dot_dimension_numbers<[1], [0], [0], [1], [0, 0, 1, 1], [], []>} : vector<256x16xbf16>, vector<16x192xbf16>, vector<256x192xf32> -> vector<256x192xf32>
    %40 = arith.addf %34, %39 : vector<256x192xf32>
    %c0_41 = arith.constant 0 : index
    %c0_42 = arith.constant 0 : index
    %41 = vector.load %arg3[%c0_41, %c0_42] : memref<1x192xf32, #tpu.memory_space<vmem>>, vector<1x192xf32>
    %42 = vector.broadcast %41 : vector<1x192xf32> to vector<256x192xf32>
    %43 = arith.mulf %40, %42 : vector<256x192xf32>
    %c0_43 = arith.constant 0 : index
    %c0_44 = arith.constant 0 : index
    %44 = vector.load %arg4[%c0_43, %c0_44] : memref<1x192xf32, #tpu.memory_space<vmem>>, vector<1x192xf32>
    %45 = vector.broadcast %44 : vector<1x192xf32> to vector<256x192xf32>
    %46 = arith.addf %43, %45 : vector<256x192xf32>
    %cst_45 = arith.constant 0.000000e+00 : f32
    %47 = vector.broadcast %cst_45 : f32 to vector<256x192xf32>
    %48 = arith.maximumf %46, %47 : vector<256x192xf32>
    %49 = vector.shape_cast %48 : vector<256x192xf32> to vector<16x16x192xf32>
    %c0_46 = arith.constant 0 : index
    %c0_47 = arith.constant 0 : index
    %c0_48 = arith.constant 0 : index
    %50 = vector.load %arg5[%c0_46, %c0_47, %c0_48] : memref<16x16x192xf32, #tpu.memory_space<vmem>>, vector<16x16x192xf32>
    tpu.vector_store %arg5[%c0_46, %c0_47, %c0_48], %49 {strides = array<i32>} : memref<16x16x192xf32, #tpu.memory_space<vmem>>, vector<16x16x192xf32>,
    return
  }
  func.func @transform_0(%arg0: i32) -> (i32, i32, i32) {
    %c0_i32 = arith.constant 0 : i32
    %c0_i32_0 = arith.constant 0 : i32
    %c0_i32_1 = arith.constant 0 : i32
    return %c0_i32, %arg0, %c0_i32_0 : i32, i32, i32
  }
  func.func @transform_1(%arg0: i32) -> (i32, i32, i32) {
    %c0_i32 = arith.constant 0 : i32
    %c0_i32_0 = arith.constant 0 : i32
    %c0_i32_1 = arith.constant 0 : i32
    %c0_i32_2 = arith.constant 0 : i32
    return %c0_i32, %c0_i32_0, %c0_i32_1 : i32, i32, i32
  }
  func.func @transform_2(%arg0: i32) -> (i32, i32) {
    %c0_i32 = arith.constant 0 : i32
    %c0_i32_0 = arith.constant 0 : i32
    %c0_i32_1 = arith.constant 0 : i32
    return %c0_i32, %c0_i32_0 : i32, i32
  }
  func.func @transform_3(%arg0: i32) -> (i32, i32) {
    %c0_i32 = arith.constant 0 : i32
    %c0_i32_0 = arith.constant 0 : i32
    %c0_i32_1 = arith.constant 0 : i32
    return %c0_i32, %c0_i32_0 : i32, i32
  }
  func.func @transform_4(%arg0: i32) -> (i32, i32, i32) {
    %c0_i32 = arith.constant 0 : i32
    %c0_i32_0 = arith.constant 0 : i32
    %c0_i32_1 = arith.constant 0 : i32
    return %c0_i32, %arg0, %c0_i32_0 : i32, i32, i32
  }
}

module attributes {stable_mosaic.version = 11 : i64} {
  func.func @_avgpool_kernel(%arg0: i32, %arg1: memref<1x18x18x192xf32, #tpu.memory_space<vmem>>, %arg2: memref<1x192xf32, #tpu.memory_space<vmem>>, %arg3: memref<1x192xf32, #tpu.memory_space<vmem>>, %arg4: memref<1x16x16x192xf32, #tpu.memory_space<vmem>>) attributes {dimension_semantics = [#tpu.dimension_semantics<parallel>], iteration_bounds = array<i64: 2>, scalar_prefetch = 0 : i64, scratch_operands = 0 : i64, tpu.core_type = #tpu.core_type<tc>, window_params = [{transform_indices = @transform_0, window_bounds = array<i64: 1, 18, 18, 192>}, {pipeline_mode = #tpu.pipeline_mode<synchronous>, transform_indices = @transform_1, window_bounds = array<i64: 1, 192>}, {pipeline_mode = #tpu.pipeline_mode<synchronous>, transform_indices = @transform_2, window_bounds = array<i64: 1, 192>}, {transform_indices = @transform_3, window_bounds = array<i64: 1, 16, 16, 192>}]} {
    %c0 = arith.constant 0 : index
    %c0_0 = arith.constant 0 : index
    %c0_1 = arith.constant 0 : index
    %c0_2 = arith.constant 0 : index
    %0 = vector.load %arg1[%c0, %c0_0, %c0_1, %c0_2] : memref<1x18x18x192xf32, #tpu.memory_space<vmem>>, vector<1x16x18x192xf32>
    %1 = vector.shape_cast %0 : vector<1x16x18x192xf32> to vector<16x18x192xf32>
    %c0_3 = arith.constant 0 : index
    %c1 = arith.constant 1 : index
    %c0_4 = arith.constant 0 : index
    %c0_5 = arith.constant 0 : index
    %2 = vector.load %arg1[%c0_3, %c1, %c0_4, %c0_5] : memref<1x18x18x192xf32, #tpu.memory_space<vmem>>, vector<1x16x18x192xf32>
    %3 = vector.shape_cast %2 : vector<1x16x18x192xf32> to vector<16x18x192xf32>
    %4 = arith.addf %1, %3 : vector<16x18x192xf32>
    %c0_6 = arith.constant 0 : index
    %c2 = arith.constant 2 : index
    %c0_7 = arith.constant 0 : index
    %c0_8 = arith.constant 0 : index
    %5 = vector.load %arg1[%c0_6, %c2, %c0_7, %c0_8] : memref<1x18x18x192xf32, #tpu.memory_space<vmem>>, vector<1x16x18x192xf32>
    %6 = vector.shape_cast %5 : vector<1x16x18x192xf32> to vector<16x18x192xf32>
    %7 = arith.addf %4, %6 : vector<16x18x192xf32>
    %8 = vector.extract_strided_slice %7 {offsets = [0, 0, 0], sizes = [16, 16, 192], strides = [1, 1, 1]} : vector<16x18x192xf32> to vector<16x16x192xf32>
    %9 = vector.extract_strided_slice %7 {offsets = [0, 1, 0], sizes = [16, 16, 192], strides = [1, 1, 1]} : vector<16x18x192xf32> to vector<16x16x192xf32>
    %10 = arith.addf %8, %9 : vector<16x16x192xf32>
    %11 = vector.extract_strided_slice %7 {offsets = [0, 2, 0], sizes = [16, 16, 192], strides = [1, 1, 1]} : vector<16x18x192xf32> to vector<16x16x192xf32>
    %12 = arith.addf %10, %11 : vector<16x16x192xf32>
    %cst = arith.constant 0.111111112 : f32
    %13 = vector.broadcast %cst : f32 to vector<16x16x192xf32>
    %14 = arith.mulf %12, %13 : vector<16x16x192xf32>
    %c0_9 = arith.constant 0 : index
    %c0_10 = arith.constant 0 : index
    %15 = vector.load %arg2[%c0_9, %c0_10] : memref<1x192xf32, #tpu.memory_space<vmem>>, vector<1x192xf32>
    %16 = vector.shape_cast %15 : vector<1x192xf32> to vector<1x1x192xf32>
    %17 = vector.broadcast %16 : vector<1x1x192xf32> to vector<16x16x192xf32>
    %18 = arith.mulf %14, %17 : vector<16x16x192xf32>
    %c0_11 = arith.constant 0 : index
    %c0_12 = arith.constant 0 : index
    %19 = vector.load %arg3[%c0_11, %c0_12] : memref<1x192xf32, #tpu.memory_space<vmem>>, vector<1x192xf32>
    %20 = vector.shape_cast %19 : vector<1x192xf32> to vector<1x1x192xf32>
    %21 = vector.broadcast %20 : vector<1x1x192xf32> to vector<16x16x192xf32>
    %22 = arith.addf %18, %21 : vector<16x16x192xf32>
    %cst_13 = arith.constant 0.000000e+00 : f32
    %23 = vector.broadcast %cst_13 : f32 to vector<16x16x192xf32>
    %24 = arith.maximumf %22, %23 : vector<16x16x192xf32>
    %c0_14 = arith.constant 0 : index
    %c0_15 = arith.constant 0 : index
    %c0_16 = arith.constant 0 : index
    %c0_17 = arith.constant 0 : index
    %25 = vector.load %arg4[%c0_14, %c0_15, %c0_16, %c0_17] : memref<1x16x16x192xf32, #tpu.memory_space<vmem>>, vector<1x16x16x192xf32>
    %26 = vector.shape_cast %25 : vector<1x16x16x192xf32> to vector<16x16x192xf32>
    %27 = vector.shape_cast %24 : vector<16x16x192xf32> to vector<1x16x16x192xf32>
    tpu.vector_store %arg4[%c0_14, %c0_15, %c0_16, %c0_17], %27 {strides = array<i32>} : memref<1x16x16x192xf32, #tpu.memory_space<vmem>>, vector<1x16x16x192xf32>,
    return
  }
  func.func @transform_0(%arg0: i32) -> (i32, i32, i32, i32) {
    %c0_i32 = arith.constant 0 : i32
    %c0_i32_0 = arith.constant 0 : i32
    %c0_i32_1 = arith.constant 0 : i32
    %c0_i32_2 = arith.constant 0 : i32
    return %arg0, %c0_i32, %c0_i32_0, %c0_i32_1 : i32, i32, i32, i32
  }
  func.func @transform_1(%arg0: i32) -> (i32, i32) {
    %c0_i32 = arith.constant 0 : i32
    %c0_i32_0 = arith.constant 0 : i32
    %c0_i32_1 = arith.constant 0 : i32
    return %c0_i32, %c0_i32_0 : i32, i32
  }
  func.func @transform_2(%arg0: i32) -> (i32, i32) {
    %c0_i32 = arith.constant 0 : i32
    %c0_i32_0 = arith.constant 0 : i32
    %c0_i32_1 = arith.constant 0 : i32
    return %c0_i32, %c0_i32_0 : i32, i32
  }
  func.func @transform_3(%arg0: i32) -> (i32, i32, i32, i32) {
    %c0_i32 = arith.constant 0 : i32
    %c0_i32_0 = arith.constant 0 : i32
    %c0_i32_1 = arith.constant 0 : i32
    %c0_i32_2 = arith.constant 0 : i32
    return %arg0, %c0_i32, %c0_i32_0, %c0_i32_1 : i32, i32, i32, i32
  }
}

</mosaic_0001>

<bundles_post_ra>
// kernel: inception_c_forward.8
= control target key start
LH: loop header
LB: loop body
LE: loop exit
PB: predicated region body
PF: predicated region fallthrough
CT: control target
= control target key end

     0   :  { %20 = vsyncpa [#allocation3], 0  ;;  %s4472_s0 = inlined_call_operand.vmem [shape: f32[512,4], index: 0, kind: input, shape index: {}]   ;;  %s4473_s1 = inlined_call_operand.hbm [shape: bf16[4,192], index: 1, kind: input, shape index: {}]   ;;  %s4474_s2 = inlined_call_operand.hbm [shape: bf16[4,16], index: 2, kind: input, shape index: {}]   ;;  %s4475_s3 = inlined_call_operand.hbm [shape: bf16[4,16], index: 3, kind: input, shape index: {}]   ;;  %s4476_s4 = inlined_call_operand.hbm [shape: bf16[4,192], index: 4, kind: input, shape index: {}]   ;;  %s4477_s5 = inlined_call_operand.hbm [shape: f32[1,192], index: 5, kind: input, shape index: {}]   ;;  %s4478_s6 = inlined_call_operand.hbm [shape: f32[1,192], index: 6, kind: input, shape index: {}]   ;;  %s4479_s7 = inlined_call_operand.hbm [shape: f32[1,16], index: 7, kind: input, shape index: {}]   ;;  %s4480_s8 = inlined_call_operand.hbm [shape: f32[1,16], index: 8, kind: input, shape index: {}]   ;;  %s4481_s9 = inlined_call_operand.hbm [shape: f32[1,16], index: 9, kind: input, shape index: {}]   ;;  %s4482_s10 = inlined_call_operand.hbm [shape: f32[1,16], index: 10, kind: input, shape index: {}]   ;;  %s4483_s11 = inlined_call_operand.vmem [shape: f32[512,192], index: 11, kind: output, shape index: {0}]   ;;  %s4484_s12 = inlined_call_operand.vmem [shape: bf16[512,16], index: 12, kind: output, shape index: {1}]   ;;  %s4485_s13 = inlined_call_operand.vmem [shape: bf16[512,16], index: 13, kind: output, shape index: {2}]   ;;  %s4486_s14 = inlined_call_operand.vmem [shape: f32[512,192], index: 14, kind: output, shape index: {3}]  }
   0x1   :  { %21 = vsyncpa [#allocation5], 0 }
   0x2   :  { %22 = vsyncpa [#allocation8], 0 }
   0x3   :  { %23 = vsyncpa [#allocation11], 0 }
   0x4   :  { %24 = vsyncpa [#allocation14], 0 }
   0x5   :  { %25 = vsyncpa [#allocation17], 0  ;;  %s3469_s29 = smov 0  }
   0x6 LB: > { %s3383_s30 = smov [#allocation4]   ;;  %s2634_s16 = sadd.s32 4294967295, %s3381_s29   ;;  %s3381_s29 = sphi %s3469_s29, %s31_s29  }
   0x7   : > { %s400_s15 = sshll.u32 %s3383_s30, 4  ;;  %p2636_p0 = scmp.ge.s32.totalorder %s3381_s29, 1  ;;  %s401_s15 = int_to_ptr.vmem [resolvable:$true] %s400_s15 }
   0x8   : > { %p376_p1 = scmp.lt.s32.totalorder %s3381_s29, 3  ;;  %p3479_p2 = scmp.eq.s32.totalorder %s2634_s16, 0 }
   0x9   : > { %s3384_s19 = smov [#allocation7]   ;;  %s3385_s21 = smov [#allocation10]  }
   0xa   : > { %s4490_s17 = scalar_select %p3479_p2, 1, 0 }
   0xb   : > { %p3483_p3 = pnand %p2636_p0, %p376_p1  ;;  %s422_s20 = sshll.u32 %s3384_s19, 4  ;;  %s423_s20 = int_to_ptr.vmem [resolvable:$true] %s422_s20 }
   0xc   : > { %s444_s22 = sshll.u32 %s3385_s21, 4  ;;  %s3386_s24 = smov [#allocation13]   ;;  %s3495_s22 = int_to_ptr.vmem [resolvable:$true] %s444_s22 }
   0xd   : > { %s4491_s18 = scalar_select %p3483_p3, 1, 0 }
   0xe   : > { %p3021_p4 = pneg %p3483_p3  ;;  %s466_s25 = sshll.u32 %s3386_s24, 4  ;;  %s3497_s25 = int_to_ptr.vmem [resolvable:$true] %s466_s25 }
   0xf   : > { %s3102_s27 = scalar_lea.vmem %s401_s15, 32  ;;  %p3110_p10 = scmp.lt.s32.totalorder %s401_s15, %s401_s15 }
  0x10   : > { %p3491_p5 = pnand %p3479_p2, %p3021_p4  ;;  %p3103_p7 = scmp.ne.s32.totalorder %s401_s15, %s3102_s27 }
  0x11   : > { %p3111_p11 = scmp.lt.s32.totalorder %s3102_s27, %s3102_s27 }
  0x12   : > { %p3501_p6 = pneg %p3491_p5 }
  0x13   : > { %p3112_p12 = por %p3111_p11, %p3110_p10 }
  0x14   : > { %p3105_p8 = pnand %p3103_p7, %p3501_p6 }
  0x16   : > { %p3106_p9 = pneg %p3105_p8 }
  0x18   : > { %p3113_p13 = pnand %p3112_p12, %p3106_p9 }
  0x1a   : > { %3116 = shalt.err (!%p3113_p13)
}
  0x1b   : > { %3027 = dma.hbm_to_vmem [thread:$0]  (!%p3491_p5), %s4474_s2, 32, %s401_s15, [#allocation5]  }
  0x1c   : > { %s3128_s19 = scalar_lea.vmem %s423_s20, 64  ;;  %p3136_p2 = scmp.lt.s32.totalorder %s423_s20, %s423_s20 }
  0x1d   : > { %p3129_p0 = scmp.ne.s32.totalorder %s423_s20, %s3128_s19  ;;  %p3137_p7 = scmp.lt.s32.totalorder %s3128_s19, %s3128_s19 }
  0x1f   : > { %p3131_p1 = pnand %p3129_p0, %p3501_p6  ;;  %p3138_p8 = por %p3137_p7, %p3136_p2 }
  0x21   : > { %p3132_p4 = pneg %p3131_p1 }
  0x23   : > { %p3139_p3 = pnand %p3138_p8, %p3132_p4 }
  0x25   : > { %3142 = shalt.err (!%p3139_p3)
}
  0x26   : > { %3033 = dma.hbm_to_vmem [thread:$0]  (!%p3491_p5), %s4476_s4, 64, %s423_s20, [#allocation8]  }
  0x27   : > { %s3154_s15 = scalar_lea.vmem %s3495_s22, 32  ;;  %p3162_p12 = scmp.lt.s32.totalorder %s3495_s22, %s3495_s22 }
  0x28   : > { %p3155_p9 = scmp.ne.s32.totalorder %s3495_s22, %s3154_s15  ;;  %p3163_p2 = scmp.lt.s32.totalorder %s3154_s15, %s3154_s15 }
  0x2a   : > { %p3157_p10 = pnand %p3155_p9, %p3501_p6  ;;  %p3164_p13 = por %p3163_p2, %p3162_p12 }
  0x2c   : > { %p3158_p11 = pneg %p3157_p10 }
  0x2e   : > { %p3165_p3 = pnand %p3164_p13, %p3158_p11 }
  0x30   : > { %3168 = shalt.err (!%p3165_p3)
}
  0x31   : > { %3039 = dma.hbm_to_vmem [thread:$0]  (!%p3491_p5), %s4478_s6, 32, %s3495_s22, [#allocation11]  }
  0x32   : > { %s3180_s20 = scalar_lea.vmem %s3497_s25, 16  ;;  %s3187_s30 = scalar_lea.vmem %s3497_s25, 32 }
  0x33   : > { %p3181_p0 = scmp.ne.s32.totalorder %s3497_s25, %s3180_s20  ;;  %p3188_p7 = scmp.lt.s32.totalorder %s3497_s25, %s3497_s25 }
  0x34   : > { %p3189_p8 = scmp.lt.s32.totalorder %s3187_s30, %s3180_s20 }
  0x35   : > { %p3183_p1 = pnand %p3181_p0, %p3501_p6 }
  0x36   : > { %p3190_p9 = por %p3189_p8, %p3188_p7 }
  0x37   : > { %p3184_p4 = pneg %p3183_p1 }
  0x39   : > { %p3191_p10 = pnand %p3190_p9, %p3184_p4 }
  0x3b   : > { %3194 = shalt.err (!%p3191_p10)
}
  0x3c   : > { %3045 = dma.hbm_to_vmem [thread:$0]  (!%p3491_p5), %s4480_s8, 16, %s3497_s25, [#allocation14]  }
  0x3d   : > { %s3387_s22 = smov [#allocation2]   ;;  %s3388_s15 = smov [#allocation6]  }
  0x3e   : > { %s389_s24 = sshll.u32 %s3387_s22, 4  ;;  %s411_s27 = sshll.u32 %s3388_s15, 4  ;;  %s390_s24 = int_to_ptr.vmem [resolvable:$true] %s389_s24  ;;  %s412_s27 = int_to_ptr.vmem [resolvable:$true] %s411_s27 }
  0x3f   : > { %s3206_s28 = scalar_lea.vmem %s390_s24, 64  ;;  %p3214_p13 = scmp.lt.s32.totalorder %s390_s24, %s390_s24 }
  0x40   : > { %p3207_p11 = scmp.ne.s32.totalorder %s390_s24, %s3206_s28  ;;  %p3215_p3 = scmp.lt.s32.totalorder %s3206_s28, %s3206_s28 }
  0x42   : > { %p3209_p12 = pnand %p3207_p11, %p3501_p6  ;;  %p3216_p0 = por %p3215_p3, %p3214_p13 }
  0x44   : > { %p3210_p2 = pneg %p3209_p12 }
  0x46   : > { %p3217_p1 = pnand %p3216_p0, %p3210_p2 }
  0x48   : > { %3220 = shalt.err (!%p3217_p1)
}
  0x49   : > { %3024 = dma.hbm_to_vmem [thread:$0]  (!%p3491_p5), %s4473_s1, 64, %s390_s24, [#allocation3]  }
  0x4a   : > { %s3232_s25 = scalar_lea.vmem %s412_s27, 32  ;;  %p3240_p9 = scmp.lt.s32.totalorder %s412_s27, %s412_s27 }
  0x4b   : > { %p3233_p4 = scmp.ne.s32.totalorder %s412_s27, %s3232_s25  ;;  %p3241_p10 = scmp.lt.s32.totalorder %s3232_s25, %s3232_s25 }
  0x4d   : > { %p3235_p7 = pnand %p3233_p4, %p3501_p6  ;;  %p3242_p11 = por %p3241_p10, %p3240_p9 }
  0x4f   : > { %p3236_p8 = pneg %p3235_p7 }
  0x51   : > { %p3243_p12 = pnand %p3242_p11, %p3236_p8 }
  0x53   : > { %3246 = shalt.err (!%p3243_p12)
}
  0x54   : > { %3030 = dma.hbm_to_vmem [thread:$0]  (!%p3491_p5), %s4475_s3, 32, %s412_s27, [#allocation5]  }
  0x55   : > { %s3389_s22 = smov [#allocation9]   ;;  %s3390_s15 = smov [#allocation12]  }
  0x56   : > { %s433_s24 = sshll.u32 %s3389_s22, 4  ;;  %s455_s28 = sshll.u32 %s3390_s15, 4  ;;  %s434_s24 = int_to_ptr.vmem [resolvable:$true] %s433_s24  ;;  %s456_s28 = int_to_ptr.vmem [resolvable:$true] %s455_s28 }
  0x57   : > { %s3258_s20 = scalar_lea.vmem %s434_s24, 32  ;;  %p3266_p0 = scmp.lt.s32.totalorder %s434_s24, %s434_s24 }
  0x58   : > { %p3259_p2 = scmp.ne.s32.totalorder %s434_s24, %s3258_s20  ;;  %p3267_p1 = scmp.lt.s32.totalorder %s3258_s20, %s3258_s20 }
  0x5a   : > { %p3261_p13 = pnand %p3259_p2, %p3501_p6  ;;  %p3268_p4 = por %p3267_p1, %p3266_p0 }
  0x5c   : > { %p3262_p3 = pneg %p3261_p13 }
  0x5e   : > { %p3269_p7 = pnand %p3268_p4, %p3262_p3 }
  0x60   : > { %3272 = shalt.err (!%p3269_p7)
}
  0x61   : > { %3036 = dma.hbm_to_vmem [thread:$0]  (!%p3491_p5), %s4477_s5, 32, %s434_s24, [#allocation8]  }
  0x62   : > { %s3284_s27 = scalar_lea.vmem %s456_s28, 16  ;;  %s3291_s19 = scalar_lea.vmem %s456_s28, 32 }
  0x63   : > { %p3285_p8 = scmp.ne.s32.totalorder %s456_s28, %s3284_s27  ;;  %p3292_p11 = scmp.lt.s32.totalorder %s456_s28, %s456_s28 }
  0x64   : > { %p3293_p12 = scmp.lt.s32.totalorder %s3291_s19, %s3284_s27 }
  0x65   : > { %p3287_p9 = pnand %p3285_p8, %p3501_p6 }
  0x66   : > { %p3294_p2 = por %p3293_p12, %p3292_p11 }
  0x67   : > { %p3288_p10 = pneg %p3287_p9 }
  0x69   : > { %p3295_p13 = pnand %p3294_p2, %p3288_p10 }
  0x6b   : > { %3298 = shalt.err (!%p3295_p13)
}
  0x6c   : > { %3042 = dma.hbm_to_vmem [thread:$0]  (!%p3491_p5), %s4479_s7, 16, %s456_s28, [#allocation11]  }
  0x6d   : > { %s3391_s24 = smov [#allocation15]   ;;  %s3392_s20 = smov [#allocation16]  }
  0x6e   : > { %s477_s15 = sshll.u32 %s3391_s24, 4  ;;  %s488_s30 = sshll.u32 %s3392_s20, 4  ;;  %s478_s15 = int_to_ptr.vmem [resolvable:$true] %s477_s15  ;;  %s489_s30 = int_to_ptr.vmem [resolvable:$true] %s488_s30 }
  0x6f   : > { %s3310_s25 = scalar_lea.vmem %s478_s15, 16  ;;  %s3317_s27 = scalar_lea.vmem %s478_s15, 32 }
  0x70   : > { %p3311_p3 = scmp.ne.s32.totalorder %s478_s15, %s3310_s25  ;;  %p3318_p4 = scmp.lt.s32.totalorder %s478_s15, %s478_s15 }
  0x71   : > { %p3319_p7 = scmp.lt.s32.totalorder %s3317_s27, %s3310_s25 }
  0x72   : > { %p3313_p0 = pnand %p3311_p3, %p3501_p6 }
  0x73   : > { %p3320_p8 = por %p3319_p7, %p3318_p4 }
  0x74   : > { %p3314_p1 = pneg %p3313_p0 }
  0x76   : > { %p3321_p9 = pnand %p3320_p8, %p3314_p1 }
  0x78   : > { %3324 = shalt.err (!%p3321_p9)
}
  0x79   : > { %3048 = dma.hbm_to_vmem [thread:$0]  (!%p3491_p5), %s4481_s9, 16, %s478_s15, [#allocation14]  }
  0x7a   : > { %s3336_s21 = scalar_lea.vmem %s489_s30, 16  ;;  %s3343_s22 = scalar_lea.vmem %s489_s30, 32 }
  0x7b   : > { %p3337_p10 = scmp.ne.s32.totalorder %s489_s30, %s3336_s21  ;;  %p3344_p2 = scmp.lt.s32.totalorder %s489_s30, %s489_s30 }
  0x7c   : > { %p3345_p13 = scmp.lt.s32.totalorder %s3343_s22, %s3336_s21 }
  0x7d   : > { %p3339_p11 = pnand %p3337_p10, %p3501_p6 }
  0x7e   : > { %p3346_p3 = por %p3345_p13, %p3344_p2 }
  0x7f   : > { %p3340_p12 = pneg %p3339_p11 }
  0x81   : > { %p3347_p0 = pnand %p3346_p3, %p3340_p12 }
  0x83   : > { %3350 = shalt.err (!%p3347_p0)
}
  0x84   : > { %3051 = dma.hbm_to_vmem [thread:$0]  (!%p3491_p5), %s4482_s10, 16, %s489_s30, [#allocation17]  }
  0x85   : > { %p4494_p1 = scmp.ne.s32.totalorder %s4491_s18, 0 }
  0x86   : > { %p4495_p4 = scmp.ne.s32.totalorder (!%p4494_p1), %s4490_s17, 0 }
  0x87   : > { %510 = sbr.rel (%p4494_p1) target bundleno = 552 (0x228), region = 64 }
  0x8c   : > { %3356 = dma.done.wait (%p4495_p4), [#allocation3], 64  }
  0x8d   : > { %3358 = vsyncadd (%p4495_p4), [#allocation3], 4294967232 }
  0x8e   : > { %3360 = dma.done.wait (%p4495_p4), [#allocation5], 64  }
  0x8f   : > { %3362 = vsyncadd (%p4495_p4), [#allocation5], 4294967232 }
  0x90   : > { %3364 = dma.done.wait (%p4495_p4), [#allocation8], 96  }
  0x91   : > { %3366 = vsyncadd (%p4495_p4), [#allocation8], 4294967200 }
  0x92   : > { %3368 = dma.done.wait (%p4495_p4), [#allocation11], 48  }
  0x93   : > { %3370 = vsyncadd (%p4495_p4), [#allocation11], 4294967248 }
  0x94   : > { %3372 = dma.done.wait (%p4495_p4), [#allocation14], 32  }
  0x95   : > { %3374 = vsyncadd (%p4495_p4), [#allocation14], 4294967264 }
  0x96   : > { %3376 = dma.done.wait (%p4495_p4), [#allocation17], 16  }
  0x97   : > { %3378 = vsyncadd (%p4495_p4), [#allocation17], 4294967280  ;;  %s2659_s18 = sshll.u32 %s2634_s16, 5  ;;  %v3393_v0 = vmov 0   ;;  %vm749_vm0 = vcmask 1041408   ;;  %vm700_vm1 = vcmask 31744   ;;  %v951_v59 = vlaneseq }
  0x98   : > { %868 = vmatprep.mubr.bf16.mxu1 %v3393_v0  ;;  %p610_p5 = scmp.lt.s32.totalorder %s2659_s18, 63  ;;  %788 = vmatprep.mubr.bf16.mxu0 %v3393_v0  ;;  %v2671_v1 = vld.sshfl [vmem:[#allocation2] sm:$0x33 pattern:$0x76325410]  ;;  %vm1166_vm2 = vcmask 523264  }
  0x99   : > { %v699_v4 = vcombine.high %v2671_v1, %v2671_v1  ;;  %v751_v5 = vsel %vm749_vm0, %v2671_v1, 0  ;;  %v1230_v8 = vld [vmem:[#allocation4] sm:$0x3]  ;;  %v3653_v21 = vld [vmem:[#allocation6] sm:$0x3]  ;;  %v952_v60 = vshrl.u32 %v951_v59, 7 }
  0x9a   : > { %s4497_s18 = smov (!%p610_p5, %s2659_s18), 63  ;;  %v2789_v11 = vld.sshfl [vmem:[#allocation7] sm:$0x33 pattern:$0x76325410]  ;;  %v1232_v13 = vsel %vm749_vm0, %v1230_v8, 0 }
  0x9b   : > { %s2660_s23 = sshll.u32 %s4497_s18, 3  ;;  %2977 = vmatprep.subr.msk.bf16.mxu1 %vm749_vm0, %v699_v4  ;;  %2672 = vmatprep.subr.msk.bf16.mxu0 %vm749_vm0, %v699_v4  ;;  %v2110_v12 = vcombine.high %v2789_v11, %v2789_v11  ;;  %v2112_v14 = vsel %vm749_vm0, %v2789_v11, 0  ;;  %v1668_v58 = vsel %vm749_vm0, %v3653_v21, 0  ;;  %v953_v61 = vsub.s32 0, %v952_v60  ;;  %v949_v62 = vld [vmem:[#allocation9] sm:$0x3] }
  0x9c   : > { %s3622_s30 = scalar_lea.vmem %s4472_s0, %s2660_s23  ;;  %2978 = vmatpush1.bf16.msra.mxu1 %v751_v5  ;;  %771 = vmatpush1.bf16.msra.mxu0 %v751_v5  ;;  %v957_v63 = vsub.s32 1, %v952_v60  ;;  %v1025_v1 = vld [vmem:[#allocation10] sm:$0x3]  ;;  %s2809_s16 = sshll.u32 %s4497_s18, 4  ;;  %vm1633_vm3 = vcmask 125952  }
  0x9d   : > { %v658_v2 = vld [vmem:[%s3622_s30 + $0x80] sm:$0xff]  ;;  %v659_v3 = vld [vmem:[%s3622_s30 + $0x88] sm:$0xff]  ;;  %2979 = vmatprep.subr.msk.bf16.mxu1 %vm749_vm0, %v1230_v8  ;;  %2790 = vmatprep.subr.msk.bf16.mxu0 %vm749_vm0, %v2110_v12  ;;  %v660_v15 = vld [vmem:[%s3622_s30 + $0x90] sm:$0xff]  ;;  %s3867_s27 = scalar_lea.vmem %s4483_s11, %s2809_s16  ;;  %s4076_s21 = scalar_lea.vmem %s4486_s14, %s2809_s16 }
  0x9e   : > { %v642_v6 = vld [vmem:[%s3622_s30] sm:$0xff]  ;;  %v643_v7 = vld [vmem:[%s3622_s30 + $0x8] sm:$0xff]  ;;  %v3631_v9 = vpack.c.bf16 %v659_v3, %v658_v2  ;;  %v661_v16 = vld [vmem:[%s3622_s30 + $0x98] sm:$0xff]  ;;  %v3847_v2 = vrot.slane %v949_v62, %v953_v61  ;;  %v3849_v3 = vrot.slane %v1025_v1, %v953_v61  ;;  %v3851_v4 = vrot.slane %v949_v62, %v957_v63  ;;  %s2665_s22 = sshll.u32 %s4497_s18, 2 }
  0x9f   : > { %v3633_v10 = vpack.c.bf16 %v643_v7, %v642_v6  ;;  %v644_v17 = vld [vmem:[%s3622_s30 + $0x10] sm:$0xff]  ;;  %v645_v18 = vld [vmem:[%s3622_s30 + $0x18] sm:$0xff]  ;;  %v3649_v19 = vpack.c.bf16 %v661_v16, %v660_v15  ;;  %v662_v22 = vld [vmem:[%s3622_s30 + $0xa0] sm:$0xff]  ;;  %v3855_v7 = vrot.slane %v1025_v1, %v957_v63  ;;  %s4111_s23 = scalar_lea.vmem %s4484_s12, %s2665_s22 }
  0xa0   : > { %2681 = vmatmul.mubr.msk.bf16.vlgmr.msra.gmra.mxu1 %vm700_vm1, %v3631_v9  ;;  %v3651_v20 = vpack.c.bf16 %v645_v18, %v644_v17  ;;  %v663_v23 = vld [vmem:[%s3622_s30 + $0xa8] sm:$0xff]  ;;  %v646_v24 = vld [vmem:[%s3622_s30 + $0x20] sm:$0xff]  ;;  %v664_v28 = vld [vmem:[%s3622_s30 + $0xb0] sm:$0xff] }
  0xa1   : > { %2673 = vmatmul.mubr.msk.bf16.vlgmr.msra.gmra.mxu0 %vm700_vm1, %v3633_v10  ;;  %2910 = vmatpush3.bf16.msra.mxu1 %v1232_v13  ;;  %v647_v25 = vld [vmem:[%s3622_s30 + $0x28] sm:$0xff]  ;;  %v3667_v26 = vpack.c.bf16 %v663_v23, %v662_v22  ;;  %v665_v29 = vld [vmem:[%s3622_s30 + $0xb8] sm:$0xff]  ;;  %v648_v30 = vld [vmem:[%s3622_s30 + $0x30] sm:$0xff] }
  0xa2   : > { %878 = vmatprep.mubr.bf16.mxu1 %v3393_v0  ;;  %2132 = vmatpush1.bf16.msra.mxu0 %v2112_v14  ;;  %v3669_v27 = vpack.c.bf16 %v647_v25, %v646_v24  ;;  %v649_v31 = vld [vmem:[%s3622_s30 + $0x38] sm:$0xff]  ;;  %v3681_v32 = vpack.c.bf16 %v665_v29, %v664_v28  ;;  %v666_v34 = vld [vmem:[%s3622_s30 + $0xc0] sm:$0xff]  ;;  %v667_v35 = vld [vmem:[%s3622_s30 + $0xc8] sm:$0xff] }
  0xa3   : > { %798 = vmatprep.mubr.bf16.mxu0 %v3393_v0  ;;  %2980 = vmatprep.subr.msk.bf16.mxu1 %vm749_vm0, %v3653_v21  ;;  %v3683_v33 = vpack.c.bf16 %v649_v31, %v648_v30  ;;  %v650_v36 = vld [vmem:[%s3622_s30 + $0x40] sm:$0xff]  ;;  %v651_v37 = vld [vmem:[%s3622_s30 + $0x48] sm:$0xff]  ;;  %v3695_v38 = vpack.c.bf16 %v667_v35, %v666_v34  ;;  %v668_v40 = vld [vmem:[%s3622_s30 + $0xd0] sm:$0xff] }
  0xa4   : > { %v3697_v39 = vpack.c.bf16 %v651_v37, %v650_v36  ;;  %v669_v41 = vld [vmem:[%s3622_s30 + $0xd8] sm:$0xff]  ;;  %v652_v42 = vld [vmem:[%s3622_s30 + $0x50] sm:$0xff]  ;;  %v670_v46 = vld [vmem:[%s3622_s30 + $0xe0] sm:$0xff] }
  0xa5   : > { %v653_v43 = vld [vmem:[%s3622_s30 + $0x58] sm:$0xff]  ;;  %v3709_v44 = vpack.c.bf16 %v669_v41, %v668_v40  ;;  %v671_v47 = vld [vmem:[%s3622_s30 + $0xe8] sm:$0xff]  ;;  %v654_v48 = vld [vmem:[%s3622_s30 + $0x60] sm:$0xff] }
  0xa6   : > { %v3711_v45 = vpack.c.bf16 %v653_v43, %v652_v42  ;;  %v655_v49 = vld [vmem:[%s3622_s30 + $0x68] sm:$0xff]  ;;  %v3723_v50 = vpack.c.bf16 %v671_v47, %v670_v46  ;;  %v672_v52 = vld [vmem:[%s3622_s30 + $0xf0] sm:$0xff]  ;;  %v673_v53 = vld [vmem:[%s3622_s30 + $0xf8] sm:$0xff] }
  0xa7   : > { %v680_v51 = vpack.c.bf16 %v655_v49, %v654_v48  ;;  %v656_v54 = vld [vmem:[%s3622_s30 + $0x70] sm:$0xff]  ;;  %v657_v55 = vld [vmem:[%s3622_s30 + $0x78] sm:$0xff]  ;;  %v3734_v56 = vpack.c.bf16 %v673_v53, %v672_v52  ;;  %s4298_s30 = scalar_lea.vmem %s4485_s13, %s2665_s22 }
  0xa8   : > { %2682 = vmatmul.mubr.msk.bf16.gmra.mxu1 %vm700_vm1, %v3649_v19  ;;  %v681_v57 = vpack.c.bf16 %v657_v55, %v656_v54 }
  0xa9   : > { %2674 = vmatmul.mubr.msk.bf16.gmra.mxu0 %vm700_vm1, %v3651_v20  ;;  %888 = vmatprep.mubr.bf16.mxu1 %v3393_v0 }
  0xaa   : > { %808 = vmatprep.mubr.bf16.mxu0 %v3393_v0 }
  0xb0   : > { %2683 = vmatmul.mubr.msk.bf16.gmra.mxu1 %vm700_vm1, %v3667_v26 }
  0xb1   : > { %2675 = vmatmul.mubr.msk.bf16.gmra.mxu0 %vm700_vm1, %v3669_v27  ;;  %898 = vmatprep.mubr.bf16.mxu1 %v3393_v0 }
  0xb2   : > { %818 = vmatprep.mubr.bf16.mxu0 %v3393_v0 }
  0xb8   : > { %2684 = vmatmul.mubr.msk.bf16.gmra.mxu1 %vm700_vm1, %v3681_v32 }
  0xb9   : > { %2676 = vmatmul.mubr.msk.bf16.gmra.mxu0 %vm700_vm1, %v3683_v33  ;;  %908 = vmatprep.mubr.bf16.mxu1 %v3393_v0 }
  0xba   : > { %828 = vmatprep.mubr.bf16.mxu0 %v3393_v0 }
  0xc0   : > { %2685 = vmatmul.mubr.msk.bf16.gmra.mxu1 %vm700_vm1, %v3695_v38 }
  0xc1   : > { %2677 = vmatmul.mubr.msk.bf16.gmra.mxu0 %vm700_vm1, %v3697_v39  ;;  %918 = vmatprep.mubr.bf16.mxu1 %v3393_v0 }
  0xc2   : > { %838 = vmatprep.mubr.bf16.mxu0 %v3393_v0 }
  0xc8   : > { %2686 = vmatmul.mubr.msk.bf16.gmra.mxu1 %vm700_vm1, %v3709_v44 }
  0xc9   : > { %2678 = vmatmul.mubr.msk.bf16.gmra.mxu0 %vm700_vm1, %v3711_v45  ;;  %928 = vmatprep.mubr.bf16.mxu1 %v3393_v0 }
  0xca   : > { %848 = vmatprep.mubr.bf16.mxu0 %v3393_v0 }
  0xd0   : > { %2687 = vmatmul.mubr.msk.bf16.gmra.mxu1 %vm700_vm1, %v3723_v50 }
  0xd1   : > { %2679 = vmatmul.mubr.msk.bf16.gmra.mxu0 %vm700_vm1, %v680_v51  ;;  %938 = vmatprep.mubr.bf16.mxu1 %v3393_v0 }
  0xd2   : > { %858 = vmatprep.mubr.bf16.mxu0 %v3393_v0 }
  0xd8   : > { %2688 = vmatmul.mubr.msk.bf16.gmra.mxu1 %vm700_vm1, %v3734_v56 }
  0xd9   : > { %2680 = vmatmul.mubr.msk.bf16.gmra.mxu0 %vm700_vm1, %v681_v57  ;;  %2911 = vmatprep.mubr.msk.bf16.mxu1 %vm700_vm1, %v3633_v10 }
  0xda   : > { %2149 = vmatprep.mubr.bf16.mxu0 %v3393_v0 }
  0xe0   : > { %2912 = vmatmul.mubr.msk.bf16.vlgmr.msra.gmra.mxu1 %vm700_vm1, %v3651_v20 }
  0xe1   : > { %2791 = vmatmul.mubr.msk.bf16.vlgmr.msra.gmra.mxu0 %vm700_vm1, %v3633_v10  ;;  %2944 = vmatpush3.bf16.msra.mxu1 %v1668_v58 }
  0xe2   : > { %2915 = vmatprep.mubr.msk.bf16.mxu1 %vm700_vm1, %v3669_v27  ;;  %2159 = vmatprep.mubr.bf16.mxu0 %v3393_v0 }
  0xe8   : > { %2916 = vmatmul.mubr.msk.bf16.gmra.mxu1 %vm700_vm1, %v3683_v33 }
  0xe9   : > { %2792 = vmatmul.mubr.msk.bf16.gmra.mxu0 %vm700_vm1, %v3651_v20  ;;  %2919 = vmatprep.mubr.msk.bf16.mxu1 %vm700_vm1, %v3697_v39 }
  0xea   : > { %2169 = vmatprep.mubr.bf16.mxu0 %v3393_v0 }
  0xf0   : > { %2920 = vmatmul.mubr.msk.bf16.gmra.mxu1 %vm700_vm1, %v3711_v45 }
  0xf1   : > { %2793 = vmatmul.mubr.msk.bf16.gmra.mxu0 %vm700_vm1, %v3669_v27  ;;  %2923 = vmatprep.mubr.msk.bf16.mxu1 %vm700_vm1, %v680_v51 }
  0xf2   : > { %2179 = vmatprep.mubr.bf16.mxu0 %v3393_v0 }
  0xf8   : > { %2924 = vmatmul.mubr.msk.bf16.gmra.mxu1 %vm700_vm1, %v681_v57 }
  0xf9   : > { %2794 = vmatmul.mubr.msk.bf16.gmra.mxu0 %vm700_vm1, %v3683_v33  ;;  %2927 = vmatprep.mubr.msk.bf16.mxu1 %vm700_vm1, %v3631_v9 }
  0xfa   : > { %2189 = vmatprep.mubr.bf16.mxu0 %v3393_v0 }
 0x100   : > { %2928 = vmatmul.mubr.msk.bf16.gmra.mxu1 %vm700_vm1, %v3649_v19 }
 0x101   : > { %2795 = vmatmul.mubr.msk.bf16.gmra.mxu0 %vm700_vm1, %v3697_v39  ;;  %2931 = vmatprep.mubr.msk.bf16.mxu1 %vm700_vm1, %v3667_v26 }
 0x102   : > { %2199 = vmatprep.mubr.bf16.mxu0 %v3393_v0 }
 0x108   : > { %2932 = vmatmul.mubr.msk.bf16.gmra.mxu1 %vm700_vm1, %v3681_v32 }
 0x109   : > { %2796 = vmatmul.mubr.msk.bf16.gmra.mxu0 %vm700_vm1, %v3711_v45  ;;  %2935 = vmatprep.mubr.msk.bf16.mxu1 %vm700_vm1, %v3695_v38 }
 0x10a   : > { %2209 = vmatprep.mubr.bf16.mxu0 %v3393_v0 }
 0x110   : > { %2936 = vmatmul.mubr.msk.bf16.gmra.mxu1 %vm700_vm1, %v3709_v44 }
 0x111   : > { %2797 = vmatmul.mubr.msk.bf16.gmra.mxu0 %vm700_vm1, %v680_v51  ;;  %2939 = vmatprep.mubr.msk.bf16.mxu1 %vm700_vm1, %v3723_v50 }
 0x112   : > { %2219 = vmatprep.mubr.bf16.mxu0 %v3393_v0 }
 0x118   : > { %2940 = vmatmul.mubr.msk.bf16.gmra.mxu1 %vm700_vm1, %v3734_v56 }
 0x119   : > { %2798 = vmatmul.mubr.msk.bf16.gmra.mxu0 %vm700_vm1, %v681_v57  ;;  %2945 = vmatprep.mubr.msk.bf16.mxu1 %vm700_vm1, %v3633_v10 }
 0x11a   : > { %2229 = vmatprep.mubr.bf16.mxu0 %v3393_v0 }
 0x120   : > { %2946 = vmatmul.mubr.msk.bf16.vlgmr.msra.gmra.mxu1 %vm700_vm1, %v3651_v20 }
 0x121   : > { %2799 = vmatmul.mubr.msk.bf16.gmra.mxu0 %vm700_vm1, %v3631_v9  ;;  %2949 = vmatprep.mubr.msk.bf16.mxu1 %vm700_vm1, %v3669_v27 }
 0x122   : > { %2239 = vmatprep.mubr.bf16.mxu0 %v3393_v0 }
 0x128   : > { %2950 = vmatmul.mubr.msk.bf16.gmra.mxu1 %vm700_vm1, %v3683_v33 }
 0x129   : > { %2800 = vmatmul.mubr.msk.bf16.gmra.mxu0 %vm700_vm1, %v3649_v19  ;;  %2953 = vmatprep.mubr.msk.bf16.mxu1 %vm700_vm1, %v3697_v39 }
 0x12a   : > { %2249 = vmatprep.mubr.bf16.mxu0 %v3393_v0 }
 0x130   : > { %2954 = vmatmul.mubr.msk.bf16.gmra.mxu1 %vm700_vm1, %v3711_v45 }
 0x131   : > { %2801 = vmatmul.mubr.msk.bf16.gmra.mxu0 %vm700_vm1, %v3667_v26  ;;  %2957 = vmatprep.mubr.msk.bf16.mxu1 %vm700_vm1, %v680_v51 }
 0x132   : > { %2259 = vmatprep.mubr.bf16.mxu0 %v3393_v0 }
 0x138   : > { %2958 = vmatmul.mubr.msk.bf16.gmra.mxu1 %vm700_vm1, %v681_v57 }
 0x139   : > { %2802 = vmatmul.mubr.msk.bf16.gmra.mxu0 %vm700_vm1, %v3681_v32  ;;  %2961 = vmatprep.mubr.msk.bf16.mxu1 %vm700_vm1, %v3631_v9 }
 0x13a   : > { %2269 = vmatprep.mubr.bf16.mxu0 %v3393_v0 }
 0x140   : > { %2962 = vmatmul.mubr.msk.bf16.gmra.mxu1 %vm700_vm1, %v3649_v19 }
 0x141   : > { %2803 = vmatmul.mubr.msk.bf16.gmra.mxu0 %vm700_vm1, %v3695_v38  ;;  %2965 = vmatprep.mubr.msk.bf16.mxu1 %vm700_vm1, %v3667_v26 }
 0x142   : > { %2279 = vmatprep.mubr.bf16.mxu0 %v3393_v0 }
 0x148   : > { %2966 = vmatmul.mubr.msk.bf16.gmra.mxu1 %vm700_vm1, %v3681_v32 }
 0x149   : > { %2804 = vmatmul.mubr.msk.bf16.gmra.mxu0 %vm700_vm1, %v3709_v44  ;;  %2969 = vmatprep.mubr.msk.bf16.mxu1 %vm700_vm1, %v3695_v38 }
 0x14a   : > { %2289 = vmatprep.mubr.bf16.mxu0 %v3393_v0 }
 0x150   : > { %2970 = vmatmul.mubr.msk.bf16.gmra.mxu1 %vm700_vm1, %v3709_v44 }
 0x151   : > { %2805 = vmatmul.mubr.msk.bf16.gmra.mxu0 %vm700_vm1, %v3723_v50  ;;  %2973 = vmatprep.mubr.msk.bf16.mxu1 %vm700_vm1, %v3723_v50 }
 0x152   : > { %2299 = vmatprep.mubr.bf16.mxu0 %v3393_v0 }
 0x158   : > { %2974 = vmatmul.mubr.msk.bf16.gmra.mxu1 %vm700_vm1, %v3734_v56 }
 0x159   : > { %2806 = vmatmul.mubr.msk.bf16.gmra.mxu0 %vm700_vm1, %v3734_v56 }
 0x160   : > { %v870_v0 = vpop.f32.mrf.mxu1 }
 0x161   : > { %v790_v5 = vpop.f32.mrf.mxu0  ;;  %v993_v6 = vmul.f32 %v3847_v2, %v870_v0 }
 0x162   : > { %v961_v8 = vmul.f32 %v3847_v2, %v790_v5  ;;  %v872_v9 = vpop.f32.mrf.mxu1 }
 0x163   : > { %v792_v10 = vpop.f32.mrf.mxu0  ;;  %v1069_v11 = vadd.f32 %v3849_v3, %v993_v6  ;;  %v994_v12 = vmul.f32 %v3851_v4, %v872_v9 }
 0x164   : > { %v1037_v13 = vadd.f32 %v3849_v3, %v961_v8  ;;  %v962_v14 = vmul.f32 %v3851_v4, %v792_v10  ;;  %v874_v15 = vpop.f32.mrf.mxu1 }
 0x165   : > { %v794_v16 = vpop.f32.mrf.mxu0  ;;  %v1133_v17 = vmax.f32 %v1069_v11, 0.0  ;;  %v1070_v18 = vadd.f32 %v3855_v7, %v994_v12  ;;  %v995_v20 = vmul.f32 %v3847_v2, %v874_v15 }
 0x166   : > { %v1101_v19 = vmax.f32 %v1037_v13, 0.0  ;;  %v1038_v21 = vadd.f32 %v3855_v7, %v962_v14  ;;  %v876_v22 = vpop.f32.mrf.mxu1  ;;  %v963_v23 = vmul.f32 %v3847_v2, %v794_v16 }
 0x167   : > { %v796_v24 = vpop.f32.mrf.mxu0  ;;  %1198 = vst [vmem:[%s3867_s27 + $0x100] sm:$0xff] %v1133_v17  ;;  %v1134_v25 = vmax.f32 %v1070_v18, 0.0  ;;  %v1071_v26 = vadd.f32 %v3849_v3, %v995_v20  ;;  %v996_v27 = vmul.f32 %v3851_v4, %v876_v22 }
 0x168   : > { %1165 = vst [vmem:[%s3867_s27] sm:$0xff] %v1101_v19  ;;  %v964_v28 = vmul.f32 %v3851_v4, %v796_v24  ;;  %v1102_v29 = vmax.f32 %v1038_v21, 0.0  ;;  %v1039_v30 = vadd.f32 %v3849_v3, %v963_v23  ;;  %v880_v31 = vpop.f32.mrf.mxu1 }
 0x169   : > { %v800_v32 = vpop.f32.mrf.mxu0  ;;  %1199 = vst.msk [vmem:[%s3867_s27 + $0x108] sm:$0xff] %vm1166_vm2, %v1134_v25  ;;  %v1135_v33 = vmax.f32 %v1071_v26, 0.0  ;;  %v1072_v34 = vadd.f32 %v3855_v7, %v996_v27  ;;  %v997_v35 = vmul.f32 %v3847_v2, %v880_v31 }
 0x16a   : > { %v1040_v36 = vadd.f32 %v3855_v7, %v964_v28  ;;  %1167 = vst.msk [vmem:[%s3867_s27 + $0x8] sm:$0xff] %vm1166_vm2, %v1102_v29  ;;  %v1103_v37 = vmax.f32 %v1039_v30, 0.0  ;;  %v882_v38 = vpop.f32.mrf.mxu1  ;;  %v965_v39 = vmul.f32 %v3847_v2, %v800_v32 }
 0x16b   : > { %v802_v40 = vpop.f32.mrf.mxu0  ;;  %1200 = vst [vmem:[%s3867_s27 + $0x110] sm:$0xff] %v1135_v33  ;;  %v1136_v41 = vmax.f32 %v1072_v34, 0.0  ;;  %v1073_v42 = vadd.f32 %v3849_v3, %v997_v35  ;;  %v998_v44 = vmul.f32 %v3851_v4, %v882_v38 }
 0x16c   : > { %v1104_v43 = vmax.f32 %v1040_v36, 0.0  ;;  %1168 = vst [vmem:[%s3867_s27 + $0x10] sm:$0xff] %v1103_v37  ;;  %v1041_v45 = vadd.f32 %v3849_v3, %v965_v39  ;;  %v884_v46 = vpop.f32.mrf.mxu1  ;;  %v966_v47 = vmul.f32 %v3851_v4, %v802_v40 }
 0x16d   : > { %v804_v48 = vpop.f32.mrf.mxu0  ;;  %1201 = vst.msk [vmem:[%s3867_s27 + $0x118] sm:$0xff] %vm1166_vm2, %v1136_v41  ;;  %v1137_v49 = vmax.f32 %v1073_v42, 0.0  ;;  %v1074_v50 = vadd.f32 %v3855_v7, %v998_v44  ;;  %v999_v51 = vmul.f32 %v3847_v2, %v884_v46 }
 0x16e   : > { %1169 = vst.msk [vmem:[%s3867_s27 + $0x18] sm:$0xff] %vm1166_vm2, %v1104_v43  ;;  %v967_v52 = vmul.f32 %v3847_v2, %v804_v48  ;;  %v1105_v53 = vmax.f32 %v1041_v45, 0.0  ;;  %v1042_v54 = vadd.f32 %v3855_v7, %v966_v47  ;;  %v886_v55 = vpop.f32.mrf.mxu1 }
 0x16f   : > { %v806_v56 = vpop.f32.mrf.mxu0  ;;  %1202 = vst [vmem:[%s3867_s27 + $0x120] sm:$0xff] %v1137_v49  ;;  %v1138_v57 = vmax.f32 %v1074_v50, 0.0  ;;  %v1075_v58 = vadd.f32 %v3849_v3, %v999_v51  ;;  %v1000_v59 = vmul.f32 %v3851_v4, %v886_v55 }
 0x170   : > { %v1043_v60 = vadd.f32 %v3849_v3, %v967_v52  ;;  %1170 = vst [vmem:[%s3867_s27 + $0x20] sm:$0xff] %v1105_v53  ;;  %v1106_v61 = vmax.f32 %v1042_v54, 0.0  ;;  %v890_v62 = vpop.f32.mrf.mxu1  ;;  %v968_v63 = vmul.f32 %v3851_v4, %v806_v56 }
 0x171   : > { %v810_v1 = vpop.f32.mrf.mxu0  ;;  %1203 = vst.msk [vmem:[%s3867_s27 + $0x128] sm:$0xff] %vm1166_vm2, %v1138_v57  ;;  %v1139_v0 = vmax.f32 %v1075_v58, 0.0  ;;  %v1076_v5 = vadd.f32 %v3855_v7, %v1000_v59  ;;  %v1001_v8 = vmul.f32 %v3847_v2, %v890_v62 }
 0x172   : > { %v1107_v6 = vmax.f32 %v1043_v60, 0.0  ;;  %1171 = vst.msk [vmem:[%s3867_s27 + $0x28] sm:$0xff] %vm1166_vm2, %v1106_v61  ;;  %v1044_v9 = vadd.f32 %v3855_v7, %v968_v63  ;;  %v892_v10 = vpop.f32.mrf.mxu1  ;;  %v969_v11 = vmul.f32 %v3847_v2, %v810_v1 }
 0x173   : > { %v812_v12 = vpop.f32.mrf.mxu0  ;;  %1204 = vst [vmem:[%s3867_s27 + $0x130] sm:$0xff] %v1139_v0  ;;  %v1140_v13 = vmax.f32 %v1076_v5, 0.0  ;;  %v1077_v14 = vadd.f32 %v3849_v3, %v1001_v8  ;;  %v1002_v15 = vmul.f32 %v3851_v4, %v892_v10 }
 0x174   : > { %1172 = vst [vmem:[%s3867_s27 + $0x30] sm:$0xff] %v1107_v6  ;;  %v970_v16 = vmul.f32 %v3851_v4, %v812_v12  ;;  %v1108_v17 = vmax.f32 %v1044_v9, 0.0  ;;  %v1045_v18 = vadd.f32 %v3849_v3, %v969_v11  ;;  %v894_v19 = vpop.f32.mrf.mxu1 }
 0x175   : > { %v814_v20 = vpop.f32.mrf.mxu0  ;;  %1205 = vst.msk [vmem:[%s3867_s27 + $0x138] sm:$0xff] %vm1166_vm2, %v1140_v13  ;;  %v1141_v21 = vmax.f32 %v1077_v14, 0.0  ;;  %v1078_v22 = vadd.f32 %v3855_v7, %v1002_v15  ;;  %v1003_v23 = vmul.f32 %v3847_v2, %v894_v19 }
 0x176   : > { %v1046_v24 = vadd.f32 %v3855_v7, %v970_v16  ;;  %1173 = vst.msk [vmem:[%s3867_s27 + $0x38] sm:$0xff] %vm1166_vm2, %v1108_v17  ;;  %v1109_v25 = vmax.f32 %v1045_v18, 0.0  ;;  %v896_v26 = vpop.f32.mrf.mxu1  ;;  %v971_v27 = vmul.f32 %v3847_v2, %v814_v20 }
 0x177   : > { %v816_v28 = vpop.f32.mrf.mxu0  ;;  %1206 = vst [vmem:[%s3867_s27 + $0x140] sm:$0xff] %v1141_v21  ;;  %v1142_v29 = vmax.f32 %v1078_v22, 0.0  ;;  %v1079_v30 = vadd.f32 %v3849_v3, %v1003_v23  ;;  %v1004_v32 = vmul.f32 %v3851_v4, %v896_v26 }
 0x178   : > { %v1110_v31 = vmax.f32 %v1046_v24, 0.0  ;;  %1174 = vst [vmem:[%s3867_s27 + $0x40] sm:$0xff] %v1109_v25  ;;  %v1047_v33 = vadd.f32 %v3849_v3, %v971_v27  ;;  %v900_v34 = vpop.f32.mrf.mxu1  ;;  %v972_v35 = vmul.f32 %v3851_v4, %v816_v28 }
 0x179   : > { %v820_v36 = vpop.f32.mrf.mxu0  ;;  %1207 = vst.msk [vmem:[%s3867_s27 + $0x148] sm:$0xff] %vm1166_vm2, %v1142_v29  ;;  %v1143_v37 = vmax.f32 %v1079_v30, 0.0  ;;  %v1080_v38 = vadd.f32 %v3855_v7, %v1004_v32  ;;  %v1005_v39 = vmul.f32 %v3847_v2, %v900_v34 }
 0x17a   : > { %1175 = vst.msk [vmem:[%s3867_s27 + $0x48] sm:$0xff] %vm1166_vm2, %v1110_v31  ;;  %v973_v40 = vmul.f32 %v3847_v2, %v820_v36  ;;  %v1111_v41 = vmax.f32 %v1047_v33, 0.0  ;;  %v1048_v42 = vadd.f32 %v3855_v7, %v972_v35  ;;  %v902_v43 = vpop.f32.mrf.mxu1 }
 0x17b   : > { %v822_v44 = vpop.f32.mrf.mxu0  ;;  %1208 = vst [vmem:[%s3867_s27 + $0x150] sm:$0xff] %v1143_v37  ;;  %v1144_v45 = vmax.f32 %v1080_v38, 0.0  ;;  %v1081_v46 = vadd.f32 %v3849_v3, %v1005_v39  ;;  %v1006_v47 = vmul.f32 %v3851_v4, %v902_v43 }
 0x17c   : > { %v1049_v48 = vadd.f32 %v3849_v3, %v973_v40  ;;  %1176 = vst [vmem:[%s3867_s27 + $0x50] sm:$0xff] %v1111_v41  ;;  %v1112_v49 = vmax.f32 %v1048_v42, 0.0  ;;  %v904_v50 = vpop.f32.mrf.mxu1  ;;  %v974_v51 = vmul.f32 %v3851_v4, %v822_v44 }
 0x17d   : > { %v824_v52 = vpop.f32.mrf.mxu0  ;;  %1209 = vst.msk [vmem:[%s3867_s27 + $0x158] sm:$0xff] %vm1166_vm2, %v1144_v45  ;;  %v1145_v53 = vmax.f32 %v1081_v46, 0.0  ;;  %v1082_v54 = vadd.f32 %v3855_v7, %v1006_v47  ;;  %v1007_v56 = vmul.f32 %v3847_v2, %v904_v50 }
 0x17e   : > { %v1113_v55 = vmax.f32 %v1049_v48, 0.0  ;;  %1177 = vst.msk [vmem:[%s3867_s27 + $0x58] sm:$0xff] %vm1166_vm2, %v1112_v49  ;;  %v1050_v57 = vadd.f32 %v3855_v7, %v974_v51  ;;  %v906_v58 = vpop.f32.mrf.mxu1  ;;  %v975_v59 = vmul.f32 %v3847_v2, %v824_v52 }
 0x17f   : > { %v826_v60 = vpop.f32.mrf.mxu0  ;;  %1210 = vst [vmem:[%s3867_s27 + $0x160] sm:$0xff] %v1145_v53  ;;  %v1146_v61 = vmax.f32 %v1082_v54, 0.0  ;;  %v1083_v62 = vadd.f32 %v3849_v3, %v1007_v56  ;;  %v1008_v63 = vmul.f32 %v3851_v4, %v906_v58 }
 0x180   : > { %1178 = vst [vmem:[%s3867_s27 + $0x60] sm:$0xff] %v1113_v55  ;;  %v976_v1 = vmul.f32 %v3851_v4, %v826_v60  ;;  %v1114_v0 = vmax.f32 %v1050_v57, 0.0  ;;  %v1051_v5 = vadd.f32 %v3849_v3, %v975_v59  ;;  %v910_v6 = vpop.f32.mrf.mxu1 }
 0x181   : > { %v830_v8 = vpop.f32.mrf.mxu0  ;;  %1211 = vst.msk [vmem:[%s3867_s27 + $0x168] sm:$0xff] %vm1166_vm2, %v1146_v61  ;;  %v1147_v9 = vmax.f32 %v1083_v62, 0.0  ;;  %v1084_v10 = vadd.f32 %v3855_v7, %v1008_v63  ;;  %v1009_v11 = vmul.f32 %v3847_v2, %v910_v6 }
 0x182   : > { %v1052_v12 = vadd.f32 %v3855_v7, %v976_v1  ;;  %1179 = vst.msk [vmem:[%s3867_s27 + $0x68] sm:$0xff] %vm1166_vm2, %v1114_v0  ;;  %v1115_v13 = vmax.f32 %v1051_v5, 0.0  ;;  %v912_v14 = vpop.f32.mrf.mxu1  ;;  %v977_v15 = vmul.f32 %v3847_v2, %v830_v8 }
 0x183   : > { %v832_v16 = vpop.f32.mrf.mxu0  ;;  %1212 = vst [vmem:[%s3867_s27 + $0x170] sm:$0xff] %v1147_v9  ;;  %v1148_v17 = vmax.f32 %v1084_v10, 0.0  ;;  %v1085_v18 = vadd.f32 %v3849_v3, %v1009_v11  ;;  %v1010_v20 = vmul.f32 %v3851_v4, %v912_v14 }
 0x184   : > { %v1116_v19 = vmax.f32 %v1052_v12, 0.0  ;;  %1180 = vst [vmem:[%s3867_s27 + $0x70] sm:$0xff] %v1115_v13  ;;  %v1053_v21 = vadd.f32 %v3849_v3, %v977_v15  ;;  %v914_v22 = vpop.f32.mrf.mxu1  ;;  %v978_v23 = vmul.f32 %v3851_v4, %v832_v16 }
 0x185   : > { %v834_v24 = vpop.f32.mrf.mxu0  ;;  %1213 = vst.msk [vmem:[%s3867_s27 + $0x178] sm:$0xff] %vm1166_vm2, %v1148_v17  ;;  %v1149_v25 = vmax.f32 %v1085_v18, 0.0  ;;  %v1086_v26 = vadd.f32 %v3855_v7, %v1010_v20  ;;  %v1011_v27 = vmul.f32 %v3847_v2, %v914_v22 }
 0x186   : > { %1181 = vst.msk [vmem:[%s3867_s27 + $0x78] sm:$0xff] %vm1166_vm2, %v1116_v19  ;;  %v979_v28 = vmul.f32 %v3847_v2, %v834_v24  ;;  %v1117_v29 = vmax.f32 %v1053_v21, 0.0  ;;  %v1054_v30 = vadd.f32 %v3855_v7, %v978_v23  ;;  %v916_v31 = vpop.f32.mrf.mxu1 }
 0x187   : > { %v836_v32 = vpop.f32.mrf.mxu0  ;;  %1214 = vst [vmem:[%s3867_s27 + $0x180] sm:$0xff] %v1149_v25  ;;  %v1150_v33 = vmax.f32 %v1086_v26, 0.0  ;;  %v1087_v34 = vadd.f32 %v3849_v3, %v1011_v27  ;;  %v1012_v35 = vmul.f32 %v3851_v4, %v916_v31 }
 0x188   : > { %v1055_v36 = vadd.f32 %v3849_v3, %v979_v28  ;;  %1182 = vst [vmem:[%s3867_s27 + $0x80] sm:$0xff] %v1117_v29  ;;  %v1118_v37 = vmax.f32 %v1054_v30, 0.0  ;;  %v920_v38 = vpop.f32.mrf.mxu1  ;;  %v980_v39 = vmul.f32 %v3851_v4, %v836_v32 }
 0x189   : > { %v840_v40 = vpop.f32.mrf.mxu0  ;;  %1215 = vst.msk [vmem:[%s3867_s27 + $0x188] sm:$0xff] %vm1166_vm2, %v1150_v33  ;;  %v1151_v41 = vmax.f32 %v1087_v34, 0.0  ;;  %v1088_v42 = vadd.f32 %v3855_v7, %v1012_v35  ;;  %v1013_v44 = vmul.f32 %v3847_v2, %v920_v38 }
 0x18a   : > { %v1119_v43 = vmax.f32 %v1055_v36, 0.0  ;;  %1183 = vst.msk [vmem:[%s3867_s27 + $0x88] sm:$0xff] %vm1166_vm2, %v1118_v37  ;;  %v1056_v45 = vadd.f32 %v3855_v7, %v980_v39  ;;  %v922_v46 = vpop.f32.mrf.mxu1  ;;  %v981_v47 = vmul.f32 %v3847_v2, %v840_v40 }
 0x18b   : > { %v842_v48 = vpop.f32.mrf.mxu0  ;;  %1216 = vst [vmem:[%s3867_s27 + $0x190] sm:$0xff] %v1151_v41  ;;  %v1152_v49 = vmax.f32 %v1088_v42, 0.0  ;;  %v1089_v50 = vadd.f32 %v3849_v3, %v1013_v44  ;;  %v1014_v51 = vmul.f32 %v3851_v4, %v922_v46 }
 0x18c   : > { %1184 = vst [vmem:[%s3867_s27 + $0x90] sm:$0xff] %v1119_v43  ;;  %v982_v52 = vmul.f32 %v3851_v4, %v842_v48  ;;  %v1120_v53 = vmax.f32 %v1056_v45, 0.0  ;;  %v1057_v54 = vadd.f32 %v3849_v3, %v981_v47  ;;  %v924_v55 = vpop.f32.mrf.mxu1 }
 0x18d   : > { %v844_v56 = vpop.f32.mrf.mxu0  ;;  %1217 = vst.msk [vmem:[%s3867_s27 + $0x198] sm:$0xff] %vm1166_vm2, %v1152_v49  ;;  %v1153_v57 = vmax.f32 %v1089_v50, 0.0  ;;  %v1090_v58 = vadd.f32 %v3855_v7, %v1014_v51  ;;  %v1015_v59 = vmul.f32 %v3847_v2, %v924_v55 }
 0x18e   : > { %v1058_v60 = vadd.f32 %v3855_v7, %v982_v52  ;;  %1185 = vst.msk [vmem:[%s3867_s27 + $0x98] sm:$0xff] %vm1166_vm2, %v1120_v53  ;;  %v1121_v61 = vmax.f32 %v1057_v54, 0.0  ;;  %v926_v62 = vpop.f32.mrf.mxu1  ;;  %v983_v63 = vmul.f32 %v3847_v2, %v844_v56 }
 0x18f   : > { %v846_v1 = vpop.f32.mrf.mxu0  ;;  %1218 = vst [vmem:[%s3867_s27 + $0x1a0] sm:$0xff] %v1153_v57  ;;  %v1154_v0 = vmax.f32 %v1090_v58, 0.0  ;;  %v1091_v5 = vadd.f32 %v3849_v3, %v1015_v59  ;;  %v1016_v8 = vmul.f32 %v3851_v4, %v926_v62 }
 0x190   : > { %v1122_v6 = vmax.f32 %v1058_v60, 0.0  ;;  %1186 = vst [vmem:[%s3867_s27 + $0xa0] sm:$0xff] %v1121_v61  ;;  %v1059_v9 = vadd.f32 %v3849_v3, %v983_v63  ;;  %v930_v10 = vpop.f32.mrf.mxu1  ;;  %v984_v11 = vmul.f32 %v3851_v4, %v846_v1 }
 0x191   : > { %v850_v12 = vpop.f32.mrf.mxu0  ;;  %1219 = vst.msk [vmem:[%s3867_s27 + $0x1a8] sm:$0xff] %vm1166_vm2, %v1154_v0  ;;  %v1155_v13 = vmax.f32 %v1091_v5, 0.0  ;;  %v1092_v14 = vadd.f32 %v3855_v7, %v1016_v8  ;;  %v1017_v15 = vmul.f32 %v3847_v2, %v930_v10  ;;  %v4069_v8 = vld [vmem:[#allocation12] ss:$0 sm:$0xff] }
 0x192   : > { %1187 = vst.msk [vmem:[%s3867_s27 + $0xa8] sm:$0xff] %vm1166_vm2, %v1122_v6  ;;  %v985_v16 = vmul.f32 %v3847_v2, %v850_v12  ;;  %v1123_v17 = vmax.f32 %v1059_v9, 0.0  ;;  %v1060_v18 = vadd.f32 %v3855_v7, %v984_v11  ;;  %v932_v19 = vpop.f32.mrf.mxu1 }
 0x193   : > { %v852_v20 = vpop.f32.mrf.mxu0  ;;  %1220 = vst [vmem:[%s3867_s27 + $0x1b0] sm:$0xff] %v1155_v13  ;;  %v1156_v21 = vmax.f32 %v1092_v14, 0.0  ;;  %v1093_v22 = vadd.f32 %v3849_v3, %v1017_v15  ;;  %v1018_v23 = vmul.f32 %v3851_v4, %v932_v19  ;;  %v4083_v15 = vld [vmem:[#allocation13] ss:$0 sm:$0xff] }
 0x194   : > { %v1061_v24 = vadd.f32 %v3849_v3, %v985_v16  ;;  %1188 = vst [vmem:[%s3867_s27 + $0xb0] sm:$0xff] %v1123_v17  ;;  %v1124_v25 = vmax.f32 %v1060_v18, 0.0  ;;  %v934_v26 = vpop.f32.mrf.mxu1  ;;  %v986_v27 = vmul.f32 %v3851_v4, %v852_v20 }
 0x195   : > { %v854_v28 = vpop.f32.mrf.mxu0  ;;  %1221 = vst.msk [vmem:[%s3867_s27 + $0x1b8] sm:$0xff] %vm1166_vm2, %v1156_v21  ;;  %v1157_v29 = vmax.f32 %v1093_v22, 0.0  ;;  %v1094_v30 = vadd.f32 %v3855_v7, %v1018_v23  ;;  %v1019_v32 = vmul.f32 %v3847_v2, %v934_v26 }
 0x196   : > { %v1125_v31 = vmax.f32 %v1061_v24, 0.0  ;;  %1189 = vst.msk [vmem:[%s3867_s27 + $0xb8] sm:$0xff] %vm1166_vm2, %v1124_v25  ;;  %v1062_v33 = vadd.f32 %v3855_v7, %v986_v27  ;;  %v936_v34 = vpop.f32.mrf.mxu1  ;;  %v987_v35 = vmul.f32 %v3847_v2, %v854_v28 }
 0x197   : > { %v856_v36 = vpop.f32.mrf.mxu0  ;;  %1222 = vst [vmem:[%s3867_s27 + $0x1c0] sm:$0xff] %v1157_v29  ;;  %v1158_v37 = vmax.f32 %v1094_v30, 0.0  ;;  %v1095_v38 = vadd.f32 %v3849_v3, %v1019_v32  ;;  %v1020_v39 = vmul.f32 %v3851_v4, %v936_v34 }
 0x198   : > { %1190 = vst [vmem:[%s3867_s27 + $0xc0] sm:$0xff] %v1125_v31  ;;  %v988_v40 = vmul.f32 %v3851_v4, %v856_v36  ;;  %v1126_v41 = vmax.f32 %v1062_v33, 0.0  ;;  %v1063_v42 = vadd.f32 %v3849_v3, %v987_v35  ;;  %v940_v43 = vpop.f32.mrf.mxu1 }
 0x199   : > { %v860_v44 = vpop.f32.mrf.mxu0  ;;  %1223 = vst.msk [vmem:[%s3867_s27 + $0x1c8] sm:$0xff] %vm1166_vm2, %v1158_v37  ;;  %v1159_v45 = vmax.f32 %v1095_v38, 0.0  ;;  %v1096_v46 = vadd.f32 %v3855_v7, %v1020_v39  ;;  %v1021_v47 = vmul.f32 %v3847_v2, %v940_v43 }
 0x19a   : > { %v1064_v48 = vadd.f32 %v3855_v7, %v988_v40  ;;  %1191 = vst.msk [vmem:[%s3867_s27 + $0xc8] sm:$0xff] %vm1166_vm2, %v1126_v41  ;;  %v1127_v49 = vmax.f32 %v1063_v42, 0.0  ;;  %v942_v50 = vpop.f32.mrf.mxu1  ;;  %v989_v51 = vmul.f32 %v3847_v2, %v860_v44 }
 0x19b   : > { %v862_v52 = vpop.f32.mrf.mxu0  ;;  %1224 = vst [vmem:[%s3867_s27 + $0x1d0] sm:$0xff] %v1159_v45  ;;  %v1160_v53 = vmax.f32 %v1096_v46, 0.0  ;;  %v1097_v54 = vadd.f32 %v3849_v3, %v1021_v47  ;;  %v1022_v56 = vmul.f32 %v3851_v4, %v942_v50 }
 0x19c   : > { %v1128_v55 = vmax.f32 %v1064_v48, 0.0  ;;  %1192 = vst [vmem:[%s3867_s27 + $0xd0] sm:$0xff] %v1127_v49  ;;  %v1065_v57 = vadd.f32 %v3849_v3, %v989_v51  ;;  %v944_v58 = vpop.f32.mrf.mxu1  ;;  %v990_v59 = vmul.f32 %v3851_v4, %v862_v52 }
 0x19d   : > { %v864_v60 = vpop.f32.mrf.mxu0  ;;  %1225 = vst.msk [vmem:[%s3867_s27 + $0x1d8] sm:$0xff] %vm1166_vm2, %v1160_v53  ;;  %v1161_v61 = vmax.f32 %v1097_v54, 0.0  ;;  %v1098_v62 = vadd.f32 %v3855_v7, %v1022_v56  ;;  %v1023_v63 = vmul.f32 %v3847_v2, %v944_v58 }
 0x19e   : > { %1193 = vst.msk [vmem:[%s3867_s27 + $0xd8] sm:$0xff] %vm1166_vm2, %v1128_v55  ;;  %v991_v1 = vmul.f32 %v3847_v2, %v864_v60  ;;  %v1129_v0 = vmax.f32 %v1065_v57, 0.0  ;;  %v1066_v5 = vadd.f32 %v3855_v7, %v990_v59  ;;  %v946_v6 = vpop.f32.mrf.mxu1 }
 0x19f   : > { %v866_v9 = vpop.f32.mrf.mxu0  ;;  %1226 = vst [vmem:[%s3867_s27 + $0x1e0] sm:$0xff] %v1161_v61  ;;  %v1162_v10 = vmax.f32 %v1098_v62, 0.0  ;;  %v1099_v2 = vadd.f32 %v3849_v3, %v1023_v63  ;;  %v1024_v11 = vmul.f32 %v3851_v4, %v946_v6 }
 0x1a0   : > { %v1067_v12 = vadd.f32 %v3849_v3, %v991_v1  ;;  %1194 = vst [vmem:[%s3867_s27 + $0xe0] sm:$0xff] %v1129_v0  ;;  %v1130_v13 = vmax.f32 %v1066_v5, 0.0  ;;  %v2913_v14 = vpop.f32.mrf.mxu1  ;;  %v992_v16 = vmul.f32 %v3851_v4, %v866_v9 }
 0x1a1   : > { %v2151_v17 = vpop.f32.mrf.mxu0  ;;  %1227 = vst.msk [vmem:[%s3867_s27 + $0x1e8] sm:$0xff] %vm1166_vm2, %v1162_v10  ;;  %v1163_v18 = vmax.f32 %v1099_v2, 0.0  ;;  %v1100_v19 = vadd.f32 %v3855_v7, %v1024_v11  ;;  %v1404_v3 = vmul.f32 %v2913_v14, %v4069_v8 }
 0x1a2   : > { %v1131_v20 = vmax.f32 %v1067_v12, 0.0  ;;  %2310 = vst [vmem:[%s4076_s21] sm:$0xff] %v2151_v17  ;;  %1195 = vst.msk [vmem:[%s3867_s27 + $0xe8] sm:$0xff] %vm1166_vm2, %v1130_v13  ;;  %v1068_v21 = vadd.f32 %v3855_v7, %v992_v16  ;;  %v1268_v22 = vpop.f32.mrf.mxu1 }
 0x1a3   : > { %v2153_v23 = vpop.f32.mrf.mxu0  ;;  %1228 = vst [vmem:[%s3867_s27 + $0x1f0] sm:$0xff] %v1163_v18  ;;  %v1164_v4 = vmax.f32 %v1100_v19, 0.0  ;;  %v1443_v24 = vadd.f32 %v4083_v15, %v1404_v3  ;;  %v1402_v25 = vmul.f32 %v4069_v8, %v1268_v22 }
 0x1a4   : > { %1196 = vst [vmem:[%s3867_s27 + $0xf0] sm:$0xff] %v1131_v20  ;;  %2311 = vst.msk [vmem:[%s4076_s21 + $0x8] sm:$0xff] %vm1166_vm2, %v2153_v23  ;;  %v1132_v26 = vmax.f32 %v1068_v21, 0.0  ;;  %v2914_v27 = vpop.f32.mrf.mxu1 }
 0x1a5   : > { %v2155_v28 = vpop.f32.mrf.mxu0  ;;  %1229 = vst.msk [vmem:[%s3867_s27 + $0x1f8] sm:$0xff] %vm1166_vm2, %v1164_v4  ;;  %v1475_v7 = vmax.f32 %v1443_v24, 0.0  ;;  %v1441_v29 = vadd.f32 %v4083_v15, %v1402_v25  ;;  %v1405_v30 = vmul.f32 %v2914_v27, %v4069_v8 }
 0x1a6   : > { %2312 = vst [vmem:[%s4076_s21 + $0x10] sm:$0xff] %v2155_v28  ;;  %1197 = vst.msk [vmem:[%s3867_s27 + $0xf8] sm:$0xff] %vm1166_vm2, %v1132_v26  ;;  %v1271_v31 = vpop.f32.mrf.mxu1 }
 0x1a7   : > { %v2157_v32 = vpop.f32.mrf.mxu0  ;;  %v2813_v33 = vpack.c.bf16 %v1475_v7, %v1475_v7  ;;  %v1473_v34 = vmax.f32 %v1441_v29, 0.0  ;;  %v1444_v35 = vadd.f32 %v4083_v15, %v1405_v30  ;;  %v1403_v36 = vmul.f32 %v4069_v8, %v1271_v31 }
 0x1a8   : > { %2313 = vst.msk [vmem:[%s4076_s21 + $0x18] sm:$0xff] %vm1166_vm2, %v2157_v32  ;;  %v2917_v37 = vpop.f32.mrf.mxu1 }
 0x1a9   : > { %v2161_v38 = vpop.f32.mrf.mxu0  ;;  %1636 = vst.msk [vmem:[%s4111_s23 + $0x8] sm:$0xf] %vm1633_vm3, %v2813_v33  ;;  %v2811_v39 = vpack.c.bf16 %v1473_v34, %v1473_v34  ;;  %v1476_v40 = vmax.f32 %v1444_v35, 0.0  ;;  %v1442_v41 = vadd.f32 %v4083_v15, %v1403_v36  ;;  %v1408_v42 = vmul.f32 %v2917_v37, %v4069_v8 }
 0x1aa   : > { %2314 = vst [vmem:[%s4076_s21 + $0x20] sm:$0xff] %v2161_v38  ;;  %v1284_v43 = vpop.f32.mrf.mxu1 }
 0x1ab   : > { %v2163_v44 = vpop.f32.mrf.mxu0  ;;  %1634 = vst.msk [vmem:[%s4111_s23] sm:$0xf] %vm1633_vm3, %v2811_v39  ;;  %v2814_v45 = vpack.c.bf16 %v1476_v40, %v1476_v40  ;;  %v1474_v46 = vmax.f32 %v1442_v41, 0.0  ;;  %v1447_v47 = vadd.f32 %v4083_v15, %v1408_v42  ;;  %v1406_v48 = vmul.f32 %v4069_v8, %v1284_v43 }
 0x1ac   : > { %2315 = vst.msk [vmem:[%s4076_s21 + $0x28] sm:$0xff] %vm1166_vm2, %v2163_v44  ;;  %v2918_v49 = vpop.f32.mrf.mxu1 }
 0x1ad   : > { %v2165_v50 = vpop.f32.mrf.mxu0  ;;  %1637 = vst.msk [vmem:[%s4111_s23 + $0xc] sm:$0xf] %vm1633_vm3, %v2814_v45  ;;  %v2812_v51 = vpack.c.bf16 %v1474_v46, %v1474_v46  ;;  %v1479_v52 = vmax.f32 %v1447_v47, 0.0  ;;  %v1445_v53 = vadd.f32 %v4083_v15, %v1406_v48  ;;  %v1409_v54 = vmul.f32 %v2918_v49, %v4069_v8 }
 0x1ae   : > { %2316 = vst [vmem:[%s4076_s21 + $0x30] sm:$0xff] %v2165_v50  ;;  %v1287_v55 = vpop.f32.mrf.mxu1 }
 0x1af   : > { %v2167_v56 = vpop.f32.mrf.mxu0  ;;  %1635 = vst.msk [vmem:[%s4111_s23 + $0x4] sm:$0xf] %vm1633_vm3, %v2812_v51  ;;  %v2817_v57 = vpack.c.bf16 %v1479_v52, %v1479_v52  ;;  %v1477_v58 = vmax.f32 %v1445_v53, 0.0  ;;  %v1448_v59 = vadd.f32 %v4083_v15, %v1409_v54  ;;  %v1407_v60 = vmul.f32 %v4069_v8, %v1287_v55 }
 0x1b0   : > { %2317 = vst.msk [vmem:[%s4076_s21 + $0x38] sm:$0xff] %vm1166_vm2, %v2167_v56  ;;  %v2921_v61 = vpop.f32.mrf.mxu1 }
 0x1b1   : > { %v2171_v62 = vpop.f32.mrf.mxu0  ;;  %1640 = vst.msk [vmem:[%s4111_s23 + $0x18] sm:$0xf] %vm1633_vm3, %v2817_v57  ;;  %v2815_v63 = vpack.c.bf16 %v1477_v58, %v1477_v58  ;;  %v1480_v1 = vmax.f32 %v1448_v59, 0.0  ;;  %v1446_v0 = vadd.f32 %v4083_v15, %v1407_v60  ;;  %v1412_v5 = vmul.f32 %v2921_v61, %v4069_v8 }
 0x1b2   : > { %2318 = vst [vmem:[%s4076_s21 + $0x40] sm:$0xff] %v2171_v62  ;;  %v1300_v6 = vpop.f32.mrf.mxu1 }
 0x1b3   : > { %v2173_v9 = vpop.f32.mrf.mxu0  ;;  %1638 = vst.msk [vmem:[%s4111_s23 + $0x10] sm:$0xf] %vm1633_vm3, %v2815_v63  ;;  %v2818_v10 = vpack.c.bf16 %v1480_v1, %v1480_v1  ;;  %v1478_v2 = vmax.f32 %v1446_v0, 0.0  ;;  %v1451_v11 = vadd.f32 %v4083_v15, %v1412_v5  ;;  %v1410_v12 = vmul.f32 %v4069_v8, %v1300_v6 }
 0x1b4   : > { %2319 = vst.msk [vmem:[%s4076_s21 + $0x48] sm:$0xff] %vm1166_vm2, %v2173_v9  ;;  %v2922_v13 = vpop.f32.mrf.mxu1 }
 0x1b5   : > { %v2175_v14 = vpop.f32.mrf.mxu0  ;;  %1641 = vst.msk [vmem:[%s4111_s23 + $0x1c] sm:$0xf] %vm1633_vm3, %v2818_v10  ;;  %v2816_v16 = vpack.c.bf16 %v1478_v2, %v1478_v2  ;;  %v1483_v17 = vmax.f32 %v1451_v11, 0.0  ;;  %v1449_v18 = vadd.f32 %v4083_v15, %v1410_v12  ;;  %v1413_v19 = vmul.f32 %v2922_v13, %v4069_v8 }
 0x1b6   : > { %2320 = vst [vmem:[%s4076_s21 + $0x50] sm:$0xff] %v2175_v14  ;;  %v1303_v20 = vpop.f32.mrf.mxu1 }
 0x1b7   : > { %v2177_v3 = vpop.f32.mrf.mxu0  ;;  %1639 = vst.msk [vmem:[%s4111_s23 + $0x14] sm:$0xf] %vm1633_vm3, %v2816_v16  ;;  %v2821_v21 = vpack.c.bf16 %v1483_v17, %v1483_v17  ;;  %v1481_v22 = vmax.f32 %v1449_v18, 0.0  ;;  %v1452_v23 = vadd.f32 %v4083_v15, %v1413_v19  ;;  %v1411_v4 = vmul.f32 %v4069_v8, %v1303_v20 }
 0x1b8   : > { %2321 = vst.msk [vmem:[%s4076_s21 + $0x58] sm:$0xff] %vm1166_vm2, %v2177_v3  ;;  %v2925_v24 = vpop.f32.mrf.mxu1 }
 0x1b9   : > { %v2181_v25 = vpop.f32.mrf.mxu0  ;;  %1644 = vst.msk [vmem:[%s4111_s23 + $0x28] sm:$0xf] %vm1633_vm3, %v2821_v21  ;;  %v2819_v26 = vpack.c.bf16 %v1481_v22, %v1481_v22  ;;  %v1484_v27 = vmax.f32 %v1452_v23, 0.0  ;;  %v1450_v28 = vadd.f32 %v4083_v15, %v1411_v4  ;;  %v1416_v7 = vmul.f32 %v2925_v24, %v4069_v8 }
 0x1ba   : > { %2322 = vst [vmem:[%s4076_s21 + $0x60] sm:$0xff] %v2181_v25  ;;  %v1316_v29 = vpop.f32.mrf.mxu1 }
 0x1bb   : > { %v2183_v30 = vpop.f32.mrf.mxu0  ;;  %1642 = vst.msk [vmem:[%s4111_s23 + $0x20] sm:$0xf] %vm1633_vm3, %v2819_v26  ;;  %v2822_v31 = vpack.c.bf16 %v1484_v27, %v1484_v27  ;;  %v1482_v32 = vmax.f32 %v1450_v28, 0.0  ;;  %v1455_v33 = vadd.f32 %v4083_v15, %v1416_v7  ;;  %v1414_v34 = vmul.f32 %v4069_v8, %v1316_v29 }
 0x1bc   : > { %2323 = vst.msk [vmem:[%s4076_s21 + $0x68] sm:$0xff] %vm1166_vm2, %v2183_v30  ;;  %v2926_v35 = vpop.f32.mrf.mxu1 }
 0x1bd   : > { %v2185_v36 = vpop.f32.mrf.mxu0  ;;  %1645 = vst.msk [vmem:[%s4111_s23 + $0x2c] sm:$0xf] %vm1633_vm3, %v2822_v31  ;;  %v2820_v37 = vpack.c.bf16 %v1482_v32, %v1482_v32  ;;  %v1487_v38 = vmax.f32 %v1455_v33, 0.0  ;;  %v1453_v39 = vadd.f32 %v4083_v15, %v1414_v34  ;;  %v1417_v40 = vmul.f32 %v2926_v35, %v4069_v8 }
 0x1be   : > { %2324 = vst [vmem:[%s4076_s21 + $0x70] sm:$0xff] %v2185_v36  ;;  %v1319_v41 = vpop.f32.mrf.mxu1 }
 0x1bf   : > { %v2187_v42 = vpop.f32.mrf.mxu0  ;;  %1643 = vst.msk [vmem:[%s4111_s23 + $0x24] sm:$0xf] %vm1633_vm3, %v2820_v37  ;;  %v2825_v43 = vpack.c.bf16 %v1487_v38, %v1487_v38  ;;  %v1485_v44 = vmax.f32 %v1453_v39, 0.0  ;;  %v1456_v45 = vadd.f32 %v4083_v15, %v1417_v40  ;;  %v1415_v46 = vmul.f32 %v4069_v8, %v1319_v41 }
 0x1c0   : > { %2325 = vst.msk [vmem:[%s4076_s21 + $0x78] sm:$0xff] %vm1166_vm2, %v2187_v42  ;;  %v2929_v47 = vpop.f32.mrf.mxu1 }
 0x1c1   : > { %v2191_v48 = vpop.f32.mrf.mxu0  ;;  %1648 = vst.msk [vmem:[%s4111_s23 + $0x38] sm:$0xf] %vm1633_vm3, %v2825_v43  ;;  %v2823_v49 = vpack.c.bf16 %v1485_v44, %v1485_v44  ;;  %v1488_v50 = vmax.f32 %v1456_v45, 0.0  ;;  %v1454_v51 = vadd.f32 %v4083_v15, %v1415_v46  ;;  %v1420_v52 = vmul.f32 %v2929_v47, %v4069_v8 }
 0x1c2   : > { %2326 = vst [vmem:[%s4076_s21 + $0x80] sm:$0xff] %v2191_v48  ;;  %v1332_v53 = vpop.f32.mrf.mxu1 }
 0x1c3   : > { %v2193_v54 = vpop.f32.mrf.mxu0  ;;  %1646 = vst.msk [vmem:[%s4111_s23 + $0x30] sm:$0xf] %vm1633_vm3, %v2823_v49  ;;  %v2826_v55 = vpack.c.bf16 %v1488_v50, %v1488_v50  ;;  %v1486_v56 = vmax.f32 %v1454_v51, 0.0  ;;  %v1459_v57 = vadd.f32 %v4083_v15, %v1420_v52  ;;  %v1418_v58 = vmul.f32 %v4069_v8, %v1332_v53 }
 0x1c4   : > { %2327 = vst.msk [vmem:[%s4076_s21 + $0x88] sm:$0xff] %vm1166_vm2, %v2193_v54  ;;  %v2930_v59 = vpop.f32.mrf.mxu1 }
 0x1c5   : > { %v2195_v60 = vpop.f32.mrf.mxu0  ;;  %1649 = vst.msk [vmem:[%s4111_s23 + $0x3c] sm:$0xf] %vm1633_vm3, %v2826_v55  ;;  %v2824_v61 = vpack.c.bf16 %v1486_v56, %v1486_v56  ;;  %v1491_v62 = vmax.f32 %v1459_v57, 0.0  ;;  %v1457_v63 = vadd.f32 %v4083_v15, %v1418_v58  ;;  %v1421_v1 = vmul.f32 %v2930_v59, %v4069_v8 }
 0x1c6   : > { %2328 = vst [vmem:[%s4076_s21 + $0x90] sm:$0xff] %v2195_v60  ;;  %v1335_v0 = vpop.f32.mrf.mxu1 }
 0x1c7   : > { %v2197_v5 = vpop.f32.mrf.mxu0  ;;  %1647 = vst.msk [vmem:[%s4111_s23 + $0x34] sm:$0xf] %vm1633_vm3, %v2824_v61  ;;  %v2829_v6 = vpack.c.bf16 %v1491_v62, %v1491_v62  ;;  %v1489_v9 = vmax.f32 %v1457_v63, 0.0  ;;  %v1460_v10 = vadd.f32 %v4083_v15, %v1421_v1  ;;  %v1419_v2 = vmul.f32 %v4069_v8, %v1335_v0 }
 0x1c8   : > { %2329 = vst.msk [vmem:[%s4076_s21 + $0x98] sm:$0xff] %vm1166_vm2, %v2197_v5  ;;  %v2933_v11 = vpop.f32.mrf.mxu1 }
 0x1c9   : > { %v2201_v12 = vpop.f32.mrf.mxu0  ;;  %1652 = vst.msk [vmem:[%s4111_s23 + $0x48] sm:$0xf] %vm1633_vm3, %v2829_v6  ;;  %v2827_v13 = vpack.c.bf16 %v1489_v9, %v1489_v9  ;;  %v1492_v14 = vmax.f32 %v1460_v10, 0.0  ;;  %v1458_v16 = vadd.f32 %v4083_v15, %v1419_v2  ;;  %v1424_v17 = vmul.f32 %v2933_v11, %v4069_v8 }
 0x1ca   : > { %2330 = vst [vmem:[%s4076_s21 + $0xa0] sm:$0xff] %v2201_v12  ;;  %v1348_v18 = vpop.f32.mrf.mxu1 }
 0x1cb   : > { %v2203_v19 = vpop.f32.mrf.mxu0  ;;  %1650 = vst.msk [vmem:[%s4111_s23 + $0x40] sm:$0xf] %vm1633_vm3, %v2827_v13  ;;  %v2830_v20 = vpack.c.bf16 %v1492_v14, %v1492_v14  ;;  %v1490_v3 = vmax.f32 %v1458_v16, 0.0  ;;  %v1463_v21 = vadd.f32 %v4083_v15, %v1424_v17  ;;  %v1422_v22 = vmul.f32 %v4069_v8, %v1348_v18  ;;  %v4267_v17 = vld [vmem:[#allocation15] ss:$0 sm:$0xff] }
 0x1cc   : > { %2331 = vst.msk [vmem:[%s4076_s21 + $0xa8] sm:$0xff] %vm1166_vm2, %v2203_v19  ;;  %v2934_v23 = vpop.f32.mrf.mxu1 }
 0x1cd   : > { %v2205_v4 = vpop.f32.mrf.mxu0  ;;  %1653 = vst.msk [vmem:[%s4111_s23 + $0x4c] sm:$0xf] %vm1633_vm3, %v2830_v20  ;;  %v2828_v24 = vpack.c.bf16 %v1490_v3, %v1490_v3  ;;  %v1495_v25 = vmax.f32 %v1463_v21, 0.0  ;;  %v1461_v26 = vadd.f32 %v4083_v15, %v1422_v22  ;;  %v1425_v27 = vmul.f32 %v2934_v23, %v4069_v8  ;;  %v4275_v23 = vld [vmem:[#allocation16] ss:$0 sm:$0xff] }
 0x1ce   : > { %2332 = vst [vmem:[%s4076_s21 + $0xb0] sm:$0xff] %v2205_v4  ;;  %v1351_v28 = vpop.f32.mrf.mxu1 }
 0x1cf   : > { %v2207_v7 = vpop.f32.mrf.mxu0  ;;  %1651 = vst.msk [vmem:[%s4111_s23 + $0x44] sm:$0xf] %vm1633_vm3, %v2828_v24  ;;  %v2833_v29 = vpack.c.bf16 %v1495_v25, %v1495_v25  ;;  %v1493_v30 = vmax.f32 %v1461_v26, 0.0  ;;  %v1464_v31 = vadd.f32 %v4083_v15, %v1425_v27  ;;  %v1423_v32 = vmul.f32 %v4069_v8, %v1351_v28 }
 0x1d0   : > { %2333 = vst.msk [vmem:[%s4076_s21 + $0xb8] sm:$0xff] %vm1166_vm2, %v2207_v7  ;;  %v2937_v33 = vpop.f32.mrf.mxu1 }
 0x1d1   : > { %v2211_v34 = vpop.f32.mrf.mxu0  ;;  %1656 = vst.msk [vmem:[%s4111_s23 + $0x58] sm:$0xf] %vm1633_vm3, %v2833_v29  ;;  %v2831_v35 = vpack.c.bf16 %v1493_v30, %v1493_v30  ;;  %v1496_v36 = vmax.f32 %v1464_v31, 0.0  ;;  %v1462_v37 = vadd.f32 %v4083_v15, %v1423_v32  ;;  %v1428_v38 = vmul.f32 %v2937_v33, %v4069_v8 }
 0x1d2   : > { %2334 = vst [vmem:[%s4076_s21 + $0xc0] sm:$0xff] %v2211_v34  ;;  %v1364_v39 = vpop.f32.mrf.mxu1 }
 0x1d3   : > { %v2213_v40 = vpop.f32.mrf.mxu0  ;;  %1654 = vst.msk [vmem:[%s4111_s23 + $0x50] sm:$0xf] %vm1633_vm3, %v2831_v35  ;;  %v2834_v41 = vpack.c.bf16 %v1496_v36, %v1496_v36  ;;  %v1494_v42 = vmax.f32 %v1462_v37, 0.0  ;;  %v1467_v43 = vadd.f32 %v4083_v15, %v1428_v38  ;;  %v1426_v44 = vmul.f32 %v4069_v8, %v1364_v39 }
 0x1d4   : > { %2335 = vst.msk [vmem:[%s4076_s21 + $0xc8] sm:$0xff] %vm1166_vm2, %v2213_v40  ;;  %v2938_v45 = vpop.f32.mrf.mxu1 }
 0x1d5   : > { %v2215_v46 = vpop.f32.mrf.mxu0  ;;  %1657 = vst.msk [vmem:[%s4111_s23 + $0x5c] sm:$0xf] %vm1633_vm3, %v2834_v41  ;;  %v2832_v47 = vpack.c.bf16 %v1494_v42, %v1494_v42  ;;  %v1499_v48 = vmax.f32 %v1467_v43, 0.0  ;;  %v1465_v49 = vadd.f32 %v4083_v15, %v1426_v44  ;;  %v1429_v50 = vmul.f32 %v2938_v45, %v4069_v8 }
 0x1d6   : > { %2336 = vst [vmem:[%s4076_s21 + $0xd0] sm:$0xff] %v2215_v46  ;;  %v1367_v51 = vpop.f32.mrf.mxu1 }
 0x1d7   : > { %v2217_v52 = vpop.f32.mrf.mxu0  ;;  %1655 = vst.msk [vmem:[%s4111_s23 + $0x54] sm:$0xf] %vm1633_vm3, %v2832_v47  ;;  %v2837_v53 = vpack.c.bf16 %v1499_v48, %v1499_v48  ;;  %v1497_v54 = vmax.f32 %v1465_v49, 0.0  ;;  %v1468_v55 = vadd.f32 %v4083_v15, %v1429_v50  ;;  %v1427_v56 = vmul.f32 %v4069_v8, %v1367_v51 }
 0x1d8   : > { %2337 = vst.msk [vmem:[%s4076_s21 + $0xd8] sm:$0xff] %vm1166_vm2, %v2217_v52  ;;  %v2941_v57 = vpop.f32.mrf.mxu1 }
 0x1d9   : > { %v2221_v58 = vpop.f32.mrf.mxu0  ;;  %1660 = vst.msk [vmem:[%s4111_s23 + $0x68] sm:$0xf] %vm1633_vm3, %v2837_v53  ;;  %v2835_v59 = vpack.c.bf16 %v1497_v54, %v1497_v54  ;;  %v1500_v60 = vmax.f32 %v1468_v55, 0.0  ;;  %v1466_v61 = vadd.f32 %v4083_v15, %v1427_v56  ;;  %v1432_v62 = vmul.f32 %v2941_v57, %v4069_v8 }
 0x1da   : > { %2338 = vst [vmem:[%s4076_s21 + $0xe0] sm:$0xff] %v2221_v58  ;;  %v1380_v63 = vpop.f32.mrf.mxu1 }
 0x1db   : > { %v2223_v1 = vpop.f32.mrf.mxu0  ;;  %1658 = vst.msk [vmem:[%s4111_s23 + $0x60] sm:$0xf] %vm1633_vm3, %v2835_v59  ;;  %v2838_v0 = vpack.c.bf16 %v1500_v60, %v1500_v60  ;;  %v1498_v5 = vmax.f32 %v1466_v61, 0.0  ;;  %v1471_v6 = vadd.f32 %v4083_v15, %v1432_v62  ;;  %v1430_v9 = vmul.f32 %v4069_v8, %v1380_v63 }
 0x1dc   : > { %2339 = vst.msk [vmem:[%s4076_s21 + $0xe8] sm:$0xff] %vm1166_vm2, %v2223_v1  ;;  %v2942_v10 = vpop.f32.mrf.mxu1 }
 0x1dd   : > { %v2225_v2 = vpop.f32.mrf.mxu0  ;;  %1661 = vst.msk [vmem:[%s4111_s23 + $0x6c] sm:$0xf] %vm1633_vm3, %v2838_v0  ;;  %v2836_v11 = vpack.c.bf16 %v1498_v5, %v1498_v5  ;;  %v1503_v12 = vmax.f32 %v1471_v6, 0.0  ;;  %v1469_v13 = vadd.f32 %v4083_v15, %v1430_v9  ;;  %v1433_v14 = vmul.f32 %v2942_v10, %v4069_v8 }
 0x1de   : > { %2340 = vst [vmem:[%s4076_s21 + $0xf0] sm:$0xff] %v2225_v2  ;;  %v1383_v16 = vpop.f32.mrf.mxu1 }
 0x1df   : > { %v2227_v18 = vpop.f32.mrf.mxu0  ;;  %1659 = vst.msk [vmem:[%s4111_s23 + $0x64] sm:$0xf] %vm1633_vm3, %v2836_v11  ;;  %v2841_v19 = vpack.c.bf16 %v1503_v12, %v1503_v12  ;;  %v1501_v20 = vmax.f32 %v1469_v13, 0.0  ;;  %v1472_v3 = vadd.f32 %v4083_v15, %v1433_v14  ;;  %v1431_v21 = vmul.f32 %v4069_v8, %v1383_v16 }
 0x1e0   : > { %2341 = vst.msk [vmem:[%s4076_s21 + $0xf8] sm:$0xff] %vm1166_vm2, %v2227_v18  ;;  %v2947_v22 = vpop.f32.mrf.mxu1 }
 0x1e1   : > { %v2231_v4 = vpop.f32.mrf.mxu0  ;;  %1664 = vst.msk [vmem:[%s4111_s23 + $0x78] sm:$0xf] %vm1633_vm3, %v2841_v19  ;;  %v2839_v24 = vpack.c.bf16 %v1501_v20, %v1501_v20  ;;  %v1504_v25 = vmax.f32 %v1472_v3, 0.0  ;;  %v1470_v26 = vadd.f32 %v4083_v15, %v1431_v21  ;;  %v1840_v27 = vmul.f32 %v2947_v22, %v4267_v17 }
 0x1e2   : > { %2342 = vst [vmem:[%s4076_s21 + $0x100] sm:$0xff] %v2231_v4  ;;  %v1704_v28 = vpop.f32.mrf.mxu1 }
 0x1e3   : > { %v2233_v8 = vpop.f32.mrf.mxu0  ;;  %1662 = vst.msk [vmem:[%s4111_s23 + $0x70] sm:$0xf] %vm1633_vm3, %v2839_v24  ;;  %v2842_v7 = vpack.c.bf16 %v1504_v25, %v1504_v25  ;;  %v1502_v29 = vmax.f32 %v1470_v26, 0.0  ;;  %v1879_v30 = vadd.f32 %v4275_v23, %v1840_v27  ;;  %v1838_v31 = vmul.f32 %v4267_v17, %v1704_v28 }
 0x1e4   : > { %2343 = vst.msk [vmem:[%s4076_s21 + $0x108] sm:$0xff] %vm1166_vm2, %v2233_v8  ;;  %v2948_v32 = vpop.f32.mrf.mxu1 }
 0x1e5   : > { %v2235_v15 = vpop.f32.mrf.mxu0  ;;  %1665 = vst.msk [vmem:[%s4111_s23 + $0x7c] sm:$0xf] %vm1633_vm3, %v2842_v7  ;;  %v2840_v33 = vpack.c.bf16 %v1502_v29, %v1502_v29  ;;  %v1911_v34 = vmax.f32 %v1879_v30, 0.0  ;;  %v1877_v35 = vadd.f32 %v4275_v23, %v1838_v31  ;;  %v1841_v36 = vmul.f32 %v2948_v32, %v4267_v17 }
 0x1e6   : > { %2344 = vst [vmem:[%s4076_s21 + $0x110] sm:$0xff] %v2235_v15  ;;  %v1707_v37 = vpop.f32.mrf.mxu1 }
 0x1e7   : > { %v2237_v38 = vpop.f32.mrf.mxu0  ;;  %1663 = vst.msk [vmem:[%s4111_s23 + $0x74] sm:$0xf] %vm1633_vm3, %v2840_v33  ;;  %v2845_v39 = vpack.c.bf16 %v1911_v34, %v1911_v34  ;;  %v1909_v40 = vmax.f32 %v1877_v35, 0.0  ;;  %v1880_v41 = vadd.f32 %v4275_v23, %v1841_v36  ;;  %v1839_v42 = vmul.f32 %v4267_v17, %v1707_v37 }
 0x1e8   : > { %2345 = vst.msk [vmem:[%s4076_s21 + $0x118] sm:$0xff] %vm1166_vm2, %v2237_v38  ;;  %v2951_v43 = vpop.f32.mrf.mxu1 }
 0x1e9   : > { %v2241_v44 = vpop.f32.mrf.mxu0  ;;  %2071 = vst.msk [vmem:[%s4298_s30 + $0x8] sm:$0xf] %vm1633_vm3, %v2845_v39  ;;  %v2843_v45 = vpack.c.bf16 %v1909_v40, %v1909_v40  ;;  %v1912_v46 = vmax.f32 %v1880_v41, 0.0  ;;  %v1878_v47 = vadd.f32 %v4275_v23, %v1839_v42  ;;  %v1844_v48 = vmul.f32 %v2951_v43, %v4267_v17 }
 0x1ea   : > { %2346 = vst [vmem:[%s4076_s21 + $0x120] sm:$0xff] %v2241_v44  ;;  %v1720_v49 = vpop.f32.mrf.mxu1 }
 0x1eb   : > { %v2243_v50 = vpop.f32.mrf.mxu0  ;;  %2069 = vst.msk [vmem:[%s4298_s30] sm:$0xf] %vm1633_vm3, %v2843_v45  ;;  %v2846_v51 = vpack.c.bf16 %v1912_v46, %v1912_v46  ;;  %v1910_v52 = vmax.f32 %v1878_v47, 0.0  ;;  %v1883_v53 = vadd.f32 %v4275_v23, %v1844_v48  ;;  %v1842_v54 = vmul.f32 %v4267_v17, %v1720_v49 }
 0x1ec   : > { %2347 = vst.msk [vmem:[%s4076_s21 + $0x128] sm:$0xff] %vm1166_vm2, %v2243_v50  ;;  %v2952_v55 = vpop.f32.mrf.mxu1 }
 0x1ed   : > { %v2245_v56 = vpop.f32.mrf.mxu0  ;;  %2072 = vst.msk [vmem:[%s4298_s30 + $0xc] sm:$0xf] %vm1633_vm3, %v2846_v51  ;;  %v2844_v57 = vpack.c.bf16 %v1910_v52, %v1910_v52  ;;  %v1915_v58 = vmax.f32 %v1883_v53, 0.0  ;;  %v1881_v59 = vadd.f32 %v4275_v23, %v1842_v54  ;;  %v1845_v60 = vmul.f32 %v2952_v55, %v4267_v17 }
 0x1ee   : > { %2348 = vst [vmem:[%s4076_s21 + $0x130] sm:$0xff] %v2245_v56  ;;  %v1723_v61 = vpop.f32.mrf.mxu1 }
 0x1ef   : > { %v2247_v62 = vpop.f32.mrf.mxu0  ;;  %2070 = vst.msk [vmem:[%s4298_s30 + $0x4] sm:$0xf] %vm1633_vm3, %v2844_v57  ;;  %v2849_v63 = vpack.c.bf16 %v1915_v58, %v1915_v58  ;;  %v1913_v1 = vmax.f32 %v1881_v59, 0.0  ;;  %v1884_v0 = vadd.f32 %v4275_v23, %v1845_v60  ;;  %v1843_v5 = vmul.f32 %v4267_v17, %v1723_v61 }
 0x1f0   : > { %2349 = vst.msk [vmem:[%s4076_s21 + $0x138] sm:$0xff] %vm1166_vm2, %v2247_v62  ;;  %v2955_v6 = vpop.f32.mrf.mxu1 }
 0x1f1   : > { %v2251_v9 = vpop.f32.mrf.mxu0  ;;  %2075 = vst.msk [vmem:[%s4298_s30 + $0x18] sm:$0xf] %vm1633_vm3, %v2849_v63  ;;  %v2847_v10 = vpack.c.bf16 %v1913_v1, %v1913_v1  ;;  %v1916_v2 = vmax.f32 %v1884_v0, 0.0  ;;  %v1882_v11 = vadd.f32 %v4275_v23, %v1843_v5  ;;  %v1848_v12 = vmul.f32 %v2955_v6, %v4267_v17 }
 0x1f2   : > { %2350 = vst [vmem:[%s4076_s21 + $0x140] sm:$0xff] %v2251_v9  ;;  %v1736_v13 = vpop.f32.mrf.mxu1 }
 0x1f3   : > { %v2253_v14 = vpop.f32.mrf.mxu0  ;;  %2073 = vst.msk [vmem:[%s4298_s30 + $0x10] sm:$0xf] %vm1633_vm3, %v2847_v10  ;;  %v2850_v16 = vpack.c.bf16 %v1916_v2, %v1916_v2  ;;  %v1914_v18 = vmax.f32 %v1882_v11, 0.0  ;;  %v1887_v19 = vadd.f32 %v4275_v23, %v1848_v12  ;;  %v1846_v20 = vmul.f32 %v4267_v17, %v1736_v13 }
 0x1f4   : > { %2351 = vst.msk [vmem:[%s4076_s21 + $0x148] sm:$0xff] %vm1166_vm2, %v2253_v14  ;;  %v2956_v3 = vpop.f32.mrf.mxu1 }
 0x1f5   : > { %v2255_v21 = vpop.f32.mrf.mxu0  ;;  %2076 = vst.msk [vmem:[%s4298_s30 + $0x1c] sm:$0xf] %vm1633_vm3, %v2850_v16  ;;  %v2848_v22 = vpack.c.bf16 %v1914_v18, %v1914_v18  ;;  %v1919_v4 = vmax.f32 %v1887_v19, 0.0  ;;  %v1885_v24 = vadd.f32 %v4275_v23, %v1846_v20  ;;  %v1849_v25 = vmul.f32 %v2956_v3, %v4267_v17 }
 0x1f6   : > { %2352 = vst [vmem:[%s4076_s21 + $0x150] sm:$0xff] %v2255_v21  ;;  %v1739_v26 = vpop.f32.mrf.mxu1 }
 0x1f7   : > { %v2257_v27 = vpop.f32.mrf.mxu0  ;;  %2074 = vst.msk [vmem:[%s4298_s30 + $0x14] sm:$0xf] %vm1633_vm3, %v2848_v22  ;;  %v2853_v28 = vpack.c.bf16 %v1919_v4, %v1919_v4  ;;  %v1917_v8 = vmax.f32 %v1885_v24, 0.0  ;;  %v1888_v7 = vadd.f32 %v4275_v23, %v1849_v25  ;;  %v1847_v29 = vmul.f32 %v4267_v17, %v1739_v26 }
 0x1f8   : > { %2353 = vst.msk [vmem:[%s4076_s21 + $0x158] sm:$0xff] %vm1166_vm2, %v2257_v27  ;;  %v2959_v30 = vpop.f32.mrf.mxu1 }
 0x1f9   : > { %v2261_v31 = vpop.f32.mrf.mxu0  ;;  %2079 = vst.msk [vmem:[%s4298_s30 + $0x28] sm:$0xf] %vm1633_vm3, %v2853_v28  ;;  %v2851_v32 = vpack.c.bf16 %v1917_v8, %v1917_v8  ;;  %v1920_v15 = vmax.f32 %v1888_v7, 0.0  ;;  %v1886_v33 = vadd.f32 %v4275_v23, %v1847_v29  ;;  %v1852_v34 = vmul.f32 %v2959_v30, %v4267_v17 }
 0x1fa   : > { %2354 = vst [vmem:[%s4076_s21 + $0x160] sm:$0xff] %v2261_v31  ;;  %v1752_v35 = vpop.f32.mrf.mxu1 }
 0x1fb   : > { %v2263_v36 = vpop.f32.mrf.mxu0  ;;  %2077 = vst.msk [vmem:[%s4298_s30 + $0x20] sm:$0xf] %vm1633_vm3, %v2851_v32  ;;  %v2854_v37 = vpack.c.bf16 %v1920_v15, %v1920_v15  ;;  %v1918_v38 = vmax.f32 %v1886_v33, 0.0  ;;  %v1891_v39 = vadd.f32 %v4275_v23, %v1852_v34  ;;  %v1850_v40 = vmul.f32 %v4267_v17, %v1752_v35 }
 0x1fc   : > { %2355 = vst.msk [vmem:[%s4076_s21 + $0x168] sm:$0xff] %vm1166_vm2, %v2263_v36  ;;  %v2960_v41 = vpop.f32.mrf.mxu1 }
 0x1fd   : > { %v2265_v42 = vpop.f32.mrf.mxu0  ;;  %2080 = vst.msk [vmem:[%s4298_s30 + $0x2c] sm:$0xf] %vm1633_vm3, %v2854_v37  ;;  %v2852_v43 = vpack.c.bf16 %v1918_v38, %v1918_v38  ;;  %v1923_v44 = vmax.f32 %v1891_v39, 0.0  ;;  %v1889_v45 = vadd.f32 %v4275_v23, %v1850_v40  ;;  %v1853_v46 = vmul.f32 %v2960_v41, %v4267_v17 }
 0x1fe   : > { %2356 = vst [vmem:[%s4076_s21 + $0x170] sm:$0xff] %v2265_v42  ;;  %v1755_v47 = vpop.f32.mrf.mxu1 }
 0x1ff   : > { %v2267_v48 = vpop.f32.mrf.mxu0  ;;  %2078 = vst.msk [vmem:[%s4298_s30 + $0x24] sm:$0xf] %vm1633_vm3, %v2852_v43  ;;  %v2857_v49 = vpack.c.bf16 %v1923_v44, %v1923_v44  ;;  %v1921_v50 = vmax.f32 %v1889_v45, 0.0  ;;  %v1892_v51 = vadd.f32 %v4275_v23, %v1853_v46  ;;  %v1851_v52 = vmul.f32 %v4267_v17, %v1755_v47 }
 0x200   : > { %2357 = vst.msk [vmem:[%s4076_s21 + $0x178] sm:$0xff] %vm1166_vm2, %v2267_v48  ;;  %v2963_v53 = vpop.f32.mrf.mxu1 }
 0x201   : > { %v2271_v54 = vpop.f32.mrf.mxu0  ;;  %2083 = vst.msk [vmem:[%s4298_s30 + $0x38] sm:$0xf] %vm1633_vm3, %v2857_v49  ;;  %v2855_v55 = vpack.c.bf16 %v1921_v50, %v1921_v50  ;;  %v1924_v56 = vmax.f32 %v1892_v51, 0.0  ;;  %v1890_v57 = vadd.f32 %v4275_v23, %v1851_v52  ;;  %v1856_v58 = vmul.f32 %v2963_v53, %v4267_v17 }
 0x202   : > { %2358 = vst [vmem:[%s4076_s21 + $0x180] sm:$0xff] %v2271_v54  ;;  %v1768_v59 = vpop.f32.mrf.mxu1 }
 0x203   : > { %v2273_v60 = vpop.f32.mrf.mxu0  ;;  %2081 = vst.msk [vmem:[%s4298_s30 + $0x30] sm:$0xf] %vm1633_vm3, %v2855_v55  ;;  %v2858_v61 = vpack.c.bf16 %v1924_v56, %v1924_v56  ;;  %v1922_v62 = vmax.f32 %v1890_v57, 0.0  ;;  %v1895_v63 = vadd.f32 %v4275_v23, %v1856_v58  ;;  %v1854_v1 = vmul.f32 %v4267_v17, %v1768_v59 }
 0x204   : > { %2359 = vst.msk [vmem:[%s4076_s21 + $0x188] sm:$0xff] %vm1166_vm2, %v2273_v60  ;;  %v2964_v0 = vpop.f32.mrf.mxu1 }
 0x205   : > { %v2275_v5 = vpop.f32.mrf.mxu0  ;;  %2084 = vst.msk [vmem:[%s4298_s30 + $0x3c] sm:$0xf] %vm1633_vm3, %v2858_v61  ;;  %v2856_v6 = vpack.c.bf16 %v1922_v62, %v1922_v62  ;;  %v1927_v9 = vmax.f32 %v1895_v63, 0.0  ;;  %v1893_v10 = vadd.f32 %v4275_v23, %v1854_v1  ;;  %v1857_v2 = vmul.f32 %v2964_v0, %v4267_v17 }
 0x206   : > { %2360 = vst [vmem:[%s4076_s21 + $0x190] sm:$0xff] %v2275_v5  ;;  %v1771_v11 = vpop.f32.mrf.mxu1 }
 0x207   : > { %v2277_v12 = vpop.f32.mrf.mxu0  ;;  %2082 = vst.msk [vmem:[%s4298_s30 + $0x34] sm:$0xf] %vm1633_vm3, %v2856_v6  ;;  %v2861_v13 = vpack.c.bf16 %v1927_v9, %v1927_v9  ;;  %v1925_v14 = vmax.f32 %v1893_v10, 0.0  ;;  %v1896_v16 = vadd.f32 %v4275_v23, %v1857_v2  ;;  %v1855_v18 = vmul.f32 %v4267_v17, %v1771_v11 }
 0x208   : > { %2361 = vst.msk [vmem:[%s4076_s21 + $0x198] sm:$0xff] %vm1166_vm2, %v2277_v12  ;;  %v2967_v19 = vpop.f32.mrf.mxu1 }
 0x209   : > { %v2281_v20 = vpop.f32.mrf.mxu0  ;;  %2087 = vst.msk [vmem:[%s4298_s30 + $0x48] sm:$0xf] %vm1633_vm3, %v2861_v13  ;;  %v2859_v3 = vpack.c.bf16 %v1925_v14, %v1925_v14  ;;  %v1928_v21 = vmax.f32 %v1896_v16, 0.0  ;;  %v1894_v22 = vadd.f32 %v4275_v23, %v1855_v18  ;;  %v1860_v4 = vmul.f32 %v2967_v19, %v4267_v17 }
 0x20a   : > { %2362 = vst [vmem:[%s4076_s21 + $0x1a0] sm:$0xff] %v2281_v20  ;;  %v1784_v24 = vpop.f32.mrf.mxu1 }
 0x20b   : > { %v2283_v25 = vpop.f32.mrf.mxu0  ;;  %2085 = vst.msk [vmem:[%s4298_s30 + $0x40] sm:$0xf] %vm1633_vm3, %v2859_v3  ;;  %v2862_v26 = vpack.c.bf16 %v1928_v21, %v1928_v21  ;;  %v1926_v27 = vmax.f32 %v1894_v22, 0.0  ;;  %v1899_v28 = vadd.f32 %v4275_v23, %v1860_v4  ;;  %v1858_v8 = vmul.f32 %v4267_v17, %v1784_v24 }
 0x20c   : > { %2363 = vst.msk [vmem:[%s4076_s21 + $0x1a8] sm:$0xff] %vm1166_vm2, %v2283_v25  ;;  %v2968_v7 = vpop.f32.mrf.mxu1 }
 0x20d   : > { %v2285_v29 = vpop.f32.mrf.mxu0  ;;  %2088 = vst.msk [vmem:[%s4298_s30 + $0x4c] sm:$0xf] %vm1633_vm3, %v2862_v26  ;;  %v2860_v30 = vpack.c.bf16 %v1926_v27, %v1926_v27  ;;  %v1931_v31 = vmax.f32 %v1899_v28, 0.0  ;;  %v1897_v32 = vadd.f32 %v4275_v23, %v1858_v8  ;;  %v1861_v15 = vmul.f32 %v2968_v7, %v4267_v17 }
 0x20e   : > { %2364 = vst [vmem:[%s4076_s21 + $0x1b0] sm:$0xff] %v2285_v29  ;;  %v1787_v33 = vpop.f32.mrf.mxu1 }
 0x20f   : > { %v2287_v34 = vpop.f32.mrf.mxu0  ;;  %2086 = vst.msk [vmem:[%s4298_s30 + $0x44] sm:$0xf] %vm1633_vm3, %v2860_v30  ;;  %v2865_v35 = vpack.c.bf16 %v1931_v31, %v1931_v31  ;;  %v1929_v36 = vmax.f32 %v1897_v32, 0.0  ;;  %v1900_v37 = vadd.f32 %v4275_v23, %v1861_v15  ;;  %v1859_v38 = vmul.f32 %v4267_v17, %v1787_v33 }
 0x210   : > { %2365 = vst.msk [vmem:[%s4076_s21 + $0x1b8] sm:$0xff] %vm1166_vm2, %v2287_v34  ;;  %v2971_v39 = vpop.f32.mrf.mxu1 }
 0x211   : > { %v2291_v40 = vpop.f32.mrf.mxu0  ;;  %2091 = vst.msk [vmem:[%s4298_s30 + $0x58] sm:$0xf] %vm1633_vm3, %v2865_v35  ;;  %v2863_v41 = vpack.c.bf16 %v1929_v36, %v1929_v36  ;;  %v1932_v42 = vmax.f32 %v1900_v37, 0.0  ;;  %v1898_v43 = vadd.f32 %v4275_v23, %v1859_v38  ;;  %v1864_v44 = vmul.f32 %v2971_v39, %v4267_v17 }
 0x212   : > { %2366 = vst [vmem:[%s4076_s21 + $0x1c0] sm:$0xff] %v2291_v40  ;;  %v1800_v45 = vpop.f32.mrf.mxu1 }
 0x213   : > { %v2293_v46 = vpop.f32.mrf.mxu0  ;;  %2089 = vst.msk [vmem:[%s4298_s30 + $0x50] sm:$0xf] %vm1633_vm3, %v2863_v41  ;;  %v2866_v47 = vpack.c.bf16 %v1932_v42, %v1932_v42  ;;  %v1930_v48 = vmax.f32 %v1898_v43, 0.0  ;;  %v1903_v49 = vadd.f32 %v4275_v23, %v1864_v44  ;;  %v1862_v50 = vmul.f32 %v4267_v17, %v1800_v45 }
 0x214   : > { %2367 = vst.msk [vmem:[%s4076_s21 + $0x1c8] sm:$0xff] %vm1166_vm2, %v2293_v46  ;;  %v2972_v51 = vpop.f32.mrf.mxu1 }
 0x215   : > { %v2295_v52 = vpop.f32.mrf.mxu0  ;;  %2092 = vst.msk [vmem:[%s4298_s30 + $0x5c] sm:$0xf] %vm1633_vm3, %v2866_v47  ;;  %v2864_v53 = vpack.c.bf16 %v1930_v48, %v1930_v48  ;;  %v1935_v54 = vmax.f32 %v1903_v49, 0.0  ;;  %v1901_v55 = vadd.f32 %v4275_v23, %v1862_v50  ;;  %v1865_v56 = vmul.f32 %v2972_v51, %v4267_v17 }
 0x216   : > { %2368 = vst [vmem:[%s4076_s21 + $0x1d0] sm:$0xff] %v2295_v52  ;;  %v1803_v57 = vpop.f32.mrf.mxu1 }
 0x217   : > { %v2297_v58 = vpop.f32.mrf.mxu0  ;;  %2090 = vst.msk [vmem:[%s4298_s30 + $0x54] sm:$0xf] %vm1633_vm3, %v2864_v53  ;;  %v2869_v59 = vpack.c.bf16 %v1935_v54, %v1935_v54  ;;  %v1933_v60 = vmax.f32 %v1901_v55, 0.0  ;;  %v1904_v61 = vadd.f32 %v4275_v23, %v1865_v56  ;;  %v1863_v62 = vmul.f32 %v4267_v17, %v1803_v57 }
 0x218   : > { %2369 = vst.msk [vmem:[%s4076_s21 + $0x1d8] sm:$0xff] %vm1166_vm2, %v2297_v58  ;;  %v2975_v63 = vpop.f32.mrf.mxu1 }
 0x219   : > { %v2301_v1 = vpop.f32.mrf.mxu0  ;;  %2095 = vst.msk [vmem:[%s4298_s30 + $0x68] sm:$0xf] %vm1633_vm3, %v2869_v59  ;;  %v2867_v0 = vpack.c.bf16 %v1933_v60, %v1933_v60  ;;  %v1936_v5 = vmax.f32 %v1904_v61, 0.0  ;;  %v1902_v6 = vadd.f32 %v4275_v23, %v1863_v62  ;;  %v1868_v9 = vmul.f32 %v2975_v63, %v4267_v17 }
 0x21a   : > { %2370 = vst [vmem:[%s4076_s21 + $0x1e0] sm:$0xff] %v2301_v1  ;;  %v1816_v10 = vpop.f32.mrf.mxu1 }
 0x21b   : > { %v2303_v2 = vpop.f32.mrf.mxu0  ;;  %2093 = vst.msk [vmem:[%s4298_s30 + $0x60] sm:$0xf] %vm1633_vm3, %v2867_v0  ;;  %v2870_v11 = vpack.c.bf16 %v1936_v5, %v1936_v5  ;;  %v1934_v12 = vmax.f32 %v1902_v6, 0.0  ;;  %v1907_v13 = vadd.f32 %v4275_v23, %v1868_v9  ;;  %v1866_v14 = vmul.f32 %v4267_v17, %v1816_v10 }
 0x21c   : > { %2371 = vst.msk [vmem:[%s4076_s21 + $0x1e8] sm:$0xff] %vm1166_vm2, %v2303_v2  ;;  %v2976_v16 = vpop.f32.mrf.mxu1 }
 0x21d   : > { %v2305_v18 = vpop.f32.mrf.mxu0  ;;  %2096 = vst.msk [vmem:[%s4298_s30 + $0x6c] sm:$0xf] %vm1633_vm3, %v2870_v11  ;;  %v2868_v19 = vpack.c.bf16 %v1934_v12, %v1934_v12  ;;  %v1939_v20 = vmax.f32 %v1907_v13, 0.0  ;;  %v1905_v3 = vadd.f32 %v4275_v23, %v1866_v14  ;;  %v1869_v21 = vmul.f32 %v2976_v16, %v4267_v17 }
 0x21e   : > { %2372 = vst [vmem:[%s4076_s21 + $0x1f0] sm:$0xff] %v2305_v18  ;;  %v1819_v22 = vpop.f32.mrf.mxu1 }
 0x21f   : > { %v2307_v4 = vpop.f32.mrf.mxu0  ;;  %2094 = vst.msk [vmem:[%s4298_s30 + $0x64] sm:$0xf] %vm1633_vm3, %v2868_v19  ;;  %v2873_v24 = vpack.c.bf16 %v1939_v20, %v1939_v20  ;;  %v1937_v25 = vmax.f32 %v1905_v3, 0.0  ;;  %v1908_v26 = vadd.f32 %v4275_v23, %v1869_v21  ;;  %v1867_v27 = vmul.f32 %v4267_v17, %v1819_v22 }
 0x220   : > { %2373 = vst.msk [vmem:[%s4076_s21 + $0x1f8] sm:$0xff] %vm1166_vm2, %v2307_v4 }
 0x221   : > { %2099 = vst.msk [vmem:[%s4298_s30 + $0x78] sm:$0xf] %vm1633_vm3, %v2873_v24  ;;  %v2871_v28 = vpack.c.bf16 %v1937_v25, %v1937_v25  ;;  %v1940_v8 = vmax.f32 %v1908_v26, 0.0  ;;  %v1906_v7 = vadd.f32 %v4275_v23, %v1867_v27 }
 0x223   : > { %2097 = vst.msk [vmem:[%s4298_s30 + $0x70] sm:$0xf] %vm1633_vm3, %v2871_v28  ;;  %v2874_v29 = vpack.c.bf16 %v1940_v8, %v1940_v8  ;;  %v1938_v30 = vmax.f32 %v1906_v7, 0.0 }
 0x225   : > { %2100 = vst.msk [vmem:[%s4298_s30 + $0x7c] sm:$0xf] %vm1633_vm3, %v2874_v29  ;;  %v2872_v31 = vpack.c.bf16 %v1938_v30, %v1938_v30 }
 0x227   : > { %2098 = vst.msk [vmem:[%s4298_s30 + $0x74] sm:$0xf] %vm1633_vm3, %v2872_v31 }
 0x228 PF: > { %s31_s29 = sadd.s32 1, %s3381_s29  }
 0x229   : > { %p28_p6 = scmp.ge.s32.totalorder %s31_s29, 4  }
 0x22b   :  { %30 = sbr.rel (!%p28_p6) target bundleno = 6 (0x6), region = 171 }
 0x230   :  { %2451 = vsyncpa [#allocation3], 1 }
 0x231   :  { %2453 = vsyncpa [#allocation3 + $0x1], 1 }
 0x232   :  { %2454 = vsyncpa [#allocation5], 1 }
 0x233   :  { %2455 = vsyncpa [#allocation8], 1 }
 0x234   :  { %2456 = vsyncpa [#allocation11], 1 }
 0x235   :  { %2457 = vsyncpa [#allocation14], 1 }
 0x236   :  { %2458 = vsyncpa [#allocation17], 1 }

// kernel: inception_c_forward.9
= control target key start
LH: loop header
LB: loop body
LE: loop exit
PB: predicated region body
PF: predicated region fallthrough
CT: control target
= control target key end

     0   :  { %9 = vsyncpa [#allocation4], 0  ;;  %s5530_s0 = inlined_call_operand.vmem [shape: bf16[22,32,16], index: 0, kind: input, shape index: {}]   ;;  %s5531_s1 = inlined_call_operand.hbm [shape: bf16[7,16,16], index: 1, kind: input, shape index: {}]   ;;  %s5532_s2 = inlined_call_operand.hbm [shape: f32[1,16], index: 2, kind: input, shape index: {}]   ;;  %s5533_s3 = inlined_call_operand.hbm [shape: f32[1,16], index: 3, kind: input, shape index: {}]   ;;  %s5534_s4 = inlined_call_operand.vmem [shape: bf16[16,32,16], index: 4, kind: output, shape index: {}]  }
   0x1   :  { %10 = vsyncpa [#allocation6], 0  ;;  %s4647_s15 = smov 0   ;;  %s4649_s16 = smov 0  }
   0x2   :  { %s4651_s17 = smov 0  }
   0x3 LB: > { %s4663_s18 = sadd.s32 4294967295, %s4615_s17   ;;  %s4666_s19 = sadd.s32 1, %s4615_s17   ;;  %s4615_s17 = sphi %s4651_s17, %s5625_s17   ;;  %s4611_s16 = sphi %s4649_s16, %s5624_s16   ;;  %s4607_s15 = sphi %s4647_s15, %s5623_s15  }
   0x4   : > { %s20_s20 = ssub.s32 %s4615_s17, %s4666_s19  ;;  %s23_s21 = sadd.s32 1, %s4611_s16 }
   0x5   : > { %p21_p0 = scmp.eq.s32.totalorder %s20_s20, 0  ;;  %p30_p1 = scmp.ne.s32.totalorder %s4611_s16, %s4607_s15 }
   0x6   : > { %p31_p2 = scmp.eq.s32.totalorder %s4615_s17, 0  ;;  %p123_p3 = scmp.eq.s32.totalorder %s4663_s18, 1 }
   0x7   : > { %s4676_s22 = scalar_select %p21_p0, %s4611_s16, %s23_s21  }
   0x8   : > { %p4678_p4 = por %p31_p2, %p30_p1  ;;  %p4682_p5 = por %p123_p3, %p30_p1 }
   0x9   : > { %p3462_p6 = scmp.ge.s32.totalorder %s4615_s17, 1  ;;  %p136_p7 = scmp.lt.s32.totalorder %s4615_s17, 3 }
   0xa   : > { %p4353_p8 = scmp.eq.s32.totalorder %s4663_s18, 0  ;;  %s4617_s26 = smov [#allocation5]  }
   0xb   : > { %p4689_p9 = pnand %p3462_p6, %p136_p7  ;;  %s162_s27 = sshll.u32 %s4617_s26, 4  ;;  %s163_s27 = int_to_ptr.vmem [resolvable:$true] %s162_s27 }
   0xc   : > { %s4618_s28 = smov [#allocation3]   ;;  %s4619_s5 = smov [#allocation7]  }
   0xd   : > { %p4343_p10 = pneg %p4689_p9  ;;  %s148_s29 = sshll.u32 %s4618_s28, 4  ;;  %s4701_s29 = int_to_ptr.vmem [resolvable:$true] %s148_s29 }
   0xe   : > { %s173_s6 = sshll.u32 %s4619_s5, 4  ;;  %s4518_s7 = scalar_lea.vmem %s163_s27, 16  ;;  %s174_s6 = int_to_ptr.vmem [resolvable:$true] %s173_s6 }
   0xf   : > { %p4697_p11 = pnand %p4353_p8, %p4343_p10  ;;  %p4519_p13 = scmp.ne.s32.totalorder %s163_s27, %s4518_s7 }
  0x10   : > { %s4525_s8 = scalar_lea.vmem %s163_s27, 32  ;;  %p4526_p2 = scmp.lt.s32.totalorder %s163_s27, %s163_s27 }
  0x11   : > { %p4509_p12 = pneg %p4697_p11  ;;  %p4527_p3 = scmp.lt.s32.totalorder %s4525_s8, %s4518_s7 }
  0x13   : > { %p4521_p0 = pnand %p4519_p13, %p4509_p12  ;;  %p4528_p6 = por %p4527_p3, %p4526_p2 }
  0x15   : > { %p4522_p1 = pneg %p4521_p0 }
  0x17   : > { %p4529_p7 = pnand %p4528_p6, %p4522_p1 }
  0x19   : > { %4532 = shalt.err (!%p4529_p7)
}
  0x1a   : > { %4349 = dma.hbm_to_vmem [thread:$0]  (!%p4697_p11), %s5532_s2, 16, %s163_s27, [#allocation6]  }
  0x1b   : > { %s4544_s11 = scalar_lea.vmem %s4701_s29, 896  ;;  %p4552_p2 = scmp.lt.s32.totalorder %s4701_s29, %s4701_s29 }
  0x1c   : > { %p4545_p10 = scmp.ne.s32.totalorder %s4701_s29, %s4544_s11  ;;  %p4553_p1 = scmp.lt.s32.totalorder %s4544_s11, %s4544_s11 }
  0x1e   : > { %p4547_p13 = pnand %p4545_p10, %p4509_p12  ;;  %p4554_p3 = por %p4553_p1, %p4552_p2 }
  0x20   : > { %p4548_p0 = pneg %p4547_p13 }
  0x22   : > { %p4555_p6 = pnand %p4554_p3, %p4548_p0 }
  0x24   : > { %4558 = shalt.err (!%p4555_p6)
}
  0x25   : > { %s4620_s12 = smov 64   ;;  %s4621_s13 = smov 4  }
  0x26   : > { %4346 = dma.hbm_to_vmem [thread:$0]  (!%p4697_p11), %s5531_s1, 896, %s4701_s29, [#allocation4], %s4620_s12, %s4620_s12, %s4621_s13  }
  0x27   : > { %s4570_s21 = scalar_lea.vmem %s174_s6, 16  ;;  %s4577_s26 = scalar_lea.vmem %s174_s6, 32 }
  0x28   : > { %p4571_p7 = scmp.ne.s32.totalorder %s174_s6, %s4570_s21  ;;  %p4578_p0 = scmp.lt.s32.totalorder %s174_s6, %s174_s6 }
  0x29   : > { %p4579_p2 = scmp.lt.s32.totalorder %s4577_s26, %s4570_s21 }
  0x2a   : > { %p4573_p10 = pnand %p4571_p7, %p4509_p12 }
  0x2b   : > { %p4580_p1 = por %p4579_p2, %p4578_p0 }
  0x2c   : > { %p4574_p13 = pneg %p4573_p10 }
  0x2e   : > { %p4581_p3 = pnand %p4580_p1, %p4574_p13 }
  0x30   : > { %4584 = shalt.err (!%p4581_p3)
}
  0x31   : > { %4352 = dma.hbm_to_vmem [thread:$0]  (!%p4697_p11), %s5533_s3, 16, %s174_s6, [#allocation6]  }
  0x32   : > { %p3466_p6 = scmp.ge.s32.totalorder %s4615_s17, 2 }
  0x34   : > { %180 = sbr.rel (%p3466_p6) target bundleno = 72 (0x48), region = 28 }
  0x39   : > { %183 = sbr.rel (!%p4678_p4) target bundleno = 72 (0x48), region = 32  ;;  %s185_s29 = sand.u32 (%p4678_p4), 1, %s4611_s16  }
  0x3a   : > { %s3936_s5 = sshll.u32 (%p4678_p4), %s4615_s17, 3  ;;  %s4329_s7 = smul.u32 (%p4678_p4), 176, %s185_s29 }
  0x3b   : > { %s4742_s10 = scalar_lea.vmem (%p4678_p4), %s5530_s0, %s3936_s5 }
  0x3c   : > { %v207_v0 = vld [vmem:[%s4742_s10] sm:$0xff] (%p4678_p4)   ;;  %v211_v1 = vld [vmem:[%s4742_s10 + $0x10] sm:$0xff] (%p4678_p4)   ;;  %s4750_s17 = scalar_lea.vmem (%p4678_p4), [#allocation2], %s4329_s7 }
  0x3d   : > { %v215_v2 = vld [vmem:[%s4742_s10 + $0x20] sm:$0xff] (%p4678_p4)   ;;  %v219_v3 = vld [vmem:[%s4742_s10 + $0x30] sm:$0xff] (%p4678_p4)   ;;  %208 = vst [vmem:[%s4750_s17] sm:$0xff] (%p4678_p4), %v207_v0   ;;  %212 = vst [vmem:[%s4750_s17 + $0x8] sm:$0xff] (%p4678_p4), %v211_v1  }
  0x3e   : > { %v223_v4 = vld [vmem:[%s4742_s10 + $0x40] sm:$0xff]   ;;  %v227_v5 = vld [vmem:[%s4742_s10 + $0x50] sm:$0xff]   ;;  %216 = vst [vmem:[%s4750_s17 + $0x10] sm:$0xff] %v215_v2   ;;  %220 = vst [vmem:[%s4750_s17 + $0x18] sm:$0xff] %v219_v3  }
  0x3f   : > { %224 = vst [vmem:[%s4750_s17 + $0x20] sm:$0xff] %v223_v4   ;;  %228 = vst [vmem:[%s4750_s17 + $0x28] sm:$0xff] %v227_v5   ;;  %v231_v6 = vld [vmem:[%s4742_s10 + $0x60] sm:$0xff]   ;;  %v235_v7 = vld [vmem:[%s4742_s10 + $0x70] sm:$0xff]  }
  0x40   : > { %v239_v8 = vld [vmem:[%s4742_s10 + $0x80] sm:$0xff]   ;;  %232 = vst [vmem:[%s4750_s17 + $0x30] sm:$0xff] %v231_v6   ;;  %236 = vst [vmem:[%s4750_s17 + $0x38] sm:$0xff] %v235_v7   ;;  %v243_v9 = vld [vmem:[%s4742_s10 + $0x90] sm:$0xff]  }
  0x41   : > { %240 = vst [vmem:[%s4750_s17 + $0x40] sm:$0xff] %v239_v8   ;;  %v247_v10 = vld [vmem:[%s4742_s10 + $0xa0] sm:$0xff]   ;;  %v251_v11 = vld [vmem:[%s4742_s10 + $0xb0] sm:$0xff]   ;;  %244 = vst [vmem:[%s4750_s17 + $0x48] sm:$0xff] %v243_v9  }
  0x42   : > { %248 = vst [vmem:[%s4750_s17 + $0x50] sm:$0xff] %v247_v10   ;;  %252 = vst [vmem:[%s4750_s17 + $0x58] sm:$0xff] %v251_v11   ;;  %v255_v12 = vld [vmem:[%s4742_s10 + $0xc0] sm:$0xff]   ;;  %v259_v13 = vld [vmem:[%s4742_s10 + $0xd0] sm:$0xff]  }
  0x43   : > { %v263_v14 = vld [vmem:[%s4742_s10 + $0xe0] sm:$0xff]   ;;  %256 = vst [vmem:[%s4750_s17 + $0x60] sm:$0xff] %v255_v12   ;;  %260 = vst [vmem:[%s4750_s17 + $0x68] sm:$0xff] %v259_v13   ;;  %v267_v15 = vld [vmem:[%s4742_s10 + $0xf0] sm:$0xff]  }
  0x44   : > { %264 = vst [vmem:[%s4750_s17 + $0x70] sm:$0xff] %v263_v14   ;;  %v271_v16 = vld [vmem:[%s4742_s10 + $0x100] sm:$0xff]   ;;  %v275_v17 = vld [vmem:[%s4742_s10 + $0x110] sm:$0xff]   ;;  %268 = vst [vmem:[%s4750_s17 + $0x78] sm:$0xff] %v267_v15  }
  0x45   : > { %272 = vst [vmem:[%s4750_s17 + $0x80] sm:$0xff] %v271_v16   ;;  %276 = vst [vmem:[%s4750_s17 + $0x88] sm:$0xff] %v275_v17   ;;  %v279_v18 = vld [vmem:[%s4742_s10 + $0x120] sm:$0xff]   ;;  %v283_v19 = vld [vmem:[%s4742_s10 + $0x130] sm:$0xff]  }
  0x46   : > { %v287_v20 = vld [vmem:[%s4742_s10 + $0x140] sm:$0xff]   ;;  %280 = vst [vmem:[%s4750_s17 + $0x90] sm:$0xff] %v279_v18   ;;  %284 = vst [vmem:[%s4750_s17 + $0x98] sm:$0xff] %v283_v19   ;;  %v291_v21 = vld [vmem:[%s4742_s10 + $0x150] sm:$0xff]  }
  0x47   : > { %288 = vst [vmem:[%s4750_s17 + $0xa0] sm:$0xff] %v287_v20   ;;  %292 = vst [vmem:[%s4750_s17 + $0xa8] sm:$0xff] %v291_v21  }
  0x48 PF: > { %409 = sbr.rel (%p4689_p9) target bundleno = 525 (0x20d), region = 73 }
  0x4d   : > { %s412_s23 = sand.u32 1, %s4607_s15  }
  0x4e   : > { %s4330_s30 = smul.u32 176, %s412_s23 }
  0x50   : > { %s4795_s6 = scalar_lea.vmem [#allocation2], %s4330_s30 }
  0x51   : > { %4598 = dma.done.wait (%p4353_p8), [#allocation4], 896  }
  0x52   : > { %4600 = vsyncadd (%p4353_p8), [#allocation4], 4294966400 }
  0x53   : > { %4602 = dma.done.wait (%p4353_p8), [#allocation6], 32  }
  0x54   : > { %4604 = vsyncadd (%p4353_p8), [#allocation6], 4294967264  ;;  %v4388_v22 = vld [vmem:[#allocation3 + $0x8] sm:$0xff]   ;;  %vm607_vm0 = vcmask 130048   ;;  %v4391_v25 = vld [vmem:[%s4795_s6 + $0x10] sm:$0xff]   ;;  %s3473_s25 = sshll.u32 %s412_s23, 7 }
  0x55   : > { %v4389_v23 = vld [vmem:[%s4795_s6 + $0x8] sm:$0xff]   ;;  %4089 = vmatprep.subr.bf16.mxu0 %v4388_v22  ;;  %4327 = vmatprep.subr.bf16.mxu1 %v4388_v22  ;;  %v4392_v26 = vld [vmem:[%s4795_s6 + $0x50] sm:$0xff]   ;;  %v4395_v29 = vld [vmem:[%s4795_s6 + $0x18] sm:$0xff]   ;;  %vm3165_vm1 = vcmask 125952   ;;  %s5307_s15 = scalar_lea.vmem [#allocation8], %s3473_s25  ;;  %s3969_s11 = sshll.u32 (%p4682_p5), %s4663_s18, 3 }
  0x56   : > { %v4390_v24 = vld [vmem:[%s4795_s6 + $0x48] sm:$0xff]   ;;  %4090 = vmatpush3.bf16.msra.mxu0 %v4388_v22  ;;  %4328 = vmatpush3.bf16.msra.mxu1 %v4388_v22  ;;  %v4393_v27 = vld [vmem:[#allocation3] sm:$0xff]   ;;  %v4394_v28 = vld [vmem:[#allocation3 + $0x10] sm:$0xff]   ;;  %s3207_s14 = scalar_lea.vmem (%p4682_p5), %s5534_s4, %s3969_s11 }
  0x57   : > { %4091 = vmatprep.mubr.msk.bf16.mxu0 %vm607_vm0, %v4389_v23  ;;  %4107 = vmatprep.mubr.msk.bf16.mxu1 %vm607_vm0, %v4390_v24  ;;  %v4396_v30 = vld [vmem:[%s4795_s6 + $0x58] sm:$0xff]   ;;  %v4397_v31 = vld [vmem:[%s4795_s6 + $0x20] sm:$0xff]   ;;  %v4399_v33 = vld [vmem:[%s4795_s6 + $0x28] sm:$0xff]  }
  0x58   : > { %4123 = vmatprep.subr.bf16.mxu1 %v4393_v27  ;;  %4157 = vmatprep.subr.bf16.mxu0 %v4394_v28  ;;  %v4398_v32 = vld [vmem:[%s4795_s6 + $0x60] sm:$0xff]   ;;  %v4400_v34 = vld [vmem:[%s4795_s6 + $0x68] sm:$0xff]   ;;  %v4401_v35 = vld [vmem:[%s4795_s6 + $0x30] sm:$0xff]  }
  0x59   : > { %4092 = vmatmul.mubr.msk.bf16.vlgmr.msra.gmra.mxu0 %vm607_vm0, %v4391_v25  ;;  %4108 = vmatmul.mubr.msk.bf16.vlgmr.msra.gmra.mxu1 %vm607_vm0, %v4392_v26  ;;  %v4402_v36 = vld [vmem:[%s4795_s6 + $0x70] sm:$0xff]   ;;  %v4403_v37 = vld [vmem:[%s4795_s6 + $0x38] sm:$0xff]   ;;  %v4405_v40 = vld [vmem:[%s4795_s6 + $0x40] sm:$0xff]  }
  0x5a   : > { %4124 = vmatpush3.bf16.msra.mxu1 %v4393_v27  ;;  %4158 = vmatpush3.bf16.msra.mxu0 %v4394_v28  ;;  %v4404_v38 = vld [vmem:[%s4795_s6 + $0x78] sm:$0xff]   ;;  %v4412_v41 = vld [vmem:[#allocation3 + $0x20] sm:$0xff]   ;;  %v4409_v45 = vld [vmem:[%s4795_s6 + $0x8] sm:$0xff]  }
  0x5b   : > { %4095 = vmatprep.mubr.msk.bf16.mxu0 %vm607_vm0, %v4395_v29  ;;  %4111 = vmatprep.mubr.msk.bf16.mxu1 %vm607_vm0, %v4396_v30  ;;  %v4411_v39 = vld [vmem:[#allocation3 + $0x18] sm:$0xff]   ;;  %v4406_v42 = vld [vmem:[%s4795_s6 + $0x80] sm:$0xff]   ;;  %v4408_v44 = vld [vmem:[%s4795_s6 + $0x10] sm:$0xff]  }
  0x5c   : > { %4191 = vmatprep.subr.bf16.mxu1 %v4411_v39  ;;  %v4407_v43 = vld [vmem:[%s4795_s6] sm:$0xff]   ;;  %4225 = vmatprep.subr.bf16.mxu0 %v4412_v41  ;;  %v4410_v46 = vld [vmem:[%s4795_s6 + $0x18] sm:$0xff]   ;;  %v4413_v47 = vld [vmem:[%s4795_s6 + $0x10] sm:$0xff]  }
  0x5d   : > { %v4414_v48 = vld [vmem:[%s4795_s6 + $0x20] sm:$0xff]   ;;  %v4415_v49 = vld [vmem:[%s4795_s6 + $0x18] sm:$0xff]   ;;  %v4416_v50 = vld [vmem:[%s4795_s6 + $0x28] sm:$0xff]  }
  0x5e   : > { %v4417_v51 = vld [vmem:[%s4795_s6 + $0x20] sm:$0xff]   ;;  %v4418_v52 = vld [vmem:[%s4795_s6 + $0x30] sm:$0xff]   ;;  %v4419_v53 = vld [vmem:[%s4795_s6 + $0x28] sm:$0xff]  }
  0x5f   : > { %v4420_v54 = vld [vmem:[%s4795_s6 + $0x38] sm:$0xff]   ;;  %v4421_v55 = vld [vmem:[%s4795_s6 + $0x30] sm:$0xff]   ;;  %v4422_v56 = vld [vmem:[%s4795_s6 + $0x40] sm:$0xff]  }
  0x60   : > { %v4423_v57 = vld [vmem:[%s4795_s6 + $0x38] sm:$0xff]   ;;  %v4424_v58 = vld [vmem:[%s4795_s6 + $0x48] sm:$0xff]   ;;  %v4425_v59 = vld [vmem:[%s4795_s6 + $0x40] sm:$0xff]  }
  0x61   : > { %4096 = vmatmul.mubr.msk.bf16.gmra.mxu0 %vm607_vm0, %v4397_v31  ;;  %4112 = vmatmul.mubr.msk.bf16.gmra.mxu1 %vm607_vm0, %v4398_v32  ;;  %v4445_v60 = vld [vmem:[#allocation3 + $0x28] sm:$0xff]   ;;  %v4446_v61 = vld [vmem:[#allocation3 + $0x30] sm:$0xff]  }
  0x62   : > { %4099 = vmatprep.mubr.msk.bf16.mxu0 %vm607_vm0, %v4399_v33  ;;  %4115 = vmatprep.mubr.msk.bf16.mxu1 %vm607_vm0, %v4400_v34  ;;  %v4426_v62 = vld [vmem:[%s4795_s6 + $0x50] sm:$0xff]   ;;  %v4427_v63 = vld [vmem:[%s4795_s6 + $0x48] sm:$0xff]   ;;  %v4428_v0 = vld [vmem:[%s4795_s6 + $0x58] sm:$0xff]  }
  0x63   : > { %v4429_v1 = vld [vmem:[%s4795_s6 + $0x50] sm:$0xff]   ;;  %v4430_v2 = vld [vmem:[%s4795_s6 + $0x60] sm:$0xff]   ;;  %v4431_v3 = vld [vmem:[%s4795_s6 + $0x58] sm:$0xff]  }
  0x64   : > { %v4432_v4 = vld [vmem:[%s4795_s6 + $0x68] sm:$0xff]   ;;  %v4433_v5 = vld [vmem:[%s4795_s6 + $0x60] sm:$0xff]   ;;  %v4434_v6 = vld [vmem:[%s4795_s6 + $0x70] sm:$0xff]  }
  0x65   : > { %v4435_v7 = vld [vmem:[%s4795_s6 + $0x68] sm:$0xff]   ;;  %v4436_v8 = vld [vmem:[%s4795_s6 + $0x78] sm:$0xff]   ;;  %v4437_v9 = vld [vmem:[%s4795_s6 + $0x70] sm:$0xff]  }
  0x66   : > { %v4438_v10 = vld [vmem:[%s4795_s6 + $0x80] sm:$0xff]   ;;  %v4439_v11 = vld [vmem:[%s4795_s6 + $0x78] sm:$0xff]   ;;  %v4440_v12 = vld [vmem:[%s4795_s6 + $0x88] sm:$0xff]  }
  0x67   : > { %v4441_v13 = vld [vmem:[%s4795_s6 + $0x18] sm:$0xff]   ;;  %v4442_v14 = vld [vmem:[%s4795_s6 + $0x20] sm:$0xff]   ;;  %v4444_v16 = vld [vmem:[%s4795_s6 + $0x28] sm:$0xff]  }
  0x68   : > { %v4443_v15 = vld [vmem:[%s4795_s6 + $0x20] sm:$0xff]   ;;  %v4447_v17 = vld [vmem:[%s4795_s6 + $0x28] sm:$0xff]   ;;  %v4448_v18 = vld [vmem:[%s4795_s6 + $0x30] sm:$0xff]  }
  0x69   : > { %4100 = vmatmul.mubr.msk.bf16.gmra.mxu0 %vm607_vm0, %v4401_v35  ;;  %4116 = vmatmul.mubr.msk.bf16.gmra.mxu1 %vm607_vm0, %v4402_v36  ;;  %v4449_v19 = vld [vmem:[%s4795_s6 + $0x30] sm:$0xff]   ;;  %v4450_v20 = vld [vmem:[%s4795_s6 + $0x38] sm:$0xff]   ;;  %v4452_v22 = vld [vmem:[%s4795_s6 + $0x40] sm:$0xff]  }
  0x6a   : > { %4103 = vmatprep.mubr.msk.bf16.mxu0 %vm607_vm0, %v4403_v37  ;;  %4119 = vmatprep.mubr.msk.bf16.mxu1 %vm607_vm0, %v4404_v38  ;;  %v4451_v21 = vld [vmem:[%s4795_s6 + $0x38] sm:$0xff]   ;;  %v4453_v23 = vld [vmem:[%s4795_s6 + $0x40] sm:$0xff]   ;;  %v4454_v24 = vld [vmem:[%s4795_s6 + $0x48] sm:$0xff]  }
  0x6b   : > { %v4455_v25 = vld [vmem:[%s4795_s6 + $0x48] sm:$0xff]   ;;  %v4456_v26 = vld [vmem:[%s4795_s6 + $0x50] sm:$0xff]   ;;  %v4458_v28 = vld [vmem:[%s4795_s6 + $0x58] sm:$0xff]  }
  0x6c   : > { %v4457_v27 = vld [vmem:[%s4795_s6 + $0x50] sm:$0xff]   ;;  %v4459_v29 = vld [vmem:[%s4795_s6 + $0x58] sm:$0xff]   ;;  %v4460_v30 = vld [vmem:[%s4795_s6 + $0x60] sm:$0xff]  }
  0x6d   : > { %v4461_v31 = vld [vmem:[%s4795_s6 + $0x60] sm:$0xff]   ;;  %v4462_v32 = vld [vmem:[%s4795_s6 + $0x68] sm:$0xff]   ;;  %v4464_v34 = vld [vmem:[%s4795_s6 + $0x70] sm:$0xff]  }
  0x6e   : > { %v4463_v33 = vld [vmem:[%s4795_s6 + $0x68] sm:$0xff]   ;;  %v4465_v35 = vld [vmem:[%s4795_s6 + $0x70] sm:$0xff]   ;;  %v4466_v36 = vld [vmem:[%s4795_s6 + $0x78] sm:$0xff]  }
  0x6f   : > { %v4467_v37 = vld [vmem:[%s4795_s6 + $0x78] sm:$0xff]   ;;  %v4468_v38 = vld [vmem:[%s4795_s6 + $0x80] sm:$0xff]  }
  0x71   : > { %4104 = vmatmul.mubr.msk.bf16.gmra.mxu0 %vm607_vm0, %v4405_v40  ;;  %4120 = vmatmul.mubr.msk.bf16.gmra.mxu1 %vm607_vm0, %v4406_v42  ;;  %v4470_v40 = vld [vmem:[%s4795_s6 + $0x88] sm:$0xff]   ;;  %v4472_v42 = vld [vmem:[%s4795_s6 + $0x90] sm:$0xff]  }
  0x72   : > { %4125 = vmatprep.mubr.msk.bf16.mxu1 %vm607_vm0, %v4407_v43  ;;  %4159 = vmatprep.mubr.msk.bf16.mxu0 %vm607_vm0, %v4408_v44  ;;  %v4473_v43 = vld [vmem:[%s4795_s6 + $0x90] sm:$0xff]   ;;  %v4474_v44 = vld [vmem:[%s4795_s6 + $0x98] sm:$0xff]  }
  0x79   : > { %4126 = vmatmul.mubr.msk.bf16.vlgmr.msra.gmra.mxu1 %vm607_vm0, %v4409_v45  ;;  %4160 = vmatmul.mubr.msk.bf16.vlgmr.msra.gmra.mxu0 %vm607_vm0, %v4410_v46  ;;  %v4475_v45 = vld [vmem:[%s4795_s6 + $0x28] sm:$0xff]   ;;  %v4476_v46 = vld [vmem:[%s4795_s6 + $0x30] sm:$0xff]  }
  0x7a   : > { %4192 = vmatpush3.bf16.msra.mxu1 %v4411_v39  ;;  %4226 = vmatpush3.bf16.msra.mxu0 %v4412_v41  ;;  %v4469_v39 = vld [vmem:[%s4795_s6 + $0x80] sm:$0xff]   ;;  %v4471_v41 = vld [vmem:[%s4795_s6 + $0x88] sm:$0xff]  }
  0x7b   : > { %4129 = vmatprep.mubr.msk.bf16.mxu1 %vm607_vm0, %v4413_v47  ;;  %4163 = vmatprep.mubr.msk.bf16.mxu0 %vm607_vm0, %v4414_v48  ;;  %v4477_v47 = vld [vmem:[%s4795_s6 + $0x30] sm:$0xff]   ;;  %v4478_v48 = vld [vmem:[%s4795_s6 + $0x38] sm:$0xff]  }
  0x7c   : > { %4259 = vmatprep.subr.bf16.mxu1 %v4445_v60  ;;  %4293 = vmatprep.subr.bf16.mxu0 %v4446_v61 }
  0x81   : > { %4130 = vmatmul.mubr.msk.bf16.gmra.mxu1 %vm607_vm0, %v4415_v49  ;;  %4164 = vmatmul.mubr.msk.bf16.gmra.mxu0 %vm607_vm0, %v4416_v50  ;;  %v4479_v49 = vld [vmem:[%s4795_s6 + $0x38] sm:$0xff]   ;;  %v4480_v50 = vld [vmem:[%s4795_s6 + $0x40] sm:$0xff]  }
  0x82   : > { %4133 = vmatprep.mubr.msk.bf16.mxu1 %vm607_vm0, %v4417_v51  ;;  %4167 = vmatprep.mubr.msk.bf16.mxu0 %vm607_vm0, %v4418_v52  ;;  %v4481_v51 = vld [vmem:[%s4795_s6 + $0x40] sm:$0xff]   ;;  %v4482_v52 = vld [vmem:[%s4795_s6 + $0x48] sm:$0xff]  }
  0x89   : > { %4134 = vmatmul.mubr.msk.bf16.gmra.mxu1 %vm607_vm0, %v4419_v53  ;;  %4168 = vmatmul.mubr.msk.bf16.gmra.mxu0 %vm607_vm0, %v4420_v54  ;;  %v4483_v53 = vld [vmem:[%s4795_s6 + $0x48] sm:$0xff]   ;;  %v4484_v54 = vld [vmem:[%s4795_s6 + $0x50] sm:$0xff]  }
  0x8a   : > { %4137 = vmatprep.mubr.msk.bf16.mxu1 %vm607_vm0, %v4421_v55  ;;  %4171 = vmatprep.mubr.msk.bf16.mxu0 %vm607_vm0, %v4422_v56  ;;  %v4485_v55 = vld [vmem:[%s4795_s6 + $0x50] sm:$0xff]   ;;  %v4486_v56 = vld [vmem:[%s4795_s6 + $0x58] sm:$0xff]  }
  0x91   : > { %4138 = vmatmul.mubr.msk.bf16.gmra.mxu1 %vm607_vm0, %v4423_v57  ;;  %4172 = vmatmul.mubr.msk.bf16.gmra.mxu0 %vm607_vm0, %v4424_v58  ;;  %v4487_v57 = vld [vmem:[%s4795_s6 + $0x58] sm:$0xff]   ;;  %v4488_v58 = vld [vmem:[%s4795_s6 + $0x60] sm:$0xff]  }
  0x92   : > { %4141 = vmatprep.mubr.msk.bf16.mxu1 %vm607_vm0, %v4425_v59  ;;  %4175 = vmatprep.mubr.msk.bf16.mxu0 %vm607_vm0, %v4426_v62  ;;  %v4489_v59 = vld [vmem:[%s4795_s6 + $0x60] sm:$0xff]   ;;  %v4492_v62 = vld [vmem:[%s4795_s6 + $0x70] sm:$0xff]  }
  0x99   : > { %4142 = vmatmul.mubr.msk.bf16.gmra.mxu1 %vm607_vm0, %v4427_v63  ;;  %4176 = vmatmul.mubr.msk.bf16.gmra.mxu0 %vm607_vm0, %v4428_v0  ;;  %v4493_v63 = vld [vmem:[%s4795_s6 + $0x70] sm:$0xff]   ;;  %v4494_v0 = vld [vmem:[%s4795_s6 + $0x78] sm:$0xff]  }
  0x9a   : > { %4145 = vmatprep.mubr.msk.bf16.mxu1 %vm607_vm0, %v4429_v1  ;;  %4179 = vmatprep.mubr.msk.bf16.mxu0 %vm607_vm0, %v4430_v2  ;;  %v4495_v1 = vld [vmem:[%s4795_s6 + $0x78] sm:$0xff]   ;;  %v4496_v2 = vld [vmem:[%s4795_s6 + $0x80] sm:$0xff]  }
  0xa1   : > { %4146 = vmatmul.mubr.msk.bf16.gmra.mxu1 %vm607_vm0, %v4431_v3  ;;  %4180 = vmatmul.mubr.msk.bf16.gmra.mxu0 %vm607_vm0, %v4432_v4 }
  0xa2   : > { %4149 = vmatprep.mubr.msk.bf16.mxu1 %vm607_vm0, %v4433_v5  ;;  %4183 = vmatprep.mubr.msk.bf16.mxu0 %vm607_vm0, %v4434_v6 }
  0xa9   : > { %4150 = vmatmul.mubr.msk.bf16.gmra.mxu1 %vm607_vm0, %v4435_v7  ;;  %4184 = vmatmul.mubr.msk.bf16.gmra.mxu0 %vm607_vm0, %v4436_v8 }
  0xaa   : > { %4153 = vmatprep.mubr.msk.bf16.mxu1 %vm607_vm0, %v4437_v9  ;;  %4187 = vmatprep.mubr.msk.bf16.mxu0 %vm607_vm0, %v4438_v10  ;;  %v4497_v9 = vld [vmem:[%s4795_s6 + $0x80] sm:$0xff]   ;;  %v4498_v10 = vld [vmem:[%s4795_s6 + $0x88] sm:$0xff]  }
  0xb1   : > { %4154 = vmatmul.mubr.msk.bf16.gmra.mxu1 %vm607_vm0, %v4439_v11  ;;  %4188 = vmatmul.mubr.msk.bf16.gmra.mxu0 %vm607_vm0, %v4440_v12  ;;  %v4499_v11 = vld [vmem:[%s4795_s6 + $0x88] sm:$0xff]   ;;  %v4500_v12 = vld [vmem:[%s4795_s6 + $0x90] sm:$0xff]  }
  0xb2   : > { %4193 = vmatprep.mubr.msk.bf16.mxu1 %vm607_vm0, %v4441_v13  ;;  %4227 = vmatprep.mubr.msk.bf16.mxu0 %vm607_vm0, %v4442_v14 }
  0xb9   : > { %4194 = vmatmul.mubr.msk.bf16.vlgmr.msra.gmra.mxu1 %vm607_vm0, %v4443_v15  ;;  %4228 = vmatmul.mubr.msk.bf16.vlgmr.msra.gmra.mxu0 %vm607_vm0, %v4444_v16 }
  0xba   : > { %4260 = vmatpush3.bf16.msra.mxu1 %v4445_v60  ;;  %4294 = vmatpush3.bf16.msra.mxu0 %v4446_v61  ;;  %v4490_v60 = vld [vmem:[%s4795_s6 + $0x68] sm:$0xff]  }
  0xbb   : > { %4197 = vmatprep.mubr.msk.bf16.mxu1 %vm607_vm0, %v4447_v17  ;;  %4231 = vmatprep.mubr.msk.bf16.mxu0 %vm607_vm0, %v4448_v18  ;;  %v4491_v61 = vld [vmem:[%s4795_s6 + $0x68] sm:$0xff]  }
  0xc1   : > { %4198 = vmatmul.mubr.msk.bf16.gmra.mxu1 %vm607_vm0, %v4449_v19  ;;  %4232 = vmatmul.mubr.msk.bf16.gmra.mxu0 %vm607_vm0, %v4450_v20 }
  0xc2   : > { %4201 = vmatprep.mubr.msk.bf16.mxu1 %vm607_vm0, %v4451_v21  ;;  %4235 = vmatprep.mubr.msk.bf16.mxu0 %vm607_vm0, %v4452_v22  ;;  %v4501_v21 = vld [vmem:[%s4795_s6 + $0x90] sm:$0xff]   ;;  %v4502_v22 = vld [vmem:[%s4795_s6 + $0x98] sm:$0xff]  }
  0xc9   : > { %4202 = vmatmul.mubr.msk.bf16.gmra.mxu1 %vm607_vm0, %v4453_v23  ;;  %4236 = vmatmul.mubr.msk.bf16.gmra.mxu0 %vm607_vm0, %v4454_v24  ;;  %v4503_v23 = vld [vmem:[%s4795_s6 + $0x98] sm:$0xff]   ;;  %v4504_v24 = vld [vmem:[%s4795_s6 + $0xa0] sm:$0xff]  }
  0xca   : > { %4205 = vmatprep.mubr.msk.bf16.mxu1 %vm607_vm0, %v4455_v25  ;;  %4239 = vmatprep.mubr.msk.bf16.mxu0 %vm607_vm0, %v4456_v26 }
  0xd1   : > { %4206 = vmatmul.mubr.msk.bf16.gmra.mxu1 %vm607_vm0, %v4457_v27  ;;  %4240 = vmatmul.mubr.msk.bf16.gmra.mxu0 %vm607_vm0, %v4458_v28 }
  0xd2   : > { %4209 = vmatprep.mubr.msk.bf16.mxu1 %vm607_vm0, %v4459_v29  ;;  %4243 = vmatprep.mubr.msk.bf16.mxu0 %vm607_vm0, %v4460_v30 }
  0xd9   : > { %4210 = vmatmul.mubr.msk.bf16.gmra.mxu1 %vm607_vm0, %v4461_v31  ;;  %4244 = vmatmul.mubr.msk.bf16.gmra.mxu0 %vm607_vm0, %v4462_v32 }
  0xda   : > { %4213 = vmatprep.mubr.msk.bf16.mxu1 %vm607_vm0, %v4463_v33  ;;  %4247 = vmatprep.mubr.msk.bf16.mxu0 %vm607_vm0, %v4464_v34  ;;  %v4505_v33 = vld [vmem:[%s4795_s6 + $0xa0] sm:$0xff]   ;;  %v4506_v34 = vld [vmem:[%s4795_s6 + $0xa8] sm:$0xff]  }
  0xe1   : > { %4214 = vmatmul.mubr.msk.bf16.gmra.mxu1 %vm607_vm0, %v4465_v35  ;;  %4248 = vmatmul.mubr.msk.bf16.gmra.mxu0 %vm607_vm0, %v4466_v36 }
  0xe2   : > { %4217 = vmatprep.mubr.msk.bf16.mxu1 %vm607_vm0, %v4467_v37  ;;  %4251 = vmatprep.mubr.msk.bf16.mxu0 %vm607_vm0, %v4468_v38 }
  0xe9   : > { %4218 = vmatmul.mubr.msk.bf16.gmra.mxu1 %vm607_vm0, %v4469_v39  ;;  %4252 = vmatmul.mubr.msk.bf16.gmra.mxu0 %vm607_vm0, %v4470_v40 }
  0xea   : > { %4221 = vmatprep.mubr.msk.bf16.mxu1 %vm607_vm0, %v4471_v41  ;;  %4255 = vmatprep.mubr.msk.bf16.mxu0 %vm607_vm0, %v4472_v42 }
  0xf1   : > { %4222 = vmatmul.mubr.msk.bf16.gmra.mxu1 %vm607_vm0, %v4473_v43  ;;  %4256 = vmatmul.mubr.msk.bf16.gmra.mxu0 %vm607_vm0, %v4474_v44 }
  0xf2   : > { %4261 = vmatprep.mubr.msk.bf16.mxu1 %vm607_vm0, %v4475_v45  ;;  %4295 = vmatprep.mubr.msk.bf16.mxu0 %vm607_vm0, %v4476_v46 }
  0xf9   : > { %4262 = vmatmul.mubr.msk.bf16.vlgmr.msra.gmra.mxu1 %vm607_vm0, %v4477_v47  ;;  %4296 = vmatmul.mubr.msk.bf16.vlgmr.msra.gmra.mxu0 %vm607_vm0, %v4478_v48 }
  0xfa   : > { %4265 = vmatprep.mubr.msk.bf16.mxu1 %vm607_vm0, %v4479_v49  ;;  %4299 = vmatprep.mubr.msk.bf16.mxu0 %vm607_vm0, %v4480_v50 }
 0x101   : > { %4266 = vmatmul.mubr.msk.bf16.gmra.mxu1 %vm607_vm0, %v4481_v51  ;;  %4300 = vmatmul.mubr.msk.bf16.gmra.mxu0 %vm607_vm0, %v4482_v52 }
 0x102   : > { %4269 = vmatprep.mubr.msk.bf16.mxu1 %vm607_vm0, %v4483_v53  ;;  %4303 = vmatprep.mubr.msk.bf16.mxu0 %vm607_vm0, %v4484_v54 }
 0x109   : > { %4270 = vmatmul.mubr.msk.bf16.gmra.mxu1 %vm607_vm0, %v4485_v55  ;;  %4304 = vmatmul.mubr.msk.bf16.gmra.mxu0 %vm607_vm0, %v4486_v56 }
 0x10a   : > { %4273 = vmatprep.mubr.msk.bf16.mxu1 %vm607_vm0, %v4487_v57  ;;  %4307 = vmatprep.mubr.msk.bf16.mxu0 %vm607_vm0, %v4488_v58 }
 0x111   : > { %4274 = vmatmul.mubr.msk.bf16.gmra.mxu1 %vm607_vm0, %v4489_v59  ;;  %4308 = vmatmul.mubr.msk.bf16.gmra.mxu0 %vm607_vm0, %v4490_v60 }
 0x112   : > { %4277 = vmatprep.mubr.msk.bf16.mxu1 %vm607_vm0, %v4491_v61  ;;  %4311 = vmatprep.mubr.msk.bf16.mxu0 %vm607_vm0, %v4492_v62 }
 0x119   : > { %v4093_v3 = vpop.f32.mrf.mxu0  ;;  %v5005_v4 = vpop.f32.mrf.mxu1  ;;  %4278 = vmatmul.mubr.msk.bf16.gmra.mxu1 %vm607_vm0, %v4493_v63  ;;  %4312 = vmatmul.mubr.msk.bf16.gmra.mxu0 %vm607_vm0, %v4494_v0 }
 0x11a   : > { %4281 = vmatprep.mubr.msk.bf16.mxu1 %vm607_vm0, %v4495_v1  ;;  %4315 = vmatprep.mubr.msk.bf16.mxu0 %vm607_vm0, %v4496_v2 }
 0x11b   : > { %v690_v5 = vpop.f32.mrf.mxu0  ;;  %v5011_v6 = vpop.f32.mrf.mxu1 }
 0x11d   : > { %v4094_v7 = vpop.f32.mrf.mxu0  ;;  %v5013_v8 = vpop.f32.mrf.mxu1 }
 0x11f   : > { %v693_v13 = vpop.f32.mrf.mxu0  ;;  %v5019_v14 = vpop.f32.mrf.mxu1 }
 0x121   : > { %v4097_v15 = vpop.f32.mrf.mxu0  ;;  %v5021_v16 = vpop.f32.mrf.mxu1  ;;  %4282 = vmatmul.mubr.msk.bf16.gmra.mxu1 %vm607_vm0, %v4497_v9  ;;  %4316 = vmatmul.mubr.msk.bf16.gmra.mxu0 %vm607_vm0, %v4498_v10 }
 0x122   : > { %4285 = vmatprep.mubr.msk.bf16.mxu1 %vm607_vm0, %v4499_v11  ;;  %4319 = vmatprep.mubr.msk.bf16.mxu0 %vm607_vm0, %v4500_v12 }
 0x123   : > { %v706_v17 = vpop.f32.mrf.mxu0  ;;  %v5027_v18 = vpop.f32.mrf.mxu1 }
 0x125   : > { %v4098_v19 = vpop.f32.mrf.mxu0  ;;  %v5029_v20 = vpop.f32.mrf.mxu1 }
 0x127   : > { %v709_v25 = vpop.f32.mrf.mxu0  ;;  %v5035_v26 = vpop.f32.mrf.mxu1 }
 0x129   : > { %v4101_v27 = vpop.f32.mrf.mxu0  ;;  %v5037_v28 = vpop.f32.mrf.mxu1  ;;  %4286 = vmatmul.mubr.msk.bf16.gmra.mxu1 %vm607_vm0, %v4501_v21  ;;  %4320 = vmatmul.mubr.msk.bf16.gmra.mxu0 %vm607_vm0, %v4502_v22 }
 0x12a   : > { %4289 = vmatprep.mubr.msk.bf16.mxu1 %vm607_vm0, %v4503_v23  ;;  %4323 = vmatprep.mubr.msk.bf16.mxu0 %vm607_vm0, %v4504_v24 }
 0x12b   : > { %v722_v29 = vpop.f32.mrf.mxu0  ;;  %v5043_v30 = vpop.f32.mrf.mxu1 }
 0x12d   : > { %v4102_v31 = vpop.f32.mrf.mxu0  ;;  %v5045_v32 = vpop.f32.mrf.mxu1 }
 0x12f   : > { %v725_v35 = vpop.f32.mrf.mxu0  ;;  %v5049_v36 = vpop.f32.mrf.mxu1 }
 0x131   : > { %v4105_v37 = vpop.f32.mrf.mxu0  ;;  %v5051_v38 = vpop.f32.mrf.mxu1  ;;  %4290 = vmatmul.mubr.msk.bf16.gmra.mxu1 %vm607_vm0, %v4505_v33  ;;  %4324 = vmatmul.mubr.msk.bf16.gmra.mxu0 %vm607_vm0, %v4506_v34 }
 0x133   : > { %v738_v39 = vpop.f32.mrf.mxu0  ;;  %v5055_v40 = vpop.f32.mrf.mxu1 }
 0x135   : > { %v4106_v41 = vpop.f32.mrf.mxu0  ;;  %v5057_v42 = vpop.f32.mrf.mxu1 }
 0x137   : > { %v5059_v43 = vpop.f32.mrf.mxu0  ;;  %v5061_v44 = vpop.f32.mrf.mxu1 }
 0x139   : > { %v4127_v45 = vpop.f32.mrf.mxu1  ;;  %v4161_v46 = vpop.f32.mrf.mxu0 }
 0x13a   : > { %v994_v47 = vadd.f32 %v4127_v45, %v4093_v3 }
 0x13b   : > { %v985_v48 = vpop.f32.mrf.mxu1  ;;  %v1316_v49 = vpop.f32.mrf.mxu0 }
 0x13c   : > { %v5063_v50 = vadd.f32 %v4161_v46, %v994_v47  ;;  %v986_v51 = vadd.f32 %v985_v48, %v690_v5 }
 0x13d   : > { %v4128_v52 = vpop.f32.mrf.mxu1  ;;  %v4162_v53 = vpop.f32.mrf.mxu0 }
 0x13e   : > { %v5065_v54 = vadd.f32 %v1316_v49, %v986_v51  ;;  %v997_v55 = vadd.f32 %v4128_v52, %v4094_v7 }
 0x13f   : > { %v988_v56 = vpop.f32.mrf.mxu1  ;;  %v1319_v57 = vpop.f32.mrf.mxu0 }
 0x140   : > { %v5067_v58 = vadd.f32 %v4162_v53, %v997_v55  ;;  %v989_v59 = vadd.f32 %v988_v56, %v693_v13 }
 0x141   : > { %v4131_v60 = vpop.f32.mrf.mxu1  ;;  %v4165_v61 = vpop.f32.mrf.mxu0 }
 0x142   : > { %v5069_v62 = vadd.f32 %v1319_v57, %v989_v59  ;;  %v1010_v63 = vadd.f32 %v4131_v60, %v4097_v15 }
 0x143   : > { %v1001_v0 = vpop.f32.mrf.mxu1  ;;  %v1332_v1 = vpop.f32.mrf.mxu0 }
 0x144   : > { %v5071_v2 = vadd.f32 %v4165_v61, %v1010_v63  ;;  %v1002_v3 = vadd.f32 %v1001_v0, %v706_v17 }
 0x145   : > { %v4132_v5 = vpop.f32.mrf.mxu1  ;;  %v4166_v9 = vpop.f32.mrf.mxu0 }
 0x146   : > { %v5073_v10 = vadd.f32 %v1332_v1, %v1002_v3  ;;  %v1013_v7 = vadd.f32 %v4132_v5, %v4098_v19 }
 0x147   : > { %v1004_v11 = vpop.f32.mrf.mxu1  ;;  %v1335_v12 = vpop.f32.mrf.mxu0 }
 0x148   : > { %v5075_v21 = vadd.f32 %v4166_v9, %v1013_v7  ;;  %v1005_v13 = vadd.f32 %v1004_v11, %v709_v25 }
 0x149   : > { %v4135_v22 = vpop.f32.mrf.mxu1  ;;  %v4169_v23 = vpop.f32.mrf.mxu0 }
 0x14a   : > { %v5077_v24 = vadd.f32 %v1335_v12, %v1005_v13  ;;  %v1026_v15 = vadd.f32 %v4135_v22, %v4101_v27 }
 0x14b   : > { %v1017_v33 = vpop.f32.mrf.mxu1  ;;  %v1348_v34 = vpop.f32.mrf.mxu0 }
 0x14c   : > { %v5079_v45 = vadd.f32 %v4169_v23, %v1026_v15  ;;  %v1018_v17 = vadd.f32 %v1017_v33, %v722_v29 }
 0x14d   : > { %v4136_v46 = vpop.f32.mrf.mxu1  ;;  %v4170_v47 = vpop.f32.mrf.mxu0 }
 0x14e   : > { %v5081_v48 = vadd.f32 %v1348_v34, %v1018_v17  ;;  %v1029_v19 = vadd.f32 %v4136_v46, %v4102_v31 }
 0x14f   : > { %v1020_v49 = vpop.f32.mrf.mxu1  ;;  %v1351_v51 = vpop.f32.mrf.mxu0 }
 0x150   : > { %v5083_v52 = vadd.f32 %v4170_v47, %v1029_v19  ;;  %v1021_v25 = vadd.f32 %v1020_v49, %v725_v35 }
 0x151   : > { %v4139_v53 = vpop.f32.mrf.mxu1  ;;  %v4173_v55 = vpop.f32.mrf.mxu0 }
 0x152   : > { %v5085_v56 = vadd.f32 %v1351_v51, %v1021_v25  ;;  %v1042_v27 = vadd.f32 %v4139_v53, %v4105_v37 }
 0x153   : > { %v1033_v57 = vpop.f32.mrf.mxu1  ;;  %v1364_v59 = vpop.f32.mrf.mxu0 }
 0x154   : > { %v5087_v60 = vadd.f32 %v4173_v55, %v1042_v27  ;;  %v1034_v29 = vadd.f32 %v1033_v57, %v738_v39 }
 0x155   : > { %v4140_v61 = vpop.f32.mrf.mxu1  ;;  %v4174_v63 = vpop.f32.mrf.mxu0 }
 0x156   : > { %v5089_v0 = vadd.f32 %v1364_v59, %v1034_v29  ;;  %v1045_v31 = vadd.f32 %v4140_v61, %v4106_v41 }
 0x157   : > { %v1036_v1 = vpop.f32.mrf.mxu1  ;;  %v1367_v3 = vpop.f32.mrf.mxu0 }
 0x158   : > { %v5091_v5 = vadd.f32 %v4174_v63, %v1045_v31  ;;  %v1037_v35 = vadd.f32 %v1036_v1, %v5059_v43 }
 0x159   : > { %v4143_v9 = vpop.f32.mrf.mxu1  ;;  %v4177_v7 = vpop.f32.mrf.mxu0 }
 0x15a   : > { %v5094_v11 = vadd.f32 %v1367_v3, %v1037_v35  ;;  %v1058_v37 = vadd.f32 %v4143_v9, %v5005_v4 }
 0x15b   : > { %v1049_v12 = vpop.f32.mrf.mxu1  ;;  %v1380_v13 = vpop.f32.mrf.mxu0 }
 0x15c   : > { %v5097_v39 = vadd.f32 %v4177_v7, %v1058_v37  ;;  %v1050_v22 = vadd.f32 %v1049_v12, %v5011_v6 }
 0x15d   : > { %v4144_v23 = vpop.f32.mrf.mxu1  ;;  %v4178_v41 = vpop.f32.mrf.mxu0 }
 0x15e   : > { %v5100_v15 = vadd.f32 %v1380_v13, %v1050_v22  ;;  %v1061_v33 = vadd.f32 %v4144_v23, %v5013_v8 }
 0x15f   : > { %v1052_v34 = vpop.f32.mrf.mxu1  ;;  %v1383_v43 = vpop.f32.mrf.mxu0 }
 0x160   : > { %v5103_v17 = vadd.f32 %v4178_v41, %v1061_v33  ;;  %v1053_v46 = vadd.f32 %v1052_v34, %v5019_v14 }
 0x161   : > { %v4147_v47 = vpop.f32.mrf.mxu1  ;;  %v4181_v4 = vpop.f32.mrf.mxu0 }
 0x162   : > { %5539 = vst [vmem:[#allocation11_spill] sm:$0xff] %v5103_v17  ;;  %v5106_v19 = vadd.f32 %v1383_v43, %v1053_v46  ;;  %v1074_v49 = vadd.f32 %v4147_v47, %v5021_v16 }
 0x163   : > { %v1065_v51 = vpop.f32.mrf.mxu1  ;;  %v1396_v6 = vpop.f32.mrf.mxu0 }
 0x164   : > { %5540 = vst [vmem:[#allocation12_spill] sm:$0xff] %v5106_v19  ;;  %v5109_v25 = vadd.f32 %v4181_v4, %v1074_v49  ;;  %v1066_v53 = vadd.f32 %v1065_v51, %v5027_v18 }
 0x165   : > { %v4148_v55 = vpop.f32.mrf.mxu1  ;;  %v4182_v8 = vpop.f32.mrf.mxu0 }
 0x166   : > { %5541 = vst [vmem:[#allocation13_spill] sm:$0xff] %v5109_v25  ;;  %v5112_v27 = vadd.f32 %v1396_v6, %v1066_v53  ;;  %v1077_v57 = vadd.f32 %v4148_v55, %v5029_v20 }
 0x167   : > { %v1068_v59 = vpop.f32.mrf.mxu1  ;;  %v1399_v14 = vpop.f32.mrf.mxu0 }
 0x168   : > { %5542 = vst [vmem:[#allocation14_spill] sm:$0xff] %v5112_v27  ;;  %v5115_v29 = vadd.f32 %v4182_v8, %v1077_v57  ;;  %v1069_v61 = vadd.f32 %v1068_v59, %v5035_v26 }
 0x169   : > { %v4151_v63 = vpop.f32.mrf.mxu1  ;;  %v4185_v16 = vpop.f32.mrf.mxu0 }
 0x16a   : > { %5543 = vst [vmem:[#allocation15_spill] sm:$0xff] %v5115_v29  ;;  %v5118_v31 = vadd.f32 %v1399_v14, %v1069_v61  ;;  %v1090_v1 = vadd.f32 %v4151_v63, %v5037_v28 }
 0x16b   : > { %v1081_v3 = vpop.f32.mrf.mxu1  ;;  %v1412_v18 = vpop.f32.mrf.mxu0 }
 0x16c   : > { %5544 = vst [vmem:[#allocation16_spill] sm:$0xff] %v5118_v31  ;;  %v5121_v35 = vadd.f32 %v4185_v16, %v1090_v1  ;;  %v1082_v9 = vadd.f32 %v1081_v3, %v5043_v30 }
 0x16d   : > { %v4152_v7 = vpop.f32.mrf.mxu1  ;;  %v4186_v20 = vpop.f32.mrf.mxu0 }
 0x16e   : > { %5545 = vst [vmem:[#allocation17_spill] sm:$0xff] %v5121_v35  ;;  %v5124_v37 = vadd.f32 %v1412_v18, %v1082_v9  ;;  %v1093_v12 = vadd.f32 %v4152_v7, %v5045_v32 }
 0x16f   : > { %v1084_v13 = vpop.f32.mrf.mxu1  ;;  %v1415_v26 = vpop.f32.mrf.mxu0 }
 0x170   : > { %5546 = vst [vmem:[#allocation18_spill] sm:$0xff] %v5124_v37  ;;  %v5127_v22 = vadd.f32 %v4186_v20, %v1093_v12  ;;  %v1085_v23 = vadd.f32 %v1084_v13, %v5049_v36 }
 0x171   : > { %v4155_v41 = vpop.f32.mrf.mxu1  ;;  %v4189_v28 = vpop.f32.mrf.mxu0 }
 0x172   : > { %5547 = vst [vmem:[#allocation19_spill] sm:$0xff] %v5127_v22  ;;  %v5130_v33 = vadd.f32 %v1415_v26, %v1085_v23  ;;  %v1106_v34 = vadd.f32 %v4155_v41, %v5051_v38 }
 0x173   : > { %v1097_v43 = vpop.f32.mrf.mxu1  ;;  %v1428_v30 = vpop.f32.mrf.mxu0 }
 0x174   : > { %5548 = vst [vmem:[#allocation20_spill] sm:$0xff] %v5130_v33  ;;  %v5133_v46 = vadd.f32 %v4189_v28, %v1106_v34  ;;  %v1098_v47 = vadd.f32 %v1097_v43, %v5055_v40 }
 0x175   : > { %v4156_v4 = vpop.f32.mrf.mxu1  ;;  %v4190_v32 = vpop.f32.mrf.mxu0 }
 0x176   : > { %5549 = vst [vmem:[#allocation21_spill] sm:$0xff] %v5133_v46  ;;  %v5136_v49 = vadd.f32 %v1428_v30, %v1098_v47  ;;  %v1109_v51 = vadd.f32 %v4156_v4, %v5057_v42 }
 0x177   : > { %v1100_v6 = vpop.f32.mrf.mxu1  ;;  %v1431_v36 = vpop.f32.mrf.mxu0 }
 0x178   : > { %5550 = vst [vmem:[#allocation22_spill] sm:$0xff] %v5136_v49  ;;  %v5139_v53 = vadd.f32 %v4190_v32, %v1109_v51  ;;  %v1101_v55 = vadd.f32 %v1100_v6, %v5061_v44 }
 0x179   : > { %v4195_v8 = vpop.f32.mrf.mxu1  ;;  %v5142_v38 = vpop.f32.mrf.mxu0 }
 0x17a   : > { %5551 = vst [vmem:[#allocation23_spill] sm:$0xff] %v5139_v53  ;;  %v5144_v57 = vadd.f32 %v1431_v36, %v1101_v55 }
 0x17b   : > { %v1679_v59 = vpop.f32.mrf.mxu1  ;;  %v5146_v14 = vpop.f32.mrf.mxu0 }
 0x17c   : > { %5552 = vst [vmem:[#allocation24_spill] sm:$0xff] %v5144_v57 }
 0x17d   : > { %v5148_v40 = vpop.f32.mrf.mxu1  ;;  %v5150_v61 = vpop.f32.mrf.mxu0 }
 0x17f   : > { %v5152_v63 = vpop.f32.mrf.mxu1  ;;  %v5154_v42 = vpop.f32.mrf.mxu0 }
 0x181   : > { %v5156_v16 = vpop.f32.mrf.mxu1  ;;  %v5158_v1 = vpop.f32.mrf.mxu0 }
 0x183   : > { %v5160_v44 = vpop.f32.mrf.mxu1  ;;  %v5162_v3 = vpop.f32.mrf.mxu0 }
 0x185   : > { %v5164_v18 = vpop.f32.mrf.mxu1  ;;  %v5166_v9 = vpop.f32.mrf.mxu0 }
 0x187   : > { %v5168_v7 = vpop.f32.mrf.mxu1  ;;  %v5170_v20 = vpop.f32.mrf.mxu0 }
 0x189   : > { %v5172_v12 = vpop.f32.mrf.mxu1  ;;  %v5174_v13 = vpop.f32.mrf.mxu0 }
 0x18b   : > { %v5176_v26 = vpop.f32.mrf.mxu1  ;;  %v5178_v23 = vpop.f32.mrf.mxu0 }
 0x18d   : > { %v5180_v41 = vpop.f32.mrf.mxu1  ;;  %v5182_v28 = vpop.f32.mrf.mxu0 }
 0x18f   : > { %v5184_v34 = vpop.f32.mrf.mxu1  ;;  %v5186_v43 = vpop.f32.mrf.mxu0 }
 0x191   : > { %v5188_v30 = vpop.f32.mrf.mxu1  ;;  %v5190_v47 = vpop.f32.mrf.mxu0 }
 0x193   : > { %v5192_v4 = vpop.f32.mrf.mxu1  ;;  %v5194_v32 = vpop.f32.mrf.mxu0 }
 0x195   : > { %v5196_v51 = vpop.f32.mrf.mxu1  ;;  %v5198_v6 = vpop.f32.mrf.mxu0 }
 0x197   : > { %v5200_v36 = vpop.f32.mrf.mxu1  ;;  %v5202_v55 = vpop.f32.mrf.mxu0 }
 0x199   : > { %v5204_v57 = vpop.f32.mrf.mxu1  ;;  %v5206_v53 = vpop.f32.mrf.mxu0 }
 0x19b   : > { %v5208_v49 = vpop.f32.mrf.mxu1  ;;  %v5210_v46 = vpop.f32.mrf.mxu0 }
 0x19c   : > { %5553 = vst [vmem:[#allocation25_spill] sm:$0xff] %v5210_v46 }
 0x19d   : > { %v5212_v33 = vpop.f32.mrf.mxu1  ;;  %v5214_v22 = vpop.f32.mrf.mxu0 }
 0x19e   : > { %5554 = vst [vmem:[#allocation26_spill] sm:$0xff] %v5212_v33  ;;  %5555 = vst [vmem:[#allocation27_spill] sm:$0xff] %v5214_v22 }
 0x19f   : > { %v5216_v37 = vpop.f32.mrf.mxu1  ;;  %v5218_v35 = vpop.f32.mrf.mxu0 }
 0x1a0   : > { %5556 = vst [vmem:[#allocation28_spill] sm:$0xff] %v5216_v37  ;;  %5557 = vst [vmem:[#allocation29_spill] sm:$0xff] %v5218_v35 }
 0x1a1   : > { %v5220_v31 = vpop.f32.mrf.mxu1  ;;  %v5222_v29 = vpop.f32.mrf.mxu0 }
 0x1a2   : > { %5558 = vst [vmem:[#allocation30_spill] sm:$0xff] %v5220_v31  ;;  %5559 = vst [vmem:[#allocation31_spill] sm:$0xff] %v5222_v29 }
 0x1a3   : > { %v5224_v27 = vpop.f32.mrf.mxu1  ;;  %v5226_v25 = vpop.f32.mrf.mxu0 }
 0x1a4   : > { %5560 = vst [vmem:[#allocation32_spill] sm:$0xff] %v5224_v27  ;;  %5561 = vst [vmem:[#allocation33_spill] sm:$0xff] %v5226_v25 }
 0x1a5   : > { %v5228_v19 = vpop.f32.mrf.mxu1  ;;  %v5230_v17 = vpop.f32.mrf.mxu0 }
 0x1a6   : > { %5562 = vst [vmem:[#allocation34_spill] sm:$0xff] %v5228_v19  ;;  %5563 = vst [vmem:[#allocation35_spill] sm:$0xff] %v5230_v17 }
 0x1a7   : > { %v5232_v46 = vpop.f32.mrf.mxu1  ;;  %v5234_v33 = vpop.f32.mrf.mxu0 }
 0x1a8   : > { %5564 = vst [vmem:[#allocation36_spill] sm:$0xff] %v5232_v46  ;;  %5565 = vst [vmem:[#allocation37_spill] sm:$0xff] %v5234_v33 }
 0x1a9   : > { %v5236_v22 = vpop.f32.mrf.mxu1  ;;  %v5238_v37 = vpop.f32.mrf.mxu0 }
 0x1aa   : > { %5566 = vst [vmem:[#allocation38_spill] sm:$0xff] %v5236_v22  ;;  %5567 = vst [vmem:[#allocation39_spill] sm:$0xff] %v5238_v37  ;;  %v1808_v37 = vadd.f32 %v4195_v8, %v5063_v50  ;;  %v1807_v50 = vadd.f32 %v5152_v63, %v5069_v62  ;;  %v1810_v63 = vadd.f32 %v5160_v44, %v5073_v10 }
 0x1ab   : > { %v5240_v35 = vpop.f32.mrf.mxu1  ;;  %v5242_v31 = vpop.f32.mrf.mxu0 }
 0x1ac   : > { %5568 = vst [vmem:[#allocation40_spill] sm:$0xff] %v5240_v35  ;;  %5569 = vst [vmem:[#allocation41_spill] sm:$0xff] %v5242_v31 }
 0x1ad   : > { %v5244_v29 = vpop.f32.mrf.mxu1  ;;  %v5246_v27 = vpop.f32.mrf.mxu0 }
 0x1ae   : > { %5570 = vst [vmem:[#allocation42_spill] sm:$0xff] %v5244_v29  ;;  %5571 = vst [vmem:[#allocation43_spill] sm:$0xff] %v5246_v27  ;;  %v1806_v27 = vadd.f32 %v1679_v59, %v5065_v54 }
 0x1af   : > { %v5248_v25 = vpop.f32.mrf.mxu1  ;;  %v5250_v19 = vpop.f32.mrf.mxu0 }
 0x1b0   : > { %5572 = vst [vmem:[#allocation44_spill] sm:$0xff] %v5248_v25  ;;  %5573 = vst [vmem:[#allocation45_spill] sm:$0xff] %v5250_v19 }
 0x1b1   : > { %v5252_v17 = vpop.f32.mrf.mxu1  ;;  %v5254_v46 = vpop.f32.mrf.mxu0 }
 0x1b2   : > { %5574 = vst [vmem:[#allocation46_spill] sm:$0xff] %v5252_v17  ;;  %5575 = vst [vmem:[#allocation47_spill] sm:$0xff] %v5254_v46  ;;  %v2171_v17 = vadd.f32 %v5142_v38, %v1808_v37  ;;  %v1809_v46 = vadd.f32 %v5148_v40, %v5067_v58  ;;  %v1812_v58 = vadd.f32 %v5156_v16, %v5071_v2  ;;  %v5281_v38 = vld [vmem:[#allocation7] ss:$0 sm:$0xff] }
 0x1b3   : > { %v5256_v33 = vpop.f32.mrf.mxu1  ;;  %v5258_v22 = vpop.f32.mrf.mxu0 }
 0x1b4   : > { %5576 = vst [vmem:[#allocation48_spill] sm:$0xff] %v5256_v33  ;;  %5577 = vst [vmem:[#allocation49_spill] sm:$0xff] %v5258_v22  ;;  %v2169_v22 = vadd.f32 %v5146_v14, %v1806_v27  ;;  %v2170_v14 = vadd.f32 %v5154_v42, %v1807_v50 }
 0x1b5   : > { %v5261_v35 = vpop.f32.mrf.mxu1  ;;  %v5263_v31 = vpop.f32.mrf.mxu0 }
 0x1b6   : > { %5578 = vst [vmem:[#allocation50_spill] sm:$0xff] %v5263_v31  ;;  %v5276_v31 = vld [vmem:[#allocation5] ss:$0 sm:$0xff] }
 0x1b7   : > { %v5266_v29 = vpop.f32.mrf.mxu1  ;;  %v5268_v25 = vpop.f32.mrf.mxu0 }
 0x1b8   : > { %5579 = vst [vmem:[#allocation51_spill] sm:$0xff] %v5266_v29  ;;  %5580 = vst [vmem:[#allocation52_spill] sm:$0xff] %v5268_v25  ;;  %v2172_v25 = vadd.f32 %v5150_v61, %v1809_v46 }
 0x1b9   : > { %v4263_v33 = vpop.f32.mrf.mxu1  ;;  %v4297_v19 = vpop.f32.mrf.mxu0 }
 0x1ba   : > { %v2534_v8 = vadd.f32 %v4263_v33, %v2171_v17 }
 0x1bb   : > { %v2405_v54 = vpop.f32.mrf.mxu1  ;;  %v2768_v59 = vpop.f32.mrf.mxu0 }
 0x1bc   : > { %v2897_v29 = vadd.f32 %v4297_v19, %v2534_v8  ;;  %v2532_v37 = vadd.f32 %v2405_v54, %v2169_v22  ;;  %v1813_v19 = vadd.f32 %v5164_v18, %v5075_v21  ;;  %v2173_v54 = vadd.f32 %v5162_v3, %v1810_v63 }
 0x1bd   : > { %v4264_v40 = vpop.f32.mrf.mxu1  ;;  %v4298_v27 = vpop.f32.mrf.mxu0 }
 0x1be   : > { %v2936_v62 = vmul.f32 %v5276_v31, %v2897_v29  ;;  %v2895_v17 = vadd.f32 %v2768_v59, %v2532_v37  ;;  %v2535_v33 = vadd.f32 %v4264_v40, %v2172_v25  ;;  %v2175_v29 = vadd.f32 %v5158_v1, %v1812_v58 }
 0x1bf   : > { %v2408_v22 = vpop.f32.mrf.mxu1  ;;  %v2771_v46 = vpop.f32.mrf.mxu0  ;;  %v1811_v25 = vadd.f32 %v5168_v7, %v5077_v24  ;;  %v2176_v59 = vadd.f32 %v5166_v9, %v1813_v19  ;;  %v1816_v37 = vadd.f32 %v5172_v12, %v5079_v45 }
 0x1c0   : > { %v2975_v2 = vadd.f32 %v5281_v38, %v2936_v62  ;;  %v2934_v61 = vmul.f32 %v5276_v31, %v2895_v17  ;;  %v2898_v16 = vadd.f32 %v4298_v27, %v2535_v33  ;;  %v2533_v42 = vadd.f32 %v2408_v22, %v2170_v14 }
 0x1c1   : > { %v4267_v10 = vpop.f32.mrf.mxu1  ;;  %v4301_v44 = vpop.f32.mrf.mxu0  ;;  %v2174_v62 = vadd.f32 %v5170_v20, %v1811_v25  ;;  %v1814_v17 = vadd.f32 %v5176_v26, %v5081_v48  ;;  %v2179_v20 = vadd.f32 %v5174_v13, %v1816_v37  ;;  %v1817_v48 = vadd.f32 %v5180_v41, %v5083_v52 }
 0x1c2   : > { %v3007_v50 = vmax.f32 %v2975_v2, 0.0  ;;  %v2973_v21 = vadd.f32 %v5281_v38, %v2934_v61  ;;  %v2937_v18 = vmul.f32 %v5276_v31, %v2898_v16  ;;  %v2896_v8 = vadd.f32 %v2771_v46, %v2533_v42 }
 0x1c3   : > { %v2538_v1 = vadd.f32 %v4267_v10, %v2175_v29  ;;  %v2421_v58 = vpop.f32.mrf.mxu1  ;;  %v2784_v40 = vpop.f32.mrf.mxu0  ;;  %v2177_v10 = vadd.f32 %v5178_v23, %v1814_v17  ;;  %v1815_v13 = vadd.f32 %v5184_v34, %v5085_v56  ;;  %v1820_v23 = vadd.f32 %v5188_v30, %v5087_v60 }
 0x1c4   : > { %v3939_v24 = vpack.c.bf16 %v3007_v50, %v3007_v50  ;;  %v3005_v7 = vmax.f32 %v2973_v21, 0.0  ;;  %v2976_v27 = vadd.f32 %v5281_v38, %v2937_v18  ;;  %v2935_v14 = vmul.f32 %v5276_v31, %v2896_v8 }
 0x1c5   : > { %v2901_v3 = vadd.f32 %v4301_v44, %v2538_v1  ;;  %v2536_v33 = vadd.f32 %v2421_v58, %v2173_v54  ;;  %v4268_v9 = vpop.f32.mrf.mxu1  ;;  %v4302_v63 = vpop.f32.mrf.mxu0 }
 0x1c6   : > { %3168 = vst.msk [vmem:[%s5307_s15 + $0x8] sm:$0xf] %vm3165_vm1, %v3939_v24  ;;  %v3937_v45 = vpack.c.bf16 %v3005_v7, %v3005_v7  ;;  %v3008_v12 = vmax.f32 %v2976_v27, 0.0  ;;  %v2974_v19 = vadd.f32 %v5281_v38, %v2935_v14  ;;  %v2539_v22 = vadd.f32 %v4268_v9, %v2176_v59 }
 0x1c7   : > { %v2940_v26 = vmul.f32 %v5276_v31, %v2901_v3  ;;  %v2899_v46 = vadd.f32 %v2784_v40, %v2536_v33  ;;  %v2424_v2 = vpop.f32.mrf.mxu1  ;;  %v2787_v61 = vpop.f32.mrf.mxu0  ;;  %v2180_v59 = vadd.f32 %v5182_v28, %v1817_v48  ;;  %v2178_v27 = vadd.f32 %v5186_v43, %v1815_v13 }
 0x1c8   : > { %3166 = vst.msk [vmem:[%s5307_s15] sm:$0xf] %vm3165_vm1, %v3937_v45  ;;  %v3940_v16 = vpack.c.bf16 %v3008_v12, %v3008_v12  ;;  %v3006_v42 = vmax.f32 %v2974_v19, 0.0  ;;  %v2902_v29 = vadd.f32 %v4302_v63, %v2539_v22  ;;  %v2537_v25 = vadd.f32 %v2424_v2, %v2174_v62 }
 0x1c9   : > { %v2979_v52 = vadd.f32 %v5281_v38, %v2940_v26  ;;  %v2938_v41 = vmul.f32 %v5276_v31, %v2899_v46  ;;  %v4271_v44 = vpop.f32.mrf.mxu1  ;;  %v4305_v50 = vpop.f32.mrf.mxu0  ;;  %v1818_v28 = vadd.f32 %v5192_v4, %v5089_v0  ;;  %v2183_v63 = vadd.f32 %v5190_v47, %v1820_v23 }
 0x1ca   : > { %3169 = vst.msk [vmem:[%s5307_s15 + $0xc] sm:$0xf] %vm3165_vm1, %v3940_v16  ;;  %v3938_v21 = vpack.c.bf16 %v3006_v42, %v3006_v42  ;;  %v2941_v18 = vmul.f32 %v5276_v31, %v2902_v29  ;;  %v2900_v8 = vadd.f32 %v2787_v61, %v2537_v25  ;;  %v2542_v54 = vadd.f32 %v4271_v44, %v2179_v20 }
 0x1cb   : > { %v3011_v56 = vmax.f32 %v2979_v52, 0.0  ;;  %v2977_v34 = vadd.f32 %v5281_v38, %v2938_v41  ;;  %v2437_v37 = vpop.f32.mrf.mxu1  ;;  %v2800_v1 = vpop.f32.mrf.mxu0  ;;  %v1821_v45 = vadd.f32 %v5196_v51, %v5091_v5  ;;  %v2181_v26 = vadd.f32 %v5194_v32, %v1818_v28 }
 0x1cc   : > { %3167 = vst.msk [vmem:[%s5307_s15 + $0x4] sm:$0xf] %vm3165_vm1, %v3938_v21  ;;  %v2980_v58 = vadd.f32 %v5281_v38, %v2941_v18  ;;  %v2939_v40 = vmul.f32 %v5276_v31, %v2900_v8  ;;  %v2905_v24 = vadd.f32 %v4305_v50, %v2542_v54  ;;  %v2540_v7 = vadd.f32 %v2437_v37, %v2177_v10  ;;  %v5582_v37 = vld [vmem:[#allocation26_spill] sm:$0xff] }
 0x1cd   : > { %v3943_v60 = vpack.c.bf16 %v3011_v56, %v3011_v56  ;;  %v3009_v30 = vmax.f32 %v2977_v34, 0.0  ;;  %v4272_v14 = vpop.f32.mrf.mxu1  ;;  %v4306_v62 = vpop.f32.mrf.mxu0  ;;  %v1819_v47 = vadd.f32 %v5200_v36, %v5094_v11  ;;  %v2184_v25 = vadd.f32 %v5198_v6, %v1821_v45 }
 0x1ce   : > { %v3012_v17 = vmax.f32 %v2980_v58, 0.0  ;;  %v2978_v3 = vadd.f32 %v5281_v38, %v2939_v40  ;;  %v2944_v33 = vmul.f32 %v5276_v31, %v2905_v24  ;;  %v2903_v9 = vadd.f32 %v2800_v1, %v2540_v7 }
 0x1cf   : > { %3172 = vst.msk [vmem:[%s5307_s15 + $0x18] sm:$0xf] %vm3165_vm1, %v3943_v60  ;;  %v3941_v0 = vpack.c.bf16 %v3009_v30, %v3009_v30  ;;  %v2543_v43 = vadd.f32 %v4272_v14, %v2180_v59  ;;  %v2440_v4 = vpop.f32.mrf.mxu1  ;;  %v2803_v12 = vpop.f32.mrf.mxu0  ;;  %v1824_v32 = vadd.f32 %v5204_v57, %v5097_v39  ;;  %v2182_v21 = vadd.f32 %v5202_v55, %v1819_v47  ;;  %v5581_v55 = vld [vmem:[#allocation11_spill] sm:$0xff]  ;;  %v5583_v60 = vld [vmem:[#allocation25_spill] sm:$0xff]  ;;  %v5585_v14 = vld [vmem:[#allocation28_spill] sm:$0xff] }
 0x1d0   : > { %v3944_v19 = vpack.c.bf16 %v3012_v17, %v3012_v17  ;;  %v3010_v22 = vmax.f32 %v2978_v3, 0.0  ;;  %v2983_v20 = vadd.f32 %v5281_v38, %v2944_v33  ;;  %v2942_v48 = vmul.f32 %v5276_v31, %v2903_v9 }
 0x1d1   : > { %3170 = vst.msk [vmem:[%s5307_s15 + $0x10] sm:$0xf] %vm3165_vm1, %v3941_v0  ;;  %v2906_v5 = vadd.f32 %v4306_v62, %v2543_v43  ;;  %v2541_v51 = vadd.f32 %v2440_v4, %v2178_v27  ;;  %v4275_v46 = vpop.f32.mrf.mxu1  ;;  %v4309_v2 = vpop.f32.mrf.mxu0  ;;  %v1822_v6 = vadd.f32 %v5208_v49, %v5100_v15  ;;  %v2187_v34 = vadd.f32 %v5206_v53, %v1824_v32  ;;  %v5584_v53 = vld [vmem:[#allocation12_spill] sm:$0xff]  ;;  %v5586_v4 = vld [vmem:[#allocation27_spill] sm:$0xff] }
 0x1d2   : > { %3173 = vst.msk [vmem:[%s5307_s15 + $0x1c] sm:$0xf] %vm3165_vm1, %v3944_v19  ;;  %v3942_v61 = vpack.c.bf16 %v3010_v22, %v3010_v22  ;;  %v3015_v16 = vmax.f32 %v2983_v20, 0.0  ;;  %v2981_v42 = vadd.f32 %v5281_v38, %v2942_v48  ;;  %v2546_v29 = vadd.f32 %v4275_v46, %v2183_v63  ;;  %v5587_v19 = vld [vmem:[#allocation13_spill] sm:$0xff]  ;;  %v5588_v22 = vld [vmem:[#allocation30_spill] sm:$0xff] }
 0x1d3   : > { %v2945_v11 = vmul.f32 %v5276_v31, %v2906_v5  ;;  %v2904_v36 = vadd.f32 %v2803_v12, %v2541_v51  ;;  %v2453_v10 = vpop.f32.mrf.mxu1  ;;  %v2816_v13 = vpop.f32.mrf.mxu0  ;;  %v1825_v1 = vadd.f32 %v5582_v37, %v5581_v55  ;;  %v2185_v30 = vadd.f32 %v5583_v60, %v1822_v6 }
 0x1d4   : > { %3171 = vst.msk [vmem:[%s5307_s15 + $0x14] sm:$0xf] %vm3165_vm1, %v3942_v61  ;;  %v3947_v52 = vpack.c.bf16 %v3015_v16, %v3015_v16  ;;  %v3013_v41 = vmax.f32 %v2981_v42, 0.0  ;;  %v2909_v44 = vadd.f32 %v4309_v2, %v2546_v29  ;;  %v2544_v50 = vadd.f32 %v2453_v10, %v2181_v26  ;;  %v5589_v16 = vld [vmem:[#allocation29_spill] sm:$0xff]  ;;  %v5590_v29 = vld [vmem:[#allocation14_spill] sm:$0xff] }
 0x1d5   : > { %v2984_v39 = vadd.f32 %v5281_v38, %v2945_v11  ;;  %v2943_v57 = vmul.f32 %v5276_v31, %v2904_v36  ;;  %v4276_v18 = vpop.f32.mrf.mxu1  ;;  %v4310_v8 = vpop.f32.mrf.mxu0  ;;  %v1823_v62 = vadd.f32 %v5585_v14, %v5584_v53  ;;  %v2188_v12 = vadd.f32 %v5586_v4, %v1825_v1  ;;  %v5595_v1 = vld [vmem:[#allocation33_spill] sm:$0xff] }
 0x1d6   : > { %3176 = vst.msk [vmem:[%s5307_s15 + $0x28] sm:$0xf] %vm3165_vm1, %v3947_v52  ;;  %v3945_v54 = vpack.c.bf16 %v3013_v41, %v3013_v41  ;;  %v2948_v59 = vmul.f32 %v5276_v31, %v2909_v44  ;;  %v2907_v23 = vadd.f32 %v2816_v13, %v2544_v50  ;;  %v2547_v56 = vadd.f32 %v4276_v18, %v2184_v25  ;;  %v5591_v25 = vld [vmem:[#allocation32_spill] sm:$0xff] }
 0x1d7   : > { %v3016_v15 = vmax.f32 %v2984_v39, 0.0  ;;  %v2982_v49 = vadd.f32 %v5281_v38, %v2943_v57  ;;  %v2456_v58 = vpop.f32.mrf.mxu1  ;;  %v2819_v40 = vpop.f32.mrf.mxu0  ;;  %v1828_v20 = vadd.f32 %v5588_v22, %v5587_v19  ;;  %v2186_v42 = vadd.f32 %v5589_v16, %v1823_v62  ;;  %v5593_v39 = vld [vmem:[#allocation15_spill] sm:$0xff]  ;;  %v5594_v57 = vld [vmem:[#allocation34_spill] sm:$0xff] }
 0x1d8   : > { %3174 = vst.msk [vmem:[%s5307_s15 + $0x20] sm:$0xf] %vm3165_vm1, %v3945_v54  ;;  %v2987_v24 = vadd.f32 %v5281_v38, %v2948_v59  ;;  %v2946_v7 = vmul.f32 %v5276_v31, %v2907_v23  ;;  %v2910_v27 = vadd.f32 %v4310_v8, %v2547_v56  ;;  %v2545_v28 = vadd.f32 %v2456_v58, %v2182_v21  ;;  %v5592_v21 = vld [vmem:[#allocation31_spill] sm:$0xff]  ;;  %v5597_v58 = vld [vmem:[#allocation36_spill] sm:$0xff] }
 0x1d9   : > { %v3948_v17 = vpack.c.bf16 %v3016_v15, %v3016_v15  ;;  %v3014_v3 = vmax.f32 %v2982_v49, 0.0  ;;  %v4279_v33 = vpop.f32.mrf.mxu1  ;;  %v4313_v9 = vpop.f32.mrf.mxu0  ;;  %v1826_v32 = vadd.f32 %v5591_v25, %v5590_v29  ;;  %v2191_v6 = vadd.f32 %v5592_v21, %v1828_v20  ;;  %v5596_v49 = vld [vmem:[#allocation16_spill] sm:$0xff]  ;;  %v5598_v62 = vld [vmem:[#allocation35_spill] sm:$0xff]  ;;  %v5601_v20 = vld [vmem:[#allocation37_spill] sm:$0xff] }
 0x1da   : > { %v3019_v63 = vmax.f32 %v2987_v24, 0.0  ;;  %v2985_v45 = vadd.f32 %v5281_v38, %v2946_v7  ;;  %v2949_v0 = vmul.f32 %v5276_v31, %v2910_v27  ;;  %v2908_v43 = vadd.f32 %v2819_v40, %v2545_v28 }
 0x1db   : > { %3177 = vst.msk [vmem:[%s5307_s15 + $0x2c] sm:$0xf] %vm3165_vm1, %v3948_v17  ;;  %v3946_v48 = vpack.c.bf16 %v3014_v3, %v3014_v3  ;;  %v2550_v26 = vadd.f32 %v4279_v33, %v2187_v34  ;;  %v2469_v47 = vpop.f32.mrf.mxu1  ;;  %v2832_v5 = vpop.f32.mrf.mxu0  ;;  %v1829_v18 = vadd.f32 %v5594_v57, %v5593_v39  ;;  %v2189_v15 = vadd.f32 %v5595_v1, %v1826_v32  ;;  %v5599_v3 = vld [vmem:[#allocation17_spill] sm:$0xff]  ;;  %v5600_v33 = vld [vmem:[#allocation38_spill] sm:$0xff]  ;;  %v5604_v32 = vld [vmem:[#allocation39_spill] sm:$0xff] }
 0x1dc   : > { %v3951_v51 = vpack.c.bf16 %v3019_v63, %v3019_v63  ;;  %v3017_v46 = vmax.f32 %v2985_v45, 0.0  ;;  %v2988_v2 = vadd.f32 %v5281_v38, %v2949_v0  ;;  %v2947_v61 = vmul.f32 %v5276_v31, %v2908_v43 }
 0x1dd   : > { %3175 = vst.msk [vmem:[%s5307_s15 + $0x24] sm:$0xf] %vm3165_vm1, %v3946_v48  ;;  %v2913_v11 = vadd.f32 %v4313_v9, %v2550_v26  ;;  %v2548_v36 = vadd.f32 %v2469_v47, %v2185_v30  ;;  %v4280_v10 = vpop.f32.mrf.mxu1  ;;  %v4314_v13 = vpop.f32.mrf.mxu0  ;;  %v1827_v40 = vadd.f32 %v5597_v58, %v5596_v49  ;;  %v2192_v17 = vadd.f32 %v5598_v62, %v1829_v18  ;;  %v5602_v26 = vld [vmem:[#allocation18_spill] sm:$0xff]  ;;  %v5603_v47 = vld [vmem:[#allocation40_spill] sm:$0xff]  ;;  %v5607_v18 = vld [vmem:[#allocation41_spill] sm:$0xff] }
 0x1de   : > { %3180 = vst.msk [vmem:[%s5307_s15 + $0x38] sm:$0xf] %vm3165_vm1, %v3951_v51  ;;  %v3949_v52 = vpack.c.bf16 %v3017_v46, %v3017_v46  ;;  %v3020_v41 = vmax.f32 %v2988_v2, 0.0  ;;  %v2986_v44 = vadd.f32 %v5281_v38, %v2947_v61  ;;  %v2551_v50 = vadd.f32 %v4280_v10, %v2188_v12  ;;  %v5606_v10 = vld [vmem:[#allocation42_spill] sm:$0xff] }
 0x1df   : > { %v2952_v8 = vmul.f32 %v5276_v31, %v2913_v11  ;;  %v2911_v54 = vadd.f32 %v2832_v5, %v2548_v36  ;;  %v2472_v59 = vpop.f32.mrf.mxu1  ;;  %v2835_v23 = vpop.f32.mrf.mxu0  ;;  %v1832_v9 = vadd.f32 %v5600_v33, %v5599_v3  ;;  %v2190_v48 = vadd.f32 %v5601_v20, %v1827_v40  ;;  %v5605_v36 = vld [vmem:[#allocation19_spill] sm:$0xff]  ;;  %v5612_v33 = vld [vmem:[#allocation21_spill] sm:$0xff] }
 0x1e0   : > { %3178 = vst.msk [vmem:[%s5307_s15 + $0x30] sm:$0xf] %vm3165_vm1, %v3949_v52  ;;  %v3952_v56 = vpack.c.bf16 %v3020_v41, %v3020_v41  ;;  %v3018_v34 = vmax.f32 %v2986_v44, 0.0  ;;  %v2914_v55 = vadd.f32 %v4314_v13, %v2551_v50  ;;  %v2549_v37 = vadd.f32 %v2472_v59, %v2186_v42  ;;  %v5609_v59 = vld [vmem:[#allocation44_spill] sm:$0xff]  ;;  %v5610_v40 = vld [vmem:[#allocation43_spill] sm:$0xff] }
 0x1e1   : > { %v2991_v24 = vadd.f32 %v5281_v38, %v2952_v8  ;;  %v2950_v7 = vmul.f32 %v5276_v31, %v2911_v54  ;;  %v4283_v27 = vpop.f32.mrf.mxu1  ;;  %v4317_v28 = vpop.f32.mrf.mxu0  ;;  %v1830_v5 = vadd.f32 %v5603_v47, %v5602_v26  ;;  %v2195_v11 = vadd.f32 %v5604_v32, %v1832_v9  ;;  %v5608_v54 = vld [vmem:[#allocation20_spill] sm:$0xff]  ;;  %v5613_v9 = vld [vmem:[#allocation46_spill] sm:$0xff] }
 0x1e2   : > { %3181 = vst.msk [vmem:[%s5307_s15 + $0x3c] sm:$0xf] %vm3165_vm1, %v3952_v56  ;;  %v3950_v60 = vpack.c.bf16 %v3018_v34, %v3018_v34  ;;  %v2953_v30 = vmul.f32 %v5276_v31, %v2914_v55  ;;  %v2912_v53 = vadd.f32 %v2835_v23, %v2549_v37  ;;  %v2554_v14 = vadd.f32 %v4283_v27, %v2191_v6  ;;  %v5615_v26 = vld [vmem:[#allocation48_spill] sm:$0xff] }
 0x1e3   : > { %v3023_v63 = vmax.f32 %v2991_v24, 0.0  ;;  %v2989_v45 = vadd.f32 %v5281_v38, %v2950_v7  ;;  %v2485_v0 = vpop.f32.mrf.mxu1  ;;  %v2848_v43 = vpop.f32.mrf.mxu0  ;;  %v1833_v13 = vadd.f32 %v5606_v10, %v5605_v36  ;;  %v2193_v8 = vadd.f32 %v5607_v18, %v1830_v5  ;;  %v5616_v5 = vld [vmem:[#allocation23_spill] sm:$0xff]  ;;  %v5618_v10 = vld [vmem:[#allocation24_spill] sm:$0xff]  ;;  %v5620_v18 = vld [vmem:[#allocation49_spill] sm:$0xff] }
 0x1e4   : > { %3179 = vst.msk [vmem:[%s5307_s15 + $0x34] sm:$0xf] %vm3165_vm1, %v3950_v60  ;;  %v2992_v4 = vadd.f32 %v5281_v38, %v2953_v30  ;;  %v2951_v12 = vmul.f32 %v5276_v31, %v2912_v53  ;;  %v2917_v19 = vadd.f32 %v4317_v28, %v2554_v14  ;;  %v2552_v22 = vadd.f32 %v2485_v0, %v2189_v15 }
 0x1e5   : > { %v3955_v51 = vpack.c.bf16 %v3023_v63, %v3023_v63  ;;  %v3021_v46 = vmax.f32 %v2989_v45, 0.0  ;;  %v4284_v2 = vpop.f32.mrf.mxu1  ;;  %v4318_v61 = vpop.f32.mrf.mxu0  ;;  %v1831_v23 = vadd.f32 %v5609_v59, %v5608_v54  ;;  %v2196_v24 = vadd.f32 %v5610_v40, %v1833_v13  ;;  %v5619_v13 = vld [vmem:[#allocation51_spill] sm:$0xff]  ;;  %v5621_v54 = vld [vmem:[#allocation50_spill] sm:$0xff] }
 0x1e6   : > { %v3024_v16 = vmax.f32 %v2992_v4, 0.0  ;;  %v2990_v42 = vadd.f32 %v5281_v38, %v2951_v12  ;;  %v2956_v29 = vmul.f32 %v5276_v31, %v2917_v19  ;;  %v2915_v25 = vadd.f32 %v2848_v43, %v2552_v22 }
 0x1e7   : > { %3184 = vst.msk [vmem:[%s5307_s15 + $0x48] sm:$0xf] %vm3165_vm1, %v3955_v51  ;;  %v3953_v52 = vpack.c.bf16 %v3021_v46, %v3021_v46  ;;  %v2555_v41 = vadd.f32 %v4284_v2, %v2192_v17  ;;  %v2488_v44 = vpop.f32.mrf.mxu1  ;;  %v2851_v50 = vpop.f32.mrf.mxu0  ;;  %v5611_v17 = vld [vmem:[#allocation45_spill] sm:$0xff]  ;;  %v1836_v63 = vadd.f32 %v5613_v9, %v5612_v33  ;;  %v1837_v51 = vadd.f32 %v5261_v35, %v5616_v5 }
 0x1e8   : > { %v3956_v21 = vpack.c.bf16 %v3024_v16, %v3024_v16  ;;  %v3022_v6 = vmax.f32 %v2990_v42, 0.0  ;;  %v2995_v39 = vadd.f32 %v5281_v38, %v2956_v29  ;;  %v2954_v57 = vmul.f32 %v5276_v31, %v2915_v25 }
 0x1e9   : > { %3182 = vst.msk [vmem:[%s5307_s15 + $0x40] sm:$0xf] %vm3165_vm1, %v3953_v52  ;;  %v2918_v56 = vadd.f32 %v4318_v61, %v2555_v41  ;;  %v2553_v34 = vadd.f32 %v2488_v44, %v2190_v48  ;;  %v4287_v55 = vpop.f32.mrf.mxu1  ;;  %v4321_v37 = vpop.f32.mrf.mxu0  ;;  %v2194_v3 = vadd.f32 %v5611_v17, %v1831_v23  ;;  %v5614_v48 = vld [vmem:[#allocation22_spill] sm:$0xff]  ;;  %v1835_v52 = vadd.f32 %v5619_v13, %v5618_v10 }
 0x1ea   : > { %3185 = vst.msk [vmem:[%s5307_s15 + $0x4c] sm:$0xf] %vm3165_vm1, %v3956_v21  ;;  %v3954_v1 = vpack.c.bf16 %v3022_v6, %v3022_v6  ;;  %v3027_v15 = vmax.f32 %v2995_v39, 0.0  ;;  %v2993_v49 = vadd.f32 %v5281_v38, %v2954_v57  ;;  %v2558_v58 = vadd.f32 %v4287_v55, %v2195_v11  ;;  %v5617_v11 = vld [vmem:[#allocation47_spill] sm:$0xff]  ;;  %v3252_v13 = vld [vmem:[%s5307_s15 + $0x38] sm:$0xff] (%p4682_p5)  }
 0x1eb   : > { %v2957_v7 = vmul.f32 %v5276_v31, %v2918_v56  ;;  %v2916_v27 = vadd.f32 %v2851_v50, %v2553_v34  ;;  %v2501_v28 = vpop.f32.mrf.mxu1  ;;  %v2864_v60 = vpop.f32.mrf.mxu0  ;;  %v1834_v47 = vadd.f32 %v5615_v26, %v5614_v48  ;;  %v2199_v36 = vadd.f32 %v5617_v11, %v1836_v63  ;;  %v3240_v11 = vld [vmem:[%s5307_s15 + $0x20] sm:$0xff] (%p4682_p5)   ;;  %v3248_v10 = vld [vmem:[%s5307_s15 + $0x30] sm:$0xff] (%p4682_p5)   ;;  %3253 = vst [vmem:[%s3207_s14 + $0x70] sm:$0xff] (%p4682_p5), %v3252_v13  }
 0x1ec   : > { %3183 = vst.msk [vmem:[%s5307_s15 + $0x44] sm:$0xf] %vm3165_vm1, %v3954_v1  ;;  %v3959_v30 = vpack.c.bf16 %v3027_v15, %v3027_v15  ;;  %v3025_v53 = vmax.f32 %v2993_v49, 0.0  ;;  %v2921_v14 = vadd.f32 %v4321_v37, %v2558_v58  ;;  %v2556_v62 = vadd.f32 %v2501_v28, %v2193_v8  ;;  %v5622_v58 = vld [vmem:[#allocation52_spill] sm:$0xff]  ;;  %3241 = vst [vmem:[%s3207_s14 + $0x40] sm:$0xff] (%p4682_p5), %v3240_v11  }
 0x1ed   : > { %v2996_v45 = vadd.f32 %v5281_v38, %v2957_v7  ;;  %v2955_v0 = vmul.f32 %v5276_v31, %v2916_v27  ;;  %v4288_v43 = vpop.f32.mrf.mxu1  ;;  %v4322_v4 = vpop.f32.mrf.mxu0  ;;  %v2197_v8 = vadd.f32 %v5620_v18, %v1834_v47  ;;  %v2200_v59 = vadd.f32 %v5621_v54, %v1837_v51  ;;  %3249 = vst [vmem:[%s3207_s14 + $0x60] sm:$0xff] (%p4682_p5), %v3248_v10  }
 0x1ee   : > { %3188 = vst.msk [vmem:[%s5307_s15 + $0x58] sm:$0xf] %vm3165_vm1, %v3959_v30  ;;  %v3957_v12 = vpack.c.bf16 %v3025_v53, %v3025_v53  ;;  %v2960_v19 = vmul.f32 %v5276_v31, %v2921_v14  ;;  %v2919_v22 = vadd.f32 %v2864_v60, %v2556_v62  ;;  %v2559_v20 = vadd.f32 %v4288_v43, %v2196_v24 }
 0x1ef   : > { %v3028_v46 = vmax.f32 %v2996_v45, 0.0  ;;  %v2994_v2 = vadd.f32 %v5281_v38, %v2955_v0  ;;  %v2504_v61 = vpop.f32.mrf.mxu1  ;;  %v2867_v16 = vpop.f32.mrf.mxu0  ;;  %v2198_v40 = vadd.f32 %v5622_v58, %v1835_v52 }
 0x1f0   : > { %3186 = vst.msk [vmem:[%s5307_s15 + $0x50] sm:$0xf] %vm3165_vm1, %v3957_v12  ;;  %v2999_v42 = vadd.f32 %v5281_v38, %v2960_v19  ;;  %v2958_v29 = vmul.f32 %v5276_v31, %v2919_v22  ;;  %v2922_v25 = vadd.f32 %v4322_v4, %v2559_v20  ;;  %v2557_v32 = vadd.f32 %v2504_v61, %v2194_v3 }
 0x1f1   : > { %v3960_v35 = vpack.c.bf16 %v3028_v46, %v3028_v46  ;;  %v3026_v41 = vmax.f32 %v2994_v2, 0.0  ;;  %v4291_v44 = vpop.f32.mrf.mxu1  ;;  %v4325_v50 = vpop.f32.mrf.mxu0 }
 0x1f2   : > { %v3031_v21 = vmax.f32 %v2999_v42, 0.0  ;;  %v2997_v6 = vadd.f32 %v5281_v38, %v2958_v29  ;;  %v2961_v39 = vmul.f32 %v5276_v31, %v2922_v25  ;;  %v2920_v57 = vadd.f32 %v2867_v16, %v2557_v32  ;;  %v3232_v25 = vld [vmem:[%s5307_s15 + $0x10] sm:$0xff] (%p4682_p5)   ;;  %v3236_v32 = vld [vmem:[%s5307_s15 + $0x18] sm:$0xff] (%p4682_p5)  }
 0x1f3   : > { %3189 = vst.msk [vmem:[%s5307_s15 + $0x5c] sm:$0xf] %vm3165_vm1, %v3960_v35  ;;  %v3958_v23 = vpack.c.bf16 %v3026_v41, %v3026_v41  ;;  %v2562_v56 = vadd.f32 %v4291_v44, %v2199_v36  ;;  %v2517_v34 = vpop.f32.mrf.mxu1  ;;  %v2880_v55 = vpop.f32.mrf.mxu0  ;;  %v3244_v36 = vld [vmem:[%s5307_s15 + $0x28] sm:$0xff] (%p4682_p5)   ;;  %3233 = vst [vmem:[%s3207_s14 + $0x20] sm:$0xff] (%p4682_p5), %v3232_v25   ;;  %v3256_v52 = vld [vmem:[%s5307_s15 + $0x40] sm:$0xff] (%p4682_p5)  }
 0x1f4   : > { %v3963_v37 = vpack.c.bf16 %v3031_v21, %v3031_v21  ;;  %v3029_v1 = vmax.f32 %v2997_v6, 0.0  ;;  %v3000_v15 = vadd.f32 %v5281_v38, %v2961_v39  ;;  %v2959_v49 = vmul.f32 %v5276_v31, %v2920_v57  ;;  %3237 = vst [vmem:[%s3207_s14 + $0x30] sm:$0xff] (%p4682_p5), %v3236_v32   ;;  %3245 = vst [vmem:[%s3207_s14 + $0x50] sm:$0xff] (%p4682_p5), %v3244_v36   ;;  %v3260_v35 = vld [vmem:[%s5307_s15 + $0x48] sm:$0xff] (%p4682_p5)  }
 0x1f5   : > { %3187 = vst.msk [vmem:[%s5307_s15 + $0x54] sm:$0xf] %vm3165_vm1, %v3958_v23  ;;  %v2925_v24 = vadd.f32 %v4325_v50, %v2562_v56  ;;  %v2560_v7 = vadd.f32 %v2517_v34, %v2197_v8  ;;  %v4292_v27 = vpop.f32.mrf.mxu1  ;;  %v4326_v28 = vpop.f32.mrf.mxu0  ;;  %3257 = vst [vmem:[%s3207_s14 + $0x80] sm:$0xff] (%p4682_p5), %v3256_v52  }
 0x1f6   : > { %3192 = vst.msk [vmem:[%s5307_s15 + $0x68] sm:$0xf] %vm3165_vm1, %v3963_v37  ;;  %v3961_v60 = vpack.c.bf16 %v3029_v1, %v3029_v1  ;;  %v3032_v30 = vmax.f32 %v3000_v15, 0.0  ;;  %v2998_v53 = vadd.f32 %v5281_v38, %v2959_v49  ;;  %v2563_v14 = vadd.f32 %v4292_v27, %v2200_v59  ;;  %3261 = vst [vmem:[%s3207_s14 + $0x90] sm:$0xff] (%p4682_p5), %v3260_v35  }
 0x1f7   : > { %v2964_v62 = vmul.f32 %v5276_v31, %v2925_v24  ;;  %v2923_v17 = vadd.f32 %v2880_v55, %v2560_v7  ;;  %v2520_v3 = vpop.f32.mrf.mxu1  ;;  %v2883_v4 = vpop.f32.mrf.mxu0 }
 0x1f8   : > { %3190 = vst.msk [vmem:[%s5307_s15 + $0x60] sm:$0xf] %vm3165_vm1, %v3961_v60  ;;  %v3964_v33 = vpack.c.bf16 %v3032_v30, %v3032_v30  ;;  %v3030_v9 = vmax.f32 %v2998_v53, 0.0  ;;  %v2926_v63 = vadd.f32 %v4326_v28, %v2563_v14  ;;  %v2561_v45 = vadd.f32 %v2520_v3, %v2198_v40 }
 0x1f9   : > { %v3003_v0 = vadd.f32 %v5281_v38, %v2964_v62  ;;  %v2962_v43 = vmul.f32 %v5276_v31, %v2923_v17 }
 0x1fa   : > { %3193 = vst.msk [vmem:[%s5307_s15 + $0x6c] sm:$0xf] %vm3165_vm1, %v3964_v33  ;;  %v3962_v12 = vpack.c.bf16 %v3030_v9, %v3030_v9  ;;  %v2965_v19 = vmul.f32 %v5276_v31, %v2926_v63  ;;  %v2924_v22 = vadd.f32 %v2883_v4, %v2561_v45  ;;  %v3268_v44 = vld [vmem:[%s5307_s15 + $0x58] sm:$0xff] (%p4682_p5)  }
 0x1fb   : > { %v3035_v20 = vmax.f32 %v3003_v0, 0.0  ;;  %v3001_v48 = vadd.f32 %v5281_v38, %v2962_v43  ;;  %3269 = vst [vmem:[%s3207_s14 + $0xb0] sm:$0xff] (%p4682_p5), %v3268_v44  }
 0x1fc   : > { %3191 = vst.msk [vmem:[%s5307_s15 + $0x64] sm:$0xf] %vm3165_vm1, %v3962_v12  ;;  %v3004_v26 = vadd.f32 %v5281_v38, %v2965_v19  ;;  %v2963_v47 = vmul.f32 %v5276_v31, %v2924_v22  ;;  %v3224_v31 = vld [vmem:[%s5307_s15] sm:$0xff] (%p4682_p5)   ;;  %v3264_v41 = vld [vmem:[%s5307_s15 + $0x50] sm:$0xff] (%p4682_p5)  }
 0x1fd   : > { %v3967_v5 = vpack.c.bf16 %v3035_v20, %v3035_v20  ;;  %v3033_v51 = vmax.f32 %v3001_v48, 0.0  ;;  %3225 = vst [vmem:[%s3207_s14] sm:$0xff] (%p4682_p5), %v3224_v31   ;;  %3265 = vst [vmem:[%s3207_s14 + $0xa0] sm:$0xff] (%p4682_p5), %v3264_v41  }
 0x1fe   : > { %v3036_v46 = vmax.f32 %v3004_v26, 0.0  ;;  %v3002_v2 = vadd.f32 %v5281_v38, %v2963_v47  ;;  %v3228_v38 = vld [vmem:[%s5307_s15 + $0x8] sm:$0xff] (%p4682_p5)  }
 0x1ff   : > { %3196 = vst.msk [vmem:[%s5307_s15 + $0x78] sm:$0xf] %vm3165_vm1, %v3967_v5  ;;  %v3965_v61 = vpack.c.bf16 %v3033_v51, %v3033_v51  ;;  %3229 = vst [vmem:[%s3207_s14 + $0x10] sm:$0xff] (%p4682_p5), %v3228_v38  }
 0x200   : > { %v3968_v16 = vpack.c.bf16 %v3036_v46, %v3036_v46  ;;  %v3034_v42 = vmax.f32 %v3002_v2, 0.0  ;;  %3204 = sbr.rel (!%p4682_p5) target bundleno = 525 (0x20d), region = 93 }
 0x201   : > { %3194 = vst.msk [vmem:[%s5307_s15 + $0x70] sm:$0xf] %vm3165_vm1, %v3965_v61  ;;  %v3276_v21 = vld [vmem:[%s5307_s15 + $0x68] sm:$0xff] (%p4682_p5)  }
 0x202   : > { %3197 = vst.msk [vmem:[%s5307_s15 + $0x7c] sm:$0xf] %vm3165_vm1, %v3968_v16  ;;  %v3966_v29 = vpack.c.bf16 %v3034_v42, %v3034_v42  ;;  %3277 = vst [vmem:[%s3207_s14 + $0xd0] sm:$0xff] (%p4682_p5), %v3276_v21  }
 0x203   : > { %v3272_v50 = vld [vmem:[%s5307_s15 + $0x60] sm:$0xff] (%p4682_p5)  }
 0x204   : > { %3195 = vst.msk [vmem:[%s5307_s15 + $0x74] sm:$0xf] %vm3165_vm1, %v3966_v29  ;;  %3273 = vst [vmem:[%s3207_s14 + $0xc0] sm:$0xff] (%p4682_p5), %v3272_v50  }
 0x209   : > { %v3284_v39 = vld [vmem:[%s5307_s15 + $0x78] sm:$0xff]  }
 0x20a   : > { %3285 = vst [vmem:[%s3207_s14 + $0xf0] sm:$0xff] %v3284_v39  }
 0x20b   : > { %v3280_v6 = vld [vmem:[%s5307_s15 + $0x70] sm:$0xff]  }
 0x20c   : > { %3281 = vst [vmem:[%s3207_s14 + $0xe0] sm:$0xff] %v3280_v6  }
 0x20d PF: > { %p13_p4 = scmp.ge.s32.totalorder %s4666_s19, 4   ;;  %s5623_s15 = smov %s4611_s16 }
 0x20e   : > { %s5624_s16 = smov %s4676_s22  ;;  %s5625_s17 = smov %s4666_s19 }
 0x20f   :  { %15 = sbr.rel (!%p13_p4) target bundleno = 3 (0x3), region = 178 }
 0x214   :  { %3385 = vsyncpa [#allocation4], 1 }
 0x215   :  { %3387 = vsyncpa [#allocation4 + $0x1], 1 }
 0x216   :  { %3388 = vsyncpa [#allocation6], 1 }

// kernel: inception_c_forward.11
= control target key start
LH: loop header
LB: loop body
LE: loop exit
PB: predicated region body
PF: predicated region fallthrough
CT: control target
= control target key end

     0   :  { %s4458_s15 = smov 0   ;;  %s4460_s16 = smov 0   ;;  %s5303_s0 = inlined_call_operand.vmem [shape: bf16[22,32,16], index: 0, kind: input, shape index: {}]   ;;  %s5304_s1 = inlined_call_operand.vmem [shape: bf16[7,16,16], index: 1, kind: input, shape index: {}]   ;;  %s5305_s2 = inlined_call_operand.vmem [shape: f32[1,16], index: 2, kind: input, shape index: {}]   ;;  %s5306_s3 = inlined_call_operand.vmem [shape: f32[1,16], index: 3, kind: input, shape index: {}]   ;;  %s5307_s4 = inlined_call_operand.vmem [shape: bf16[16,32,16], index: 4, kind: output, shape index: {}]  }
   0x1   :  { %s4462_s17 = smov 0  }
   0x2 LB: > { %s3389_s18 = sadd.s32 4294967295, %s4431_s17   ;;  %s4475_s19 = sadd.s32 1, %s4431_s17   ;;  %s4431_s17 = sphi %s4462_s17, %s5395_s17   ;;  %s4427_s16 = sphi %s4460_s16, %s5394_s16   ;;  %s4423_s15 = sphi %s4458_s15, %s5393_s15  }
   0x3   : > { %s18_s20 = ssub.s32 %s4431_s17, %s4475_s19  ;;  %s21_s21 = sadd.s32 1, %s4427_s16 }
   0x4   : > { %p19_p0 = scmp.eq.s32.totalorder %s18_s20, 0  ;;  %p28_p1 = scmp.ne.s32.totalorder %s4427_s16, %s4423_s15 }
   0x5   : > { %p29_p2 = scmp.eq.s32.totalorder %s4431_s17, 0  ;;  %p121_p3 = scmp.eq.s32.totalorder %s3389_s18, 1 }
   0x6   : > { %s4486_s22 = scalar_select %p19_p0, %s4427_s16, %s21_s21  }
   0x7   : > { %p30_p4 = por %p29_p2, %p28_p1  ;;  %p4488_p5 = por %p121_p3, %p28_p1 }
   0x8   : > { %p3392_p6 = scmp.ge.s32.totalorder %s4431_s17, 2 }
   0xa   : > { %152 = sbr.rel (%p3392_p6) target bundleno = 30 (0x1e), region = 28 }
   0xf   : > { %155 = sbr.rel (!%p30_p4) target bundleno = 30 (0x1e), region = 32  ;;  %s157_s24 = sand.u32 (%p30_p4), 1, %s4427_s16  }
  0x10   : > { %s3871_s25 = sshll.u32 (%p30_p4), %s4431_s17, 3  ;;  %s4264_s26 = smul.u32 (%p30_p4), 176, %s157_s24 }
  0x11   : > { %s4498_s29 = scalar_lea.vmem (%p30_p4), %s5303_s0, %s3871_s25 }
  0x12   : > { %v179_v0 = vld [vmem:[%s4498_s29] sm:$0xff] (%p30_p4)   ;;  %v183_v1 = vld [vmem:[%s4498_s29 + $0x10] sm:$0xff] (%p30_p4)   ;;  %s4506_s30 = scalar_lea.vmem (%p30_p4), [#allocation2], %s4264_s26 }
  0x13   : > { %v187_v2 = vld [vmem:[%s4498_s29 + $0x20] sm:$0xff] (%p30_p4)   ;;  %v191_v3 = vld [vmem:[%s4498_s29 + $0x30] sm:$0xff] (%p30_p4)   ;;  %180 = vst [vmem:[%s4506_s30] sm:$0xff] (%p30_p4), %v179_v0   ;;  %184 = vst [vmem:[%s4506_s30 + $0x8] sm:$0xff] (%p30_p4), %v183_v1  }
  0x14   : > { %v195_v4 = vld [vmem:[%s4498_s29 + $0x40] sm:$0xff]   ;;  %v199_v5 = vld [vmem:[%s4498_s29 + $0x50] sm:$0xff]   ;;  %188 = vst [vmem:[%s4506_s30 + $0x10] sm:$0xff] %v187_v2   ;;  %192 = vst [vmem:[%s4506_s30 + $0x18] sm:$0xff] %v191_v3  }
  0x15   : > { %196 = vst [vmem:[%s4506_s30 + $0x20] sm:$0xff] %v195_v4   ;;  %200 = vst [vmem:[%s4506_s30 + $0x28] sm:$0xff] %v199_v5   ;;  %v203_v6 = vld [vmem:[%s4498_s29 + $0x60] sm:$0xff]   ;;  %v207_v7 = vld [vmem:[%s4498_s29 + $0x70] sm:$0xff]  }
  0x16   : > { %v211_v8 = vld [vmem:[%s4498_s29 + $0x80] sm:$0xff]   ;;  %204 = vst [vmem:[%s4506_s30 + $0x30] sm:$0xff] %v203_v6   ;;  %208 = vst [vmem:[%s4506_s30 + $0x38] sm:$0xff] %v207_v7   ;;  %v215_v9 = vld [vmem:[%s4498_s29 + $0x90] sm:$0xff]  }
  0x17   : > { %212 = vst [vmem:[%s4506_s30 + $0x40] sm:$0xff] %v211_v8   ;;  %v219_v10 = vld [vmem:[%s4498_s29 + $0xa0] sm:$0xff]   ;;  %v223_v11 = vld [vmem:[%s4498_s29 + $0xb0] sm:$0xff]   ;;  %216 = vst [vmem:[%s4506_s30 + $0x48] sm:$0xff] %v215_v9  }
  0x18   : > { %220 = vst [vmem:[%s4506_s30 + $0x50] sm:$0xff] %v219_v10   ;;  %224 = vst [vmem:[%s4506_s30 + $0x58] sm:$0xff] %v223_v11   ;;  %v227_v12 = vld [vmem:[%s4498_s29 + $0xc0] sm:$0xff]   ;;  %v231_v13 = vld [vmem:[%s4498_s29 + $0xd0] sm:$0xff]  }
  0x19   : > { %v235_v14 = vld [vmem:[%s4498_s29 + $0xe0] sm:$0xff]   ;;  %228 = vst [vmem:[%s4506_s30 + $0x60] sm:$0xff] %v227_v12   ;;  %232 = vst [vmem:[%s4506_s30 + $0x68] sm:$0xff] %v231_v13   ;;  %v239_v15 = vld [vmem:[%s4498_s29 + $0xf0] sm:$0xff]  }
  0x1a   : > { %236 = vst [vmem:[%s4506_s30 + $0x70] sm:$0xff] %v235_v14   ;;  %v243_v16 = vld [vmem:[%s4498_s29 + $0x100] sm:$0xff]   ;;  %v247_v17 = vld [vmem:[%s4498_s29 + $0x110] sm:$0xff]   ;;  %240 = vst [vmem:[%s4506_s30 + $0x78] sm:$0xff] %v239_v15  }
  0x1b   : > { %244 = vst [vmem:[%s4506_s30 + $0x80] sm:$0xff] %v243_v16   ;;  %248 = vst [vmem:[%s4506_s30 + $0x88] sm:$0xff] %v247_v17   ;;  %v251_v18 = vld [vmem:[%s4498_s29 + $0x120] sm:$0xff]   ;;  %v255_v19 = vld [vmem:[%s4498_s29 + $0x130] sm:$0xff]  }
  0x1c   : > { %v259_v20 = vld [vmem:[%s4498_s29 + $0x140] sm:$0xff]   ;;  %252 = vst [vmem:[%s4506_s30 + $0x90] sm:$0xff] %v251_v18   ;;  %256 = vst [vmem:[%s4506_s30 + $0x98] sm:$0xff] %v255_v19   ;;  %v263_v21 = vld [vmem:[%s4498_s29 + $0x150] sm:$0xff]  }
  0x1d   : > { %260 = vst [vmem:[%s4506_s30 + $0xa0] sm:$0xff] %v259_v20   ;;  %264 = vst [vmem:[%s4506_s30 + $0xa8] sm:$0xff] %v263_v21  }
  0x1e PF: > { %p3395_p7 = scmp.ge.s32.totalorder %s4431_s17, 1  ;;  %p377_p8 = scmp.lt.s32.totalorder %s4431_s17, 3 }
  0x20   : > { %p378_p9 = pnand %p3395_p7, %p377_p8 }
  0x22   : > { %381 = sbr.rel (%p378_p9) target bundleno = 482 (0x1e2), region = 73 }
  0x27   : > { %v4290_v22 = vld [vmem:[%s5304_s1 + $0x8] sm:$0xff]   ;;  %s384_s7 = sand.u32 1, %s4423_s15   ;;  %vm567_vm0 = vcmask 130048   ;;  %v4293_v23 = vld [vmem:[%s5304_s1] sm:$0xff]   ;;  %v4296_v24 = vld [vmem:[%s5304_s1 + $0x10] sm:$0xff]   ;;  %vm3125_vm1 = vcmask 125952  }
  0x28   : > { %s4265_s8 = smul.u32 176, %s384_s7  ;;  %4262 = vmatprep.subr.bf16.mxu1 %v4290_v22  ;;  %4024 = vmatprep.subr.bf16.mxu0 %v4290_v22  ;;  %v4311_v39 = vld [vmem:[%s5304_s1 + $0x18] sm:$0xff]   ;;  %v4314_v40 = vld [vmem:[%s5304_s1 + $0x20] sm:$0xff]   ;;  %v4345_v57 = vld [vmem:[%s5304_s1 + $0x28] sm:$0xff]  }
  0x29   : > { %4263 = vmatpush3.bf16.msra.mxu1 %v4290_v22  ;;  %4025 = vmatpush3.bf16.msra.mxu0 %v4290_v22  ;;  %v4348_v59 = vld [vmem:[%s5304_s1 + $0x30] sm:$0xff]  }
  0x2a   : > { %s4560_s13 = scalar_lea.vmem [#allocation2], %s4265_s8  ;;  %4058 = vmatprep.subr.bf16.mxu1 %v4293_v23  ;;  %4092 = vmatprep.subr.bf16.mxu0 %v4296_v24  ;;  %s3396_s8 = sshll.u32 %s384_s7, 7 }
  0x2b   : > { %v4291_v25 = vld [vmem:[%s4560_s13 + $0x8] sm:$0xff]   ;;  %v4294_v27 = vld [vmem:[%s4560_s13 + $0x10] sm:$0xff]   ;;  %v4297_v29 = vld [vmem:[%s4560_s13 + $0x18] sm:$0xff]   ;;  %s5079_s15 = scalar_lea.vmem [#allocation3], %s3396_s8  ;;  %s3904_s7 = sshll.u32 (%p4488_p5), %s3389_s18, 3 }
  0x2c   : > { %v4292_v26 = vld [vmem:[%s4560_s13 + $0x48] sm:$0xff]   ;;  %4026 = vmatprep.mubr.msk.bf16.mxu0 %vm567_vm0, %v4291_v25  ;;  %v4295_v28 = vld [vmem:[%s4560_s13 + $0x50] sm:$0xff]   ;;  %v4298_v30 = vld [vmem:[%s4560_s13 + $0x58] sm:$0xff]   ;;  %s3167_s23 = scalar_lea.vmem (%p4488_p5), %s5307_s4, %s3904_s7 }
  0x2d   : > { %4042 = vmatprep.mubr.msk.bf16.mxu1 %vm567_vm0, %v4292_v26  ;;  %4027 = vmatmul.mubr.msk.bf16.vlgmr.msra.gmra.mxu0 %vm567_vm0, %v4294_v27  ;;  %v4299_v31 = vld [vmem:[%s4560_s13 + $0x20] sm:$0xff]   ;;  %v4301_v33 = vld [vmem:[%s4560_s13 + $0x28] sm:$0xff]   ;;  %v4303_v35 = vld [vmem:[%s4560_s13 + $0x30] sm:$0xff]  }
  0x2e   : > { %4043 = vmatmul.mubr.msk.bf16.vlgmr.msra.gmra.mxu1 %vm567_vm0, %v4295_v28  ;;  %4093 = vmatpush3.bf16.msra.mxu0 %v4296_v24  ;;  %v4300_v32 = vld [vmem:[%s4560_s13 + $0x60] sm:$0xff]   ;;  %v4302_v34 = vld [vmem:[%s4560_s13 + $0x68] sm:$0xff]   ;;  %v4304_v36 = vld [vmem:[%s4560_s13 + $0x70] sm:$0xff]  }
  0x2f   : > { %4059 = vmatpush3.bf16.msra.mxu1 %v4293_v23  ;;  %4030 = vmatprep.mubr.msk.bf16.mxu0 %vm567_vm0, %v4297_v29  ;;  %v4305_v37 = vld [vmem:[%s4560_s13 + $0x38] sm:$0xff]   ;;  %v4307_v41 = vld [vmem:[%s4560_s13 + $0x40] sm:$0xff]   ;;  %v4310_v43 = vld [vmem:[%s4560_s13 + $0x10] sm:$0xff]  }
  0x30   : > { %4046 = vmatprep.mubr.msk.bf16.mxu1 %vm567_vm0, %v4298_v30  ;;  %v4306_v38 = vld [vmem:[%s4560_s13 + $0x78] sm:$0xff]   ;;  %4126 = vmatprep.subr.bf16.mxu1 %v4311_v39  ;;  %v4308_v42 = vld [vmem:[%s4560_s13 + $0x80] sm:$0xff]   ;;  %v4312_v46 = vld [vmem:[%s4560_s13 + $0x8] sm:$0xff]  }
  0x31   : > { %4160 = vmatprep.subr.bf16.mxu0 %v4314_v40  ;;  %v4309_v44 = vld [vmem:[%s4560_s13] sm:$0xff]   ;;  %v4313_v45 = vld [vmem:[%s4560_s13 + $0x18] sm:$0xff]   ;;  %v4315_v47 = vld [vmem:[%s4560_s13 + $0x10] sm:$0xff]  }
  0x32   : > { %v4316_v48 = vld [vmem:[%s4560_s13 + $0x20] sm:$0xff]   ;;  %v4317_v49 = vld [vmem:[%s4560_s13 + $0x18] sm:$0xff]   ;;  %v4318_v50 = vld [vmem:[%s4560_s13 + $0x28] sm:$0xff]  }
  0x33   : > { %v4320_v51 = vld [vmem:[%s4560_s13 + $0x30] sm:$0xff]   ;;  %v4319_v52 = vld [vmem:[%s4560_s13 + $0x20] sm:$0xff]   ;;  %v4321_v53 = vld [vmem:[%s4560_s13 + $0x28] sm:$0xff]  }
  0x34   : > { %v4322_v54 = vld [vmem:[%s4560_s13 + $0x38] sm:$0xff]   ;;  %v4324_v55 = vld [vmem:[%s4560_s13 + $0x40] sm:$0xff]   ;;  %v4323_v56 = vld [vmem:[%s4560_s13 + $0x30] sm:$0xff]  }
  0x35   : > { %4031 = vmatmul.mubr.msk.bf16.gmra.mxu0 %vm567_vm0, %v4299_v31  ;;  %v4325_v58 = vld [vmem:[%s4560_s13 + $0x38] sm:$0xff]   ;;  %v4326_v60 = vld [vmem:[%s4560_s13 + $0x48] sm:$0xff]   ;;  %v4328_v61 = vld [vmem:[%s4560_s13 + $0x50] sm:$0xff]  }
  0x36   : > { %4047 = vmatmul.mubr.msk.bf16.gmra.mxu1 %vm567_vm0, %v4300_v32  ;;  %4034 = vmatprep.mubr.msk.bf16.mxu0 %vm567_vm0, %v4301_v33  ;;  %v4327_v62 = vld [vmem:[%s4560_s13 + $0x40] sm:$0xff]   ;;  %v4329_v63 = vld [vmem:[%s4560_s13 + $0x48] sm:$0xff]   ;;  %v4330_v0 = vld [vmem:[%s4560_s13 + $0x58] sm:$0xff]  }
  0x37   : > { %4050 = vmatprep.mubr.msk.bf16.mxu1 %vm567_vm0, %v4302_v34  ;;  %v4332_v1 = vld [vmem:[%s4560_s13 + $0x60] sm:$0xff]   ;;  %v4331_v2 = vld [vmem:[%s4560_s13 + $0x50] sm:$0xff]   ;;  %v4333_v3 = vld [vmem:[%s4560_s13 + $0x58] sm:$0xff]  }
  0x38   : > { %v4334_v4 = vld [vmem:[%s4560_s13 + $0x68] sm:$0xff]   ;;  %v4336_v5 = vld [vmem:[%s4560_s13 + $0x70] sm:$0xff]   ;;  %v4335_v6 = vld [vmem:[%s4560_s13 + $0x60] sm:$0xff]  }
  0x39   : > { %v4337_v7 = vld [vmem:[%s4560_s13 + $0x68] sm:$0xff]   ;;  %v4338_v8 = vld [vmem:[%s4560_s13 + $0x78] sm:$0xff]   ;;  %v4340_v9 = vld [vmem:[%s4560_s13 + $0x80] sm:$0xff]  }
  0x3a   : > { %v4339_v10 = vld [vmem:[%s4560_s13 + $0x70] sm:$0xff]   ;;  %v4341_v11 = vld [vmem:[%s4560_s13 + $0x78] sm:$0xff]   ;;  %v4342_v12 = vld [vmem:[%s4560_s13 + $0x88] sm:$0xff]  }
  0x3b   : > { %v4344_v13 = vld [vmem:[%s4560_s13 + $0x20] sm:$0xff]   ;;  %v4343_v14 = vld [vmem:[%s4560_s13 + $0x18] sm:$0xff]   ;;  %v4347_v15 = vld [vmem:[%s4560_s13 + $0x28] sm:$0xff]  }
  0x3c   : > { %v4346_v16 = vld [vmem:[%s4560_s13 + $0x20] sm:$0xff]   ;;  %v4349_v17 = vld [vmem:[%s4560_s13 + $0x28] sm:$0xff]   ;;  %v4350_v18 = vld [vmem:[%s4560_s13 + $0x30] sm:$0xff]  }
  0x3d   : > { %4035 = vmatmul.mubr.msk.bf16.gmra.mxu0 %vm567_vm0, %v4303_v35  ;;  %v4351_v19 = vld [vmem:[%s4560_s13 + $0x30] sm:$0xff]   ;;  %v4352_v20 = vld [vmem:[%s4560_s13 + $0x38] sm:$0xff]   ;;  %v4354_v21 = vld [vmem:[%s4560_s13 + $0x40] sm:$0xff]  }
  0x3e   : > { %4051 = vmatmul.mubr.msk.bf16.gmra.mxu1 %vm567_vm0, %v4304_v36  ;;  %4038 = vmatprep.mubr.msk.bf16.mxu0 %vm567_vm0, %v4305_v37  ;;  %v4353_v22 = vld [vmem:[%s4560_s13 + $0x38] sm:$0xff]   ;;  %v4355_v23 = vld [vmem:[%s4560_s13 + $0x40] sm:$0xff]   ;;  %v4356_v24 = vld [vmem:[%s4560_s13 + $0x48] sm:$0xff]  }
  0x3f   : > { %4054 = vmatprep.mubr.msk.bf16.mxu1 %vm567_vm0, %v4306_v38  ;;  %v4358_v25 = vld [vmem:[%s4560_s13 + $0x50] sm:$0xff]   ;;  %v4357_v26 = vld [vmem:[%s4560_s13 + $0x48] sm:$0xff]   ;;  %v4360_v27 = vld [vmem:[%s4560_s13 + $0x58] sm:$0xff]  }
  0x40   : > { %v4359_v28 = vld [vmem:[%s4560_s13 + $0x50] sm:$0xff]   ;;  %v4362_v29 = vld [vmem:[%s4560_s13 + $0x60] sm:$0xff]   ;;  %v4361_v30 = vld [vmem:[%s4560_s13 + $0x58] sm:$0xff]  }
  0x41   : > { %v4364_v31 = vld [vmem:[%s4560_s13 + $0x68] sm:$0xff]   ;;  %v4363_v32 = vld [vmem:[%s4560_s13 + $0x60] sm:$0xff]   ;;  %v4366_v33 = vld [vmem:[%s4560_s13 + $0x70] sm:$0xff]  }
  0x42   : > { %v4365_v34 = vld [vmem:[%s4560_s13 + $0x68] sm:$0xff]   ;;  %v4368_v35 = vld [vmem:[%s4560_s13 + $0x78] sm:$0xff]   ;;  %v4367_v36 = vld [vmem:[%s4560_s13 + $0x70] sm:$0xff]  }
  0x43   : > { %v4370_v37 = vld [vmem:[%s4560_s13 + $0x80] sm:$0xff]   ;;  %v4369_v38 = vld [vmem:[%s4560_s13 + $0x78] sm:$0xff]  }
  0x45   : > { %4039 = vmatmul.mubr.msk.bf16.gmra.mxu0 %vm567_vm0, %v4307_v41  ;;  %v4374_v41 = vld [vmem:[%s4560_s13 + $0x90] sm:$0xff]  }
  0x46   : > { %4055 = vmatmul.mubr.msk.bf16.gmra.mxu1 %vm567_vm0, %v4308_v42  ;;  %4094 = vmatprep.mubr.msk.bf16.mxu0 %vm567_vm0, %v4310_v43  ;;  %v4373_v42 = vld [vmem:[%s4560_s13 + $0x88] sm:$0xff]   ;;  %v4376_v43 = vld [vmem:[%s4560_s13 + $0x98] sm:$0xff]  }
  0x47   : > { %4060 = vmatprep.mubr.msk.bf16.mxu1 %vm567_vm0, %v4309_v44  ;;  %v4375_v44 = vld [vmem:[%s4560_s13 + $0x90] sm:$0xff]  }
  0x4d   : > { %4095 = vmatmul.mubr.msk.bf16.vlgmr.msra.gmra.mxu0 %vm567_vm0, %v4313_v45  ;;  %v4378_v45 = vld [vmem:[%s4560_s13 + $0x30] sm:$0xff]  }
  0x4e   : > { %4061 = vmatmul.mubr.msk.bf16.vlgmr.msra.gmra.mxu1 %vm567_vm0, %v4312_v46  ;;  %4161 = vmatpush3.bf16.msra.mxu0 %v4314_v40  ;;  %v4371_v40 = vld [vmem:[%s4560_s13 + $0x80] sm:$0xff]   ;;  %v4377_v46 = vld [vmem:[%s4560_s13 + $0x28] sm:$0xff]  }
  0x4f   : > { %4127 = vmatpush3.bf16.msra.mxu1 %v4311_v39  ;;  %4064 = vmatprep.mubr.msk.bf16.mxu1 %vm567_vm0, %v4315_v47  ;;  %v4372_v39 = vld [vmem:[%s4560_s13 + $0x88] sm:$0xff]   ;;  %v4380_v47 = vld [vmem:[%s4560_s13 + $0x38] sm:$0xff]  }
  0x50   : > { %4098 = vmatprep.mubr.msk.bf16.mxu0 %vm567_vm0, %v4316_v48  ;;  %4194 = vmatprep.subr.bf16.mxu1 %v4345_v57  ;;  %v4379_v48 = vld [vmem:[%s4560_s13 + $0x30] sm:$0xff]  }
  0x51   : > { %4228 = vmatprep.subr.bf16.mxu0 %v4348_v59 }
  0x55   : > { %4099 = vmatmul.mubr.msk.bf16.gmra.mxu0 %vm567_vm0, %v4318_v50  ;;  %v4381_v50 = vld [vmem:[%s4560_s13 + $0x38] sm:$0xff]  }
  0x56   : > { %4065 = vmatmul.mubr.msk.bf16.gmra.mxu1 %vm567_vm0, %v4317_v49  ;;  %4102 = vmatprep.mubr.msk.bf16.mxu0 %vm567_vm0, %v4320_v51  ;;  %v4382_v49 = vld [vmem:[%s4560_s13 + $0x40] sm:$0xff]   ;;  %v4384_v51 = vld [vmem:[%s4560_s13 + $0x48] sm:$0xff]  }
  0x57   : > { %4068 = vmatprep.mubr.msk.bf16.mxu1 %vm567_vm0, %v4319_v52  ;;  %v4383_v52 = vld [vmem:[%s4560_s13 + $0x40] sm:$0xff]  }
  0x5d   : > { %4103 = vmatmul.mubr.msk.bf16.gmra.mxu0 %vm567_vm0, %v4322_v54  ;;  %v4385_v54 = vld [vmem:[%s4560_s13 + $0x48] sm:$0xff]  }
  0x5e   : > { %4069 = vmatmul.mubr.msk.bf16.gmra.mxu1 %vm567_vm0, %v4321_v53  ;;  %4106 = vmatprep.mubr.msk.bf16.mxu0 %vm567_vm0, %v4324_v55  ;;  %v4386_v53 = vld [vmem:[%s4560_s13 + $0x50] sm:$0xff]   ;;  %v4388_v55 = vld [vmem:[%s4560_s13 + $0x58] sm:$0xff]  }
  0x5f   : > { %4072 = vmatprep.mubr.msk.bf16.mxu1 %vm567_vm0, %v4323_v56  ;;  %v4387_v56 = vld [vmem:[%s4560_s13 + $0x50] sm:$0xff]  }
  0x65   : > { %4107 = vmatmul.mubr.msk.bf16.gmra.mxu0 %vm567_vm0, %v4326_v60  ;;  %v4391_v60 = vld [vmem:[%s4560_s13 + $0x60] sm:$0xff]  }
  0x66   : > { %4073 = vmatmul.mubr.msk.bf16.gmra.mxu1 %vm567_vm0, %v4325_v58  ;;  %4110 = vmatprep.mubr.msk.bf16.mxu0 %vm567_vm0, %v4328_v61  ;;  %v4389_v58 = vld [vmem:[%s4560_s13 + $0x58] sm:$0xff]   ;;  %v4394_v61 = vld [vmem:[%s4560_s13 + $0x70] sm:$0xff]  }
  0x67   : > { %4076 = vmatprep.mubr.msk.bf16.mxu1 %vm567_vm0, %v4327_v62  ;;  %v4393_v62 = vld [vmem:[%s4560_s13 + $0x68] sm:$0xff]  }
  0x6d   : > { %4111 = vmatmul.mubr.msk.bf16.gmra.mxu0 %vm567_vm0, %v4330_v0  ;;  %v4395_v0 = vld [vmem:[%s4560_s13 + $0x70] sm:$0xff]  }
  0x6e   : > { %4077 = vmatmul.mubr.msk.bf16.gmra.mxu1 %vm567_vm0, %v4329_v63  ;;  %4114 = vmatprep.mubr.msk.bf16.mxu0 %vm567_vm0, %v4332_v1  ;;  %v4396_v63 = vld [vmem:[%s4560_s13 + $0x78] sm:$0xff]   ;;  %v4398_v1 = vld [vmem:[%s4560_s13 + $0x80] sm:$0xff]  }
  0x6f   : > { %4080 = vmatprep.mubr.msk.bf16.mxu1 %vm567_vm0, %v4331_v2  ;;  %v4397_v2 = vld [vmem:[%s4560_s13 + $0x78] sm:$0xff]  }
  0x75   : > { %4115 = vmatmul.mubr.msk.bf16.gmra.mxu0 %vm567_vm0, %v4334_v4 }
  0x76   : > { %4081 = vmatmul.mubr.msk.bf16.gmra.mxu1 %vm567_vm0, %v4333_v3  ;;  %4118 = vmatprep.mubr.msk.bf16.mxu0 %vm567_vm0, %v4336_v5 }
  0x77   : > { %4084 = vmatprep.mubr.msk.bf16.mxu1 %vm567_vm0, %v4335_v6 }
  0x7d   : > { %4119 = vmatmul.mubr.msk.bf16.gmra.mxu0 %vm567_vm0, %v4338_v8  ;;  %v4400_v8 = vld [vmem:[%s4560_s13 + $0x88] sm:$0xff]  }
  0x7e   : > { %4085 = vmatmul.mubr.msk.bf16.gmra.mxu1 %vm567_vm0, %v4337_v7  ;;  %4122 = vmatprep.mubr.msk.bf16.mxu0 %vm567_vm0, %v4340_v9 }
  0x7f   : > { %4088 = vmatprep.mubr.msk.bf16.mxu1 %vm567_vm0, %v4339_v10  ;;  %v4399_v10 = vld [vmem:[%s4560_s13 + $0x80] sm:$0xff]  }
  0x85   : > { %4123 = vmatmul.mubr.msk.bf16.gmra.mxu0 %vm567_vm0, %v4342_v12 }
  0x86   : > { %4089 = vmatmul.mubr.msk.bf16.gmra.mxu1 %vm567_vm0, %v4341_v11  ;;  %4162 = vmatprep.mubr.msk.bf16.mxu0 %vm567_vm0, %v4344_v13  ;;  %v4402_v11 = vld [vmem:[%s4560_s13 + $0x90] sm:$0xff]   ;;  %v4401_v13 = vld [vmem:[%s4560_s13 + $0x88] sm:$0xff]  }
  0x87   : > { %4128 = vmatprep.mubr.msk.bf16.mxu1 %vm567_vm0, %v4343_v14 }
  0x8d   : > { %4163 = vmatmul.mubr.msk.bf16.vlgmr.msra.gmra.mxu0 %vm567_vm0, %v4347_v15 }
  0x8e   : > { %4129 = vmatmul.mubr.msk.bf16.vlgmr.msra.gmra.mxu1 %vm567_vm0, %v4346_v16  ;;  %4229 = vmatpush3.bf16.msra.mxu0 %v4348_v59  ;;  %v4392_v59 = vld [vmem:[%s4560_s13 + $0x68] sm:$0xff]  }
  0x8f   : > { %4195 = vmatpush3.bf16.msra.mxu1 %v4345_v57  ;;  %4132 = vmatprep.mubr.msk.bf16.mxu1 %vm567_vm0, %v4349_v17  ;;  %v4390_v57 = vld [vmem:[%s4560_s13 + $0x60] sm:$0xff]  }
  0x90   : > { %4166 = vmatprep.mubr.msk.bf16.mxu0 %vm567_vm0, %v4350_v18 }
  0x95   : > { %4167 = vmatmul.mubr.msk.bf16.gmra.mxu0 %vm567_vm0, %v4352_v20  ;;  %v4404_v20 = vld [vmem:[%s4560_s13 + $0x98] sm:$0xff]  }
  0x96   : > { %4133 = vmatmul.mubr.msk.bf16.gmra.mxu1 %vm567_vm0, %v4351_v19  ;;  %4170 = vmatprep.mubr.msk.bf16.mxu0 %vm567_vm0, %v4354_v21 }
  0x97   : > { %4136 = vmatprep.mubr.msk.bf16.mxu1 %vm567_vm0, %v4353_v22  ;;  %v4403_v22 = vld [vmem:[%s4560_s13 + $0x90] sm:$0xff]  }
  0x9d   : > { %4171 = vmatmul.mubr.msk.bf16.gmra.mxu0 %vm567_vm0, %v4356_v24 }
  0x9e   : > { %4137 = vmatmul.mubr.msk.bf16.gmra.mxu1 %vm567_vm0, %v4355_v23  ;;  %4174 = vmatprep.mubr.msk.bf16.mxu0 %vm567_vm0, %v4358_v25  ;;  %v4406_v23 = vld [vmem:[%s4560_s13 + $0xa0] sm:$0xff]   ;;  %v4405_v25 = vld [vmem:[%s4560_s13 + $0x98] sm:$0xff]  }
  0x9f   : > { %4140 = vmatprep.mubr.msk.bf16.mxu1 %vm567_vm0, %v4357_v26 }
  0xa5   : > { %4175 = vmatmul.mubr.msk.bf16.gmra.mxu0 %vm567_vm0, %v4360_v27 }
  0xa6   : > { %4141 = vmatmul.mubr.msk.bf16.gmra.mxu1 %vm567_vm0, %v4359_v28  ;;  %4178 = vmatprep.mubr.msk.bf16.mxu0 %vm567_vm0, %v4362_v29 }
  0xa7   : > { %4144 = vmatprep.mubr.msk.bf16.mxu1 %vm567_vm0, %v4361_v30 }
  0xad   : > { %4179 = vmatmul.mubr.msk.bf16.gmra.mxu0 %vm567_vm0, %v4364_v31 }
  0xae   : > { %4145 = vmatmul.mubr.msk.bf16.gmra.mxu1 %vm567_vm0, %v4363_v32  ;;  %4182 = vmatprep.mubr.msk.bf16.mxu0 %vm567_vm0, %v4366_v33  ;;  %v4408_v32 = vld [vmem:[%s4560_s13 + $0xa8] sm:$0xff]  }
  0xaf   : > { %4148 = vmatprep.mubr.msk.bf16.mxu1 %vm567_vm0, %v4365_v34  ;;  %v4407_v34 = vld [vmem:[%s4560_s13 + $0xa0] sm:$0xff]  }
  0xb5   : > { %4183 = vmatmul.mubr.msk.bf16.gmra.mxu0 %vm567_vm0, %v4368_v35 }
  0xb6   : > { %4149 = vmatmul.mubr.msk.bf16.gmra.mxu1 %vm567_vm0, %v4367_v36  ;;  %4186 = vmatprep.mubr.msk.bf16.mxu0 %vm567_vm0, %v4370_v37 }
  0xb7   : > { %4152 = vmatprep.mubr.msk.bf16.mxu1 %vm567_vm0, %v4369_v38 }
  0xbd   : > { %4187 = vmatmul.mubr.msk.bf16.gmra.mxu0 %vm567_vm0, %v4372_v39 }
  0xbe   : > { %4153 = vmatmul.mubr.msk.bf16.gmra.mxu1 %vm567_vm0, %v4371_v40  ;;  %4190 = vmatprep.mubr.msk.bf16.mxu0 %vm567_vm0, %v4374_v41 }
  0xbf   : > { %4156 = vmatprep.mubr.msk.bf16.mxu1 %vm567_vm0, %v4373_v42 }
  0xc5   : > { %4191 = vmatmul.mubr.msk.bf16.gmra.mxu0 %vm567_vm0, %v4376_v43 }
  0xc6   : > { %4157 = vmatmul.mubr.msk.bf16.gmra.mxu1 %vm567_vm0, %v4375_v44  ;;  %4230 = vmatprep.mubr.msk.bf16.mxu0 %vm567_vm0, %v4378_v45 }
  0xc7   : > { %4196 = vmatprep.mubr.msk.bf16.mxu1 %vm567_vm0, %v4377_v46 }
  0xcd   : > { %4231 = vmatmul.mubr.msk.bf16.vlgmr.msra.gmra.mxu0 %vm567_vm0, %v4380_v47 }
  0xce   : > { %4197 = vmatmul.mubr.msk.bf16.vlgmr.msra.gmra.mxu1 %vm567_vm0, %v4379_v48  ;;  %4234 = vmatprep.mubr.msk.bf16.mxu0 %vm567_vm0, %v4382_v49 }
  0xcf   : > { %4200 = vmatprep.mubr.msk.bf16.mxu1 %vm567_vm0, %v4381_v50 }
  0xd5   : > { %4235 = vmatmul.mubr.msk.bf16.gmra.mxu0 %vm567_vm0, %v4384_v51 }
  0xd6   : > { %4201 = vmatmul.mubr.msk.bf16.gmra.mxu1 %vm567_vm0, %v4383_v52  ;;  %4238 = vmatprep.mubr.msk.bf16.mxu0 %vm567_vm0, %v4386_v53 }
  0xd7   : > { %4204 = vmatprep.mubr.msk.bf16.mxu1 %vm567_vm0, %v4385_v54 }
  0xdd   : > { %4239 = vmatmul.mubr.msk.bf16.gmra.mxu0 %vm567_vm0, %v4388_v55 }
  0xde   : > { %4205 = vmatmul.mubr.msk.bf16.gmra.mxu1 %vm567_vm0, %v4387_v56  ;;  %4242 = vmatprep.mubr.msk.bf16.mxu0 %vm567_vm0, %v4390_v57 }
  0xdf   : > { %4208 = vmatprep.mubr.msk.bf16.mxu1 %vm567_vm0, %v4389_v58 }
  0xe5   : > { %4243 = vmatmul.mubr.msk.bf16.gmra.mxu0 %vm567_vm0, %v4392_v59 }
  0xe6   : > { %4209 = vmatmul.mubr.msk.bf16.gmra.mxu1 %vm567_vm0, %v4391_v60  ;;  %4246 = vmatprep.mubr.msk.bf16.mxu0 %vm567_vm0, %v4394_v61 }
  0xe7   : > { %4212 = vmatprep.mubr.msk.bf16.mxu1 %vm567_vm0, %v4393_v62 }
  0xed   : > { %v4028_v3 = vpop.f32.mrf.mxu0  ;;  %4247 = vmatmul.mubr.msk.bf16.gmra.mxu0 %vm567_vm0, %v4396_v63 }
  0xee   : > { %v4775_v4 = vpop.f32.mrf.mxu1  ;;  %4213 = vmatmul.mubr.msk.bf16.gmra.mxu1 %vm567_vm0, %v4395_v0  ;;  %4250 = vmatprep.mubr.msk.bf16.mxu0 %vm567_vm0, %v4398_v1 }
  0xef   : > { %v650_v5 = vpop.f32.mrf.mxu0  ;;  %4216 = vmatprep.mubr.msk.bf16.mxu1 %vm567_vm0, %v4397_v2 }
  0xf0   : > { %v4780_v6 = vpop.f32.mrf.mxu1 }
  0xf1   : > { %v4029_v7 = vpop.f32.mrf.mxu0 }
  0xf2   : > { %v4783_v9 = vpop.f32.mrf.mxu1 }
  0xf3   : > { %v653_v12 = vpop.f32.mrf.mxu0 }
  0xf4   : > { %v4788_v14 = vpop.f32.mrf.mxu1 }
  0xf5   : > { %v4032_v15 = vpop.f32.mrf.mxu0  ;;  %4251 = vmatmul.mubr.msk.bf16.gmra.mxu0 %vm567_vm0, %v4400_v8 }
  0xf6   : > { %v4791_v16 = vpop.f32.mrf.mxu1  ;;  %4217 = vmatmul.mubr.msk.bf16.gmra.mxu1 %vm567_vm0, %v4399_v10  ;;  %4254 = vmatprep.mubr.msk.bf16.mxu0 %vm567_vm0, %v4402_v11 }
  0xf7   : > { %v666_v17 = vpop.f32.mrf.mxu0  ;;  %4220 = vmatprep.mubr.msk.bf16.mxu1 %vm567_vm0, %v4401_v13 }
  0xf8   : > { %v4796_v18 = vpop.f32.mrf.mxu1 }
  0xf9   : > { %v4033_v19 = vpop.f32.mrf.mxu0 }
  0xfa   : > { %v4799_v21 = vpop.f32.mrf.mxu1 }
  0xfb   : > { %v669_v24 = vpop.f32.mrf.mxu0 }
  0xfc   : > { %v4804_v26 = vpop.f32.mrf.mxu1 }
  0xfd   : > { %v4036_v27 = vpop.f32.mrf.mxu0  ;;  %4255 = vmatmul.mubr.msk.bf16.gmra.mxu0 %vm567_vm0, %v4404_v20 }
  0xfe   : > { %v4807_v28 = vpop.f32.mrf.mxu1  ;;  %4221 = vmatmul.mubr.msk.bf16.gmra.mxu1 %vm567_vm0, %v4403_v22  ;;  %4258 = vmatprep.mubr.msk.bf16.mxu0 %vm567_vm0, %v4406_v23 }
  0xff   : > { %v682_v29 = vpop.f32.mrf.mxu0  ;;  %4224 = vmatprep.mubr.msk.bf16.mxu1 %vm567_vm0, %v4405_v25 }
 0x100   : > { %v4812_v30 = vpop.f32.mrf.mxu1 }
 0x101   : > { %v4037_v31 = vpop.f32.mrf.mxu0 }
 0x102   : > { %v4815_v33 = vpop.f32.mrf.mxu1 }
 0x103   : > { %v685_v35 = vpop.f32.mrf.mxu0 }
 0x104   : > { %v4818_v36 = vpop.f32.mrf.mxu1 }
 0x105   : > { %v4040_v37 = vpop.f32.mrf.mxu0  ;;  %4259 = vmatmul.mubr.msk.bf16.gmra.mxu0 %vm567_vm0, %v4408_v32 }
 0x106   : > { %v4821_v38 = vpop.f32.mrf.mxu1  ;;  %4225 = vmatmul.mubr.msk.bf16.gmra.mxu1 %vm567_vm0, %v4407_v34 }
 0x107   : > { %v698_v39 = vpop.f32.mrf.mxu0 }
 0x108   : > { %v4824_v40 = vpop.f32.mrf.mxu1 }
 0x109   : > { %v4041_v41 = vpop.f32.mrf.mxu0 }
 0x10a   : > { %v4826_v42 = vpop.f32.mrf.mxu1 }
 0x10b   : > { %v4828_v43 = vpop.f32.mrf.mxu0 }
 0x10c   : > { %v4830_v44 = vpop.f32.mrf.mxu1 }
 0x10d   : > { %v4096_v45 = vpop.f32.mrf.mxu0 }
 0x10e   : > { %v4062_v46 = vpop.f32.mrf.mxu1 }
 0x10f   : > { %v954_v47 = vadd.f32 %v4062_v46, %v4028_v3  ;;  %v1276_v48 = vpop.f32.mrf.mxu0 }
 0x110   : > { %v945_v49 = vpop.f32.mrf.mxu1 }
 0x111   : > { %v4832_v50 = vadd.f32 %v4096_v45, %v954_v47  ;;  %v946_v51 = vadd.f32 %v945_v49, %v650_v5  ;;  %v4097_v52 = vpop.f32.mrf.mxu0 }
 0x112   : > { %v4063_v53 = vpop.f32.mrf.mxu1 }
 0x113   : > { %v4834_v54 = vadd.f32 %v1276_v48, %v946_v51  ;;  %v957_v55 = vadd.f32 %v4063_v53, %v4029_v7  ;;  %v1279_v56 = vpop.f32.mrf.mxu0 }
 0x114   : > { %v948_v57 = vpop.f32.mrf.mxu1 }
 0x115   : > { %v4836_v58 = vadd.f32 %v4097_v52, %v957_v55  ;;  %v949_v59 = vadd.f32 %v948_v57, %v653_v12  ;;  %v4100_v60 = vpop.f32.mrf.mxu0 }
 0x116   : > { %v4066_v61 = vpop.f32.mrf.mxu1 }
 0x117   : > { %v4838_v62 = vadd.f32 %v1279_v56, %v949_v59  ;;  %v970_v63 = vadd.f32 %v4066_v61, %v4032_v15  ;;  %v1292_v0 = vpop.f32.mrf.mxu0 }
 0x118   : > { %v961_v1 = vpop.f32.mrf.mxu1 }
 0x119   : > { %v4840_v2 = vadd.f32 %v4100_v60, %v970_v63  ;;  %v962_v3 = vadd.f32 %v961_v1, %v666_v17  ;;  %v4101_v5 = vpop.f32.mrf.mxu0 }
 0x11a   : > { %v4067_v8 = vpop.f32.mrf.mxu1 }
 0x11b   : > { %v4842_v10 = vadd.f32 %v1292_v0, %v962_v3  ;;  %v973_v7 = vadd.f32 %v4067_v8, %v4033_v19  ;;  %v1295_v11 = vpop.f32.mrf.mxu0 }
 0x11c   : > { %v964_v13 = vpop.f32.mrf.mxu1 }
 0x11d   : > { %v4844_v20 = vadd.f32 %v4101_v5, %v973_v7  ;;  %v965_v12 = vadd.f32 %v964_v13, %v669_v24  ;;  %v4104_v22 = vpop.f32.mrf.mxu0 }
 0x11e   : > { %v4070_v23 = vpop.f32.mrf.mxu1 }
 0x11f   : > { %v4846_v25 = vadd.f32 %v1295_v11, %v965_v12  ;;  %v986_v15 = vadd.f32 %v4070_v23, %v4036_v27  ;;  %v1308_v32 = vpop.f32.mrf.mxu0 }
 0x120   : > { %v977_v34 = vpop.f32.mrf.mxu1 }
 0x121   : > { %v4848_v45 = vadd.f32 %v4104_v22, %v986_v15  ;;  %v978_v17 = vadd.f32 %v977_v34, %v682_v29  ;;  %v4105_v46 = vpop.f32.mrf.mxu0 }
 0x122   : > { %v4071_v47 = vpop.f32.mrf.mxu1 }
 0x123   : > { %v4850_v48 = vadd.f32 %v1308_v32, %v978_v17  ;;  %v989_v19 = vadd.f32 %v4071_v47, %v4037_v31  ;;  %v1311_v49 = vpop.f32.mrf.mxu0 }
 0x124   : > { %v980_v51 = vpop.f32.mrf.mxu1 }
 0x125   : > { %v4852_v52 = vadd.f32 %v4105_v46, %v989_v19  ;;  %v981_v24 = vadd.f32 %v980_v51, %v685_v35  ;;  %v4108_v53 = vpop.f32.mrf.mxu0 }
 0x126   : > { %v4074_v55 = vpop.f32.mrf.mxu1 }
 0x127   : > { %v4854_v56 = vadd.f32 %v1311_v49, %v981_v24  ;;  %v1002_v27 = vadd.f32 %v4074_v55, %v4040_v37  ;;  %v1324_v57 = vpop.f32.mrf.mxu0 }
 0x128   : > { %v993_v59 = vpop.f32.mrf.mxu1 }
 0x129   : > { %v4856_v60 = vadd.f32 %v4108_v53, %v1002_v27  ;;  %v994_v29 = vadd.f32 %v993_v59, %v698_v39  ;;  %v4109_v61 = vpop.f32.mrf.mxu0 }
 0x12a   : > { %v4075_v63 = vpop.f32.mrf.mxu1 }
 0x12b   : > { %v4858_v0 = vadd.f32 %v1324_v57, %v994_v29  ;;  %v1005_v31 = vadd.f32 %v4075_v63, %v4041_v41  ;;  %v1327_v1 = vpop.f32.mrf.mxu0 }
 0x12c   : > { %v996_v3 = vpop.f32.mrf.mxu1 }
 0x12d   : > { %v4860_v5 = vadd.f32 %v4109_v61, %v1005_v31  ;;  %v997_v35 = vadd.f32 %v996_v3, %v4828_v43  ;;  %v4112_v8 = vpop.f32.mrf.mxu0 }
 0x12e   : > { %v4078_v7 = vpop.f32.mrf.mxu1 }
 0x12f   : > { %v4863_v11 = vadd.f32 %v1327_v1, %v997_v35  ;;  %v1018_v37 = vadd.f32 %v4078_v7, %v4775_v4  ;;  %v1340_v13 = vpop.f32.mrf.mxu0 }
 0x130   : > { %v1009_v12 = vpop.f32.mrf.mxu1 }
 0x131   : > { %v4866_v39 = vadd.f32 %v4112_v8, %v1018_v37  ;;  %v1010_v22 = vadd.f32 %v1009_v12, %v4780_v6  ;;  %v4113_v23 = vpop.f32.mrf.mxu0 }
 0x132   : > { %v4079_v41 = vpop.f32.mrf.mxu1 }
 0x133   : > { %v4869_v15 = vadd.f32 %v1340_v13, %v1010_v22  ;;  %v1021_v32 = vadd.f32 %v4079_v41, %v4783_v9  ;;  %v1343_v34 = vpop.f32.mrf.mxu0 }
 0x134   : > { %v1012_v43 = vpop.f32.mrf.mxu1 }
 0x135   : > { %v4872_v17 = vadd.f32 %v4113_v23, %v1021_v32  ;;  %v1013_v46 = vadd.f32 %v1012_v43, %v4788_v14  ;;  %v4116_v47 = vpop.f32.mrf.mxu0 }
 0x136   : > { %v4082_v4 = vpop.f32.mrf.mxu1 }
 0x137   : > { %5309 = vst [vmem:[#allocation4_spill] sm:$0xff] %v4872_v17  ;;  %v4875_v19 = vadd.f32 %v1343_v34, %v1013_v46  ;;  %v1034_v49 = vadd.f32 %v4082_v4, %v4791_v16  ;;  %v1356_v51 = vpop.f32.mrf.mxu0 }
 0x138   : > { %v1025_v6 = vpop.f32.mrf.mxu1 }
 0x139   : > { %5310 = vst [vmem:[#allocation5_spill] sm:$0xff] %v4875_v19  ;;  %v4878_v24 = vadd.f32 %v4116_v47, %v1034_v49  ;;  %v1026_v53 = vadd.f32 %v1025_v6, %v4796_v18  ;;  %v4117_v55 = vpop.f32.mrf.mxu0 }
 0x13a   : > { %v4083_v9 = vpop.f32.mrf.mxu1 }
 0x13b   : > { %5311 = vst [vmem:[#allocation6_spill] sm:$0xff] %v4878_v24  ;;  %v4881_v27 = vadd.f32 %v1356_v51, %v1026_v53  ;;  %v1037_v57 = vadd.f32 %v4083_v9, %v4799_v21  ;;  %v1359_v59 = vpop.f32.mrf.mxu0 }
 0x13c   : > { %v1028_v14 = vpop.f32.mrf.mxu1 }
 0x13d   : > { %5312 = vst [vmem:[#allocation7_spill] sm:$0xff] %v4881_v27  ;;  %v4884_v29 = vadd.f32 %v4117_v55, %v1037_v57  ;;  %v1029_v61 = vadd.f32 %v1028_v14, %v4804_v26  ;;  %v4120_v63 = vpop.f32.mrf.mxu0 }
 0x13e   : > { %v4086_v16 = vpop.f32.mrf.mxu1 }
 0x13f   : > { %5313 = vst [vmem:[#allocation8_spill] sm:$0xff] %v4884_v29  ;;  %v4887_v31 = vadd.f32 %v1359_v59, %v1029_v61  ;;  %v1050_v1 = vadd.f32 %v4086_v16, %v4807_v28  ;;  %v1372_v3 = vpop.f32.mrf.mxu0 }
 0x140   : > { %v1041_v18 = vpop.f32.mrf.mxu1 }
 0x141   : > { %5314 = vst [vmem:[#allocation9_spill] sm:$0xff] %v4887_v31  ;;  %v4890_v35 = vadd.f32 %v4120_v63, %v1050_v1  ;;  %v1042_v8 = vadd.f32 %v1041_v18, %v4812_v30  ;;  %v4121_v7 = vpop.f32.mrf.mxu0 }
 0x142   : > { %v4087_v21 = vpop.f32.mrf.mxu1 }
 0x143   : > { %5315 = vst [vmem:[#allocation10_spill] sm:$0xff] %v4890_v35  ;;  %v4893_v37 = vadd.f32 %v1372_v3, %v1042_v8  ;;  %v1053_v13 = vadd.f32 %v4087_v21, %v4815_v33  ;;  %v1375_v12 = vpop.f32.mrf.mxu0 }
 0x144   : > { %v1044_v26 = vpop.f32.mrf.mxu1 }
 0x145   : > { %5316 = vst [vmem:[#allocation11_spill] sm:$0xff] %v4893_v37  ;;  %v4896_v22 = vadd.f32 %v4121_v7, %v1053_v13  ;;  %v1045_v23 = vadd.f32 %v1044_v26, %v4818_v36  ;;  %v4124_v41 = vpop.f32.mrf.mxu0 }
 0x146   : > { %v4090_v28 = vpop.f32.mrf.mxu1 }
 0x147   : > { %5317 = vst [vmem:[#allocation12_spill] sm:$0xff] %v4896_v22  ;;  %v4899_v32 = vadd.f32 %v1375_v12, %v1045_v23  ;;  %v1066_v34 = vadd.f32 %v4090_v28, %v4821_v38  ;;  %v1388_v43 = vpop.f32.mrf.mxu0 }
 0x148   : > { %v1057_v30 = vpop.f32.mrf.mxu1 }
 0x149   : > { %5318 = vst [vmem:[#allocation13_spill] sm:$0xff] %v4899_v32  ;;  %v4902_v46 = vadd.f32 %v4124_v41, %v1066_v34  ;;  %v1058_v47 = vadd.f32 %v1057_v30, %v4824_v40  ;;  %v4125_v4 = vpop.f32.mrf.mxu0 }
 0x14a   : > { %v4091_v33 = vpop.f32.mrf.mxu1 }
 0x14b   : > { %5319 = vst [vmem:[#allocation14_spill] sm:$0xff] %v4902_v46  ;;  %v4905_v49 = vadd.f32 %v1388_v43, %v1058_v47  ;;  %v1069_v51 = vadd.f32 %v4091_v33, %v4826_v42  ;;  %v1391_v6 = vpop.f32.mrf.mxu0 }
 0x14c   : > { %v1060_v36 = vpop.f32.mrf.mxu1 }
 0x14d   : > { %5320 = vst [vmem:[#allocation15_spill] sm:$0xff] %v4905_v49  ;;  %v4908_v53 = vadd.f32 %v4125_v4, %v1069_v51  ;;  %v1061_v55 = vadd.f32 %v1060_v36, %v4830_v44  ;;  %v4911_v9 = vpop.f32.mrf.mxu0 }
 0x14e   : > { %v4130_v38 = vpop.f32.mrf.mxu1 }
 0x14f   : > { %5321 = vst [vmem:[#allocation16_spill] sm:$0xff] %v4908_v53  ;;  %v4913_v57 = vadd.f32 %v1391_v6, %v1061_v55  ;;  %v4915_v59 = vpop.f32.mrf.mxu0 }
 0x150   : > { %v1639_v40 = vpop.f32.mrf.mxu1 }
 0x151   : > { %5322 = vst [vmem:[#allocation17_spill] sm:$0xff] %v4913_v57  ;;  %v4917_v14 = vpop.f32.mrf.mxu0 }
 0x152   : > { %v4131_v61 = vpop.f32.mrf.mxu1 }
 0x153   : > { %v4919_v63 = vpop.f32.mrf.mxu0 }
 0x154   : > { %v4921_v42 = vpop.f32.mrf.mxu1 }
 0x155   : > { %v4923_v16 = vpop.f32.mrf.mxu0 }
 0x156   : > { %v4925_v1 = vpop.f32.mrf.mxu1 }
 0x157   : > { %v4927_v44 = vpop.f32.mrf.mxu0 }
 0x158   : > { %v4929_v3 = vpop.f32.mrf.mxu1 }
 0x159   : > { %v4931_v18 = vpop.f32.mrf.mxu0 }
 0x15a   : > { %v4933_v8 = vpop.f32.mrf.mxu1 }
 0x15b   : > { %v4935_v7 = vpop.f32.mrf.mxu0 }
 0x15c   : > { %v4937_v21 = vpop.f32.mrf.mxu1 }
 0x15d   : > { %v4939_v13 = vpop.f32.mrf.mxu0 }
 0x15e   : > { %v4941_v12 = vpop.f32.mrf.mxu1 }
 0x15f   : > { %v4943_v26 = vpop.f32.mrf.mxu0 }
 0x160   : > { %v4945_v23 = vpop.f32.mrf.mxu1 }
 0x161   : > { %v4947_v41 = vpop.f32.mrf.mxu0 }
 0x162   : > { %v4949_v28 = vpop.f32.mrf.mxu1 }
 0x163   : > { %v4951_v34 = vpop.f32.mrf.mxu0 }
 0x164   : > { %v4953_v43 = vpop.f32.mrf.mxu1 }
 0x165   : > { %v4955_v30 = vpop.f32.mrf.mxu0 }
 0x166   : > { %v4957_v47 = vpop.f32.mrf.mxu1 }
 0x167   : > { %v4959_v4 = vpop.f32.mrf.mxu0 }
 0x168   : > { %v4961_v33 = vpop.f32.mrf.mxu1 }
 0x169   : > { %v4963_v51 = vpop.f32.mrf.mxu0 }
 0x16a   : > { %v4965_v6 = vpop.f32.mrf.mxu1 }
 0x16b   : > { %v4967_v36 = vpop.f32.mrf.mxu0 }
 0x16c   : > { %v4969_v55 = vpop.f32.mrf.mxu1 }
 0x16d   : > { %v4971_v57 = vpop.f32.mrf.mxu0 }
 0x16e   : > { %v4973_v53 = vpop.f32.mrf.mxu1 }
 0x16f   : > { %v4975_v49 = vpop.f32.mrf.mxu0 }
 0x170   : > { %5323 = vst [vmem:[#allocation18_spill] sm:$0xff] %v4975_v49  ;;  %v4977_v46 = vpop.f32.mrf.mxu1 }
 0x171   : > { %v4979_v32 = vpop.f32.mrf.mxu0 }
 0x172   : > { %5324 = vst [vmem:[#allocation19_spill] sm:$0xff] %v4979_v32  ;;  %v4981_v22 = vpop.f32.mrf.mxu1 }
 0x173   : > { %5325 = vst [vmem:[#allocation20_spill] sm:$0xff] %v4981_v22  ;;  %v4983_v37 = vpop.f32.mrf.mxu0 }
 0x174   : > { %5326 = vst [vmem:[#allocation21_spill] sm:$0xff] %v4983_v37  ;;  %v4985_v35 = vpop.f32.mrf.mxu1 }
 0x175   : > { %5327 = vst [vmem:[#allocation22_spill] sm:$0xff] %v4985_v35  ;;  %v4987_v31 = vpop.f32.mrf.mxu0 }
 0x176   : > { %5328 = vst [vmem:[#allocation23_spill] sm:$0xff] %v4987_v31  ;;  %v4989_v29 = vpop.f32.mrf.mxu1 }
 0x177   : > { %5329 = vst [vmem:[#allocation24_spill] sm:$0xff] %v4989_v29  ;;  %v4991_v27 = vpop.f32.mrf.mxu0 }
 0x178   : > { %5330 = vst [vmem:[#allocation25_spill] sm:$0xff] %v4991_v27  ;;  %v4993_v24 = vpop.f32.mrf.mxu1 }
 0x179   : > { %5331 = vst [vmem:[#allocation26_spill] sm:$0xff] %v4993_v24  ;;  %v4995_v19 = vpop.f32.mrf.mxu0 }
 0x17a   : > { %5332 = vst [vmem:[#allocation27_spill] sm:$0xff] %v4995_v19  ;;  %v4997_v49 = vpop.f32.mrf.mxu1 }
 0x17b   : > { %5333 = vst [vmem:[#allocation28_spill] sm:$0xff] %v4997_v49  ;;  %v4999_v17 = vpop.f32.mrf.mxu0 }
 0x17c   : > { %5334 = vst [vmem:[#allocation29_spill] sm:$0xff] %v4999_v17  ;;  %v5001_v32 = vpop.f32.mrf.mxu1 }
 0x17d   : > { %5335 = vst [vmem:[#allocation30_spill] sm:$0xff] %v5001_v32  ;;  %v5003_v22 = vpop.f32.mrf.mxu0 }
 0x17e   : > { %5336 = vst [vmem:[#allocation31_spill] sm:$0xff] %v5003_v22  ;;  %v5005_v37 = vpop.f32.mrf.mxu1 }
 0x17f   : > { %5337 = vst [vmem:[#allocation32_spill] sm:$0xff] %v5005_v37  ;;  %v5007_v35 = vpop.f32.mrf.mxu0 }
 0x180   : > { %5338 = vst [vmem:[#allocation33_spill] sm:$0xff] %v5007_v35  ;;  %v5009_v31 = vpop.f32.mrf.mxu1  ;;  %v1768_v35 = vadd.f32 %v4130_v38, %v4832_v50  ;;  %v1767_v50 = vadd.f32 %v4921_v42, %v4838_v62  ;;  %v5053_v62 = vld [vmem:[%s5306_s3] ss:$0 sm:$0xff] }
 0x181   : > { %5339 = vst [vmem:[#allocation34_spill] sm:$0xff] %v5009_v31  ;;  %v5011_v29 = vpop.f32.mrf.mxu0 }
 0x182   : > { %5340 = vst [vmem:[#allocation35_spill] sm:$0xff] %v5011_v29  ;;  %v5013_v27 = vpop.f32.mrf.mxu1  ;;  %v1766_v29 = vadd.f32 %v1639_v40, %v4834_v54  ;;  %v5045_v54 = vld [vmem:[%s5305_s2] ss:$0 sm:$0xff] }
 0x183   : > { %5341 = vst [vmem:[#allocation36_spill] sm:$0xff] %v5013_v27  ;;  %v5015_v24 = vpop.f32.mrf.mxu0 }
 0x184   : > { %5342 = vst [vmem:[#allocation37_spill] sm:$0xff] %v5015_v24  ;;  %v5017_v19 = vpop.f32.mrf.mxu1 }
 0x185   : > { %5343 = vst [vmem:[#allocation38_spill] sm:$0xff] %v5017_v19  ;;  %v5019_v49 = vpop.f32.mrf.mxu0 }
 0x186   : > { %5344 = vst [vmem:[#allocation39_spill] sm:$0xff] %v5019_v49  ;;  %v5021_v17 = vpop.f32.mrf.mxu1  ;;  %v2131_v49 = vadd.f32 %v4911_v9, %v1768_v35 }
 0x187   : > { %5345 = vst [vmem:[#allocation40_spill] sm:$0xff] %v5021_v17  ;;  %v5023_v32 = vpop.f32.mrf.mxu0  ;;  %v1769_v17 = vadd.f32 %v4131_v61, %v4836_v58 }
 0x188   : > { %5346 = vst [vmem:[#allocation41_spill] sm:$0xff] %v5023_v32  ;;  %v5025_v22 = vpop.f32.mrf.mxu1 }
 0x189   : > { %5347 = vst [vmem:[#allocation42_spill] sm:$0xff] %v5025_v22  ;;  %v5028_v37 = vpop.f32.mrf.mxu0  ;;  %v2129_v22 = vadd.f32 %v4915_v59, %v1766_v29  ;;  %v2132_v35 = vadd.f32 %v4917_v14, %v1769_v17  ;;  %v1772_v29 = vadd.f32 %v4925_v1, %v4840_v2  ;;  %v1770_v17 = vadd.f32 %v4929_v3, %v4842_v10 }
 0x18a   : > { %5348 = vst [vmem:[#allocation43_spill] sm:$0xff] %v5028_v37  ;;  %v5030_v31 = vpop.f32.mrf.mxu1 }
 0x18b   : > { %v5033_v27 = vpop.f32.mrf.mxu0 }
 0x18c   : > { %5349 = vst [vmem:[#allocation44_spill] sm:$0xff] %v5033_v27  ;;  %v5035_v24 = vpop.f32.mrf.mxu1 }
 0x18d   : > { %5350 = vst [vmem:[#allocation45_spill] sm:$0xff] %v5035_v24  ;;  %v4232_v19 = vpop.f32.mrf.mxu0 }
 0x18e   : > { %v4198_v32 = vpop.f32.mrf.mxu1 }
 0x18f   : > { %v2494_v38 = vadd.f32 %v4198_v32, %v2131_v49  ;;  %v2728_v37 = vpop.f32.mrf.mxu0  ;;  %v2130_v49 = vadd.f32 %v4919_v63, %v1767_v50 }
 0x190   : > { %v2365_v40 = vpop.f32.mrf.mxu1 }
 0x191   : > { %v2857_v9 = vadd.f32 %v4232_v19, %v2494_v38  ;;  %v2492_v58 = vadd.f32 %v2365_v40, %v2129_v22  ;;  %v4233_v61 = vpop.f32.mrf.mxu0  ;;  %v1773_v19 = vadd.f32 %v4933_v8, %v4844_v20  ;;  %v1771_v38 = vadd.f32 %v4937_v21, %v4846_v25 }
 0x192   : > { %v4199_v32 = vpop.f32.mrf.mxu1 }
 0x193   : > { %v2896_v59 = vmul.f32 %v5045_v54, %v2857_v9  ;;  %v2855_v42 = vadd.f32 %v2728_v37, %v2492_v58  ;;  %v2495_v27 = vadd.f32 %v4199_v32, %v2132_v35  ;;  %v2731_v24 = vpop.f32.mrf.mxu0  ;;  %v2135_v37 = vadd.f32 %v4923_v16, %v1772_v29 }
 0x194   : > { %v2368_v2 = vpop.f32.mrf.mxu1  ;;  %v2133_v9 = vadd.f32 %v4927_v44, %v1770_v17  ;;  %v1776_v58 = vadd.f32 %v4941_v12, %v4848_v45 }
 0x195   : > { %v2935_v22 = vadd.f32 %v5053_v62, %v2896_v59  ;;  %v2894_v14 = vmul.f32 %v5045_v54, %v2855_v42  ;;  %v2858_v1 = vadd.f32 %v4233_v61, %v2495_v27  ;;  %v2493_v63 = vadd.f32 %v2368_v2, %v2130_v49  ;;  %v4236_v50 = vpop.f32.mrf.mxu0 }
 0x196   : > { %v4202_v10 = vpop.f32.mrf.mxu1  ;;  %v2136_v27 = vadd.f32 %v4931_v18, %v1773_v19  ;;  %v2134_v59 = vadd.f32 %v4935_v7, %v1771_v38  ;;  %v2139_v7 = vadd.f32 %v4939_v13, %v1776_v58  ;;  %v1775_v13 = vadd.f32 %v4953_v43, %v4854_v56 }
 0x197   : > { %v2967_v3 = vmax.f32 %v2935_v22, 0.0  ;;  %v2933_v20 = vadd.f32 %v5053_v62, %v2894_v14  ;;  %v2897_v8 = vmul.f32 %v5045_v54, %v2858_v1  ;;  %v2856_v40 = vadd.f32 %v2731_v24, %v2493_v63  ;;  %v2744_v35 = vpop.f32.mrf.mxu0 }
 0x198   : > { %v2498_v16 = vadd.f32 %v4202_v10, %v2135_v37  ;;  %v2381_v61 = vpop.f32.mrf.mxu1  ;;  %v1774_v24 = vadd.f32 %v4945_v23, %v4850_v48  ;;  %v1777_v48 = vadd.f32 %v4949_v28, %v4852_v52 }
 0x199   : > { %v3874_v29 = vpack.c.bf16 %v2967_v3, %v2967_v3  ;;  %v2965_v25 = vmax.f32 %v2933_v20, 0.0  ;;  %v2936_v21 = vadd.f32 %v5053_v62, %v2897_v8  ;;  %v2895_v32 = vmul.f32 %v5045_v54, %v2856_v40  ;;  %v4237_v49 = vpop.f32.mrf.mxu0 }
 0x19a   : > { %v2861_v44 = vadd.f32 %v4236_v50, %v2498_v16  ;;  %v2496_v42 = vadd.f32 %v2381_v61, %v2133_v9  ;;  %v4203_v18 = vpop.f32.mrf.mxu1  ;;  %v2137_v10 = vadd.f32 %v4943_v26, %v1774_v24  ;;  %v1780_v26 = vadd.f32 %v4957_v47, %v4856_v60 }
 0x19b   : > { %3128 = vst.msk [vmem:[%s5079_s15 + $0x8] sm:$0xf] %vm3125_vm1, %v3874_v29  ;;  %v3872_v45 = vpack.c.bf16 %v2965_v25, %v2965_v25  ;;  %v2968_v12 = vmax.f32 %v2936_v21, 0.0  ;;  %v2934_v17 = vadd.f32 %v5053_v62, %v2895_v32  ;;  %v2499_v19 = vadd.f32 %v4203_v18, %v2136_v27  ;;  %v2747_v2 = vpop.f32.mrf.mxu0 }
 0x19c   : > { %v2900_v23 = vmul.f32 %v5045_v54, %v2861_v44  ;;  %v2859_v22 = vadd.f32 %v2744_v35, %v2496_v42  ;;  %v2384_v14 = vpop.f32.mrf.mxu1  ;;  %v2140_v27 = vadd.f32 %v4947_v41, %v1777_v48  ;;  %v2138_v32 = vadd.f32 %v4951_v34, %v1775_v13 }
 0x19d   : > { %3126 = vst.msk [vmem:[%s5079_s15] sm:$0xf] %vm3125_vm1, %v3872_v45  ;;  %v3875_v1 = vpack.c.bf16 %v2968_v12, %v2968_v12  ;;  %v2966_v63 = vmax.f32 %v2934_v17, 0.0  ;;  %v2862_v50 = vadd.f32 %v4237_v49, %v2499_v19  ;;  %v2497_v37 = vadd.f32 %v2384_v14, %v2134_v59  ;;  %v4240_v38 = vpop.f32.mrf.mxu0 }
 0x19e   : > { %v2939_v3 = vadd.f32 %v5053_v62, %v2900_v23  ;;  %v2898_v52 = vmul.f32 %v5045_v54, %v2859_v22  ;;  %v4206_v28 = vpop.f32.mrf.mxu1  ;;  %v1778_v41 = vadd.f32 %v4961_v33, %v4858_v0  ;;  %v2143_v45 = vadd.f32 %v4955_v30, %v1780_v26 }
 0x19f   : > { %3129 = vst.msk [vmem:[%s5079_s15 + $0xc] sm:$0xf] %vm3125_vm1, %v3875_v1  ;;  %v3873_v20 = vpack.c.bf16 %v2966_v63, %v2966_v63  ;;  %v2901_v8 = vmul.f32 %v5045_v54, %v2862_v50  ;;  %v2860_v40 = vadd.f32 %v2747_v2, %v2497_v37  ;;  %v2502_v35 = vadd.f32 %v4206_v28, %v2139_v7  ;;  %v2760_v9 = vpop.f32.mrf.mxu0 }
 0x1a0   : > { %v2971_v58 = vmax.f32 %v2939_v3, 0.0  ;;  %v2937_v56 = vadd.f32 %v5053_v62, %v2898_v52  ;;  %v2397_v43 = vpop.f32.mrf.mxu1  ;;  %v1781_v12 = vadd.f32 %v4965_v6, %v4860_v5  ;;  %v2141_v23 = vadd.f32 %v4959_v4, %v1778_v41 }
 0x1a1   : > { %3127 = vst.msk [vmem:[%s5079_s15 + $0x4] sm:$0xf] %vm3125_vm1, %v3873_v20  ;;  %v2940_v16 = vadd.f32 %v5053_v62, %v2901_v8  ;;  %v2899_v61 = vmul.f32 %v5045_v54, %v2860_v40  ;;  %v2865_v29 = vadd.f32 %v4240_v38, %v2502_v35  ;;  %v2500_v25 = vadd.f32 %v2397_v43, %v2137_v10  ;;  %v4241_v21 = vpop.f32.mrf.mxu0  ;;  %v5352_v43 = vld [vmem:[#allocation20_spill] sm:$0xff] }
 0x1a2   : > { %v3878_v60 = vpack.c.bf16 %v2971_v58, %v2971_v58  ;;  %v2969_v47 = vmax.f32 %v2937_v56, 0.0  ;;  %v4207_v49 = vpop.f32.mrf.mxu1  ;;  %v1779_v30 = vadd.f32 %v4969_v55, %v4863_v11  ;;  %v2144_v38 = vadd.f32 %v4963_v51, %v1781_v12 }
 0x1a3   : > { %v2972_v59 = vmax.f32 %v2940_v16, 0.0  ;;  %v2938_v24 = vadd.f32 %v5053_v62, %v2899_v61  ;;  %v2904_v44 = vmul.f32 %v5045_v54, %v2865_v29  ;;  %v2863_v42 = vadd.f32 %v2760_v9, %v2500_v25  ;;  %v2763_v18 = vpop.f32.mrf.mxu0 }
 0x1a4   : > { %3132 = vst.msk [vmem:[%s5079_s15 + $0x18] sm:$0xf] %vm3125_vm1, %v3878_v60  ;;  %v3876_v0 = vpack.c.bf16 %v2969_v47, %v2969_v47  ;;  %v2503_v34 = vadd.f32 %v4207_v49, %v2140_v27  ;;  %v2400_v33 = vpop.f32.mrf.mxu1  ;;  %v1784_v11 = vadd.f32 %v4973_v53, %v4866_v39  ;;  %v2142_v8 = vadd.f32 %v4967_v36, %v1779_v30  ;;  %v5351_v36 = vld [vmem:[#allocation4_spill] sm:$0xff]  ;;  %v5353_v60 = vld [vmem:[#allocation18_spill] sm:$0xff] }
 0x1a5   : > { %v3879_v17 = vpack.c.bf16 %v2972_v59, %v2972_v59  ;;  %v2970_v19 = vmax.f32 %v2938_v24, 0.0  ;;  %v2943_v2 = vadd.f32 %v5053_v62, %v2904_v44  ;;  %v2902_v7 = vmul.f32 %v5045_v54, %v2863_v42  ;;  %v4244_v48 = vpop.f32.mrf.mxu0  ;;  %v5355_v49 = vld [vmem:[#allocation22_spill] sm:$0xff] }
 0x1a6   : > { %3130 = vst.msk [vmem:[%s5079_s15 + $0x10] sm:$0xf] %vm3125_vm1, %v3876_v0  ;;  %v2866_v5 = vadd.f32 %v4241_v21, %v2503_v34  ;;  %v2501_v6 = vadd.f32 %v2400_v33, %v2138_v32  ;;  %v4210_v22 = vpop.f32.mrf.mxu1  ;;  %v1782_v51 = vadd.f32 %v4977_v46, %v4869_v15  ;;  %v2147_v56 = vadd.f32 %v4971_v57, %v1784_v11  ;;  %v5354_v57 = vld [vmem:[#allocation5_spill] sm:$0xff]  ;;  %v5356_v33 = vld [vmem:[#allocation19_spill] sm:$0xff] }
 0x1a7   : > { %3133 = vst.msk [vmem:[%s5079_s15 + $0x1c] sm:$0xf] %vm3125_vm1, %v3879_v17  ;;  %v3877_v14 = vpack.c.bf16 %v2970_v19, %v2970_v19  ;;  %v2975_v1 = vmax.f32 %v2943_v2, 0.0  ;;  %v2941_v63 = vadd.f32 %v5053_v62, %v2902_v7  ;;  %v2506_v50 = vadd.f32 %v4210_v22, %v2143_v45  ;;  %v2776_v37 = vpop.f32.mrf.mxu0  ;;  %v5357_v19 = vld [vmem:[#allocation6_spill] sm:$0xff]  ;;  %v5358_v2 = vld [vmem:[#allocation24_spill] sm:$0xff] }
 0x1a8   : > { %v2905_v4 = vmul.f32 %v5045_v54, %v2866_v5  ;;  %v2864_v55 = vadd.f32 %v2763_v18, %v2501_v6  ;;  %v2413_v10 = vpop.f32.mrf.mxu1  ;;  %v1785_v16 = vadd.f32 %v5352_v43, %v5351_v36  ;;  %v2145_v47 = vadd.f32 %v5353_v60, %v1782_v51 }
 0x1a9   : > { %3131 = vst.msk [vmem:[%s5079_s15 + $0x14] sm:$0xf] %vm3125_vm1, %v3877_v14  ;;  %v3882_v13 = vpack.c.bf16 %v2975_v1, %v2975_v1  ;;  %v2973_v3 = vmax.f32 %v2941_v63, 0.0  ;;  %v2869_v52 = vadd.f32 %v4244_v48, %v2506_v50  ;;  %v2504_v28 = vadd.f32 %v2413_v10, %v2141_v23  ;;  %v4245_v20 = vpop.f32.mrf.mxu0  ;;  %v5359_v63 = vld [vmem:[#allocation21_spill] sm:$0xff] }
 0x1aa   : > { %v2944_v40 = vadd.f32 %v5053_v62, %v2905_v4  ;;  %v2903_v39 = vmul.f32 %v5045_v54, %v2864_v55  ;;  %v4211_v53 = vpop.f32.mrf.mxu1  ;;  %v1783_v59 = vadd.f32 %v5355_v49, %v5354_v57  ;;  %v2148_v17 = vadd.f32 %v5356_v33, %v1785_v16  ;;  %v5365_v16 = vld [vmem:[#allocation25_spill] sm:$0xff] }
 0x1ab   : > { %3136 = vst.msk [vmem:[%s5079_s15 + $0x28] sm:$0xf] %vm3125_vm1, %v3882_v13  ;;  %v3880_v35 = vpack.c.bf16 %v2973_v3, %v2973_v3  ;;  %v2908_v9 = vmul.f32 %v5045_v54, %v2869_v52  ;;  %v2867_v27 = vadd.f32 %v2776_v37, %v2504_v28  ;;  %v2507_v26 = vadd.f32 %v4211_v53, %v2144_v38  ;;  %v2779_v58 = vpop.f32.mrf.mxu0  ;;  %v5360_v37 = vld [vmem:[#allocation7_spill] sm:$0xff]  ;;  %v5361_v38 = vld [vmem:[#allocation26_spill] sm:$0xff] }
 0x1ac   : > { %v2976_v61 = vmax.f32 %v2944_v40, 0.0  ;;  %v2942_v15 = vadd.f32 %v5053_v62, %v2903_v39  ;;  %v2416_v46 = vpop.f32.mrf.mxu1  ;;  %v1788_v7 = vadd.f32 %v5358_v2, %v5357_v19  ;;  %v2146_v50 = vadd.f32 %v5359_v63, %v1783_v59  ;;  %v5363_v40 = vld [vmem:[#allocation8_spill] sm:$0xff]  ;;  %v5368_v59 = vld [vmem:[#allocation27_spill] sm:$0xff] }
 0x1ad   : > { %3134 = vst.msk [vmem:[%s5079_s15 + $0x20] sm:$0xf] %vm3125_vm1, %v3880_v35  ;;  %v2947_v29 = vadd.f32 %v5053_v62, %v2908_v9  ;;  %v2906_v25 = vmul.f32 %v5045_v54, %v2867_v27  ;;  %v2870_v21 = vadd.f32 %v4245_v20, %v2507_v26  ;;  %v2505_v32 = vadd.f32 %v2416_v46, %v2142_v8  ;;  %v4248_v41 = vpop.f32.mrf.mxu0  ;;  %v5362_v8 = vld [vmem:[#allocation23_spill] sm:$0xff]  ;;  %v5364_v39 = vld [vmem:[#allocation28_spill] sm:$0xff]  ;;  %v5367_v46 = vld [vmem:[#allocation30_spill] sm:$0xff] }
 0x1ae   : > { %v3883_v24 = vpack.c.bf16 %v2976_v61, %v2976_v61  ;;  %v2974_v44 = vmax.f32 %v2942_v15, 0.0  ;;  %v4214_v42 = vpop.f32.mrf.mxu1  ;;  %v1786_v11 = vadd.f32 %v5361_v38, %v5360_v37  ;;  %v2151_v51 = vadd.f32 %v5362_v8, %v1788_v7  ;;  %v5366_v15 = vld [vmem:[#allocation9_spill] sm:$0xff] }
 0x1af   : > { %v2979_v18 = vmax.f32 %v2947_v29, 0.0  ;;  %v2945_v45 = vadd.f32 %v5053_v62, %v2906_v25  ;;  %v2909_v12 = vmul.f32 %v5045_v54, %v2870_v21  ;;  %v2868_v0 = vadd.f32 %v2779_v58, %v2505_v32  ;;  %v2792_v34 = vpop.f32.mrf.mxu0  ;;  %v5371_v7 = vld [vmem:[#allocation29_spill] sm:$0xff] }
 0x1b0   : > { %3137 = vst.msk [vmem:[%s5079_s15 + $0x2c] sm:$0xf] %vm3125_vm1, %v3883_v24  ;;  %v3881_v48 = vpack.c.bf16 %v2974_v44, %v2974_v44  ;;  %v2510_v23 = vadd.f32 %v4214_v42, %v2147_v56  ;;  %v2429_v30 = vpop.f32.mrf.mxu1  ;;  %v1789_v53 = vadd.f32 %v5364_v39, %v5363_v40  ;;  %v2149_v61 = vadd.f32 %v5365_v16, %v1786_v11  ;;  %v5369_v44 = vld [vmem:[#allocation10_spill] sm:$0xff]  ;;  %v5370_v42 = vld [vmem:[#allocation32_spill] sm:$0xff]  ;;  %v5374_v11 = vld [vmem:[#allocation31_spill] sm:$0xff] }
 0x1b1   : > { %v3886_v5 = vpack.c.bf16 %v2979_v18, %v2979_v18  ;;  %v2977_v6 = vmax.f32 %v2945_v45, 0.0  ;;  %v2948_v22 = vadd.f32 %v5053_v62, %v2909_v12  ;;  %v2907_v14 = vmul.f32 %v5045_v54, %v2868_v0  ;;  %v4249_v1 = vpop.f32.mrf.mxu0 }
 0x1b2   : > { %3135 = vst.msk [vmem:[%s5079_s15 + $0x24] sm:$0xf] %vm3125_vm1, %v3881_v48  ;;  %v2873_v4 = vadd.f32 %v4248_v41, %v2510_v23  ;;  %v2508_v55 = vadd.f32 %v2429_v30, %v2145_v47  ;;  %v4215_v10 = vpop.f32.mrf.mxu1  ;;  %v1787_v29 = vadd.f32 %v5367_v46, %v5366_v15  ;;  %v2152_v24 = vadd.f32 %v5368_v59, %v1789_v53  ;;  %v5372_v23 = vld [vmem:[#allocation11_spill] sm:$0xff]  ;;  %v5373_v30 = vld [vmem:[#allocation34_spill] sm:$0xff]  ;;  %v5377_v53 = vld [vmem:[#allocation33_spill] sm:$0xff] }
 0x1b3   : > { %3140 = vst.msk [vmem:[%s5079_s15 + $0x38] sm:$0xf] %vm3125_vm1, %v3886_v5  ;;  %v3884_v13 = vpack.c.bf16 %v2977_v6, %v2977_v6  ;;  %v2980_v3 = vmax.f32 %v2948_v22, 0.0  ;;  %v2946_v52 = vadd.f32 %v5053_v62, %v2907_v14  ;;  %v2511_v28 = vadd.f32 %v4215_v10, %v2148_v17  ;;  %v2795_v20 = vpop.f32.mrf.mxu0  ;;  %v5376_v10 = vld [vmem:[#allocation36_spill] sm:$0xff] }
 0x1b4   : > { %v2912_v35 = vmul.f32 %v5045_v54, %v2873_v4  ;;  %v2871_v9 = vadd.f32 %v2792_v34, %v2508_v55  ;;  %v2432_v27 = vpop.f32.mrf.mxu1  ;;  %v1792_v18 = vadd.f32 %v5370_v42, %v5369_v44  ;;  %v2150_v48 = vadd.f32 %v5371_v7, %v1787_v29  ;;  %v5375_v55 = vld [vmem:[#allocation12_spill] sm:$0xff]  ;;  %v5380_v29 = vld [vmem:[#allocation35_spill] sm:$0xff]  ;;  %v5382_v42 = vld [vmem:[#allocation14_spill] sm:$0xff] }
 0x1b5   : > { %3138 = vst.msk [vmem:[%s5079_s15 + $0x30] sm:$0xf] %vm3125_vm1, %v3884_v13  ;;  %v3887_v26 = vpack.c.bf16 %v2980_v3, %v2980_v3  ;;  %v2978_v58 = vmax.f32 %v2946_v52, 0.0  ;;  %v2874_v56 = vadd.f32 %v4249_v1, %v2511_v28  ;;  %v2509_v36 = vadd.f32 %v2432_v27, %v2146_v50  ;;  %v4252_v43 = vpop.f32.mrf.mxu0  ;;  %v5379_v27 = vld [vmem:[#allocation38_spill] sm:$0xff] }
 0x1b6   : > { %v2951_v25 = vadd.f32 %v5053_v62, %v2912_v35  ;;  %v2910_v21 = vmul.f32 %v5045_v54, %v2871_v9  ;;  %v4218_v32 = vpop.f32.mrf.mxu1  ;;  %v1790_v5 = vadd.f32 %v5373_v30, %v5372_v23  ;;  %v2155_v4 = vadd.f32 %v5374_v11, %v1792_v18  ;;  %v5378_v9 = vld [vmem:[#allocation13_spill] sm:$0xff]  ;;  %v5383_v18 = vld [vmem:[#allocation40_spill] sm:$0xff]  ;;  %v5385_v23 = vld [vmem:[#allocation42_spill] sm:$0xff] }
 0x1b7   : > { %3141 = vst.msk [vmem:[%s5079_s15 + $0x3c] sm:$0xf] %vm3125_vm1, %v3887_v26  ;;  %v3885_v41 = vpack.c.bf16 %v2978_v58, %v2978_v58  ;;  %v2913_v60 = vmul.f32 %v5045_v54, %v2874_v56  ;;  %v2872_v47 = vadd.f32 %v2795_v20, %v2509_v36  ;;  %v2514_v57 = vadd.f32 %v4218_v32, %v2151_v51  ;;  %v2808_v49 = vpop.f32.mrf.mxu0 }
 0x1b8   : > { %v2983_v45 = vmax.f32 %v2951_v25, 0.0  ;;  %v2949_v12 = vadd.f32 %v5053_v62, %v2910_v21  ;;  %v2445_v0 = vpop.f32.mrf.mxu1  ;;  %v1793_v13 = vadd.f32 %v5376_v10, %v5375_v55  ;;  %v2153_v35 = vadd.f32 %v5377_v53, %v1790_v5  ;;  %v5386_v5 = vld [vmem:[#allocation16_spill] sm:$0xff]  ;;  %v5388_v10 = vld [vmem:[#allocation17_spill] sm:$0xff] }
 0x1b9   : > { %3139 = vst.msk [vmem:[%s5079_s15 + $0x34] sm:$0xf] %vm3125_vm1, %v3885_v41  ;;  %v2952_v34 = vadd.f32 %v5053_v62, %v2913_v60  ;;  %v2911_v33 = vmul.f32 %v5045_v54, %v2872_v47  ;;  %v2877_v17 = vadd.f32 %v4252_v43, %v2514_v57  ;;  %v2512_v19 = vadd.f32 %v2445_v0, %v2149_v61  ;;  %v4253_v2 = vpop.f32.mrf.mxu0  ;;  %v5390_v53 = vld [vmem:[#allocation41_spill] sm:$0xff] }
 0x1ba   : > { %v3890_v6 = vpack.c.bf16 %v2983_v45, %v2983_v45  ;;  %v2981_v22 = vmax.f32 %v2949_v12, 0.0  ;;  %v4219_v14 = vpop.f32.mrf.mxu1  ;;  %v1791_v26 = vadd.f32 %v5379_v27, %v5378_v9  ;;  %v2156_v25 = vadd.f32 %v5380_v29, %v1793_v13  ;;  %v5389_v13 = vld [vmem:[#allocation45_spill] sm:$0xff]  ;;  %v5391_v9 = vld [vmem:[#allocation43_spill] sm:$0xff] }
 0x1bb   : > { %v2984_v1 = vmax.f32 %v2952_v34, 0.0  ;;  %v2950_v63 = vadd.f32 %v5053_v62, %v2911_v33  ;;  %v2916_v50 = vmul.f32 %v5045_v54, %v2877_v17  ;;  %v2875_v37 = vadd.f32 %v2808_v49, %v2512_v19  ;;  %v2811_v38 = vpop.f32.mrf.mxu0 }
 0x1bc   : > { %3144 = vst.msk [vmem:[%s5079_s15 + $0x48] sm:$0xf] %vm3125_vm1, %v3890_v6  ;;  %v3888_v3 = vpack.c.bf16 %v2981_v22, %v2981_v22  ;;  %v2515_v52 = vadd.f32 %v4219_v14, %v2152_v24  ;;  %v2448_v28 = vpop.f32.mrf.mxu1  ;;  %v5381_v24 = vld [vmem:[#allocation37_spill] sm:$0xff]  ;;  %v1796_v45 = vadd.f32 %v5383_v18, %v5382_v42  ;;  %v1797_v6 = vadd.f32 %v5030_v31, %v5386_v5 }
 0x1bd   : > { %v3891_v20 = vpack.c.bf16 %v2984_v1, %v2984_v1  ;;  %v2982_v8 = vmax.f32 %v2950_v63, 0.0  ;;  %v2955_v51 = vadd.f32 %v5053_v62, %v2916_v50  ;;  %v2914_v40 = vmul.f32 %v5045_v54, %v2875_v37  ;;  %v4256_v39 = vpop.f32.mrf.mxu0 }
 0x1be   : > { %3142 = vst.msk [vmem:[%s5079_s15 + $0x40] sm:$0xf] %vm3125_vm1, %v3888_v3  ;;  %v2878_v58 = vadd.f32 %v4253_v2, %v2515_v52  ;;  %v2513_v56 = vadd.f32 %v2448_v28, %v2150_v48  ;;  %v4222_v36 = vpop.f32.mrf.mxu1  ;;  %v2154_v44 = vadd.f32 %v5381_v24, %v1791_v26  ;;  %v5384_v48 = vld [vmem:[#allocation15_spill] sm:$0xff]  ;;  %v1795_v3 = vadd.f32 %v5389_v13, %v5388_v10 }
 0x1bf   : > { %3145 = vst.msk [vmem:[%s5079_s15 + $0x4c] sm:$0xf] %vm3125_vm1, %v3891_v20  ;;  %v3889_v43 = vpack.c.bf16 %v2982_v8, %v2982_v8  ;;  %v2987_v16 = vmax.f32 %v2955_v51, 0.0  ;;  %v2953_v61 = vadd.f32 %v5053_v62, %v2914_v40  ;;  %v2518_v15 = vadd.f32 %v4222_v36, %v2155_v4  ;;  %v2824_v46 = vpop.f32.mrf.mxu0  ;;  %v5387_v4 = vld [vmem:[#allocation39_spill] sm:$0xff] }
 0x1c0   : > { %v2917_v21 = vmul.f32 %v5045_v54, %v2878_v58  ;;  %v2876_v32 = vadd.f32 %v2811_v38, %v2513_v56  ;;  %v2461_v41 = vpop.f32.mrf.mxu1  ;;  %v1794_v30 = vadd.f32 %v5385_v23, %v5384_v48  ;;  %v2159_v55 = vadd.f32 %v5387_v4, %v1796_v45  ;;  %v3204_v4 = vld [vmem:[%s5079_s15 + $0x28] sm:$0xff] (%p4488_p5)   ;;  %v3212_v10 = vld [vmem:[%s5079_s15 + $0x38] sm:$0xff] (%p4488_p5)  }
 0x1c1   : > { %3143 = vst.msk [vmem:[%s5079_s15 + $0x44] sm:$0xf] %vm3125_vm1, %v3889_v43  ;;  %v3894_v60 = vpack.c.bf16 %v2987_v16, %v2987_v16  ;;  %v2985_v47 = vmax.f32 %v2953_v61, 0.0  ;;  %v2881_v57 = vadd.f32 %v4256_v39, %v2518_v15  ;;  %v2516_v49 = vadd.f32 %v2461_v41, %v2153_v35  ;;  %v4257_v59 = vpop.f32.mrf.mxu0  ;;  %v5392_v15 = vld [vmem:[#allocation44_spill] sm:$0xff]  ;;  %3205 = vst [vmem:[%s3167_s23 + $0x50] sm:$0xff] (%p4488_p5), %v3204_v4  }
 0x1c2   : > { %v2956_v12 = vadd.f32 %v5053_v62, %v2917_v21  ;;  %v2915_v0 = vmul.f32 %v5045_v54, %v2876_v32  ;;  %v4223_v34 = vpop.f32.mrf.mxu1  ;;  %v2157_v35 = vadd.f32 %v5390_v53, %v1794_v30  ;;  %v2160_v27 = vadd.f32 %v5391_v9, %v1797_v6  ;;  %3213 = vst [vmem:[%s3167_s23 + $0x70] sm:$0xff] (%p4488_p5), %v3212_v10  }
 0x1c3   : > { %3148 = vst.msk [vmem:[%s5079_s15 + $0x58] sm:$0xf] %vm3125_vm1, %v3894_v60  ;;  %v3892_v33 = vpack.c.bf16 %v2985_v47, %v2985_v47  ;;  %v2920_v17 = vmul.f32 %v5045_v54, %v2881_v57  ;;  %v2879_v19 = vadd.f32 %v2824_v46, %v2516_v49  ;;  %v2519_v2 = vadd.f32 %v4223_v34, %v2156_v25  ;;  %v2827_v7 = vpop.f32.mrf.mxu0 }
 0x1c4   : > { %v2988_v22 = vmax.f32 %v2956_v12, 0.0  ;;  %v2954_v14 = vadd.f32 %v5053_v62, %v2915_v0  ;;  %v2464_v1 = vpop.f32.mrf.mxu1  ;;  %v2158_v46 = vadd.f32 %v5392_v15, %v1795_v3 }
 0x1c5   : > { %3146 = vst.msk [vmem:[%s5079_s15 + $0x50] sm:$0xf] %vm3125_vm1, %v3892_v33  ;;  %v2959_v63 = vadd.f32 %v5053_v62, %v2920_v17  ;;  %v2918_v50 = vmul.f32 %v5045_v54, %v2879_v19  ;;  %v2882_v37 = vadd.f32 %v4257_v59, %v2519_v2  ;;  %v2517_v38 = vadd.f32 %v2464_v1, %v2154_v44  ;;  %v4260_v11 = vpop.f32.mrf.mxu0 }
 0x1c6   : > { %v3895_v31 = vpack.c.bf16 %v2988_v22, %v2988_v22  ;;  %v2986_v52 = vmax.f32 %v2954_v14, 0.0  ;;  %v4226_v28 = vpop.f32.mrf.mxu1  ;;  %v3220_v3 = vld [vmem:[%s5079_s15 + $0x48] sm:$0xff] (%p4488_p5)  }
 0x1c7   : > { %v2991_v20 = vmax.f32 %v2959_v63, 0.0  ;;  %v2957_v8 = vadd.f32 %v5053_v62, %v2918_v50  ;;  %v2921_v51 = vmul.f32 %v5045_v54, %v2882_v37  ;;  %v2880_v40 = vadd.f32 %v2827_v7, %v2517_v38  ;;  %v2840_v39 = vpop.f32.mrf.mxu0  ;;  %v3192_v37 = vld [vmem:[%s5079_s15 + $0x10] sm:$0xff] (%p4488_p5)   ;;  %v3196_v38 = vld [vmem:[%s5079_s15 + $0x18] sm:$0xff] (%p4488_p5)   ;;  %3221 = vst [vmem:[%s3167_s23 + $0x90] sm:$0xff] (%p4488_p5), %v3220_v3  }
 0x1c8   : > { %3149 = vst.msk [vmem:[%s5079_s15 + $0x5c] sm:$0xf] %vm3125_vm1, %v3895_v31  ;;  %v3893_v26 = vpack.c.bf16 %v2986_v52, %v2986_v52  ;;  %v2522_v58 = vadd.f32 %v4226_v28, %v2159_v55  ;;  %v2477_v56 = vpop.f32.mrf.mxu1  ;;  %3193 = vst [vmem:[%s3167_s23 + $0x20] sm:$0xff] (%p4488_p5), %v3192_v37   ;;  %v3208_v55 = vld [vmem:[%s5079_s15 + $0x30] sm:$0xff] (%p4488_p5)   ;;  %v3216_v13 = vld [vmem:[%s5079_s15 + $0x40] sm:$0xff] (%p4488_p5)  }
 0x1c9   : > { %v3898_v36 = vpack.c.bf16 %v2991_v20, %v2991_v20  ;;  %v2989_v43 = vmax.f32 %v2957_v8, 0.0  ;;  %v2960_v16 = vadd.f32 %v5053_v62, %v2921_v51  ;;  %v2919_v61 = vmul.f32 %v5045_v54, %v2880_v40  ;;  %v4261_v32 = vpop.f32.mrf.mxu0  ;;  %3197 = vst [vmem:[%s3167_s23 + $0x30] sm:$0xff] (%p4488_p5), %v3196_v38   ;;  %3209 = vst [vmem:[%s3167_s23 + $0x60] sm:$0xff] (%p4488_p5), %v3208_v55  }
 0x1ca   : > { %3147 = vst.msk [vmem:[%s5079_s15 + $0x54] sm:$0xf] %vm3125_vm1, %v3893_v26  ;;  %v2885_v29 = vadd.f32 %v4260_v11, %v2522_v58  ;;  %v2520_v25 = vadd.f32 %v2477_v56, %v2157_v35  ;;  %v4227_v21 = vpop.f32.mrf.mxu1  ;;  %v3200_v11 = vld [vmem:[%s5079_s15 + $0x20] sm:$0xff] (%p4488_p5)   ;;  %3217 = vst [vmem:[%s3167_s23 + $0x80] sm:$0xff] (%p4488_p5), %v3216_v13  }
 0x1cb   : > { %3152 = vst.msk [vmem:[%s5079_s15 + $0x68] sm:$0xf] %vm3125_vm1, %v3898_v36  ;;  %v3896_v41 = vpack.c.bf16 %v2989_v43, %v2989_v43  ;;  %v2992_v60 = vmax.f32 %v2960_v16, 0.0  ;;  %v2958_v47 = vadd.f32 %v5053_v62, %v2919_v61  ;;  %v2523_v57 = vadd.f32 %v4227_v21, %v2160_v27  ;;  %v2843_v34 = vpop.f32.mrf.mxu0  ;;  %3201 = vst [vmem:[%s3167_s23 + $0x40] sm:$0xff] (%p4488_p5), %v3200_v11  }
 0x1cc   : > { %v2924_v49 = vmul.f32 %v5045_v54, %v2885_v29  ;;  %v2883_v59 = vadd.f32 %v2840_v39, %v2520_v25  ;;  %v2480_v24 = vpop.f32.mrf.mxu1 }
 0x1cd   : > { %3150 = vst.msk [vmem:[%s5079_s15 + $0x60] sm:$0xf] %vm3125_vm1, %v3896_v41  ;;  %v3899_v44 = vpack.c.bf16 %v2992_v60, %v2992_v60  ;;  %v2990_v42 = vmax.f32 %v2958_v47, 0.0  ;;  %v2886_v18 = vadd.f32 %v4261_v32, %v2523_v57  ;;  %v2521_v45 = vadd.f32 %v2480_v24, %v2158_v46 }
 0x1ce   : > { %v2963_v12 = vadd.f32 %v5053_v62, %v2924_v49  ;;  %v2922_v0 = vmul.f32 %v5045_v54, %v2883_v59 }
 0x1cf   : > { %3153 = vst.msk [vmem:[%s5079_s15 + $0x6c] sm:$0xf] %vm3125_vm1, %v3899_v44  ;;  %v3897_v33 = vpack.c.bf16 %v2990_v42, %v2990_v42  ;;  %v2925_v17 = vmul.f32 %v5045_v54, %v2886_v18  ;;  %v2884_v19 = vadd.f32 %v2843_v34, %v2521_v45  ;;  %v3228_v52 = vld [vmem:[%s5079_s15 + $0x58] sm:$0xff] (%p4488_p5)  }
 0x1d0   : > { %v2995_v2 = vmax.f32 %v2963_v12, 0.0  ;;  %v2961_v7 = vadd.f32 %v5053_v62, %v2922_v0  ;;  %3229 = vst [vmem:[%s3167_s23 + $0xb0] sm:$0xff] (%p4488_p5), %v3228_v52  }
 0x1d1   : > { %3151 = vst.msk [vmem:[%s5079_s15 + $0x64] sm:$0xf] %vm3125_vm1, %v3897_v33  ;;  %v2964_v48 = vadd.f32 %v5053_v62, %v2925_v17  ;;  %v2923_v23 = vmul.f32 %v5045_v54, %v2884_v19  ;;  %v3184_v54 = vld [vmem:[%s5079_s15] sm:$0xff] (%p4488_p5)   ;;  %v3224_v31 = vld [vmem:[%s5079_s15 + $0x50] sm:$0xff] (%p4488_p5)  }
 0x1d2   : > { %v3902_v30 = vpack.c.bf16 %v2995_v2, %v2995_v2  ;;  %v2993_v5 = vmax.f32 %v2961_v7, 0.0  ;;  %3185 = vst [vmem:[%s3167_s23] sm:$0xff] (%p4488_p5), %v3184_v54   ;;  %3225 = vst [vmem:[%s3167_s23 + $0xa0] sm:$0xff] (%p4488_p5), %v3224_v31  }
 0x1d3   : > { %v2996_v6 = vmax.f32 %v2964_v48, 0.0  ;;  %v2962_v22 = vadd.f32 %v5053_v62, %v2923_v23  ;;  %v3188_v62 = vld [vmem:[%s5079_s15 + $0x8] sm:$0xff] (%p4488_p5)  }
 0x1d4   : > { %3156 = vst.msk [vmem:[%s5079_s15 + $0x78] sm:$0xf] %vm3125_vm1, %v3902_v30  ;;  %v3900_v14 = vpack.c.bf16 %v2993_v5, %v2993_v5  ;;  %3189 = vst [vmem:[%s3167_s23 + $0x10] sm:$0xff] (%p4488_p5), %v3188_v62  }
 0x1d5   : > { %v3903_v1 = vpack.c.bf16 %v2996_v6, %v2996_v6  ;;  %v2994_v63 = vmax.f32 %v2962_v22, 0.0  ;;  %3164 = sbr.rel (!%p4488_p5) target bundleno = 482 (0x1e2), region = 81 }
 0x1d6   : > { %3154 = vst.msk [vmem:[%s5079_s15 + $0x70] sm:$0xf] %vm3125_vm1, %v3900_v14  ;;  %v3236_v20 = vld [vmem:[%s5079_s15 + $0x68] sm:$0xff] (%p4488_p5)  }
 0x1d7   : > { %3157 = vst.msk [vmem:[%s5079_s15 + $0x7c] sm:$0xf] %vm3125_vm1, %v3903_v1  ;;  %v3901_v50 = vpack.c.bf16 %v2994_v63, %v2994_v63  ;;  %3237 = vst [vmem:[%s3167_s23 + $0xd0] sm:$0xff] (%p4488_p5), %v3236_v20  }
 0x1d8   : > { %v3232_v28 = vld [vmem:[%s5079_s15 + $0x60] sm:$0xff] (%p4488_p5)  }
 0x1d9   : > { %3155 = vst.msk [vmem:[%s5079_s15 + $0x74] sm:$0xf] %vm3125_vm1, %v3901_v50  ;;  %3233 = vst [vmem:[%s3167_s23 + $0xc0] sm:$0xff] (%p4488_p5), %v3232_v28  }
 0x1de   : > { %v3244_v51 = vld [vmem:[%s5079_s15 + $0x78] sm:$0xff]  }
 0x1df   : > { %3245 = vst [vmem:[%s3167_s23 + $0xf0] sm:$0xff] %v3244_v51  }
 0x1e0   : > { %v3240_v8 = vld [vmem:[%s5079_s15 + $0x70] sm:$0xff]  }
 0x1e1   : > { %3241 = vst [vmem:[%s3167_s23 + $0xe0] sm:$0xff] %v3240_v8  }
 0x1e2 PF: > { %p11_p10 = scmp.ge.s32.totalorder %s4475_s19, 4   ;;  %s5393_s15 = smov %s4427_s16 }
 0x1e3   : > { %s5394_s16 = smov %s4486_s22  ;;  %s5395_s17 = smov %s4475_s19 }
 0x1e4   :  { %13 = sbr.rel (!%p11_p10) target bundleno = 2 (0x2), region = 165 }

// kernel: inception_c_forward.14
= control target key start
LH: loop header
LB: loop body
LE: loop exit
PB: predicated region body
PF: predicated region fallthrough
CT: control target
= control target key end

     0   :  { %s4461_s15 = smov 0   ;;  %s4463_s16 = smov 0   ;;  %s5899_s0 = inlined_call_operand.vmem [shape: bf16[22,32,16], index: 0, kind: input, shape index: {}]   ;;  %s5900_s1 = inlined_call_operand.vmem [shape: bf16[7,16,192], index: 1, kind: input, shape index: {}]   ;;  %s5901_s2 = inlined_call_operand.vmem [shape: f32[1,192], index: 2, kind: input, shape index: {}]   ;;  %s5902_s3 = inlined_call_operand.vmem [shape: f32[1,192], index: 3, kind: input, shape index: {}]   ;;  %s5903_s4 = inlined_call_operand.vmem [shape: f32[16,32,192], index: 4, kind: output, shape index: {}]  }
   0x1   :  { %s4465_s17 = smov 0  }
   0x2 LB: > { %s3790_s18 = sadd.s32 4294967295, %s4433_s17   ;;  %s4478_s19 = sadd.s32 1, %s4433_s17   ;;  %s4433_s17 = sphi %s4465_s17, %s6018_s17   ;;  %s4429_s16 = sphi %s4463_s16, %s6017_s16   ;;  %s4425_s15 = sphi %s4461_s15, %s6016_s15  }
   0x3   : > { %s18_s20 = ssub.s32 %s4433_s17, %s4478_s19  ;;  %s21_s21 = sadd.s32 1, %s4429_s16 }
   0x4   : > { %p19_p0 = scmp.eq.s32.totalorder %s18_s20, 0  ;;  %p28_p1 = scmp.ne.s32.totalorder %s4429_s16, %s4425_s15 }
   0x5   : > { %p29_p2 = scmp.eq.s32.totalorder %s4433_s17, 0  ;;  %p121_p3 = scmp.eq.s32.totalorder %s3790_s18, 1 }
   0x6   : > { %s4489_s22 = scalar_select %p19_p0, %s4429_s16, %s21_s21  }
   0x7   : > { %p30_p4 = por %p29_p2, %p28_p1  ;;  %p4491_p5 = por %p121_p3, %p28_p1 }
   0x8   : > { %p3793_p6 = scmp.ge.s32.totalorder %s4433_s17, 2 }
   0xa   : > { %152 = sbr.rel (%p3793_p6) target bundleno = 30 (0x1e), region = 28 }
   0xf   : > { %155 = sbr.rel (!%p30_p4) target bundleno = 30 (0x1e), region = 32  ;;  %s157_s24 = sand.u32 (%p30_p4), 1, %s4429_s16  }
  0x10   : > { %s4246_s25 = sshll.u32 (%p30_p4), %s4433_s17, 3  ;;  %s4251_s26 = smul.u32 (%p30_p4), 176, %s157_s24 }
  0x11   : > { %s4501_s29 = scalar_lea.vmem (%p30_p4), %s5899_s0, %s4246_s25 }
  0x12   : > { %v179_v0 = vld [vmem:[%s4501_s29] sm:$0xff] (%p30_p4)   ;;  %v183_v1 = vld [vmem:[%s4501_s29 + $0x10] sm:$0xff] (%p30_p4)   ;;  %s4509_s30 = scalar_lea.vmem (%p30_p4), [#allocation2], %s4251_s26 }
  0x13   : > { %v187_v2 = vld [vmem:[%s4501_s29 + $0x20] sm:$0xff] (%p30_p4)   ;;  %v191_v3 = vld [vmem:[%s4501_s29 + $0x30] sm:$0xff] (%p30_p4)   ;;  %180 = vst [vmem:[%s4509_s30] sm:$0xff] (%p30_p4), %v179_v0   ;;  %184 = vst [vmem:[%s4509_s30 + $0x8] sm:$0xff] (%p30_p4), %v183_v1  }
  0x14   : > { %v195_v4 = vld [vmem:[%s4501_s29 + $0x40] sm:$0xff]   ;;  %v199_v5 = vld [vmem:[%s4501_s29 + $0x50] sm:$0xff]   ;;  %188 = vst [vmem:[%s4509_s30 + $0x10] sm:$0xff] %v187_v2   ;;  %192 = vst [vmem:[%s4509_s30 + $0x18] sm:$0xff] %v191_v3  }
  0x15   : > { %196 = vst [vmem:[%s4509_s30 + $0x20] sm:$0xff] %v195_v4   ;;  %200 = vst [vmem:[%s4509_s30 + $0x28] sm:$0xff] %v199_v5   ;;  %v203_v6 = vld [vmem:[%s4501_s29 + $0x60] sm:$0xff]   ;;  %v207_v7 = vld [vmem:[%s4501_s29 + $0x70] sm:$0xff]  }
  0x16   : > { %v211_v8 = vld [vmem:[%s4501_s29 + $0x80] sm:$0xff]   ;;  %204 = vst [vmem:[%s4509_s30 + $0x30] sm:$0xff] %v203_v6   ;;  %208 = vst [vmem:[%s4509_s30 + $0x38] sm:$0xff] %v207_v7   ;;  %v215_v9 = vld [vmem:[%s4501_s29 + $0x90] sm:$0xff]  }
  0x17   : > { %212 = vst [vmem:[%s4509_s30 + $0x40] sm:$0xff] %v211_v8   ;;  %v219_v10 = vld [vmem:[%s4501_s29 + $0xa0] sm:$0xff]   ;;  %v223_v11 = vld [vmem:[%s4501_s29 + $0xb0] sm:$0xff]   ;;  %216 = vst [vmem:[%s4509_s30 + $0x48] sm:$0xff] %v215_v9  }
  0x18   : > { %220 = vst [vmem:[%s4509_s30 + $0x50] sm:$0xff] %v219_v10   ;;  %224 = vst [vmem:[%s4509_s30 + $0x58] sm:$0xff] %v223_v11   ;;  %v227_v12 = vld [vmem:[%s4501_s29 + $0xc0] sm:$0xff]   ;;  %v231_v13 = vld [vmem:[%s4501_s29 + $0xd0] sm:$0xff]  }
  0x19   : > { %v235_v14 = vld [vmem:[%s4501_s29 + $0xe0] sm:$0xff]   ;;  %228 = vst [vmem:[%s4509_s30 + $0x60] sm:$0xff] %v227_v12   ;;  %232 = vst [vmem:[%s4509_s30 + $0x68] sm:$0xff] %v231_v13   ;;  %v239_v15 = vld [vmem:[%s4501_s29 + $0xf0] sm:$0xff]  }
  0x1a   : > { %236 = vst [vmem:[%s4509_s30 + $0x70] sm:$0xff] %v235_v14   ;;  %v243_v16 = vld [vmem:[%s4501_s29 + $0x100] sm:$0xff]   ;;  %v247_v17 = vld [vmem:[%s4501_s29 + $0x110] sm:$0xff]   ;;  %240 = vst [vmem:[%s4509_s30 + $0x78] sm:$0xff] %v239_v15  }
  0x1b   : > { %244 = vst [vmem:[%s4509_s30 + $0x80] sm:$0xff] %v243_v16   ;;  %248 = vst [vmem:[%s4509_s30 + $0x88] sm:$0xff] %v247_v17   ;;  %v251_v18 = vld [vmem:[%s4501_s29 + $0x120] sm:$0xff]   ;;  %v255_v19 = vld [vmem:[%s4501_s29 + $0x130] sm:$0xff]  }
  0x1c   : > { %v259_v20 = vld [vmem:[%s4501_s29 + $0x140] sm:$0xff]   ;;  %252 = vst [vmem:[%s4509_s30 + $0x90] sm:$0xff] %v251_v18   ;;  %256 = vst [vmem:[%s4509_s30 + $0x98] sm:$0xff] %v255_v19   ;;  %v263_v21 = vld [vmem:[%s4501_s29 + $0x150] sm:$0xff]  }
  0x1d   : > { %260 = vst [vmem:[%s4509_s30 + $0xa0] sm:$0xff] %v259_v20   ;;  %264 = vst [vmem:[%s4509_s30 + $0xa8] sm:$0xff] %v263_v21  }
  0x1e PF: > { %p3796_p7 = scmp.ge.s32.totalorder %s4433_s17, 1  ;;  %p377_p8 = scmp.lt.s32.totalorder %s4433_s17, 3 }
  0x20   : > { %p378_p9 = pnand %p3796_p7, %p377_p8 }
  0x22   : > { %381 = sbr.rel (%p378_p9) target bundleno = 712 (0x2c8), region = 73 }
  0x27   : > { %v4278_v22 = vld [vmem:[%s5900_s1 + $0x14] ss:$8 sps:$4 sm:$0xff]   ;;  %s384_s7 = sand.u32 1, %s4425_s15   ;;  %v4280_v23 = vld [vmem:[%s5900_s1 + $0x10] ss:$8 sps:$4 sm:$0xff]   ;;  %v5904_v24 = vmov 0  }
  0x28   : > { %652 = vmatprep.mubr.bf16.mxu0 %v5904_v24  ;;  %732 = vmatprep.mubr.bf16.mxu1 %v5904_v24  ;;  %s4252_s10 = smul.u32 176, %s384_s7  ;;  %vm571_vm0 = vcmask 130048   ;;  %v4283_v25 = vld [vmem:[%s5900_s1] ss:$8 sps:$4 sm:$0xff]   ;;  %v4285_v26 = vld [vmem:[%s5900_s1 + $0x4] ss:$8 sps:$4 sm:$0xff]  }
  0x29   : > { %634 = vmatprep.subr.bf16.mxu0 %v4278_v22  ;;  %4249 = vmatprep.subr.bf16.mxu1 %v4278_v22  ;;  %v4286_v27 = vld [vmem:[%s5900_s1 + $0x20] ss:$8 sps:$4 sm:$0xff]   ;;  %v4288_v28 = vld [vmem:[%s5900_s1 + $0x24] ss:$8 sps:$4 sm:$0xff]   ;;  %v4307_v35 = vld [vmem:[%s5900_s1 + $0x34] ss:$8 sps:$4 sm:$0xff]  }
  0x2a   : > { %635 = vmatpush1.bf16.msra.mxu0 %v4280_v23  ;;  %4250 = vmatpush1.bf16.msra.mxu1 %v4280_v23  ;;  %s4574_s26 = scalar_lea.vmem [#allocation2], %s4252_s10  ;;  %v4310_v36 = vld [vmem:[%s5900_s1 + $0x44] ss:$8 sps:$4 sm:$0xff]   ;;  %v4308_v49 = vld [vmem:[%s5900_s1 + $0x40] ss:$8 sps:$4 sm:$0xff]   ;;  %s3797_s29 = sshll.u32 %s384_s7, 9 }
  0x2b   : > { %v4281_v29 = vld [vmem:[%s4574_s26 + $0x8] sm:$0xff]   ;;  %965 = vmatprep.subr.bf16.mxu1 %v4285_v26  ;;  %1332 = vmatprep.subr.bf16.mxu0 %v4288_v28  ;;  %v4289_v31 = vld [vmem:[%s4574_s26 + $0x10] sm:$0xff]   ;;  %v4291_v33 = vld [vmem:[%s4574_s26 + $0x18] sm:$0xff]   ;;  %vm3516_vm1 = vcmask 523264   ;;  %s5472_s15 = scalar_lea.vmem [#allocation3], %s3797_s29  ;;  %s4248_s7 = sshll.u32 (%p4491_p5), %s3790_s18, 5 }
  0x2c   : > { %v4282_v30 = vld [vmem:[%s4574_s26 + $0x48] sm:$0xff]   ;;  %v4290_v32 = vld [vmem:[%s4574_s26 + $0x50] sm:$0xff]   ;;  %v4292_v34 = vld [vmem:[%s4574_s26 + $0x58] sm:$0xff]   ;;  %s5762_s23 = scalar_lea.vmem (%p4491_p5), %s5903_s4, %s4248_s7 }
  0x2d   : > { %3850 = vmatmul.mubr.msk.bf16.vlgmr.msra.gmra.mxu0 %vm571_vm0, %v4281_v29  ;;  %3858 = vmatmul.mubr.msk.bf16.vlgmr.msra.gmra.mxu1 %vm571_vm0, %v4282_v30  ;;  %v4293_v37 = vld [vmem:[%s4574_s26 + $0x20] sm:$0xff]   ;;  %v4295_v39 = vld [vmem:[%s4574_s26 + $0x28] sm:$0xff]   ;;  %v4297_v41 = vld [vmem:[%s4574_s26 + $0x30] sm:$0xff]  }
  0x2e   : > { %1333 = vmatpush1.bf16.msra.mxu0 %v4286_v27  ;;  %966 = vmatpush1.bf16.msra.mxu1 %v4283_v25  ;;  %v4294_v38 = vld [vmem:[%s4574_s26 + $0x60] sm:$0xff]   ;;  %v4296_v40 = vld [vmem:[%s4574_s26 + $0x68] sm:$0xff]   ;;  %v4298_v42 = vld [vmem:[%s4574_s26 + $0x70] sm:$0xff]  }
  0x2f   : > { %662 = vmatprep.mubr.bf16.mxu0 %v5904_v24  ;;  %742 = vmatprep.mubr.bf16.mxu1 %v5904_v24  ;;  %v4299_v43 = vld [vmem:[%s4574_s26 + $0x38] sm:$0xff]   ;;  %v4301_v45 = vld [vmem:[%s4574_s26 + $0x40] sm:$0xff]   ;;  %v4304_v47 = vld [vmem:[%s4574_s26 + $0x10] sm:$0xff]  }
  0x30   : > { %1763 = vmatprep.subr.bf16.mxu1 %v4307_v35  ;;  %2194 = vmatprep.subr.bf16.mxu0 %v4310_v36  ;;  %v4300_v44 = vld [vmem:[%s4574_s26 + $0x78] sm:$0xff]   ;;  %v4302_v46 = vld [vmem:[%s4574_s26 + $0x80] sm:$0xff]   ;;  %v4311_v52 = vld [vmem:[%s4574_s26 + $0x8] sm:$0xff]  }
  0x31   : > { %v4303_v48 = vld [vmem:[%s4574_s26] sm:$0xff]   ;;  %v4312_v53 = vld [vmem:[%s4574_s26 + $0x18] sm:$0xff]   ;;  %v4313_v56 = vld [vmem:[%s4574_s26 + $0x10] sm:$0xff]  }
  0x32   : > { %v4305_v50 = vld [vmem:[%s5900_s1 + $0x30] ss:$8 sps:$4 sm:$0xff]   ;;  %v4345_v51 = vld [vmem:[%s5900_s1 + $0x54] ss:$8 sps:$4 sm:$0xff]   ;;  %v4348_v54 = vld [vmem:[%s5900_s1 + $0x64] ss:$8 sps:$4 sm:$0xff]  }
  0x33   : > { %v4314_v55 = vld [vmem:[%s4574_s26 + $0x20] sm:$0xff]   ;;  %v4316_v57 = vld [vmem:[%s4574_s26 + $0x28] sm:$0xff]   ;;  %v4315_v58 = vld [vmem:[%s4574_s26 + $0x18] sm:$0xff]  }
  0x34   : > { %v4318_v59 = vld [vmem:[%s4574_s26 + $0x30] sm:$0xff]   ;;  %v4317_v60 = vld [vmem:[%s4574_s26 + $0x20] sm:$0xff]   ;;  %v4320_v61 = vld [vmem:[%s4574_s26 + $0x38] sm:$0xff]  }
  0x35   : > { %3851 = vmatmul.mubr.msk.bf16.gmra.mxu0 %vm571_vm0, %v4289_v31  ;;  %3859 = vmatmul.mubr.msk.bf16.gmra.mxu1 %vm571_vm0, %v4290_v32  ;;  %v4319_v62 = vld [vmem:[%s4574_s26 + $0x28] sm:$0xff]   ;;  %v4322_v63 = vld [vmem:[%s4574_s26 + $0x40] sm:$0xff]   ;;  %v4321_v0 = vld [vmem:[%s4574_s26 + $0x30] sm:$0xff]  }
  0x36   : > { %672 = vmatprep.mubr.bf16.mxu0 %v5904_v24  ;;  %752 = vmatprep.mubr.bf16.mxu1 %v5904_v24  ;;  %v4324_v1 = vld [vmem:[%s4574_s26 + $0x48] sm:$0xff]   ;;  %v4323_v2 = vld [vmem:[%s4574_s26 + $0x38] sm:$0xff]   ;;  %v4326_v3 = vld [vmem:[%s4574_s26 + $0x50] sm:$0xff]  }
  0x37   : > { %v4325_v4 = vld [vmem:[%s4574_s26 + $0x40] sm:$0xff]   ;;  %v4328_v5 = vld [vmem:[%s4574_s26 + $0x58] sm:$0xff]   ;;  %v4327_v6 = vld [vmem:[%s4574_s26 + $0x48] sm:$0xff]  }
  0x38   : > { %v4330_v7 = vld [vmem:[%s4574_s26 + $0x60] sm:$0xff]   ;;  %v4329_v8 = vld [vmem:[%s4574_s26 + $0x50] sm:$0xff]   ;;  %v4332_v9 = vld [vmem:[%s4574_s26 + $0x68] sm:$0xff]  }
  0x39   : > { %v4331_v10 = vld [vmem:[%s4574_s26 + $0x58] sm:$0xff]   ;;  %v4334_v11 = vld [vmem:[%s4574_s26 + $0x70] sm:$0xff]   ;;  %v4333_v12 = vld [vmem:[%s4574_s26 + $0x60] sm:$0xff]  }
  0x3a   : > { %v4336_v13 = vld [vmem:[%s4574_s26 + $0x78] sm:$0xff]   ;;  %v4335_v14 = vld [vmem:[%s4574_s26 + $0x68] sm:$0xff]   ;;  %v4338_v15 = vld [vmem:[%s4574_s26 + $0x80] sm:$0xff]  }
  0x3b   : > { %v4337_v16 = vld [vmem:[%s4574_s26 + $0x70] sm:$0xff]   ;;  %v4340_v17 = vld [vmem:[%s4574_s26 + $0x88] sm:$0xff]   ;;  %v4339_v18 = vld [vmem:[%s4574_s26 + $0x78] sm:$0xff]  }
  0x3c   : > { %v4342_v19 = vld [vmem:[%s4574_s26 + $0x20] sm:$0xff]   ;;  %v4341_v20 = vld [vmem:[%s4574_s26 + $0x18] sm:$0xff]   ;;  %v4350_v29 = vld [vmem:[%s4574_s26 + $0x28] sm:$0xff]  }
  0x3d   : > { %3852 = vmatmul.mubr.msk.bf16.gmra.mxu0 %vm571_vm0, %v4291_v33  ;;  %3860 = vmatmul.mubr.msk.bf16.gmra.mxu1 %vm571_vm0, %v4292_v34  ;;  %v4346_v21 = vld [vmem:[%s5900_s1 + $0x60] ss:$8 sps:$4 sm:$0xff]   ;;  %v4343_v22 = vld [vmem:[%s5900_s1 + $0x50] ss:$8 sps:$4 sm:$0xff]  }
  0x3e   : > { %682 = vmatprep.mubr.bf16.mxu0 %v5904_v24  ;;  %762 = vmatprep.mubr.bf16.mxu1 %v5904_v24  ;;  %v4349_v31 = vld [vmem:[%s4574_s26 + $0x20] sm:$0xff]  }
  0x45   : > { %3853 = vmatmul.mubr.msk.bf16.gmra.mxu0 %vm571_vm0, %v4293_v37  ;;  %3861 = vmatmul.mubr.msk.bf16.gmra.mxu1 %vm571_vm0, %v4294_v38 }
  0x46   : > { %692 = vmatprep.mubr.bf16.mxu0 %v5904_v24  ;;  %772 = vmatprep.mubr.bf16.mxu1 %v5904_v24 }
  0x4d   : > { %3854 = vmatmul.mubr.msk.bf16.gmra.mxu0 %vm571_vm0, %v4295_v39  ;;  %3862 = vmatmul.mubr.msk.bf16.gmra.mxu1 %vm571_vm0, %v4296_v40  ;;  %v4352_v39 = vld [vmem:[%s4574_s26 + $0x30] sm:$0xff]  }
  0x4e   : > { %702 = vmatprep.mubr.bf16.mxu0 %v5904_v24  ;;  %782 = vmatprep.mubr.bf16.mxu1 %v5904_v24 }
  0x55   : > { %3855 = vmatmul.mubr.msk.bf16.gmra.mxu0 %vm571_vm0, %v4297_v41  ;;  %3863 = vmatmul.mubr.msk.bf16.gmra.mxu1 %vm571_vm0, %v4298_v42  ;;  %v4351_v41 = vld [vmem:[%s4574_s26 + $0x28] sm:$0xff]  }
  0x56   : > { %712 = vmatprep.mubr.bf16.mxu0 %v5904_v24  ;;  %792 = vmatprep.mubr.bf16.mxu1 %v5904_v24 }
  0x5d   : > { %3856 = vmatmul.mubr.msk.bf16.gmra.mxu0 %vm571_vm0, %v4299_v43  ;;  %3864 = vmatmul.mubr.msk.bf16.gmra.mxu1 %vm571_vm0, %v4300_v44 }
  0x5e   : > { %722 = vmatprep.mubr.bf16.mxu0 %v5904_v24  ;;  %802 = vmatprep.mubr.bf16.mxu1 %v5904_v24 }
  0x65   : > { %3857 = vmatmul.mubr.msk.bf16.gmra.mxu0 %vm571_vm0, %v4301_v45  ;;  %3865 = vmatmul.mubr.msk.bf16.gmra.mxu1 %vm571_vm0, %v4302_v46 }
  0x66   : > { %1350 = vmatprep.mubr.bf16.mxu0 %v5904_v24  ;;  %983 = vmatprep.mubr.bf16.mxu1 %v5904_v24 }
  0x6d   : > { %3952 = vmatmul.mubr.msk.bf16.vlgmr.msra.gmra.mxu0 %vm571_vm0, %v4304_v47  ;;  %3884 = vmatmul.mubr.msk.bf16.vlgmr.msra.gmra.mxu1 %vm571_vm0, %v4303_v48 }
  0x6e   : > { %2195 = vmatpush1.bf16.msra.mxu0 %v4308_v49  ;;  %1764 = vmatpush1.bf16.msra.mxu1 %v4305_v50  ;;  %v4354_v49 = vld [vmem:[%s4574_s26 + $0x38] sm:$0xff]  }
  0x6f   : > { %993 = vmatprep.mubr.bf16.mxu1 %v5904_v24  ;;  %1360 = vmatprep.mubr.bf16.mxu0 %v5904_v24 }
  0x70   : > { %2625 = vmatprep.subr.bf16.mxu1 %v4345_v51  ;;  %3056 = vmatprep.subr.bf16.mxu0 %v4348_v54  ;;  %v4353_v51 = vld [vmem:[%s4574_s26 + $0x30] sm:$0xff]  }
  0x75   : > { %3953 = vmatmul.mubr.msk.bf16.gmra.mxu0 %vm571_vm0, %v4312_v53  ;;  %3885 = vmatmul.mubr.msk.bf16.gmra.mxu1 %vm571_vm0, %v4311_v52 }
  0x76   : > { %1370 = vmatprep.mubr.bf16.mxu0 %v5904_v24  ;;  %1003 = vmatprep.mubr.bf16.mxu1 %v5904_v24 }
  0x7d   : > { %3954 = vmatmul.mubr.msk.bf16.gmra.mxu0 %vm571_vm0, %v4314_v55  ;;  %3886 = vmatmul.mubr.msk.bf16.gmra.mxu1 %vm571_vm0, %v4313_v56 }
  0x7e   : > { %1380 = vmatprep.mubr.bf16.mxu0 %v5904_v24  ;;  %1013 = vmatprep.mubr.bf16.mxu1 %v5904_v24 }
  0x85   : > { %3955 = vmatmul.mubr.msk.bf16.gmra.mxu0 %vm571_vm0, %v4316_v57  ;;  %3887 = vmatmul.mubr.msk.bf16.gmra.mxu1 %vm571_vm0, %v4315_v58 }
  0x86   : > { %1390 = vmatprep.mubr.bf16.mxu0 %v5904_v24  ;;  %1023 = vmatprep.mubr.bf16.mxu1 %v5904_v24 }
  0x8d   : > { %3956 = vmatmul.mubr.msk.bf16.gmra.mxu0 %vm571_vm0, %v4318_v59  ;;  %3888 = vmatmul.mubr.msk.bf16.gmra.mxu1 %vm571_vm0, %v4317_v60  ;;  %v4356_v59 = vld [vmem:[%s4574_s26 + $0x40] sm:$0xff]  }
  0x8e   : > { %1400 = vmatprep.mubr.bf16.mxu0 %v5904_v24  ;;  %1033 = vmatprep.mubr.bf16.mxu1 %v5904_v24 }
  0x95   : > { %3957 = vmatmul.mubr.msk.bf16.gmra.mxu0 %vm571_vm0, %v4320_v61  ;;  %3889 = vmatmul.mubr.msk.bf16.gmra.mxu1 %vm571_vm0, %v4319_v62  ;;  %v4355_v61 = vld [vmem:[%s4574_s26 + $0x38] sm:$0xff]  }
  0x96   : > { %1410 = vmatprep.mubr.bf16.mxu0 %v5904_v24  ;;  %1043 = vmatprep.mubr.bf16.mxu1 %v5904_v24 }
  0x9d   : > { %3958 = vmatmul.mubr.msk.bf16.gmra.mxu0 %vm571_vm0, %v4322_v63  ;;  %3890 = vmatmul.mubr.msk.bf16.gmra.mxu1 %vm571_vm0, %v4321_v0 }
  0x9e   : > { %1420 = vmatprep.mubr.bf16.mxu0 %v5904_v24  ;;  %1053 = vmatprep.mubr.bf16.mxu1 %v5904_v24 }
  0xa5   : > { %3959 = vmatmul.mubr.msk.bf16.gmra.mxu0 %vm571_vm0, %v4324_v1  ;;  %3891 = vmatmul.mubr.msk.bf16.gmra.mxu1 %vm571_vm0, %v4323_v2 }
  0xa6   : > { %1430 = vmatprep.mubr.bf16.mxu0 %v5904_v24  ;;  %1063 = vmatprep.mubr.bf16.mxu1 %v5904_v24 }
  0xad   : > { %3960 = vmatmul.mubr.msk.bf16.gmra.mxu0 %vm571_vm0, %v4326_v3  ;;  %3892 = vmatmul.mubr.msk.bf16.gmra.mxu1 %vm571_vm0, %v4325_v4 }
  0xae   : > { %1440 = vmatprep.mubr.bf16.mxu0 %v5904_v24  ;;  %1073 = vmatprep.mubr.bf16.mxu1 %v5904_v24 }
  0xb5   : > { %3961 = vmatmul.mubr.msk.bf16.gmra.mxu0 %vm571_vm0, %v4328_v5  ;;  %3893 = vmatmul.mubr.msk.bf16.gmra.mxu1 %vm571_vm0, %v4327_v6  ;;  %v4358_v5 = vld [vmem:[%s4574_s26 + $0x48] sm:$0xff]  }
  0xb6   : > { %1450 = vmatprep.mubr.bf16.mxu0 %v5904_v24  ;;  %1083 = vmatprep.mubr.bf16.mxu1 %v5904_v24 }
  0xbd   : > { %3962 = vmatmul.mubr.msk.bf16.gmra.mxu0 %vm571_vm0, %v4330_v7  ;;  %3894 = vmatmul.mubr.msk.bf16.gmra.mxu1 %vm571_vm0, %v4329_v8  ;;  %v4357_v7 = vld [vmem:[%s4574_s26 + $0x40] sm:$0xff]  }
  0xbe   : > { %1460 = vmatprep.mubr.bf16.mxu0 %v5904_v24  ;;  %1093 = vmatprep.mubr.bf16.mxu1 %v5904_v24 }
  0xc5   : > { %3963 = vmatmul.mubr.msk.bf16.gmra.mxu0 %vm571_vm0, %v4332_v9  ;;  %3895 = vmatmul.mubr.msk.bf16.gmra.mxu1 %vm571_vm0, %v4331_v10 }
  0xc6   : > { %1470 = vmatprep.mubr.bf16.mxu0 %v5904_v24  ;;  %1103 = vmatprep.mubr.bf16.mxu1 %v5904_v24 }
  0xcd   : > { %3964 = vmatmul.mubr.msk.bf16.gmra.mxu0 %vm571_vm0, %v4334_v11  ;;  %3896 = vmatmul.mubr.msk.bf16.gmra.mxu1 %vm571_vm0, %v4333_v12 }
  0xce   : > { %1480 = vmatprep.mubr.bf16.mxu0 %v5904_v24  ;;  %1113 = vmatprep.mubr.bf16.mxu1 %v5904_v24 }
  0xd5   : > { %3965 = vmatmul.mubr.msk.bf16.gmra.mxu0 %vm571_vm0, %v4336_v13  ;;  %3897 = vmatmul.mubr.msk.bf16.gmra.mxu1 %vm571_vm0, %v4335_v14 }
  0xd6   : > { %1490 = vmatprep.mubr.bf16.mxu0 %v5904_v24  ;;  %1123 = vmatprep.mubr.bf16.mxu1 %v5904_v24 }
  0xdd   : > { %3966 = vmatmul.mubr.msk.bf16.gmra.mxu0 %vm571_vm0, %v4338_v15  ;;  %3898 = vmatmul.mubr.msk.bf16.gmra.mxu1 %vm571_vm0, %v4337_v16  ;;  %v4360_v15 = vld [vmem:[%s4574_s26 + $0x50] sm:$0xff]  }
  0xde   : > { %1500 = vmatprep.mubr.bf16.mxu0 %v5904_v24  ;;  %1133 = vmatprep.mubr.bf16.mxu1 %v5904_v24 }
  0xe5   : > { %3967 = vmatmul.mubr.msk.bf16.gmra.mxu0 %vm571_vm0, %v4340_v17  ;;  %3899 = vmatmul.mubr.msk.bf16.gmra.mxu1 %vm571_vm0, %v4339_v18  ;;  %v4359_v17 = vld [vmem:[%s4574_s26 + $0x48] sm:$0xff]  }
  0xe6   : > { %2212 = vmatprep.mubr.bf16.mxu0 %v5904_v24  ;;  %1781 = vmatprep.mubr.bf16.mxu1 %v5904_v24 }
  0xed   : > { %v4746_v23 = vpop.f32.mrf.mxu0  ;;  %4088 = vmatmul.mubr.msk.bf16.vlgmr.msra.gmra.mxu0 %vm571_vm0, %v4342_v19  ;;  %v4749_v25 = vpop.f32.mrf.mxu1  ;;  %4020 = vmatmul.mubr.msk.bf16.vlgmr.msra.gmra.mxu1 %vm571_vm0, %v4341_v20 }
  0xee   : > { %3057 = vmatpush1.bf16.msra.mxu0 %v4346_v21  ;;  %2626 = vmatpush1.bf16.msra.mxu1 %v4343_v22 }
  0xef   : > { %v4752_v26 = vpop.f32.mrf.mxu0  ;;  %1791 = vmatprep.mubr.bf16.mxu1 %v5904_v24  ;;  %v4755_v27 = vpop.f32.mrf.mxu1  ;;  %2222 = vmatprep.mubr.bf16.mxu0 %v5904_v24 }
  0xf1   : > { %v4758_v28 = vpop.f32.mrf.mxu0  ;;  %v4761_v30 = vpop.f32.mrf.mxu1 }
  0xf3   : > { %v4764_v32 = vpop.f32.mrf.mxu0  ;;  %v4766_v33 = vpop.f32.mrf.mxu1 }
  0xf5   : > { %v4768_v34 = vpop.f32.mrf.mxu0  ;;  %4089 = vmatmul.mubr.msk.bf16.gmra.mxu0 %vm571_vm0, %v4350_v29  ;;  %v4771_v35 = vpop.f32.mrf.mxu1  ;;  %4021 = vmatmul.mubr.msk.bf16.gmra.mxu1 %vm571_vm0, %v4349_v31 }
  0xf6   : > { %2232 = vmatprep.mubr.bf16.mxu0 %v5904_v24  ;;  %1801 = vmatprep.mubr.bf16.mxu1 %v5904_v24 }
  0xf7   : > { %v4775_v36 = vpop.f32.mrf.mxu0  ;;  %v4778_v37 = vpop.f32.mrf.mxu1 }
  0xf9   : > { %v4780_v38 = vpop.f32.mrf.mxu0  ;;  %v4783_v40 = vpop.f32.mrf.mxu1 }
  0xfb   : > { %v4786_v42 = vpop.f32.mrf.mxu0  ;;  %v4788_v43 = vpop.f32.mrf.mxu1 }
  0xfd   : > { %v4790_v44 = vpop.f32.mrf.mxu0  ;;  %4090 = vmatmul.mubr.msk.bf16.gmra.mxu0 %vm571_vm0, %v4352_v39  ;;  %v4793_v45 = vpop.f32.mrf.mxu1  ;;  %4022 = vmatmul.mubr.msk.bf16.gmra.mxu1 %vm571_vm0, %v4351_v41  ;;  %v4362_v39 = vld [vmem:[%s4574_s26 + $0x58] sm:$0xff]  }
  0xfe   : > { %2242 = vmatprep.mubr.bf16.mxu0 %v5904_v24  ;;  %1811 = vmatprep.mubr.bf16.mxu1 %v5904_v24 }
  0xff   : > { %v4797_v46 = vpop.f32.mrf.mxu0  ;;  %v4800_v47 = vpop.f32.mrf.mxu1 }
 0x101   : > { %v4802_v48 = vpop.f32.mrf.mxu0  ;;  %v4805_v50 = vpop.f32.mrf.mxu1 }
 0x103   : > { %v4808_v52 = vpop.f32.mrf.mxu0  ;;  %v4810_v53 = vpop.f32.mrf.mxu1 }
 0x105   : > { %v4812_v54 = vpop.f32.mrf.mxu0  ;;  %4091 = vmatmul.mubr.msk.bf16.gmra.mxu0 %vm571_vm0, %v4354_v49  ;;  %v4815_v55 = vpop.f32.mrf.mxu1  ;;  %4023 = vmatmul.mubr.msk.bf16.gmra.mxu1 %vm571_vm0, %v4353_v51  ;;  %v4361_v49 = vld [vmem:[%s4574_s26 + $0x50] sm:$0xff]  }
 0x106   : > { %2252 = vmatprep.mubr.bf16.mxu0 %v5904_v24  ;;  %1821 = vmatprep.mubr.bf16.mxu1 %v5904_v24 }
 0x107   : > { %v4819_v56 = vpop.f32.mrf.mxu0  ;;  %v4822_v57 = vpop.f32.mrf.mxu1 }
 0x109   : > { %v4824_v58 = vpop.f32.mrf.mxu0  ;;  %v4827_v60 = vpop.f32.mrf.mxu1 }
 0x10b   : > { %v4830_v62 = vpop.f32.mrf.mxu0  ;;  %v4832_v63 = vpop.f32.mrf.mxu1 }
 0x10d   : > { %v4834_v0 = vpop.f32.mrf.mxu0  ;;  %4092 = vmatmul.mubr.msk.bf16.gmra.mxu0 %vm571_vm0, %v4356_v59  ;;  %v4837_v1 = vpop.f32.mrf.mxu1  ;;  %4024 = vmatmul.mubr.msk.bf16.gmra.mxu1 %vm571_vm0, %v4355_v61 }
 0x10e   : > { %5907 = vst [vmem:[#allocation4_spill] sm:$0xff] %v4837_v1  ;;  %2262 = vmatprep.mubr.bf16.mxu0 %v5904_v24  ;;  %1831 = vmatprep.mubr.bf16.mxu1 %v5904_v24 }
 0x10f   : > { %v4841_v2 = vpop.f32.mrf.mxu0  ;;  %v4844_v3 = vpop.f32.mrf.mxu1 }
 0x110   : > { %5908 = vst [vmem:[#allocation5_spill] sm:$0xff] %v4844_v3 }
 0x111   : > { %v4846_v4 = vpop.f32.mrf.mxu0  ;;  %v4849_v6 = vpop.f32.mrf.mxu1 }
 0x112   : > { %5909 = vst [vmem:[#allocation6_spill] sm:$0xff] %v4849_v6  ;;  %v4365_v6 = vld [vmem:[%s4574_s26 + $0x60] sm:$0xff]  }
 0x113   : > { %v4852_v8 = vpop.f32.mrf.mxu0  ;;  %v4854_v9 = vpop.f32.mrf.mxu1 }
 0x114   : > { %5910 = vst [vmem:[#allocation7_spill] sm:$0xff] %v4854_v9 }
 0x115   : > { %v4856_v10 = vpop.f32.mrf.mxu0  ;;  %4093 = vmatmul.mubr.msk.bf16.gmra.mxu0 %vm571_vm0, %v4358_v5  ;;  %v4859_v11 = vpop.f32.mrf.mxu1  ;;  %4025 = vmatmul.mubr.msk.bf16.gmra.mxu1 %vm571_vm0, %v4357_v7 }
 0x116   : > { %5911 = vst [vmem:[#allocation8_spill] sm:$0xff] %v4859_v11  ;;  %2272 = vmatprep.mubr.bf16.mxu0 %v5904_v24  ;;  %1841 = vmatprep.mubr.bf16.mxu1 %v5904_v24 }
 0x117   : > { %v4863_v12 = vpop.f32.mrf.mxu0  ;;  %v4866_v13 = vpop.f32.mrf.mxu1 }
 0x118   : > { %5912 = vst [vmem:[#allocation9_spill] sm:$0xff] %v4866_v13 }
 0x119   : > { %v4868_v14 = vpop.f32.mrf.mxu0  ;;  %v4871_v16 = vpop.f32.mrf.mxu1 }
 0x11a   : > { %5913 = vst [vmem:[#allocation10_spill] sm:$0xff] %v4871_v16 }
 0x11b   : > { %v4874_v18 = vpop.f32.mrf.mxu0  ;;  %v4876_v19 = vpop.f32.mrf.mxu1 }
 0x11c   : > { %5914 = vst [vmem:[#allocation11_spill] sm:$0xff] %v4876_v19 }
 0x11d   : > { %v4878_v20 = vpop.f32.mrf.mxu0  ;;  %4094 = vmatmul.mubr.msk.bf16.gmra.mxu0 %vm571_vm0, %v4360_v15  ;;  %v4881_v21 = vpop.f32.mrf.mxu1  ;;  %4026 = vmatmul.mubr.msk.bf16.gmra.mxu1 %vm571_vm0, %v4359_v17 }
 0x11e   : > { %5915 = vst [vmem:[#allocation12_spill] sm:$0xff] %v4881_v21  ;;  %2282 = vmatprep.mubr.bf16.mxu0 %v5904_v24  ;;  %1851 = vmatprep.mubr.bf16.mxu1 %v5904_v24 }
 0x11f   : > { %v4885_v22 = vpop.f32.mrf.mxu0  ;;  %v4888_v29 = vpop.f32.mrf.mxu1 }
 0x120   : > { %5916 = vst [vmem:[#allocation13_spill] sm:$0xff] %v4888_v29  ;;  %v4363_v29 = vld [vmem:[%s4574_s26 + $0x58] sm:$0xff]  }
 0x121   : > { %v4890_v31 = vpop.f32.mrf.mxu0  ;;  %v4893_v41 = vpop.f32.mrf.mxu1 }
 0x122   : > { %5917 = vst [vmem:[#allocation14_spill] sm:$0xff] %v4893_v41  ;;  %v4364_v41 = vld [vmem:[%s4574_s26 + $0x60] sm:$0xff]  }
 0x123   : > { %v4896_v51 = vpop.f32.mrf.mxu0  ;;  %v4898_v59 = vpop.f32.mrf.mxu1 }
 0x124   : > { %5918 = vst [vmem:[#allocation15_spill] sm:$0xff] %v4898_v59 }
 0x125   : > { %v4900_v61 = vpop.f32.mrf.mxu0  ;;  %4095 = vmatmul.mubr.msk.bf16.gmra.mxu0 %vm571_vm0, %v4362_v39  ;;  %v4903_v5 = vpop.f32.mrf.mxu1  ;;  %4027 = vmatmul.mubr.msk.bf16.gmra.mxu1 %vm571_vm0, %v4361_v49 }
 0x126   : > { %5919 = vst [vmem:[#allocation16_spill] sm:$0xff] %v4903_v5  ;;  %2292 = vmatprep.mubr.bf16.mxu0 %v5904_v24  ;;  %1861 = vmatprep.mubr.bf16.mxu1 %v5904_v24 }
 0x127   : > { %v4907_v7 = vpop.f32.mrf.mxu0  ;;  %v4910_v15 = vpop.f32.mrf.mxu1 }
 0x128   : > { %5920 = vst [vmem:[#allocation17_spill] sm:$0xff] %v4910_v15 }
 0x129   : > { %v4912_v17 = vpop.f32.mrf.mxu0  ;;  %v4915_v59 = vpop.f32.mrf.mxu1 }
 0x12a   : > { %5921 = vst [vmem:[#allocation18_spill] sm:$0xff] %v4915_v59 }
 0x12b   : > { %v4918_v39 = vpop.f32.mrf.mxu0  ;;  %v4920_v5 = vpop.f32.mrf.mxu1 }
 0x12c   : > { %5922 = vst [vmem:[#allocation19_spill] sm:$0xff] %v4920_v5  ;;  %v4366_v5 = vld [vmem:[%s4574_s26 + $0x68] sm:$0xff]  }
 0x12d   : > { %v1352_v49 = vpop.f32.mrf.mxu0  ;;  %4096 = vmatmul.mubr.msk.bf16.gmra.mxu0 %vm571_vm0, %v4364_v41  ;;  %v985_v21 = vpop.f32.mrf.mxu1  ;;  %4028 = vmatmul.mubr.msk.bf16.gmra.mxu1 %vm571_vm0, %v4363_v29 }
 0x12e   : > { %2302 = vmatprep.mubr.bf16.mxu0 %v5904_v24  ;;  %v986_v15 = vadd.f32 %v985_v21, %v4746_v23  ;;  %1871 = vmatprep.mubr.bf16.mxu1 %v5904_v24 }
 0x12f   : > { %v1354_v19 = vpop.f32.mrf.mxu0  ;;  %v987_v59 = vpop.f32.mrf.mxu1 }
 0x130   : > { %v4927_v16 = vadd.f32 %v1352_v49, %v986_v15  ;;  %v988_v13 = vadd.f32 %v987_v59, %v4752_v26  ;;  %v4368_v59 = vld [vmem:[%s4574_s26 + $0x70] sm:$0xff]   ;;  %v4367_v49 = vld [vmem:[%s4574_s26 + $0x68] sm:$0xff]  }
 0x131   : > { %v1356_v11 = vpop.f32.mrf.mxu0  ;;  %v989_v9 = vpop.f32.mrf.mxu1 }
 0x132   : > { %v4932_v41 = vadd.f32 %v1354_v19, %v988_v13  ;;  %v990_v29 = vadd.f32 %v989_v9, %v4758_v28 }
 0x133   : > { %v1358_v3 = vpop.f32.mrf.mxu0  ;;  %v991_v1 = vpop.f32.mrf.mxu1 }
 0x134   : > { %v4935_v23 = vadd.f32 %v1356_v11, %v990_v29  ;;  %v992_v21 = vadd.f32 %v991_v1, %v4764_v32 }
 0x135   : > { %v1362_v15 = vpop.f32.mrf.mxu0  ;;  %4097 = vmatmul.mubr.msk.bf16.gmra.mxu0 %vm571_vm0, %v4366_v5  ;;  %v995_v26 = vpop.f32.mrf.mxu1  ;;  %4029 = vmatmul.mubr.msk.bf16.gmra.mxu1 %vm571_vm0, %v4365_v6 }
 0x136   : > { %2312 = vmatprep.mubr.bf16.mxu0 %v5904_v24  ;;  %v4941_v13 = vadd.f32 %v1358_v3, %v992_v21  ;;  %v996_v28 = vadd.f32 %v995_v26, %v4768_v34  ;;  %1881 = vmatprep.mubr.bf16.mxu1 %v5904_v24 }
 0x137   : > { %v1364_v9 = vpop.f32.mrf.mxu0  ;;  %v997_v11 = vpop.f32.mrf.mxu1 }
 0x138   : > { %v4945_v19 = vadd.f32 %v1362_v15, %v996_v28  ;;  %v998_v32 = vadd.f32 %v997_v11, %v4775_v36 }
 0x139   : > { %v1366_v1 = vpop.f32.mrf.mxu0  ;;  %v999_v5 = vpop.f32.mrf.mxu1 }
 0x13a   : > { %v4950_v29 = vadd.f32 %v1364_v9, %v998_v32  ;;  %v1000_v6 = vadd.f32 %v999_v5, %v4780_v38  ;;  %v4370_v5 = vld [vmem:[%s4574_s26 + $0x78] sm:$0xff]  }
 0x13b   : > { %v1368_v3 = vpop.f32.mrf.mxu0  ;;  %v1001_v21 = vpop.f32.mrf.mxu1 }
 0x13c   : > { %v4953_v34 = vadd.f32 %v1366_v1, %v1000_v6  ;;  %v1002_v26 = vadd.f32 %v1001_v21, %v4786_v42  ;;  %v4369_v6 = vld [vmem:[%s4574_s26 + $0x70] sm:$0xff]  }
 0x13d   : > { %v1372_v15 = vpop.f32.mrf.mxu0  ;;  %4098 = vmatmul.mubr.msk.bf16.gmra.mxu0 %vm571_vm0, %v4368_v59  ;;  %v1005_v36 = vpop.f32.mrf.mxu1  ;;  %4030 = vmatmul.mubr.msk.bf16.gmra.mxu1 %vm571_vm0, %v4367_v49 }
 0x13e   : > { %2322 = vmatprep.mubr.bf16.mxu0 %v5904_v24  ;;  %v4959_v28 = vadd.f32 %v1368_v3, %v1002_v26  ;;  %v1006_v38 = vadd.f32 %v1005_v36, %v4790_v44  ;;  %1891 = vmatprep.mubr.bf16.mxu1 %v5904_v24 }
 0x13f   : > { %v1374_v9 = vpop.f32.mrf.mxu0  ;;  %v1007_v11 = vpop.f32.mrf.mxu1 }
 0x140   : > { %v4963_v32 = vadd.f32 %v1372_v15, %v1006_v38  ;;  %v1008_v42 = vadd.f32 %v1007_v11, %v4797_v46 }
 0x141   : > { %v1376_v1 = vpop.f32.mrf.mxu0  ;;  %v1009_v59 = vpop.f32.mrf.mxu1 }
 0x142   : > { %v4968_v21 = vadd.f32 %v1374_v9, %v1008_v42  ;;  %v1010_v49 = vadd.f32 %v1009_v59, %v4802_v48  ;;  %v4372_v59 = vld [vmem:[%s4574_s26 + $0x80] sm:$0xff]  }
 0x143   : > { %v1378_v3 = vpop.f32.mrf.mxu0  ;;  %v1011_v26 = vpop.f32.mrf.mxu1 }
 0x144   : > { %v4971_v44 = vadd.f32 %v1376_v1, %v1010_v49  ;;  %v1012_v36 = vadd.f32 %v1011_v26, %v4808_v52  ;;  %v4371_v49 = vld [vmem:[%s4574_s26 + $0x78] sm:$0xff]  }
 0x145   : > { %v1382_v15 = vpop.f32.mrf.mxu0  ;;  %4099 = vmatmul.mubr.msk.bf16.gmra.mxu0 %vm571_vm0, %v4370_v5  ;;  %v1015_v46 = vpop.f32.mrf.mxu1  ;;  %4031 = vmatmul.mubr.msk.bf16.gmra.mxu1 %vm571_vm0, %v4369_v6 }
 0x146   : > { %2332 = vmatprep.mubr.bf16.mxu0 %v5904_v24  ;;  %v4977_v38 = vadd.f32 %v1378_v3, %v1012_v36  ;;  %v1016_v48 = vadd.f32 %v1015_v46, %v4812_v54  ;;  %1901 = vmatprep.mubr.bf16.mxu1 %v5904_v24 }
 0x147   : > { %v1384_v9 = vpop.f32.mrf.mxu0  ;;  %v1017_v11 = vpop.f32.mrf.mxu1 }
 0x148   : > { %v4981_v42 = vadd.f32 %v1382_v15, %v1016_v48  ;;  %v1018_v52 = vadd.f32 %v1017_v11, %v4819_v56 }
 0x149   : > { %v1386_v1 = vpop.f32.mrf.mxu0  ;;  %v1019_v5 = vpop.f32.mrf.mxu1 }
 0x14a   : > { %v4986_v26 = vadd.f32 %v1384_v9, %v1018_v52  ;;  %v1020_v6 = vadd.f32 %v1019_v5, %v4824_v58  ;;  %v4374_v5 = vld [vmem:[%s4574_s26 + $0x88] sm:$0xff]  }
 0x14b   : > { %v1388_v3 = vpop.f32.mrf.mxu0  ;;  %v1021_v36 = vpop.f32.mrf.mxu1 }
 0x14c   : > { %v4989_v54 = vadd.f32 %v1386_v1, %v1020_v6  ;;  %v1022_v46 = vadd.f32 %v1021_v36, %v4830_v62  ;;  %v4373_v6 = vld [vmem:[%s4574_s26 + $0x80] sm:$0xff]  }
 0x14d   : > { %v1392_v15 = vpop.f32.mrf.mxu0  ;;  %4100 = vmatmul.mubr.msk.bf16.gmra.mxu0 %vm571_vm0, %v4372_v59  ;;  %v1025_v56 = vpop.f32.mrf.mxu1  ;;  %4032 = vmatmul.mubr.msk.bf16.gmra.mxu1 %vm571_vm0, %v4371_v49 }
 0x14e   : > { %2342 = vmatprep.mubr.bf16.mxu0 %v5904_v24  ;;  %v4995_v48 = vadd.f32 %v1388_v3, %v1022_v46  ;;  %v1026_v58 = vadd.f32 %v1025_v56, %v4834_v0  ;;  %1911 = vmatprep.mubr.bf16.mxu1 %v5904_v24 }
 0x14f   : > { %v1394_v9 = vpop.f32.mrf.mxu0  ;;  %v1027_v11 = vpop.f32.mrf.mxu1 }
 0x150   : > { %v4999_v52 = vadd.f32 %v1392_v15, %v1026_v58  ;;  %v1028_v62 = vadd.f32 %v1027_v11, %v4841_v2 }
 0x151   : > { %v1396_v1 = vpop.f32.mrf.mxu0  ;;  %v1029_v59 = vpop.f32.mrf.mxu1 }
 0x152   : > { %v5004_v36 = vadd.f32 %v1394_v9, %v1028_v62  ;;  %v1030_v49 = vadd.f32 %v1029_v59, %v4846_v4  ;;  %v4376_v59 = vld [vmem:[%s4574_s26 + $0x90] sm:$0xff]  }
 0x153   : > { %v1398_v3 = vpop.f32.mrf.mxu0  ;;  %v1031_v46 = vpop.f32.mrf.mxu1 }
 0x154   : > { %v5007_v0 = vadd.f32 %v1396_v1, %v1030_v49  ;;  %v1032_v56 = vadd.f32 %v1031_v46, %v4852_v8  ;;  %v4375_v49 = vld [vmem:[%s4574_s26 + $0x88] sm:$0xff]  }
 0x155   : > { %v1402_v15 = vpop.f32.mrf.mxu0  ;;  %4101 = vmatmul.mubr.msk.bf16.gmra.mxu0 %vm571_vm0, %v4374_v5  ;;  %v1035_v2 = vpop.f32.mrf.mxu1  ;;  %4033 = vmatmul.mubr.msk.bf16.gmra.mxu1 %vm571_vm0, %v4373_v6 }
 0x156   : > { %2352 = vmatprep.mubr.bf16.mxu0 %v5904_v24  ;;  %v5013_v58 = vadd.f32 %v1398_v3, %v1032_v56  ;;  %v1036_v4 = vadd.f32 %v1035_v2, %v4856_v10  ;;  %1921 = vmatprep.mubr.bf16.mxu1 %v5904_v24 }
 0x157   : > { %v1404_v9 = vpop.f32.mrf.mxu0  ;;  %v1037_v11 = vpop.f32.mrf.mxu1 }
 0x158   : > { %v5017_v62 = vadd.f32 %v1402_v15, %v1036_v4  ;;  %v1038_v8 = vadd.f32 %v1037_v11, %v4863_v12 }
 0x159   : > { %v1406_v1 = vpop.f32.mrf.mxu0  ;;  %v1039_v5 = vpop.f32.mrf.mxu1 }
 0x15a   : > { %v5022_v46 = vadd.f32 %v1404_v9, %v1038_v8  ;;  %v1040_v6 = vadd.f32 %v1039_v5, %v4868_v14  ;;  %v4378_v5 = vld [vmem:[%s4574_s26 + $0x98] sm:$0xff]  }
 0x15b   : > { %v1408_v3 = vpop.f32.mrf.mxu0  ;;  %v1041_v56 = vpop.f32.mrf.mxu1 }
 0x15c   : > { %v5025_v10 = vadd.f32 %v1406_v1, %v1040_v6  ;;  %v1042_v2 = vadd.f32 %v1041_v56, %v4874_v18  ;;  %v4377_v6 = vld [vmem:[%s4574_s26 + $0x90] sm:$0xff]  }
 0x15d   : > { %v1412_v15 = vpop.f32.mrf.mxu0  ;;  %4102 = vmatmul.mubr.msk.bf16.gmra.mxu0 %vm571_vm0, %v4376_v59  ;;  %v1045_v12 = vpop.f32.mrf.mxu1  ;;  %4034 = vmatmul.mubr.msk.bf16.gmra.mxu1 %vm571_vm0, %v4375_v49 }
 0x15e   : > { %2362 = vmatprep.mubr.bf16.mxu0 %v5904_v24  ;;  %v5031_v4 = vadd.f32 %v1408_v3, %v1042_v2  ;;  %v1046_v14 = vadd.f32 %v1045_v12, %v4878_v20  ;;  %1931 = vmatprep.mubr.bf16.mxu1 %v5904_v24 }
 0x15f   : > { %v1414_v9 = vpop.f32.mrf.mxu0  ;;  %v1047_v11 = vpop.f32.mrf.mxu1 }
 0x160   : > { %v5035_v8 = vadd.f32 %v1412_v15, %v1046_v14  ;;  %v1048_v18 = vadd.f32 %v1047_v11, %v4885_v22 }
 0x161   : > { %v1416_v1 = vpop.f32.mrf.mxu0  ;;  %v1049_v59 = vpop.f32.mrf.mxu1 }
 0x162   : > { %v5040_v56 = vadd.f32 %v1414_v9, %v1048_v18  ;;  %v1050_v49 = vadd.f32 %v1049_v59, %v4890_v31  ;;  %v4380_v59 = vld [vmem:[%s4574_s26 + $0x30] sm:$0xff]  }
 0x163   : > { %v1418_v3 = vpop.f32.mrf.mxu0  ;;  %v1051_v2 = vpop.f32.mrf.mxu1 }
 0x164   : > { %v5043_v20 = vadd.f32 %v1416_v1, %v1050_v49  ;;  %v1052_v12 = vadd.f32 %v1051_v2, %v4896_v51  ;;  %v4379_v49 = vld [vmem:[%s4574_s26 + $0x28] sm:$0xff]  }
 0x165   : > { %v1422_v15 = vpop.f32.mrf.mxu0  ;;  %4103 = vmatmul.mubr.msk.bf16.gmra.mxu0 %vm571_vm0, %v4378_v5  ;;  %v1055_v22 = vpop.f32.mrf.mxu1  ;;  %4035 = vmatmul.mubr.msk.bf16.gmra.mxu1 %vm571_vm0, %v4377_v6 }
 0x166   : > { %3074 = vmatprep.mubr.bf16.mxu0 %v5904_v24  ;;  %v5049_v14 = vadd.f32 %v1418_v3, %v1052_v12  ;;  %v1056_v31 = vadd.f32 %v1055_v22, %v4900_v61  ;;  %2643 = vmatprep.mubr.bf16.mxu1 %v5904_v24 }
 0x167   : > { %v1424_v9 = vpop.f32.mrf.mxu0  ;;  %v1057_v11 = vpop.f32.mrf.mxu1 }
 0x168   : > { %v5053_v18 = vadd.f32 %v1422_v15, %v1056_v31  ;;  %v1058_v51 = vadd.f32 %v1057_v11, %v4907_v7 }
 0x169   : > { %v1426_v1 = vpop.f32.mrf.mxu0  ;;  %v1059_v5 = vpop.f32.mrf.mxu1 }
 0x16a   : > { %v5058_v2 = vadd.f32 %v1424_v9, %v1058_v51  ;;  %v1060_v6 = vadd.f32 %v1059_v5, %v4912_v17  ;;  %v4382_v5 = vld [vmem:[%s4574_s26 + $0x38] sm:$0xff]  }
 0x16b   : > { %v1428_v3 = vpop.f32.mrf.mxu0  ;;  %v1061_v12 = vpop.f32.mrf.mxu1 }
 0x16c   : > { %v5061_v61 = vadd.f32 %v1426_v1, %v1060_v6  ;;  %v1062_v22 = vadd.f32 %v1061_v12, %v4918_v39  ;;  %v4381_v6 = vld [vmem:[%s4574_s26 + $0x30] sm:$0xff]  }
 0x16d   : > { %v1432_v15 = vpop.f32.mrf.mxu0  ;;  %4224 = vmatmul.mubr.msk.bf16.vlgmr.msra.gmra.mxu0 %vm571_vm0, %v4380_v59  ;;  %v1065_v7 = vpop.f32.mrf.mxu1  ;;  %4156 = vmatmul.mubr.msk.bf16.vlgmr.msra.gmra.mxu1 %vm571_vm0, %v4379_v49 }
 0x16e   : > { %3084 = vmatprep.mubr.bf16.mxu0 %v5904_v24  ;;  %v5067_v31 = vadd.f32 %v1428_v3, %v1062_v22  ;;  %v1066_v17 = vadd.f32 %v1065_v7, %v4749_v25  ;;  %2653 = vmatprep.mubr.bf16.mxu1 %v5904_v24 }
 0x16f   : > { %v1434_v9 = vpop.f32.mrf.mxu0  ;;  %v1067_v11 = vpop.f32.mrf.mxu1 }
 0x170   : > { %v5071_v51 = vadd.f32 %v1432_v15, %v1066_v17  ;;  %v1068_v39 = vadd.f32 %v1067_v11, %v4755_v27 }
 0x171   : > { %v1436_v1 = vpop.f32.mrf.mxu0  ;;  %v1069_v59 = vpop.f32.mrf.mxu1 }
 0x172   : > { %v5076_v12 = vadd.f32 %v1434_v9, %v1068_v39  ;;  %v1070_v49 = vadd.f32 %v1069_v59, %v4761_v30  ;;  %v4384_v59 = vld [vmem:[%s4574_s26 + $0x40] sm:$0xff]  }
 0x173   : > { %v1438_v3 = vpop.f32.mrf.mxu0  ;;  %v1071_v22 = vpop.f32.mrf.mxu1 }
 0x174   : > { %v5079_v25 = vadd.f32 %v1436_v1, %v1070_v49  ;;  %v1072_v7 = vadd.f32 %v1071_v22, %v4766_v33  ;;  %v4383_v49 = vld [vmem:[%s4574_s26 + $0x38] sm:$0xff]  }
 0x175   : > { %v1442_v15 = vpop.f32.mrf.mxu0  ;;  %4225 = vmatmul.mubr.msk.bf16.gmra.mxu0 %vm571_vm0, %v4382_v5  ;;  %v1075_v27 = vpop.f32.mrf.mxu1  ;;  %4157 = vmatmul.mubr.msk.bf16.gmra.mxu1 %vm571_vm0, %v4381_v6 }
 0x176   : > { %3094 = vmatprep.mubr.bf16.mxu0 %v5904_v24  ;;  %v5085_v17 = vadd.f32 %v1438_v3, %v1072_v7  ;;  %v1076_v30 = vadd.f32 %v1075_v27, %v4771_v35  ;;  %2663 = vmatprep.mubr.bf16.mxu1 %v5904_v24 }
 0x177   : > { %v1444_v9 = vpop.f32.mrf.mxu0  ;;  %v1077_v11 = vpop.f32.mrf.mxu1 }
 0x178   : > { %v5089_v39 = vadd.f32 %v1442_v15, %v1076_v30  ;;  %v1078_v33 = vadd.f32 %v1077_v11, %v4778_v37 }
 0x179   : > { %v1446_v1 = vpop.f32.mrf.mxu0  ;;  %v1079_v5 = vpop.f32.mrf.mxu1 }
 0x17a   : > { %v5094_v22 = vadd.f32 %v1444_v9, %v1078_v33  ;;  %v1080_v6 = vadd.f32 %v1079_v5, %v4783_v40  ;;  %v4386_v5 = vld [vmem:[%s4574_s26 + $0x48] sm:$0xff]  }
 0x17b   : > { %v1448_v3 = vpop.f32.mrf.mxu0  ;;  %v1081_v7 = vpop.f32.mrf.mxu1 }
 0x17c   : > { %v5097_v35 = vadd.f32 %v1446_v1, %v1080_v6  ;;  %v1082_v27 = vadd.f32 %v1081_v7, %v4788_v43  ;;  %v4385_v6 = vld [vmem:[%s4574_s26 + $0x40] sm:$0xff]  }
 0x17d   : > { %v1452_v15 = vpop.f32.mrf.mxu0  ;;  %4226 = vmatmul.mubr.msk.bf16.gmra.mxu0 %vm571_vm0, %v4384_v59  ;;  %v1085_v37 = vpop.f32.mrf.mxu1  ;;  %4158 = vmatmul.mubr.msk.bf16.gmra.mxu1 %vm571_vm0, %v4383_v49 }
 0x17e   : > { %3104 = vmatprep.mubr.bf16.mxu0 %v5904_v24  ;;  %v5103_v30 = vadd.f32 %v1448_v3, %v1082_v27  ;;  %v1086_v40 = vadd.f32 %v1085_v37, %v4793_v45  ;;  %2673 = vmatprep.mubr.bf16.mxu1 %v5904_v24 }
 0x17f   : > { %v1454_v9 = vpop.f32.mrf.mxu0  ;;  %v1087_v11 = vpop.f32.mrf.mxu1 }
 0x180   : > { %v5107_v33 = vadd.f32 %v1452_v15, %v1086_v40  ;;  %v1088_v43 = vadd.f32 %v1087_v11, %v4800_v47 }
 0x181   : > { %v1456_v1 = vpop.f32.mrf.mxu0  ;;  %v1089_v59 = vpop.f32.mrf.mxu1 }
 0x182   : > { %v5112_v7 = vadd.f32 %v1454_v9, %v1088_v43  ;;  %v1090_v49 = vadd.f32 %v1089_v59, %v4805_v50  ;;  %v4388_v59 = vld [vmem:[%s4574_s26 + $0x50] sm:$0xff]  }
 0x183   : > { %v1458_v3 = vpop.f32.mrf.mxu0  ;;  %v1091_v27 = vpop.f32.mrf.mxu1 }
 0x184   : > { %v5115_v45 = vadd.f32 %v1456_v1, %v1090_v49  ;;  %v1092_v37 = vadd.f32 %v1091_v27, %v4810_v53  ;;  %v4387_v49 = vld [vmem:[%s4574_s26 + $0x48] sm:$0xff]  }
 0x185   : > { %v1462_v15 = vpop.f32.mrf.mxu0  ;;  %4227 = vmatmul.mubr.msk.bf16.gmra.mxu0 %vm571_vm0, %v4386_v5  ;;  %v1095_v47 = vpop.f32.mrf.mxu1  ;;  %4159 = vmatmul.mubr.msk.bf16.gmra.mxu1 %vm571_vm0, %v4385_v6 }
 0x186   : > { %3114 = vmatprep.mubr.bf16.mxu0 %v5904_v24  ;;  %v5121_v40 = vadd.f32 %v1458_v3, %v1092_v37  ;;  %v1096_v50 = vadd.f32 %v1095_v47, %v4815_v55  ;;  %2683 = vmatprep.mubr.bf16.mxu1 %v5904_v24 }
 0x187   : > { %v1464_v9 = vpop.f32.mrf.mxu0  ;;  %v1097_v11 = vpop.f32.mrf.mxu1 }
 0x188   : > { %v5125_v43 = vadd.f32 %v1462_v15, %v1096_v50  ;;  %v1098_v53 = vadd.f32 %v1097_v11, %v4822_v57 }
 0x189   : > { %v1466_v1 = vpop.f32.mrf.mxu0  ;;  %v1099_v5 = vpop.f32.mrf.mxu1 }
 0x18a   : > { %5923 = vst [vmem:[#allocation20_spill] sm:$0xff] %v5125_v43  ;;  %v5130_v27 = vadd.f32 %v1464_v9, %v1098_v53  ;;  %v1100_v6 = vadd.f32 %v1099_v5, %v4827_v60  ;;  %v5927_v9 = vld [vmem:[#allocation4_spill] sm:$0xff] }
 0x18b   : > { %v1468_v3 = vpop.f32.mrf.mxu0  ;;  %v1101_v37 = vpop.f32.mrf.mxu1 }
 0x18c   : > { %5924 = vst [vmem:[#allocation21_spill] sm:$0xff] %v5130_v27  ;;  %v5133_v55 = vadd.f32 %v1466_v1, %v1100_v6  ;;  %v1102_v47 = vadd.f32 %v1101_v37, %v4832_v63  ;;  %v5929_v63 = vld [vmem:[#allocation5_spill] sm:$0xff] }
 0x18d   : > { %v1472_v15 = vpop.f32.mrf.mxu0  ;;  %4228 = vmatmul.mubr.msk.bf16.gmra.mxu0 %vm571_vm0, %v4388_v59  ;;  %v1105_v57 = vpop.f32.mrf.mxu1  ;;  %4160 = vmatmul.mubr.msk.bf16.gmra.mxu1 %vm571_vm0, %v4387_v49  ;;  %v4390_v37 = vld [vmem:[%s4574_s26 + $0x58] sm:$0xff]   ;;  %v5931_v49 = vld [vmem:[#allocation6_spill] sm:$0xff] }
 0x18e   : > { %5925 = vst [vmem:[#allocation22_spill] sm:$0xff] %v5133_v55  ;;  %3124 = vmatprep.mubr.bf16.mxu0 %v5904_v24  ;;  %v5139_v50 = vadd.f32 %v1468_v3, %v1102_v47  ;;  %v1106_v60 = vadd.f32 %v1105_v57, %v5927_v9  ;;  %2693 = vmatprep.mubr.bf16.mxu1 %v5904_v24  ;;  %v4389_v55 = vld [vmem:[%s4574_s26 + $0x50] sm:$0xff]   ;;  %v5933_v9 = vld [vmem:[#allocation7_spill] sm:$0xff] }
 0x18f   : > { %v1474_v11 = vpop.f32.mrf.mxu0  ;;  %v1107_v53 = vpop.f32.mrf.mxu1 }
 0x190   : > { %5926 = vst [vmem:[#allocation23_spill] sm:$0xff] %v5139_v50  ;;  %v5143_v1 = vadd.f32 %v1472_v15, %v1106_v60  ;;  %v1108_v5 = vadd.f32 %v1107_v53, %v5929_v63  ;;  %v5934_v53 = vmov 0   ;;  %v5936_v63 = vld [vmem:[#allocation8_spill] sm:$0xff] }
 0x191   : > { %v1476_v6 = vpop.f32.mrf.mxu0  ;;  %v1109_v59 = vpop.f32.mrf.mxu1 }
 0x192   : > { %5928 = vst [vmem:[#allocation4_spill] sm:$0xff] %v5143_v1  ;;  %v5148_v27 = vadd.f32 %v1474_v11, %v1108_v5  ;;  %v1110_v43 = vadd.f32 %v1109_v59, %v5931_v49  ;;  %v5938_v49 = vld [vmem:[#allocation9_spill] sm:$0xff] }
 0x193   : > { %v1478_v3 = vpop.f32.mrf.mxu0  ;;  %v1111_v47 = vpop.f32.mrf.mxu1 }
 0x194   : > { %5930 = vst [vmem:[#allocation5_spill] sm:$0xff] %v5148_v27  ;;  %v5151_v57 = vadd.f32 %v1476_v6, %v1110_v43  ;;  %v1112_v24 = vadd.f32 %v1111_v47, %v5933_v9  ;;  %v4391_v27 = vld [vmem:[%s4574_s26 + $0x58] sm:$0xff]  }
 0x195   : > { %v1482_v15 = vpop.f32.mrf.mxu0  ;;  %4229 = vmatmul.mubr.msk.bf16.gmra.mxu0 %vm571_vm0, %v4390_v37  ;;  %v1115_v60 = vpop.f32.mrf.mxu1  ;;  %4161 = vmatmul.mubr.msk.bf16.gmra.mxu1 %vm571_vm0, %v4389_v55  ;;  %v5940_v55 = vld [vmem:[#allocation10_spill] sm:$0xff] }
 0x196   : > { %5932 = vst [vmem:[#allocation6_spill] sm:$0xff] %v5151_v57  ;;  %3134 = vmatprep.mubr.bf16.mxu0 %v5934_v53  ;;  %v5157_v11 = vadd.f32 %v1478_v3, %v1112_v24  ;;  %v1116_v5 = vadd.f32 %v1115_v60, %v5936_v63  ;;  %2703 = vmatprep.mubr.bf16.mxu1 %v5934_v53  ;;  %v4392_v57 = vld [vmem:[%s4574_s26 + $0x60] sm:$0xff]   ;;  %v5942_v63 = vld [vmem:[#allocation11_spill] sm:$0xff] }
 0x197   : > { %v1484_v59 = vpop.f32.mrf.mxu0  ;;  %v1117_v43 = vpop.f32.mrf.mxu1 }
 0x198   : > { %5935 = vst [vmem:[#allocation7_spill] sm:$0xff] %v5157_v11  ;;  %v5161_v6 = vadd.f32 %v1482_v15, %v1116_v5  ;;  %v1118_v47 = vadd.f32 %v1117_v43, %v5938_v49  ;;  %v5944_v43 = vld [vmem:[#allocation12_spill] sm:$0xff] }
 0x199   : > { %v1486_v9 = vpop.f32.mrf.mxu0  ;;  %v1119_v37 = vpop.f32.mrf.mxu1 }
 0x19a   : > { %5937 = vst [vmem:[#allocation8_spill] sm:$0xff] %v5161_v6  ;;  %v5166_v1 = vadd.f32 %v1484_v59, %v1118_v47  ;;  %v1120_v50 = vadd.f32 %v1119_v37, %v5940_v55  ;;  %v5946_v37 = vld [vmem:[#allocation13_spill] sm:$0xff] }
 0x19b   : > { %v1488_v24 = vpop.f32.mrf.mxu0  ;;  %v1121_v3 = vpop.f32.mrf.mxu1 }
 0x19c   : > { %5939 = vst [vmem:[#allocation9_spill] sm:$0xff] %v5166_v1  ;;  %v5169_v60 = vadd.f32 %v1486_v9, %v1120_v50  ;;  %v1122_v11 = vadd.f32 %v1121_v3, %v5942_v63  ;;  %v4394_v63 = vld [vmem:[%s4574_s26 + $0x68] sm:$0xff]  }
 0x19d   : > { %v1492_v15 = vpop.f32.mrf.mxu0  ;;  %4230 = vmatmul.mubr.msk.bf16.gmra.mxu0 %vm571_vm0, %v4392_v57  ;;  %v1125_v5 = vpop.f32.mrf.mxu1  ;;  %4162 = vmatmul.mubr.msk.bf16.gmra.mxu1 %vm571_vm0, %v4391_v27  ;;  %v5948_v27 = vld [vmem:[#allocation14_spill] sm:$0xff] }
 0x19e   : > { %5941 = vst [vmem:[#allocation10_spill] sm:$0xff] %v5169_v60  ;;  %3144 = vmatprep.mubr.bf16.mxu0 %v5934_v53  ;;  %v5175_v59 = vadd.f32 %v1488_v24, %v1122_v11  ;;  %v1126_v49 = vadd.f32 %v1125_v5, %v5944_v43  ;;  %2713 = vmatprep.mubr.bf16.mxu1 %v5934_v53  ;;  %v4393_v60 = vld [vmem:[%s4574_s26 + $0x60] sm:$0xff]   ;;  %v5950_v43 = vld [vmem:[#allocation15_spill] sm:$0xff] }
 0x19f   : > { %v1494_v47 = vpop.f32.mrf.mxu0  ;;  %v1127_v50 = vpop.f32.mrf.mxu1 }
 0x1a0   : > { %5943 = vst [vmem:[#allocation11_spill] sm:$0xff] %v5175_v59  ;;  %v5179_v9 = vadd.f32 %v1492_v15, %v1126_v49  ;;  %v1128_v55 = vadd.f32 %v1127_v50, %v5946_v37  ;;  %v5952_v50 = vld [vmem:[#allocation16_spill] sm:$0xff] }
 0x1a1   : > { %v1496_v3 = vpop.f32.mrf.mxu0  ;;  %v1129_v57 = vpop.f32.mrf.mxu1 }
 0x1a2   : > { %5945 = vst [vmem:[#allocation12_spill] sm:$0xff] %v5179_v9  ;;  %v5184_v1 = vadd.f32 %v1494_v47, %v1128_v55  ;;  %v1130_v6 = vadd.f32 %v1129_v57, %v5948_v27  ;;  %v5953_v57 = vld [vmem:[#allocation17_spill] sm:$0xff] }
 0x1a3   : > { %v1498_v11 = vpop.f32.mrf.mxu0  ;;  %v1131_v24 = vpop.f32.mrf.mxu1 }
 0x1a4   : > { %5947 = vst [vmem:[#allocation13_spill] sm:$0xff] %v5184_v1  ;;  %v5187_v5 = vadd.f32 %v1496_v3, %v1130_v6  ;;  %v1132_v59 = vadd.f32 %v1131_v24, %v5950_v43  ;;  %v4396_v43 = vld [vmem:[%s4574_s26 + $0x70] sm:$0xff]  }
 0x1a5   : > { %v1502_v15 = vpop.f32.mrf.mxu0  ;;  %4231 = vmatmul.mubr.msk.bf16.gmra.mxu0 %vm571_vm0, %v4394_v63  ;;  %v1135_v49 = vpop.f32.mrf.mxu1  ;;  %4163 = vmatmul.mubr.msk.bf16.gmra.mxu1 %vm571_vm0, %v4393_v60  ;;  %v5954_v60 = vld [vmem:[#allocation18_spill] sm:$0xff] }
 0x1a6   : > { %5949 = vst [vmem:[#allocation14_spill] sm:$0xff] %v5187_v5  ;;  %3154 = vmatprep.mubr.bf16.mxu0 %v5934_v53  ;;  %v5193_v47 = vadd.f32 %v1498_v11, %v1132_v59  ;;  %v1136_v37 = vadd.f32 %v1135_v49, %v5952_v50  ;;  %2723 = vmatprep.mubr.bf16.mxu1 %v5934_v53  ;;  %v4395_v5 = vld [vmem:[%s4574_s26 + $0x68] sm:$0xff]  }
 0x1a7   : > { %v1504_v55 = vpop.f32.mrf.mxu0  ;;  %v1137_v6 = vpop.f32.mrf.mxu1  ;;  %v5955_v50 = vld [vmem:[#allocation19_spill] sm:$0xff] }
 0x1a8   : > { %5951 = vst [vmem:[#allocation15_spill] sm:$0xff] %v5193_v47  ;;  %v5197_v3 = vadd.f32 %v1502_v15, %v1136_v37  ;;  %v1138_v27 = vadd.f32 %v1137_v6, %v5953_v57 }
 0x1a9   : > { %v1506_v24 = vpop.f32.mrf.mxu0  ;;  %v1139_v63 = vpop.f32.mrf.mxu1 }
 0x1aa   : > { %v5202_v1 = vadd.f32 %v1504_v55, %v1138_v27  ;;  %v1140_v9 = vadd.f32 %v1139_v63, %v5954_v60  ;;  %v4398_v60 = vld [vmem:[%s4574_s26 + $0x78] sm:$0xff]  }
 0x1ab   : > { %v1508_v59 = vpop.f32.mrf.mxu0  ;;  %v1141_v11 = vpop.f32.mrf.mxu1 }
 0x1ac   : > { %v5205_v49 = vadd.f32 %v1506_v24, %v1140_v9  ;;  %v1142_v47 = vadd.f32 %v1141_v11, %v5955_v50  ;;  %v4397_v11 = vld [vmem:[%s4574_s26 + $0x70] sm:$0xff]  }
 0x1ad   : > { %v2214_v15 = vpop.f32.mrf.mxu0  ;;  %4232 = vmatmul.mubr.msk.bf16.gmra.mxu0 %vm571_vm0, %v4396_v43  ;;  %v1783_v37 = vpop.f32.mrf.mxu1  ;;  %4164 = vmatmul.mubr.msk.bf16.gmra.mxu1 %vm571_vm0, %v4395_v5 }
 0x1ae   : > { %3164 = vmatprep.mubr.bf16.mxu0 %v5934_v53  ;;  %v5211_v55 = vadd.f32 %v1508_v59, %v1142_v47  ;;  %v1942_v6 = vadd.f32 %v1783_v37, %v4927_v16  ;;  %2733 = vmatprep.mubr.bf16.mxu1 %v5934_v53 }
 0x1af   : > { %v2216_v57 = vpop.f32.mrf.mxu0  ;;  %v1785_v9 = vpop.f32.mrf.mxu1 }
 0x1b0   : > { %v5215_v27 = vadd.f32 %v2214_v15, %v1942_v6  ;;  %v1943_v24 = vadd.f32 %v1785_v9, %v4932_v41 }
 0x1b1   : > { %v2218_v63 = vpop.f32.mrf.mxu0  ;;  %v1787_v43 = vpop.f32.mrf.mxu1 }
 0x1b2   : > { %v5220_v50 = vadd.f32 %v2216_v57, %v1943_v24  ;;  %v1944_v5 = vadd.f32 %v1787_v43, %v4935_v23  ;;  %v4400_v43 = vld [vmem:[%s4574_s26 + $0x80] sm:$0xff]  }
 0x1b3   : > { %v2220_v47 = vpop.f32.mrf.mxu0  ;;  %v1789_v59 = vpop.f32.mrf.mxu1 }
 0x1b4   : > { %v5223_v16 = vadd.f32 %v2218_v63, %v1944_v5  ;;  %v1945_v37 = vadd.f32 %v1789_v59, %v4941_v13  ;;  %v4399_v5 = vld [vmem:[%s4574_s26 + $0x78] sm:$0xff]  }
 0x1b5   : > { %v2224_v15 = vpop.f32.mrf.mxu0  ;;  %4233 = vmatmul.mubr.msk.bf16.gmra.mxu0 %vm571_vm0, %v4398_v60  ;;  %v1793_v41 = vpop.f32.mrf.mxu1  ;;  %4165 = vmatmul.mubr.msk.bf16.gmra.mxu1 %vm571_vm0, %v4397_v11 }
 0x1b6   : > { %3174 = vmatprep.mubr.bf16.mxu0 %v5934_v53  ;;  %v5229_v6 = vadd.f32 %v2220_v47, %v1945_v37  ;;  %v1946_v23 = vadd.f32 %v1793_v41, %v4945_v19  ;;  %2743 = vmatprep.mubr.bf16.mxu1 %v5934_v53 }
 0x1b7   : > { %v2226_v57 = vpop.f32.mrf.mxu0  ;;  %v1795_v9 = vpop.f32.mrf.mxu1 }
 0x1b8   : > { %v5233_v24 = vadd.f32 %v2224_v15, %v1946_v23  ;;  %v1947_v13 = vadd.f32 %v1795_v9, %v4950_v29 }
 0x1b9   : > { %v2228_v63 = vpop.f32.mrf.mxu0  ;;  %v1797_v60 = vpop.f32.mrf.mxu1 }
 0x1ba   : > { %v5238_v59 = vadd.f32 %v2226_v57, %v1947_v13  ;;  %v1948_v11 = vadd.f32 %v1797_v60, %v4953_v34  ;;  %v4402_v60 = vld [vmem:[%s4574_s26 + $0x88] sm:$0xff]  }
 0x1bb   : > { %v2230_v47 = vpop.f32.mrf.mxu0  ;;  %v1799_v37 = vpop.f32.mrf.mxu1 }
 0x1bc   : > { %v5241_v19 = vadd.f32 %v2228_v63, %v1948_v11  ;;  %v1949_v41 = vadd.f32 %v1799_v37, %v4959_v28  ;;  %v4401_v11 = vld [vmem:[%s4574_s26 + $0x80] sm:$0xff]  }
 0x1bd   : > { %v2234_v15 = vpop.f32.mrf.mxu0  ;;  %4234 = vmatmul.mubr.msk.bf16.gmra.mxu0 %vm571_vm0, %v4400_v43  ;;  %v1803_v29 = vpop.f32.mrf.mxu1  ;;  %4166 = vmatmul.mubr.msk.bf16.gmra.mxu1 %vm571_vm0, %v4399_v5 }
 0x1be   : > { %3184 = vmatprep.mubr.bf16.mxu0 %v5934_v53  ;;  %v5247_v23 = vadd.f32 %v2230_v47, %v1949_v41  ;;  %v1950_v34 = vadd.f32 %v1803_v29, %v4963_v32  ;;  %2753 = vmatprep.mubr.bf16.mxu1 %v5934_v53 }
 0x1bf   : > { %v2236_v57 = vpop.f32.mrf.mxu0  ;;  %v1805_v9 = vpop.f32.mrf.mxu1 }
 0x1c0   : > { %v5251_v13 = vadd.f32 %v2234_v15, %v1950_v34  ;;  %v1951_v28 = vadd.f32 %v1805_v9, %v4968_v21 }
 0x1c1   : > { %v2238_v63 = vpop.f32.mrf.mxu0  ;;  %v1807_v43 = vpop.f32.mrf.mxu1 }
 0x1c2   : > { %v5256_v37 = vadd.f32 %v2236_v57, %v1951_v28  ;;  %v1952_v5 = vadd.f32 %v1807_v43, %v4971_v44  ;;  %v4404_v43 = vld [vmem:[%s4574_s26 + $0x90] sm:$0xff]  }
 0x1c3   : > { %v2240_v47 = vpop.f32.mrf.mxu0  ;;  %v1809_v41 = vpop.f32.mrf.mxu1 }
 0x1c4   : > { %v5259_v32 = vadd.f32 %v2238_v63, %v1952_v5  ;;  %v1953_v29 = vadd.f32 %v1809_v41, %v4977_v38  ;;  %v4403_v5 = vld [vmem:[%s4574_s26 + $0x88] sm:$0xff]  }
 0x1c5   : > { %v2244_v15 = vpop.f32.mrf.mxu0  ;;  %4235 = vmatmul.mubr.msk.bf16.gmra.mxu0 %vm571_vm0, %v4402_v60  ;;  %v1813_v21 = vpop.f32.mrf.mxu1  ;;  %4167 = vmatmul.mubr.msk.bf16.gmra.mxu1 %vm571_vm0, %v4401_v11 }
 0x1c6   : > { %3194 = vmatprep.mubr.bf16.mxu0 %v5934_v53  ;;  %v5265_v34 = vadd.f32 %v2240_v47, %v1953_v29  ;;  %v1954_v44 = vadd.f32 %v1813_v21, %v4981_v42  ;;  %2763 = vmatprep.mubr.bf16.mxu1 %v5934_v53 }
 0x1c7   : > { %v2246_v57 = vpop.f32.mrf.mxu0  ;;  %v1815_v9 = vpop.f32.mrf.mxu1 }
 0x1c8   : > { %v5269_v28 = vadd.f32 %v2244_v15, %v1954_v44  ;;  %v1955_v38 = vadd.f32 %v1815_v9, %v4986_v26 }
 0x1c9   : > { %v2248_v63 = vpop.f32.mrf.mxu0  ;;  %v1817_v60 = vpop.f32.mrf.mxu1 }
 0x1ca   : > { %v5274_v41 = vadd.f32 %v2246_v57, %v1955_v38  ;;  %v1956_v11 = vadd.f32 %v1817_v60, %v4989_v54  ;;  %v4406_v60 = vld [vmem:[%s4574_s26 + $0x98] sm:$0xff]  }
 0x1cb   : > { %v2250_v47 = vpop.f32.mrf.mxu0  ;;  %v1819_v29 = vpop.f32.mrf.mxu1 }
 0x1cc   : > { %v5277_v42 = vadd.f32 %v2248_v63, %v1956_v11  ;;  %v1957_v21 = vadd.f32 %v1819_v29, %v4995_v48  ;;  %v4405_v11 = vld [vmem:[%s4574_s26 + $0x90] sm:$0xff]  }
 0x1cd   : > { %v2254_v15 = vpop.f32.mrf.mxu0  ;;  %4236 = vmatmul.mubr.msk.bf16.gmra.mxu0 %vm571_vm0, %v4404_v43  ;;  %v1823_v26 = vpop.f32.mrf.mxu1  ;;  %4168 = vmatmul.mubr.msk.bf16.gmra.mxu1 %vm571_vm0, %v4403_v5 }
 0x1ce   : > { %3204 = vmatprep.mubr.bf16.mxu0 %v5934_v53  ;;  %v5283_v44 = vadd.f32 %v2250_v47, %v1957_v21  ;;  %v1958_v54 = vadd.f32 %v1823_v26, %v4999_v52  ;;  %2773 = vmatprep.mubr.bf16.mxu1 %v5934_v53 }
 0x1cf   : > { %v2256_v57 = vpop.f32.mrf.mxu0  ;;  %v1825_v9 = vpop.f32.mrf.mxu1 }
 0x1d0   : > { %v5287_v38 = vadd.f32 %v2254_v15, %v1958_v54  ;;  %v1959_v48 = vadd.f32 %v1825_v9, %v5004_v36 }
 0x1d1   : > { %v2258_v63 = vpop.f32.mrf.mxu0  ;;  %v1827_v43 = vpop.f32.mrf.mxu1 }
 0x1d2   : > { %v5292_v29 = vadd.f32 %v2256_v57, %v1959_v48  ;;  %v1960_v5 = vadd.f32 %v1827_v43, %v5007_v0  ;;  %v4408_v43 = vld [vmem:[%s4574_s26 + $0xa0] sm:$0xff]  }
 0x1d3   : > { %v2260_v47 = vpop.f32.mrf.mxu0  ;;  %v1829_v21 = vpop.f32.mrf.mxu1 }
 0x1d4   : > { %v5295_v52 = vadd.f32 %v2258_v63, %v1960_v5  ;;  %v1961_v26 = vadd.f32 %v1829_v21, %v5013_v58  ;;  %v4407_v5 = vld [vmem:[%s4574_s26 + $0x98] sm:$0xff]  }
 0x1d5   : > { %v2264_v15 = vpop.f32.mrf.mxu0  ;;  %4237 = vmatmul.mubr.msk.bf16.gmra.mxu0 %vm571_vm0, %v4406_v60  ;;  %v1833_v36 = vpop.f32.mrf.mxu1  ;;  %4169 = vmatmul.mubr.msk.bf16.gmra.mxu1 %vm571_vm0, %v4405_v11 }
 0x1d6   : > { %3214 = vmatprep.mubr.bf16.mxu0 %v5934_v53  ;;  %v5301_v54 = vadd.f32 %v2260_v47, %v1961_v26  ;;  %v1962_v0 = vadd.f32 %v1833_v36, %v5017_v62  ;;  %2783 = vmatprep.mubr.bf16.mxu1 %v5934_v53 }
 0x1d7   : > { %v2266_v57 = vpop.f32.mrf.mxu0  ;;  %v1835_v9 = vpop.f32.mrf.mxu1 }
 0x1d8   : > { %v5305_v48 = vadd.f32 %v2264_v15, %v1962_v0  ;;  %v1963_v58 = vadd.f32 %v1835_v9, %v5022_v46 }
 0x1d9   : > { %v2268_v63 = vpop.f32.mrf.mxu0  ;;  %v1837_v60 = vpop.f32.mrf.mxu1 }
 0x1da   : > { %v5310_v21 = vadd.f32 %v2266_v57, %v1963_v58  ;;  %v1964_v11 = vadd.f32 %v1837_v60, %v5025_v10  ;;  %v4410_v60 = vld [vmem:[%s4574_s26 + $0xa8] sm:$0xff]  }
 0x1db   : > { %v2270_v47 = vpop.f32.mrf.mxu0  ;;  %v1839_v26 = vpop.f32.mrf.mxu1 }
 0x1dc   : > { %v5313_v62 = vadd.f32 %v2268_v63, %v1964_v11  ;;  %v1965_v36 = vadd.f32 %v1839_v26, %v5031_v4  ;;  %v4409_v11 = vld [vmem:[%s4574_s26 + $0xa0] sm:$0xff]  }
 0x1dd   : > { %v2274_v15 = vpop.f32.mrf.mxu0  ;;  %4238 = vmatmul.mubr.msk.bf16.gmra.mxu0 %vm571_vm0, %v4408_v43  ;;  %v1843_v46 = vpop.f32.mrf.mxu1  ;;  %4170 = vmatmul.mubr.msk.bf16.gmra.mxu1 %vm571_vm0, %v4407_v5 }
 0x1de   : > { %3224 = vmatprep.mubr.bf16.mxu0 %v5934_v53  ;;  %v5319_v0 = vadd.f32 %v2270_v47, %v1965_v36  ;;  %v1966_v10 = vadd.f32 %v1843_v46, %v5035_v8  ;;  %2793 = vmatprep.mubr.bf16.mxu1 %v5934_v53 }
 0x1df   : > { %v2276_v57 = vpop.f32.mrf.mxu0  ;;  %v1845_v9 = vpop.f32.mrf.mxu1 }
 0x1e0   : > { %5956 = vst [vmem:[#allocation16_spill] sm:$0xff] %v5319_v0  ;;  %v5323_v58 = vadd.f32 %v2274_v15, %v1966_v10  ;;  %v1967_v4 = vadd.f32 %v1845_v9, %v5040_v56 }
 0x1e1   : > { %v2278_v63 = vpop.f32.mrf.mxu0  ;;  %v1847_v43 = vpop.f32.mrf.mxu1 }
 0x1e2   : > { %v5328_v26 = vadd.f32 %v2276_v57, %v1967_v4  ;;  %v1968_v5 = vadd.f32 %v1847_v43, %v5043_v20 }
 0x1e3   : > { %v2280_v47 = vpop.f32.mrf.mxu0  ;;  %v1849_v36 = vpop.f32.mrf.mxu1 }
 0x1e4   : > { %v5331_v0 = vadd.f32 %v2278_v63, %v1968_v5  ;;  %v1969_v8 = vadd.f32 %v1849_v36, %v5049_v14 }
 0x1e5   : > { %v2284_v53 = vpop.f32.mrf.mxu0  ;;  %4239 = vmatmul.mubr.msk.bf16.gmra.mxu0 %vm571_vm0, %v4410_v60  ;;  %v1853_v15 = vpop.f32.mrf.mxu1  ;;  %4171 = vmatmul.mubr.msk.bf16.gmra.mxu1 %vm571_vm0, %v4409_v11 }
 0x1e6   : > { %v5336_v56 = vadd.f32 %v2280_v47, %v1969_v8  ;;  %v1970_v46 = vadd.f32 %v1853_v15, %v5053_v18 }
 0x1e7   : > { %v2286_v10 = vpop.f32.mrf.mxu0  ;;  %v1855_v57 = vpop.f32.mrf.mxu1 }
 0x1e8   : > { %v5339_v9 = vadd.f32 %v2284_v53, %v1970_v46  ;;  %v1971_v20 = vadd.f32 %v1855_v57, %v5058_v2 }
 0x1e9   : > { %v2288_v4 = vpop.f32.mrf.mxu0  ;;  %v1857_v63 = vpop.f32.mrf.mxu1 }
 0x1ea   : > { %v5342_v43 = vadd.f32 %v2286_v10, %v1971_v20  ;;  %v1972_v14 = vadd.f32 %v1857_v63, %v5061_v61 }
 0x1eb   : > { %v2290_v60 = vpop.f32.mrf.mxu0  ;;  %v1859_v5 = vpop.f32.mrf.mxu1 }
 0x1ec   : > { %v5345_v36 = vadd.f32 %v2288_v4, %v1972_v14  ;;  %v1973_v11 = vadd.f32 %v1859_v5, %v5067_v31 }
 0x1ed   : > { %v2294_v47 = vpop.f32.mrf.mxu0  ;;  %v1863_v18 = vpop.f32.mrf.mxu1 }
 0x1ee   : > { %v5348_v8 = vadd.f32 %v2290_v60, %v1973_v11  ;;  %v1974_v53 = vadd.f32 %v1863_v18, %v5071_v51 }
 0x1ef   : > { %v2296_v15 = vpop.f32.mrf.mxu0  ;;  %v1865_v2 = vpop.f32.mrf.mxu1 }
 0x1f0   : > { %v5351_v46 = vadd.f32 %v2294_v47, %v1974_v53  ;;  %v1975_v10 = vadd.f32 %v1865_v2, %v5076_v12 }
 0x1f1   : > { %v2298_v57 = vpop.f32.mrf.mxu0  ;;  %v1867_v61 = vpop.f32.mrf.mxu1 }
 0x1f2   : > { %v5354_v20 = vadd.f32 %v2296_v15, %v1975_v10  ;;  %v1976_v4 = vadd.f32 %v1867_v61, %v5079_v25 }
 0x1f3   : > { %v2300_v63 = vpop.f32.mrf.mxu0  ;;  %v1869_v31 = vpop.f32.mrf.mxu1 }
 0x1f4   : > { %v5357_v14 = vadd.f32 %v2298_v57, %v1976_v4  ;;  %v1977_v60 = vadd.f32 %v1869_v31, %v5085_v17 }
 0x1f5   : > { %v2304_v5 = vpop.f32.mrf.mxu0  ;;  %v1873_v51 = vpop.f32.mrf.mxu1 }
 0x1f6   : > { %v5360_v11 = vadd.f32 %v2300_v63, %v1977_v60  ;;  %v1978_v47 = vadd.f32 %v1873_v51, %v5089_v39 }
 0x1f7   : > { %v2306_v18 = vpop.f32.mrf.mxu0  ;;  %v1875_v12 = vpop.f32.mrf.mxu1 }
 0x1f8   : > { %v5363_v53 = vadd.f32 %v2304_v5, %v1978_v47  ;;  %v1979_v15 = vadd.f32 %v1875_v12, %v5094_v22 }
 0x1f9   : > { %v2308_v2 = vpop.f32.mrf.mxu0  ;;  %v1877_v25 = vpop.f32.mrf.mxu1 }
 0x1fa   : > { %v5366_v10 = vadd.f32 %v2306_v18, %v1979_v15  ;;  %v1980_v57 = vadd.f32 %v1877_v25, %v5097_v35 }
 0x1fb   : > { %v2310_v61 = vpop.f32.mrf.mxu0  ;;  %v1879_v17 = vpop.f32.mrf.mxu1 }
 0x1fc   : > { %v5369_v4 = vadd.f32 %v2308_v2, %v1980_v57  ;;  %v1981_v63 = vadd.f32 %v1879_v17, %v5103_v30 }
 0x1fd   : > { %v2314_v31 = vpop.f32.mrf.mxu0  ;;  %v1883_v39 = vpop.f32.mrf.mxu1 }
 0x1fe   : > { %v5372_v60 = vadd.f32 %v2310_v61, %v1981_v63  ;;  %v1982_v5 = vadd.f32 %v1883_v39, %v5107_v33 }
 0x1ff   : > { %v2316_v51 = vpop.f32.mrf.mxu0  ;;  %v1885_v22 = vpop.f32.mrf.mxu1 }
 0x200   : > { %v5375_v47 = vadd.f32 %v2314_v31, %v1982_v5  ;;  %v1983_v18 = vadd.f32 %v1885_v22, %v5112_v7  ;;  %v5961_v31 = vld [vmem:[#allocation20_spill] sm:$0xff] }
 0x201   : > { %v2318_v12 = vpop.f32.mrf.mxu0  ;;  %v1887_v35 = vpop.f32.mrf.mxu1 }
 0x202   : > { %5957 = vst [vmem:[#allocation17_spill] sm:$0xff] %v5375_v47  ;;  %v5378_v15 = vadd.f32 %v2316_v51, %v1983_v18  ;;  %v1984_v2 = vadd.f32 %v1887_v35, %v5115_v45  ;;  %v5963_v51 = vld [vmem:[#allocation21_spill] sm:$0xff] }
 0x203   : > { %v2320_v25 = vpop.f32.mrf.mxu0  ;;  %v1889_v30 = vpop.f32.mrf.mxu1 }
 0x204   : > { %5958 = vst [vmem:[#allocation18_spill] sm:$0xff] %v5378_v15  ;;  %v5381_v57 = vadd.f32 %v2318_v12, %v1984_v2  ;;  %v1985_v61 = vadd.f32 %v1889_v30, %v5121_v40  ;;  %v5965_v12 = vld [vmem:[#allocation22_spill] sm:$0xff] }
 0x205   : > { %v2324_v17 = vpop.f32.mrf.mxu0  ;;  %v1893_v33 = vpop.f32.mrf.mxu1 }
 0x206   : > { %5959 = vst [vmem:[#allocation19_spill] sm:$0xff] %v5381_v57  ;;  %v5384_v63 = vadd.f32 %v2320_v25, %v1985_v61  ;;  %v1986_v39 = vadd.f32 %v1893_v33, %v5961_v31  ;;  %v5967_v25 = vld [vmem:[#allocation23_spill] sm:$0xff] }
 0x207   : > { %v2326_v5 = vpop.f32.mrf.mxu0  ;;  %v1895_v7 = vpop.f32.mrf.mxu1 }
 0x208   : > { %5960 = vst [vmem:[#allocation24_spill] sm:$0xff] %v5384_v63  ;;  %v5387_v22 = vadd.f32 %v2324_v17, %v1986_v39  ;;  %v1987_v18 = vadd.f32 %v1895_v7, %v5963_v51  ;;  %v5969_v17 = vld [vmem:[#allocation4_spill] sm:$0xff] }
 0x209   : > { %v2328_v15 = vpop.f32.mrf.mxu0  ;;  %v1897_v45 = vpop.f32.mrf.mxu1 }
 0x20a   : > { %5962 = vst [vmem:[#allocation20_spill] sm:$0xff] %v5387_v22  ;;  %v5390_v35 = vadd.f32 %v2326_v5, %v1987_v18  ;;  %v1988_v2 = vadd.f32 %v1897_v45, %v5965_v12  ;;  %v5971_v5 = vld [vmem:[#allocation5_spill] sm:$0xff] }
 0x20b   : > { %v2330_v57 = vpop.f32.mrf.mxu0  ;;  %v1899_v40 = vpop.f32.mrf.mxu1 }
 0x20c   : > { %5964 = vst [vmem:[#allocation21_spill] sm:$0xff] %v5390_v35  ;;  %v5393_v30 = vadd.f32 %v2328_v15, %v1988_v2  ;;  %v1989_v61 = vadd.f32 %v1899_v40, %v5967_v25  ;;  %v5973_v15 = vld [vmem:[#allocation6_spill] sm:$0xff] }
 0x20d   : > { %v2334_v63 = vpop.f32.mrf.mxu0  ;;  %v1903_v33 = vpop.f32.mrf.mxu1 }
 0x20e   : > { %5966 = vst [vmem:[#allocation22_spill] sm:$0xff] %v5393_v30  ;;  %v5396_v31 = vadd.f32 %v2330_v57, %v1989_v61  ;;  %v1990_v39 = vadd.f32 %v1903_v33, %v5969_v17  ;;  %v5975_v57 = vld [vmem:[#allocation7_spill] sm:$0xff] }
 0x20f   : > { %v2336_v22 = vpop.f32.mrf.mxu0  ;;  %v1905_v7 = vpop.f32.mrf.mxu1 }
 0x210   : > { %5968 = vst [vmem:[#allocation23_spill] sm:$0xff] %v5396_v31  ;;  %v5399_v51 = vadd.f32 %v2334_v63, %v1990_v39  ;;  %v1991_v18 = vadd.f32 %v1905_v7, %v5971_v5  ;;  %v5977_v63 = vld [vmem:[#allocation8_spill] sm:$0xff] }
 0x211   : > { %v2338_v35 = vpop.f32.mrf.mxu0  ;;  %v1907_v45 = vpop.f32.mrf.mxu1 }
 0x212   : > { %5970 = vst [vmem:[#allocation4_spill] sm:$0xff] %v5399_v51  ;;  %v5402_v12 = vadd.f32 %v2336_v22, %v1991_v18  ;;  %v1992_v2 = vadd.f32 %v1907_v45, %v5973_v15  ;;  %v5979_v22 = vld [vmem:[#allocation9_spill] sm:$0xff] }
 0x213   : > { %v2340_v30 = vpop.f32.mrf.mxu0  ;;  %v1909_v40 = vpop.f32.mrf.mxu1 }
 0x214   : > { %5972 = vst [vmem:[#allocation5_spill] sm:$0xff] %v5402_v12  ;;  %v5405_v25 = vadd.f32 %v2338_v35, %v1992_v2  ;;  %v1993_v61 = vadd.f32 %v1909_v40, %v5975_v57  ;;  %v5981_v35 = vld [vmem:[#allocation10_spill] sm:$0xff] }
 0x215   : > { %v2344_v31 = vpop.f32.mrf.mxu0  ;;  %v1913_v33 = vpop.f32.mrf.mxu1 }
 0x216   : > { %5974 = vst [vmem:[#allocation6_spill] sm:$0xff] %v5405_v25  ;;  %v5408_v17 = vadd.f32 %v2340_v30, %v1993_v61  ;;  %v1994_v39 = vadd.f32 %v1913_v33, %v5977_v63  ;;  %v5983_v30 = vld [vmem:[#allocation11_spill] sm:$0xff] }
 0x217   : > { %v2346_v51 = vpop.f32.mrf.mxu0  ;;  %v1915_v7 = vpop.f32.mrf.mxu1 }
 0x218   : > { %5976 = vst [vmem:[#allocation7_spill] sm:$0xff] %v5408_v17  ;;  %v5411_v5 = vadd.f32 %v2344_v31, %v1994_v39  ;;  %v1995_v18 = vadd.f32 %v1915_v7, %v5979_v22  ;;  %v5985_v31 = vld [vmem:[#allocation12_spill] sm:$0xff] }
 0x219   : > { %v2348_v12 = vpop.f32.mrf.mxu0  ;;  %v1917_v45 = vpop.f32.mrf.mxu1 }
 0x21a   : > { %5978 = vst [vmem:[#allocation8_spill] sm:$0xff] %v5411_v5  ;;  %v5414_v15 = vadd.f32 %v2346_v51, %v1995_v18  ;;  %v1996_v2 = vadd.f32 %v1917_v45, %v5981_v35  ;;  %v5986_v51 = vld [vmem:[#allocation13_spill] sm:$0xff] }
 0x21b   : > { %v2350_v25 = vpop.f32.mrf.mxu0  ;;  %v1919_v40 = vpop.f32.mrf.mxu1 }
 0x21c   : > { %5980 = vst [vmem:[#allocation9_spill] sm:$0xff] %v5414_v15  ;;  %v5417_v57 = vadd.f32 %v2348_v12, %v1996_v2  ;;  %v1997_v61 = vadd.f32 %v1919_v40, %v5983_v30  ;;  %v5988_v12 = vld [vmem:[#allocation14_spill] sm:$0xff]  ;;  %v3301_v40 = vlaneseq }
 0x21d   : > { %v2354_v17 = vpop.f32.mrf.mxu0  ;;  %v1923_v33 = vpop.f32.mrf.mxu1 }
 0x21e   : > { %5982 = vst [vmem:[#allocation10_spill] sm:$0xff] %v5417_v57  ;;  %v5420_v63 = vadd.f32 %v2350_v25, %v1997_v61  ;;  %v1998_v39 = vadd.f32 %v1923_v33, %v5985_v31  ;;  %v5989_v25 = vld [vmem:[#allocation15_spill] sm:$0xff] }
 0x21f   : > { %v2356_v5 = vpop.f32.mrf.mxu0  ;;  %v1925_v7 = vpop.f32.mrf.mxu1 }
 0x220   : > { %5984 = vst [vmem:[#allocation11_spill] sm:$0xff] %v5420_v63  ;;  %v5423_v22 = vadd.f32 %v2354_v17, %v1998_v39  ;;  %v1999_v18 = vadd.f32 %v1925_v7, %v5986_v51  ;;  %v3302_v7 = vshrl.u32 %v3301_v40, 7 }
 0x221   : > { %v2358_v15 = vpop.f32.mrf.mxu0  ;;  %v1927_v45 = vpop.f32.mrf.mxu1 }
 0x222   : > { %v5426_v35 = vadd.f32 %v2356_v5, %v1999_v18  ;;  %v2000_v2 = vadd.f32 %v1927_v45, %v5988_v12 }
 0x223   : > { %v2360_v57 = vpop.f32.mrf.mxu0  ;;  %v1929_v30 = vpop.f32.mrf.mxu1 }
 0x224   : > { %5987 = vst [vmem:[#allocation12_spill] sm:$0xff] %v5426_v35  ;;  %v5429_v47 = vadd.f32 %v2358_v15, %v2000_v2  ;;  %v2001_v61 = vadd.f32 %v1929_v30, %v5989_v25  ;;  %v3303_v30 = vsub.s32 0, %v3302_v7 }
 0x225   : > { %v2364_v33 = vpop.f32.mrf.mxu0  ;;  %v1933_v31 = vpop.f32.mrf.mxu1 }
 0x226   : > { %v5432_v63 = vadd.f32 %v2360_v57, %v2001_v61  ;;  %v2002_v17 = vadd.f32 %v1933_v31, %v5197_v3  ;;  %v3299_v3 = vld [vmem:[%s5901_s2] sm:$0x3] }
 0x227   : > { %v2366_v39 = vpop.f32.mrf.mxu0  ;;  %v1935_v51 = vpop.f32.mrf.mxu1  ;;  %v3375_v31 = vld [vmem:[%s5902_s3] sm:$0x3] }
 0x228   : > { %v5435_v5 = vadd.f32 %v2364_v33, %v2002_v17  ;;  %v2003_v18 = vadd.f32 %v1935_v51, %v5202_v1  ;;  %v3307_v1 = vsub.s32 1, %v3302_v7 }
 0x229   : > { %v2368_v45 = vpop.f32.mrf.mxu0  ;;  %v1937_v12 = vpop.f32.mrf.mxu1 }
 0x22a   : > { %5990 = vst [vmem:[#allocation13_spill] sm:$0xff] %v5435_v5  ;;  %v5438_v35 = vadd.f32 %v2366_v39, %v2003_v18  ;;  %v2004_v15 = vadd.f32 %v1937_v12, %v5205_v49  ;;  %v5453_v39 = vrot.slane %v3299_v3, %v3303_v30  ;;  %v5455_v12 = vrot.slane %v3375_v31, %v3303_v30 }
 0x22b   : > { %v2370_v2 = vpop.f32.mrf.mxu0  ;;  %v1939_v25 = vpop.f32.mrf.mxu1 }
 0x22c   : > { %5991 = vst [vmem:[#allocation14_spill] sm:$0xff] %v5438_v35  ;;  %v5444_v57 = vadd.f32 %v2368_v45, %v2004_v15  ;;  %v2005_v40 = vadd.f32 %v1939_v25, %v5211_v55  ;;  %v5458_v15 = vrot.slane %v3299_v3, %v3307_v1 }
 0x22d   : > { %v3076_v61 = vpop.f32.mrf.mxu0  ;;  %v2645_v33 = vpop.f32.mrf.mxu1 }
 0x22e   : > { %5992 = vst [vmem:[#allocation15_spill] sm:$0xff] %v5444_v57  ;;  %v5450_v49 = vadd.f32 %v2370_v2, %v2005_v40  ;;  %v2804_v17 = vadd.f32 %v2645_v33, %v5215_v27 }
 0x22f   : > { %v3078_v51 = vpop.f32.mrf.mxu0  ;;  %v2647_v18 = vpop.f32.mrf.mxu1 }
 0x230   : > { %5993 = vst [vmem:[#allocation25_spill] sm:$0xff] %v5450_v49  ;;  %v3235_v45 = vadd.f32 %v3076_v61, %v2804_v17  ;;  %v2805_v55 = vadd.f32 %v2647_v18, %v5220_v50  ;;  %v5463_v49 = vrot.slane %v3375_v31, %v3307_v1 }
 0x231   : > { %v3080_v7 = vpop.f32.mrf.mxu0  ;;  %v2649_v25 = vpop.f32.mrf.mxu1 }
 0x232   : > { %v3311_v2 = vmul.f32 %v5453_v39, %v3235_v45  ;;  %v3236_v40 = vadd.f32 %v3078_v51, %v2805_v55  ;;  %v2806_v27 = vadd.f32 %v2649_v25, %v5223_v16 }
 0x233   : > { %v3082_v33 = vpop.f32.mrf.mxu0  ;;  %v2651_v57 = vpop.f32.mrf.mxu1 }
 0x234   : > { %v3387_v30 = vadd.f32 %v5455_v12, %v3311_v2  ;;  %v3312_v61 = vmul.f32 %v5458_v15, %v3236_v40  ;;  %v3237_v50 = vadd.f32 %v3080_v7, %v2806_v27  ;;  %v2807_v3 = vadd.f32 %v2651_v57, %v5229_v6 }
 0x235   : > { %v3086_v17 = vpop.f32.mrf.mxu0  ;;  %v2655_v18 = vpop.f32.mrf.mxu1 }
 0x236   : > { %v3451_v35 = vmax.f32 %v3387_v30, 0.0  ;;  %v3388_v5 = vadd.f32 %v5463_v49, %v3312_v61  ;;  %v3313_v51 = vmul.f32 %v5453_v39, %v3237_v50  ;;  %v3238_v1 = vadd.f32 %v3082_v33, %v2807_v3 }
 0x237   : > { %v3088_v31 = vpop.f32.mrf.mxu0  ;;  %v2808_v16 = vadd.f32 %v2655_v18, %v5233_v24  ;;  %v2657_v45 = vpop.f32.mrf.mxu1 }
 0x238   : > { %3515 = vst [vmem:[%s5472_s15] sm:$0xff] %v3451_v35  ;;  %v3452_v6 = vmax.f32 %v3388_v5, 0.0  ;;  %v3389_v57 = vadd.f32 %v5455_v12, %v3313_v51  ;;  %v3314_v55 = vmul.f32 %v5458_v15, %v3238_v1  ;;  %v2809_v7 = vadd.f32 %v2657_v45, %v5238_v59 }
 0x239   : > { %v3090_v25 = vpop.f32.mrf.mxu0  ;;  %v3239_v2 = vadd.f32 %v3086_v17, %v2808_v16  ;;  %v2659_v40 = vpop.f32.mrf.mxu1 }
 0x23a   : > { %3517 = vst.msk [vmem:[%s5472_s15 + $0x8] sm:$0xff] %vm3516_vm1, %v3452_v6  ;;  %v3453_v24 = vmax.f32 %v3389_v57, 0.0  ;;  %v3390_v27 = vadd.f32 %v5463_v49, %v3314_v55  ;;  %v3240_v33 = vadd.f32 %v3088_v31, %v2809_v7  ;;  %v2810_v35 = vadd.f32 %v2659_v40, %v5241_v19 }
 0x23b   : > { %v3092_v30 = vpop.f32.mrf.mxu0  ;;  %v3315_v5 = vmul.f32 %v5453_v39, %v3239_v2  ;;  %v2661_v61 = vpop.f32.mrf.mxu1 }
 0x23c   : > { %3518 = vst [vmem:[%s5472_s15 + $0x10] sm:$0xff] %v3453_v24  ;;  %v3454_v50 = vmax.f32 %v3390_v27, 0.0  ;;  %v3316_v59 = vmul.f32 %v5458_v15, %v3240_v33  ;;  %v3241_v3 = vadd.f32 %v3090_v25, %v2810_v35  ;;  %v2811_v17 = vadd.f32 %v2661_v61, %v5247_v23 }
 0x23d   : > { %v3096_v18 = vpop.f32.mrf.mxu0  ;;  %v3391_v51 = vadd.f32 %v5455_v12, %v3315_v5  ;;  %v2665_v1 = vpop.f32.mrf.mxu1 }
 0x23e   : > { %3519 = vst.msk [vmem:[%s5472_s15 + $0x18] sm:$0xff] %vm3516_vm1, %v3454_v50  ;;  %v3392_v19 = vadd.f32 %v5463_v49, %v3316_v59  ;;  %v3317_v31 = vmul.f32 %v5453_v39, %v3241_v3  ;;  %v3242_v16 = vadd.f32 %v3092_v30, %v2811_v17  ;;  %v2812_v45 = vadd.f32 %v2665_v1, %v5251_v13 }
 0x23f   : > { %v3098_v6 = vpop.f32.mrf.mxu0  ;;  %v3455_v57 = vmax.f32 %v3391_v51, 0.0  ;;  %v2667_v55 = vpop.f32.mrf.mxu1 }
 0x240   : > { %v3456_v7 = vmax.f32 %v3392_v19, 0.0  ;;  %v3393_v23 = vadd.f32 %v5455_v12, %v3317_v31  ;;  %v3318_v25 = vmul.f32 %v5458_v15, %v3242_v16  ;;  %v3243_v2 = vadd.f32 %v3096_v18, %v2812_v45 }
 0x241   : > { %v3100_v40 = vpop.f32.mrf.mxu0  ;;  %3520 = vst [vmem:[%s5472_s15 + $0x20] sm:$0xff] %v3455_v57  ;;  %v2813_v24 = vadd.f32 %v2667_v55, %v5256_v37  ;;  %v2669_v27 = vpop.f32.mrf.mxu1 }
 0x242   : > { %3521 = vst.msk [vmem:[%s5472_s15 + $0x28] sm:$0xff] %vm3516_vm1, %v3456_v7  ;;  %v3457_v33 = vmax.f32 %v3393_v23, 0.0  ;;  %v3394_v13 = vadd.f32 %v5463_v49, %v3318_v25  ;;  %v3319_v35 = vmul.f32 %v5453_v39, %v3243_v2  ;;  %v2814_v30 = vadd.f32 %v2669_v27, %v5259_v32 }
 0x243   : > { %v3102_v5 = vpop.f32.mrf.mxu0  ;;  %v3244_v61 = vadd.f32 %v3098_v6, %v2813_v24  ;;  %v2671_v50 = vpop.f32.mrf.mxu1 }
 0x244   : > { %3522 = vst [vmem:[%s5472_s15 + $0x30] sm:$0xff] %v3457_v33  ;;  %v3458_v59 = vmax.f32 %v3394_v13, 0.0  ;;  %v3395_v3 = vadd.f32 %v5455_v12, %v3319_v35  ;;  %v3245_v37 = vadd.f32 %v3100_v40, %v2814_v30  ;;  %v2815_v17 = vadd.f32 %v2671_v50, %v5265_v34 }
 0x245   : > { %v3106_v18 = vpop.f32.mrf.mxu0  ;;  %v3320_v51 = vmul.f32 %v5458_v15, %v3244_v61  ;;  %v2675_v1 = vpop.f32.mrf.mxu1 }
 0x246   : > { %3523 = vst.msk [vmem:[%s5472_s15 + $0x38] sm:$0xff] %vm3516_vm1, %v3458_v59  ;;  %v3459_v19 = vmax.f32 %v3395_v3, 0.0  ;;  %v3321_v32 = vmul.f32 %v5453_v39, %v3245_v37  ;;  %v3246_v31 = vadd.f32 %v3102_v5, %v2815_v17  ;;  %v2816_v16 = vadd.f32 %v2675_v1, %v5269_v28 }
 0x247   : > { %v3108_v45 = vpop.f32.mrf.mxu0  ;;  %v3396_v6 = vadd.f32 %v5463_v49, %v3320_v51  ;;  %v2677_v57 = vpop.f32.mrf.mxu1 }
 0x248   : > { %3524 = vst [vmem:[%s5472_s15 + $0x40] sm:$0xff] %v3459_v19  ;;  %v3397_v34 = vadd.f32 %v5455_v12, %v3321_v32  ;;  %v3322_v55 = vmul.f32 %v5458_v15, %v3246_v31  ;;  %v3247_v7 = vadd.f32 %v3106_v18, %v2816_v16  ;;  %v2817_v23 = vadd.f32 %v2677_v57, %v5274_v41 }
 0x249   : > { %v3110_v25 = vpop.f32.mrf.mxu0  ;;  %v3460_v2 = vmax.f32 %v3396_v6, 0.0  ;;  %v2679_v40 = vpop.f32.mrf.mxu1 }
 0x24a   : > { %v3461_v24 = vmax.f32 %v3397_v34, 0.0  ;;  %v3398_v28 = vadd.f32 %v5463_v49, %v3322_v55  ;;  %v3323_v27 = vmul.f32 %v5453_v39, %v3247_v7  ;;  %v3248_v33 = vadd.f32 %v3108_v45, %v2817_v23 }
 0x24b   : > { %v3112_v13 = vpop.f32.mrf.mxu0  ;;  %3525 = vst.msk [vmem:[%s5472_s15 + $0x48] sm:$0xff] %vm3516_vm1, %v3460_v2  ;;  %v2818_v35 = vadd.f32 %v2679_v40, %v5277_v42  ;;  %v2681_v30 = vpop.f32.mrf.mxu1 }
 0x24c   : > { %3526 = vst [vmem:[%s5472_s15 + $0x50] sm:$0xff] %v3461_v24  ;;  %v3462_v5 = vmax.f32 %v3398_v28, 0.0  ;;  %v3399_v41 = vadd.f32 %v5455_v12, %v3323_v27  ;;  %v3324_v61 = vmul.f32 %v5458_v15, %v3248_v33  ;;  %v2819_v50 = vadd.f32 %v2681_v30, %v5283_v44 }
 0x24d   : > { %v3116_v59 = vpop.f32.mrf.mxu0  ;;  %v3249_v3 = vadd.f32 %v3110_v25, %v2818_v35  ;;  %v2685_v37 = vpop.f32.mrf.mxu1 }
 0x24e   : > { %3527 = vst.msk [vmem:[%s5472_s15 + $0x58] sm:$0xff] %vm3516_vm1, %v3462_v5  ;;  %v3463_v17 = vmax.f32 %v3399_v41, 0.0  ;;  %v3400_v18 = vadd.f32 %v5463_v49, %v3324_v61  ;;  %v3250_v42 = vadd.f32 %v3112_v13, %v2819_v50  ;;  %v2820_v51 = vadd.f32 %v2685_v37, %v5287_v38 }
 0x24f   : > { %v3118_v1 = vpop.f32.mrf.mxu0  ;;  %v3325_v19 = vmul.f32 %v5453_v39, %v3249_v3  ;;  %v2687_v32 = vpop.f32.mrf.mxu1 }
 0x250   : > { %3528 = vst [vmem:[%s5472_s15 + $0x60] sm:$0xff] %v3463_v17  ;;  %v3464_v31 = vmax.f32 %v3400_v18, 0.0  ;;  %v3326_v44 = vmul.f32 %v5458_v15, %v3250_v42  ;;  %v3251_v16 = vadd.f32 %v3116_v59, %v2820_v51  ;;  %v2821_v45 = vadd.f32 %v2687_v32, %v5292_v29 }
 0x251   : > { %v3120_v6 = vpop.f32.mrf.mxu0  ;;  %v3401_v57 = vadd.f32 %v5455_v12, %v3325_v19  ;;  %v2689_v34 = vpop.f32.mrf.mxu1 }
 0x252   : > { %3529 = vst.msk [vmem:[%s5472_s15 + $0x68] sm:$0xff] %vm3516_vm1, %v3464_v31  ;;  %v3402_v38 = vadd.f32 %v5463_v49, %v3326_v44  ;;  %v3327_v55 = vmul.f32 %v5453_v39, %v3251_v16  ;;  %v3252_v7 = vadd.f32 %v3118_v1, %v2821_v45  ;;  %v2822_v23 = vadd.f32 %v2689_v34, %v5295_v52 }
 0x253   : > { %v3122_v25 = vpop.f32.mrf.mxu0  ;;  %v3465_v2 = vmax.f32 %v3401_v57, 0.0  ;;  %v2691_v40 = vpop.f32.mrf.mxu1  ;;  %v5994_v57 = vld [vmem:[#allocation16_spill] sm:$0xff] }
 0x254   : > { %v3466_v24 = vmax.f32 %v3402_v38, 0.0  ;;  %v3403_v29 = vadd.f32 %v5455_v12, %v3327_v55  ;;  %v3328_v28 = vmul.f32 %v5458_v15, %v3252_v7  ;;  %v3253_v27 = vadd.f32 %v3120_v6, %v2822_v23 }
 0x255   : > { %v3126_v33 = vpop.f32.mrf.mxu0  ;;  %3530 = vst [vmem:[%s5472_s15 + $0x70] sm:$0xff] %v3465_v2  ;;  %v2823_v13 = vadd.f32 %v2691_v40, %v5301_v54  ;;  %v2695_v35 = vpop.f32.mrf.mxu1 }
 0x256   : > { %3531 = vst.msk [vmem:[%s5472_s15 + $0x78] sm:$0xff] %vm3516_vm1, %v3466_v24  ;;  %v3467_v30 = vmax.f32 %v3403_v29, 0.0  ;;  %v3404_v52 = vadd.f32 %v5463_v49, %v3328_v28  ;;  %v3329_v5 = vmul.f32 %v5453_v39, %v3253_v27  ;;  %v2824_v41 = vadd.f32 %v2695_v35, %v5305_v48 }
 0x257   : > { %v3128_v61 = vpop.f32.mrf.mxu0  ;;  %v3254_v50 = vadd.f32 %v3122_v25, %v2823_v13  ;;  %v2697_v59 = vpop.f32.mrf.mxu1 }
 0x258   : > { %3532 = vst [vmem:[%s5472_s15 + $0x80] sm:$0xff] %v3467_v30  ;;  %v3468_v3 = vmax.f32 %v3404_v52, 0.0  ;;  %v3405_v37 = vadd.f32 %v5455_v12, %v3329_v5  ;;  %v3255_v54 = vadd.f32 %v3126_v33, %v2824_v41  ;;  %v2825_v17 = vadd.f32 %v2697_v59, %v5310_v21 }
 0x259   : > { %v3130_v18 = vpop.f32.mrf.mxu0  ;;  %v3330_v42 = vmul.f32 %v5458_v15, %v3254_v50  ;;  %v2699_v51 = vpop.f32.mrf.mxu1 }
 0x25a   : > { %3533 = vst.msk [vmem:[%s5472_s15 + $0x88] sm:$0xff] %vm3516_vm1, %v3468_v3  ;;  %v3469_v1 = vmax.f32 %v3405_v37, 0.0  ;;  %v3331_v48 = vmul.f32 %v5453_v39, %v3255_v54  ;;  %v3256_v19 = vadd.f32 %v3128_v61, %v2825_v17  ;;  %v2826_v32 = vadd.f32 %v2699_v51, %v5313_v62 }
 0x25b   : > { %v3132_v31 = vpop.f32.mrf.mxu0  ;;  %v3406_v44 = vadd.f32 %v5463_v49, %v3330_v42  ;;  %v2701_v16 = vpop.f32.mrf.mxu1 }
 0x25c   : > { %3534 = vst [vmem:[%s5472_s15 + $0x90] sm:$0xff] %v3469_v1  ;;  %v3407_v21 = vadd.f32 %v5455_v12, %v3331_v48  ;;  %v3332_v45 = vmul.f32 %v5458_v15, %v3256_v19  ;;  %v3257_v6 = vadd.f32 %v3130_v18, %v2826_v32  ;;  %v2827_v34 = vadd.f32 %v2701_v16, %v5994_v57 }
 0x25d   : > { %v3136_v38 = vpop.f32.mrf.mxu0  ;;  %v3470_v55 = vmax.f32 %v3406_v44, 0.0  ;;  %v2705_v7 = vpop.f32.mrf.mxu1 }
 0x25e   : > { %v3471_v23 = vmax.f32 %v3407_v21, 0.0  ;;  %v3408_v62 = vadd.f32 %v5463_v49, %v3332_v45  ;;  %v3333_v25 = vmul.f32 %v5453_v39, %v3257_v6  ;;  %v3258_v2 = vadd.f32 %v3132_v31, %v2827_v34 }
 0x25f   : > { %v3138_v40 = vpop.f32.mrf.mxu0  ;;  %3535 = vst.msk [vmem:[%s5472_s15 + $0x98] sm:$0xff] %vm3516_vm1, %v3470_v55  ;;  %v2828_v24 = vadd.f32 %v2705_v7, %v5323_v58  ;;  %v2707_v29 = vpop.f32.mrf.mxu1 }
 0x260   : > { %3536 = vst [vmem:[%s5472_s15 + $0xa0] sm:$0xff] %v3471_v23  ;;  %v3472_v28 = vmax.f32 %v3408_v62, 0.0  ;;  %v3409_v27 = vadd.f32 %v5455_v12, %v3333_v25  ;;  %v3334_v33 = vmul.f32 %v5458_v15, %v3258_v2  ;;  %v2829_v13 = vadd.f32 %v2707_v29, %v5328_v26 }
 0x261   : > { %v3140_v35 = vpop.f32.mrf.mxu0  ;;  %v3259_v30 = vadd.f32 %v3136_v38, %v2828_v24  ;;  %v2709_v52 = vpop.f32.mrf.mxu1 }
 0x262   : > { %3537 = vst.msk [vmem:[%s5472_s15 + $0xa8] sm:$0xff] %vm3516_vm1, %v3472_v28  ;;  %v3473_v5 = vmax.f32 %v3409_v27, 0.0  ;;  %v3410_v41 = vadd.f32 %v5463_v49, %v3334_v33  ;;  %v3260_v58 = vadd.f32 %v3138_v40, %v2829_v13  ;;  %v2830_v61 = vadd.f32 %v2709_v52, %v5331_v0 }
 0x263   : > { %v3142_v50 = vpop.f32.mrf.mxu0  ;;  %v3335_v59 = vmul.f32 %v5453_v39, %v3259_v30  ;;  %v2711_v3 = vpop.f32.mrf.mxu1 }
 0x264   : > { %3538 = vst [vmem:[%s5472_s15 + $0xb0] sm:$0xff] %v3473_v5  ;;  %v3474_v37 = vmax.f32 %v3410_v41, 0.0  ;;  %v3336_v26 = vmul.f32 %v5458_v15, %v3260_v58  ;;  %v3261_v54 = vadd.f32 %v3140_v35, %v2830_v61  ;;  %v2831_v17 = vadd.f32 %v2711_v3, %v5336_v56 }
 0x265   : > { %v3146_v18 = vpop.f32.mrf.mxu0  ;;  %v3411_v42 = vadd.f32 %v5455_v12, %v3335_v59  ;;  %v2715_v51 = vpop.f32.mrf.mxu1 }
 0x266   : > { %3539 = vst.msk [vmem:[%s5472_s15 + $0xb8] sm:$0xff] %vm3516_vm1, %v3474_v37  ;;  %v3412_v0 = vadd.f32 %v5463_v49, %v3336_v26  ;;  %v3337_v1 = vmul.f32 %v5453_v39, %v3261_v54  ;;  %v3262_v48 = vadd.f32 %v3142_v50, %v2831_v17  ;;  %v2832_v19 = vadd.f32 %v2715_v51, %v5339_v9 }
 0x267   : > { %v3148_v32 = vpop.f32.mrf.mxu0  ;;  %v3475_v31 = vmax.f32 %v3411_v42, 0.0  ;;  %v2717_v44 = vpop.f32.mrf.mxu1 }
 0x268   : > { %v3476_v16 = vmax.f32 %v3412_v0, 0.0  ;;  %v3413_v56 = vadd.f32 %v5455_v12, %v3337_v1  ;;  %v3338_v21 = vmul.f32 %v5458_v15, %v3262_v48  ;;  %v3263_v45 = vadd.f32 %v3146_v18, %v2832_v19 }
 0x269   : > { %v3150_v6 = vpop.f32.mrf.mxu0  ;;  %3540 = vst [vmem:[%s5472_s15 + $0xc0] sm:$0xff] %v3475_v31  ;;  %v2833_v57 = vadd.f32 %v2717_v44, %v5342_v43  ;;  %v2719_v34 = vpop.f32.mrf.mxu1 }
 0x26a   : > { %3541 = vst.msk [vmem:[%s5472_s15 + $0xc8] sm:$0xff] %vm3516_vm1, %v3476_v16  ;;  %v3477_v38 = vmax.f32 %v3413_v56, 0.0  ;;  %v3414_v9 = vadd.f32 %v5463_v49, %v3338_v21  ;;  %v3339_v55 = vmul.f32 %v5453_v39, %v3263_v45  ;;  %v2834_v7 = vadd.f32 %v2719_v34, %v5345_v36 }
 0x26b   : > { %v3152_v23 = vpop.f32.mrf.mxu0  ;;  %v3264_v62 = vadd.f32 %v3148_v32, %v2833_v57  ;;  %v2721_v25 = vpop.f32.mrf.mxu1 }
 0x26c   : > { %3542 = vst [vmem:[%s5472_s15 + $0xd0] sm:$0xff] %v3477_v38  ;;  %v3478_v2 = vmax.f32 %v3414_v9, 0.0  ;;  %v3415_v40 = vadd.f32 %v5455_v12, %v3339_v55  ;;  %v3265_v43 = vadd.f32 %v3150_v6, %v2834_v7  ;;  %v2835_v24 = vadd.f32 %v2721_v25, %v5348_v8 }
 0x26d   : > { %v3156_v29 = vpop.f32.mrf.mxu0  ;;  %v3340_v28 = vmul.f32 %v5458_v15, %v3264_v62  ;;  %v2725_v27 = vpop.f32.mrf.mxu1 }
 0x26e   : > { %3543 = vst.msk [vmem:[%s5472_s15 + $0xd8] sm:$0xff] %vm3516_vm1, %v3478_v2  ;;  %v3479_v33 = vmax.f32 %v3415_v40, 0.0  ;;  %v3341_v36 = vmul.f32 %v5453_v39, %v3265_v43  ;;  %v3266_v13 = vadd.f32 %v3152_v23, %v2835_v24  ;;  %v2836_v35 = vadd.f32 %v2725_v27, %v5351_v46 }
 0x26f   : > { %v3158_v30 = vpop.f32.mrf.mxu0  ;;  %v3416_v52 = vadd.f32 %v5463_v49, %v3340_v28  ;;  %v2727_v5 = vpop.f32.mrf.mxu1 }
 0x270   : > { %3544 = vst [vmem:[%s5472_s15 + $0xe0] sm:$0xff] %v3479_v33  ;;  %v3417_v8 = vadd.f32 %v5455_v12, %v3341_v36  ;;  %v3342_v41 = vmul.f32 %v5458_v15, %v3266_v13  ;;  %v3267_v58 = vadd.f32 %v3156_v29, %v2836_v35  ;;  %v2837_v61 = vadd.f32 %v2727_v5, %v5354_v20  ;;  %v5995_v35 = vld [vmem:[#allocation17_spill] sm:$0xff] }
 0x271   : > { %v3160_v50 = vpop.f32.mrf.mxu0  ;;  %v3480_v59 = vmax.f32 %v3416_v52, 0.0  ;;  %v2729_v3 = vpop.f32.mrf.mxu1 }
 0x272   : > { %v3481_v37 = vmax.f32 %v3417_v8, 0.0  ;;  %v3418_v46 = vadd.f32 %v5463_v49, %v3342_v41  ;;  %v3343_v26 = vmul.f32 %v5453_v39, %v3267_v58  ;;  %v3268_v54 = vadd.f32 %v3158_v30, %v2837_v61  ;;  %v5996_v61 = vld [vmem:[#allocation18_spill] sm:$0xff] }
 0x273   : > { %v3162_v17 = vpop.f32.mrf.mxu0  ;;  %3545 = vst.msk [vmem:[%s5472_s15 + $0xe8] sm:$0xff] %vm3516_vm1, %v3480_v59  ;;  %v2838_v18 = vadd.f32 %v2729_v3, %v5357_v14  ;;  %v2731_v42 = vpop.f32.mrf.mxu1 }
 0x274   : > { %3546 = vst [vmem:[%s5472_s15 + $0xf0] sm:$0xff] %v3481_v37  ;;  %v3482_v51 = vmax.f32 %v3418_v46, 0.0  ;;  %v3419_v20 = vadd.f32 %v5455_v12, %v3343_v26  ;;  %v3344_v0 = vmul.f32 %v5458_v15, %v3268_v54  ;;  %v2839_v1 = vadd.f32 %v2731_v42, %v5360_v11 }
 0x275   : > { %v3166_v48 = vpop.f32.mrf.mxu0  ;;  %v3269_v19 = vadd.f32 %v3160_v50, %v2838_v18  ;;  %v2735_v32 = vpop.f32.mrf.mxu1 }
 0x276   : > { %3547 = vst.msk [vmem:[%s5472_s15 + $0xf8] sm:$0xff] %vm3516_vm1, %v3482_v51  ;;  %v3483_v31 = vmax.f32 %v3419_v20, 0.0  ;;  %v3420_v44 = vadd.f32 %v5463_v49, %v3344_v0  ;;  %v3270_v14 = vadd.f32 %v3162_v17, %v2839_v1  ;;  %v2840_v16 = vadd.f32 %v2735_v32, %v5363_v53  ;;  %v5997_v17 = vld [vmem:[#allocation19_spill] sm:$0xff] }
 0x277   : > { %v3168_v56 = vpop.f32.mrf.mxu0  ;;  %v3345_v21 = vmul.f32 %v5453_v39, %v3269_v19  ;;  %v2737_v45 = vpop.f32.mrf.mxu1  ;;  %v5998_v19 = vld [vmem:[#allocation24_spill] sm:$0xff] }
 0x278   : > { %3548 = vst [vmem:[%s5472_s15 + $0x100] sm:$0xff] %v3483_v31  ;;  %v3484_v6 = vmax.f32 %v3420_v44, 0.0  ;;  %v3346_v11 = vmul.f32 %v5458_v15, %v3270_v14  ;;  %v3271_v57 = vadd.f32 %v3166_v48, %v2840_v16  ;;  %v2841_v34 = vadd.f32 %v2737_v45, %v5366_v10 }
 0x279   : > { %v3170_v38 = vpop.f32.mrf.mxu0  ;;  %v3421_v9 = vadd.f32 %v5455_v12, %v3345_v21  ;;  %v2739_v55 = vpop.f32.mrf.mxu1 }
 0x27a   : > { %3549 = vst.msk [vmem:[%s5472_s15 + $0x108] sm:$0xff] %vm3516_vm1, %v3484_v6  ;;  %v3422_v53 = vadd.f32 %v5463_v49, %v3346_v11  ;;  %v3347_v7 = vmul.f32 %v5453_v39, %v3271_v57  ;;  %v3272_v23 = vadd.f32 %v3168_v56, %v2841_v34  ;;  %v2842_v62 = vadd.f32 %v2739_v55, %v5369_v4  ;;  %v5999_v11 = vld [vmem:[#allocation20_spill] sm:$0xff] }
 0x27b   : > { %v3172_v25 = vpop.f32.mrf.mxu0  ;;  %v3485_v2 = vmax.f32 %v3421_v9, 0.0  ;;  %v2741_v40 = vpop.f32.mrf.mxu1 }
 0x27c   : > { %v3486_v43 = vmax.f32 %v3422_v53, 0.0  ;;  %v3423_v10 = vadd.f32 %v5455_v12, %v3347_v7  ;;  %v3348_v24 = vmul.f32 %v5458_v15, %v3272_v23  ;;  %v3273_v29 = vadd.f32 %v3170_v38, %v2842_v62  ;;  %v6000_v53 = vld [vmem:[#allocation21_spill] sm:$0xff] }
 0x27d   : > { %v3176_v28 = vpop.f32.mrf.mxu0  ;;  %3550 = vst [vmem:[%s5472_s15 + $0x110] sm:$0xff] %v3485_v2  ;;  %v2843_v27 = vadd.f32 %v2741_v40, %v5372_v60  ;;  %v2745_v33 = vpop.f32.mrf.mxu1 }
 0x27e   : > { %3551 = vst.msk [vmem:[%s5472_s15 + $0x118] sm:$0xff] %vm3516_vm1, %v3486_v43  ;;  %v3487_v36 = vmax.f32 %v3423_v10, 0.0  ;;  %v3424_v4 = vadd.f32 %v5463_v49, %v3348_v24  ;;  %v3349_v13 = vmul.f32 %v5453_v39, %v3273_v29  ;;  %v2844_v30 = vadd.f32 %v2745_v33, %v5995_v35  ;;  %v6001_v10 = vld [vmem:[#allocation22_spill] sm:$0xff] }
 0x27f   : > { %v3178_v52 = vpop.f32.mrf.mxu0  ;;  %v3274_v5 = vadd.f32 %v3172_v25, %v2843_v27  ;;  %v2747_v8 = vpop.f32.mrf.mxu1 }
 0x280   : > { %3552 = vst [vmem:[%s5472_s15 + $0x120] sm:$0xff] %v3487_v36  ;;  %v3488_v41 = vmax.f32 %v3424_v4, 0.0  ;;  %v3425_v58 = vadd.f32 %v5455_v12, %v3349_v13  ;;  %v3275_v60 = vadd.f32 %v3176_v28, %v2844_v30  ;;  %v2845_v50 = vadd.f32 %v2747_v8, %v5996_v61  ;;  %v6002_v13 = vld [vmem:[#allocation23_spill] sm:$0xff] }
 0x281   : > { %v3180_v59 = vpop.f32.mrf.mxu0  ;;  %v3350_v3 = vmul.f32 %v5458_v15, %v3274_v5  ;;  %v2749_v37 = vpop.f32.mrf.mxu1 }
 0x282   : > { %3553 = vst.msk [vmem:[%s5472_s15 + $0x128] sm:$0xff] %vm3516_vm1, %v3488_v41  ;;  %v3489_v46 = vmax.f32 %v3425_v58, 0.0  ;;  %v3351_v26 = vmul.f32 %v5453_v39, %v3275_v60  ;;  %v3276_v54 = vadd.f32 %v3178_v52, %v2845_v50  ;;  %v2846_v18 = vadd.f32 %v2749_v37, %v5997_v17  ;;  %v6003_v60 = vld [vmem:[#allocation4_spill] sm:$0xff] }
 0x283   : > { %v3182_v42 = vpop.f32.mrf.mxu0  ;;  %v3426_v51 = vadd.f32 %v5463_v49, %v3350_v3  ;;  %v2751_v20 = vpop.f32.mrf.mxu1 }
 0x284   : > { %3554 = vst [vmem:[%s5472_s15 + $0x130] sm:$0xff] %v3489_v46  ;;  %v3427_v0 = vadd.f32 %v5455_v12, %v3351_v26  ;;  %v3352_v1 = vmul.f32 %v5458_v15, %v3276_v54  ;;  %v3277_v48 = vadd.f32 %v3180_v59, %v2846_v18  ;;  %v2847_v32 = vadd.f32 %v2751_v20, %v5998_v19  ;;  %v6004_v18 = vld [vmem:[#allocation5_spill] sm:$0xff] }
 0x285   : > { %v3186_v31 = vpop.f32.mrf.mxu0  ;;  %v3490_v44 = vmax.f32 %v3426_v51, 0.0  ;;  %v2755_v14 = vpop.f32.mrf.mxu1 }
 0x286   : > { %v3491_v16 = vmax.f32 %v3427_v0, 0.0  ;;  %v3428_v56 = vadd.f32 %v5463_v49, %v3352_v1  ;;  %v3353_v21 = vmul.f32 %v5453_v39, %v3277_v48  ;;  %v3278_v45 = vadd.f32 %v3182_v42, %v2847_v32  ;;  %v6005_v48 = vld [vmem:[#allocation6_spill] sm:$0xff] }
 0x287   : > { %v3188_v6 = vpop.f32.mrf.mxu0  ;;  %3555 = vst.msk [vmem:[%s5472_s15 + $0x138] sm:$0xff] %vm3516_vm1, %v3490_v44  ;;  %v2848_v57 = vadd.f32 %v2755_v14, %v5999_v11  ;;  %v2757_v34 = vpop.f32.mrf.mxu1 }
 0x288   : > { %3556 = vst [vmem:[%s5472_s15 + $0x140] sm:$0xff] %v3491_v16  ;;  %v3492_v38 = vmax.f32 %v3428_v56, 0.0  ;;  %v3429_v9 = vadd.f32 %v5455_v12, %v3353_v21  ;;  %v3354_v55 = vmul.f32 %v5458_v15, %v3278_v45  ;;  %v2849_v7 = vadd.f32 %v2757_v34, %v6000_v53  ;;  %v6006_v21 = vld [vmem:[#allocation7_spill] sm:$0xff] }
 0x289   : > { %v3190_v23 = vpop.f32.mrf.mxu0  ;;  %v3279_v62 = vadd.f32 %v3186_v31, %v2848_v57  ;;  %v2759_v25 = vpop.f32.mrf.mxu1 }
 0x28a   : > { %3557 = vst.msk [vmem:[%s5472_s15 + $0x148] sm:$0xff] %vm3516_vm1, %v3492_v38  ;;  %v3493_v2 = vmax.f32 %v3429_v9, 0.0  ;;  %v3430_v40 = vadd.f32 %v5463_v49, %v3354_v55  ;;  %v3280_v43 = vadd.f32 %v3188_v6, %v2849_v7  ;;  %v2850_v24 = vadd.f32 %v2759_v25, %v6001_v10  ;;  %v6007_v55 = vld [vmem:[#allocation8_spill] sm:$0xff] }
 0x28b   : > { %v3192_v29 = vpop.f32.mrf.mxu0  ;;  %v3355_v28 = vmul.f32 %v5453_v39, %v3279_v62  ;;  %v2761_v27 = vpop.f32.mrf.mxu1 }
 0x28c   : > { %3558 = vst [vmem:[%s5472_s15 + $0x150] sm:$0xff] %v3493_v2  ;;  %v3494_v33 = vmax.f32 %v3430_v40, 0.0  ;;  %v3356_v36 = vmul.f32 %v5458_v15, %v3280_v43  ;;  %v3281_v4 = vadd.f32 %v3190_v23, %v2850_v24  ;;  %v2851_v35 = vadd.f32 %v2761_v27, %v6002_v13  ;;  %v6008_v43 = vld [vmem:[#allocation9_spill] sm:$0xff] }
 0x28d   : > { %v3196_v30 = vpop.f32.mrf.mxu0  ;;  %v3431_v52 = vadd.f32 %v5455_v12, %v3355_v28  ;;  %v2765_v5 = vpop.f32.mrf.mxu1 }
 0x28e   : > { %3559 = vst.msk [vmem:[%s5472_s15 + $0x158] sm:$0xff] %vm3516_vm1, %v3494_v33  ;;  %v3432_v8 = vadd.f32 %v5463_v49, %v3356_v36  ;;  %v3357_v41 = vmul.f32 %v5453_v39, %v3281_v4  ;;  %v3282_v58 = vadd.f32 %v3192_v29, %v2851_v35  ;;  %v2852_v61 = vadd.f32 %v2765_v5, %v6003_v60  ;;  %v6009_v35 = vld [vmem:[#allocation10_spill] sm:$0xff] }
 0x28f   : > { %v3198_v50 = vpop.f32.mrf.mxu0  ;;  %v3495_v59 = vmax.f32 %v3431_v52, 0.0  ;;  %v2767_v3 = vpop.f32.mrf.mxu1 }
 0x290   : > { %v3496_v37 = vmax.f32 %v3432_v8, 0.0  ;;  %v3433_v46 = vadd.f32 %v5455_v12, %v3357_v41  ;;  %v3358_v26 = vmul.f32 %v5458_v15, %v3282_v58  ;;  %v3283_v54 = vadd.f32 %v3196_v30, %v2852_v61  ;;  %v6010_v58 = vld [vmem:[#allocation11_spill] sm:$0xff] }
 0x291   : > { %v3200_v17 = vpop.f32.mrf.mxu0  ;;  %3560 = vst [vmem:[%s5472_s15 + $0x160] sm:$0xff] %v3495_v59  ;;  %v2853_v42 = vadd.f32 %v2767_v3, %v6004_v18  ;;  %v2769_v51 = vpop.f32.mrf.mxu1 }
 0x292   : > { %3561 = vst.msk [vmem:[%s5472_s15 + $0x168] sm:$0xff] %vm3516_vm1, %v3496_v37  ;;  %v3497_v20 = vmax.f32 %v3433_v46, 0.0  ;;  %v3434_v0 = vadd.f32 %v5463_v49, %v3358_v26  ;;  %v3359_v1 = vmul.f32 %v5453_v39, %v3283_v54  ;;  %v2854_v19 = vadd.f32 %v2769_v51, %v6005_v48 }
 0x293   : > { %v3202_v32 = vpop.f32.mrf.mxu0  ;;  %v3284_v31 = vadd.f32 %v3198_v50, %v2853_v42  ;;  %v2771_v44 = vpop.f32.mrf.mxu1 }
 0x294   : > { %3562 = vst [vmem:[%s5472_s15 + $0x170] sm:$0xff] %v3497_v20  ;;  %v3498_v14 = vmax.f32 %v3434_v0, 0.0  ;;  %v3435_v16 = vadd.f32 %v5455_v12, %v3359_v1  ;;  %v3285_v56 = vadd.f32 %v3200_v17, %v2854_v19  ;;  %v2855_v45 = vadd.f32 %v2771_v44, %v6006_v21  ;;  %v6011_v0 = vld [vmem:[#allocation12_spill] sm:$0xff] }
 0x295   : > { %v3206_v6 = vpop.f32.mrf.mxu0  ;;  %v3360_v11 = vmul.f32 %v5458_v15, %v3284_v31  ;;  %v2775_v57 = vpop.f32.mrf.mxu1 }
 0x296   : > { %3563 = vst.msk [vmem:[%s5472_s15 + $0x178] sm:$0xff] %vm3516_vm1, %v3498_v14  ;;  %v3499_v34 = vmax.f32 %v3435_v16, 0.0  ;;  %v3361_v38 = vmul.f32 %v5453_v39, %v3285_v56  ;;  %v3286_v9 = vadd.f32 %v3202_v32, %v2855_v45  ;;  %v2856_v53 = vadd.f32 %v2775_v57, %v6007_v55 }
 0x297   : > { %v3208_v7 = vpop.f32.mrf.mxu0  ;;  %v3436_v23 = vadd.f32 %v5463_v49, %v3360_v11  ;;  %v2777_v62 = vpop.f32.mrf.mxu1 }
 0x298   : > { %3564 = vst [vmem:[%s5472_s15 + $0x180] sm:$0xff] %v3499_v34  ;;  %v3437_v25 = vadd.f32 %v5455_v12, %v3361_v38  ;;  %v3362_v2 = vmul.f32 %v5458_v15, %v3286_v9  ;;  %v3287_v40 = vadd.f32 %v3206_v6, %v2856_v53  ;;  %v2857_v10 = vadd.f32 %v2777_v62, %v6008_v43 }
 0x299   : > { %v3210_v24 = vpop.f32.mrf.mxu0  ;;  %v3500_v29 = vmax.f32 %v3436_v23, 0.0  ;;  %v2779_v28 = vpop.f32.mrf.mxu1 }
 0x29a   : > { %v3501_v27 = vmax.f32 %v3437_v25, 0.0  ;;  %v3438_v33 = vadd.f32 %v5463_v49, %v3362_v2  ;;  %v3363_v36 = vmul.f32 %v5453_v39, %v3287_v40  ;;  %v3288_v4 = vadd.f32 %v3208_v7, %v2857_v10  ;;  %v6012_v7 = vld [vmem:[#allocation13_spill] sm:$0xff]  ;;  %v6013_v10 = vld [vmem:[#allocation14_spill] sm:$0xff] }
 0x29b   : > { %v3212_v13 = vpop.f32.mrf.mxu0  ;;  %3565 = vst.msk [vmem:[%s5472_s15 + $0x188] sm:$0xff] %vm3516_vm1, %v3500_v29  ;;  %v2858_v30 = vadd.f32 %v2779_v28, %v6009_v35  ;;  %v2781_v52 = vpop.f32.mrf.mxu1 }
 0x29c   : > { %3566 = vst [vmem:[%s5472_s15 + $0x190] sm:$0xff] %v3501_v27  ;;  %v3502_v5 = vmax.f32 %v3438_v33, 0.0  ;;  %v3439_v8 = vadd.f32 %v5455_v12, %v3363_v36  ;;  %v3364_v41 = vmul.f32 %v5458_v15, %v3288_v4  ;;  %v2859_v60 = vadd.f32 %v2781_v52, %v6010_v58  ;;  %v6015_v58 = vld [vmem:[#allocation25_spill] sm:$0xff] }
 0x29d   : > { %v3216_v61 = vpop.f32.mrf.mxu0  ;;  %v3289_v50 = vadd.f32 %v3210_v24, %v2858_v30  ;;  %v2785_v59 = vpop.f32.mrf.mxu1 }
 0x29e   : > { %3567 = vst.msk [vmem:[%s5472_s15 + $0x198] sm:$0xff] %vm3516_vm1, %v3502_v5  ;;  %v3503_v3 = vmax.f32 %v3439_v8, 0.0  ;;  %v3440_v37 = vadd.f32 %v5463_v49, %v3364_v41  ;;  %v3290_v46 = vadd.f32 %v3212_v13, %v2859_v60  ;;  %v2860_v26 = vadd.f32 %v2785_v59, %v5423_v22  ;;  %v6014_v13 = vld [vmem:[#allocation15_spill] sm:$0xff] }
 0x29f   : > { %v3218_v54 = vpop.f32.mrf.mxu0  ;;  %v3365_v17 = vmul.f32 %v5453_v39, %v3289_v50  ;;  %v2787_v18 = vpop.f32.mrf.mxu1 }
 0x2a0   : > { %3568 = vst [vmem:[%s5472_s15 + $0x1a0] sm:$0xff] %v3503_v3  ;;  %v3504_v42 = vmax.f32 %v3440_v37, 0.0  ;;  %v3366_v51 = vmul.f32 %v5458_v15, %v3290_v46  ;;  %v3291_v20 = vadd.f32 %v3216_v61, %v2860_v26  ;;  %v2861_v1 = vadd.f32 %v2787_v18, %v6011_v0  ;;  %v3613_v0 = vld [vmem:[%s5472_s15 + $0x28] sm:$0xff] (%p4491_p5) }
 0x2a1   : > { %v3220_v48 = vpop.f32.mrf.mxu0  ;;  %v3441_v19 = vadd.f32 %v5455_v12, %v3365_v17  ;;  %v2789_v32 = vpop.f32.mrf.mxu1  ;;  %3614 = vst [vmem:[%s5762_s23 + $0x48] sm:$0xff] (%p4491_p5), %v3613_v0 }
 0x2a2   : > { %3569 = vst.msk [vmem:[%s5472_s15 + $0x1a8] sm:$0xff] %vm3516_vm1, %v3504_v42  ;;  %v3442_v22 = vadd.f32 %v5463_v49, %v3366_v51  ;;  %v3367_v31 = vmul.f32 %v5453_v39, %v3291_v20  ;;  %v3292_v44 = vadd.f32 %v3218_v54, %v2861_v1  ;;  %v2862_v14 = vadd.f32 %v2789_v32, %v5429_v47  ;;  %v3611_v20 = vld [vmem:[%s5472_s15 + $0x20] sm:$0xff] (%p4491_p5)  ;;  %v3615_v1 = vld [vmem:[%s5472_s15 + $0x30] sm:$0xff] (%p4491_p5)  ;;  %v3621_v32 = vld [vmem:[%s5472_s15 + $0x48] sm:$0xff] (%p4491_p5) }
 0x2a3   : > { %v3222_v16 = vpop.f32.mrf.mxu0  ;;  %v3505_v56 = vmax.f32 %v3441_v19, 0.0  ;;  %v2791_v21 = vpop.f32.mrf.mxu1  ;;  %3612 = vst [vmem:[%s5762_s23 + $0x40] sm:$0xff] (%p4491_p5), %v3611_v20  ;;  %v3619_v19 = vld [vmem:[%s5472_s15 + $0x40] sm:$0xff] (%p4491_p5)  ;;  %3616 = vst [vmem:[%s5762_s23 + $0x50] sm:$0xff] (%p4491_p5), %v3615_v1 }
 0x2a4   : > { %v3506_v45 = vmax.f32 %v3442_v22, 0.0  ;;  %v3443_v6 = vadd.f32 %v5455_v12, %v3367_v31  ;;  %v3368_v11 = vmul.f32 %v5458_v15, %v3292_v44  ;;  %v3293_v57 = vadd.f32 %v3220_v48, %v2862_v14  ;;  %v3617_v48 = vld [vmem:[%s5472_s15 + $0x38] sm:$0xff] (%p4491_p5)  ;;  %3620 = vst [vmem:[%s5762_s23 + $0x80] sm:$0xff] (%p4491_p5), %v3619_v19  ;;  %v3623_v22 = vld [vmem:[%s5472_s15 + $0x50] sm:$0xff] (%p4491_p5)  ;;  %3622 = vst [vmem:[%s5762_s23 + $0x88] sm:$0xff] (%p4491_p5), %v3621_v32 }
 0x2a5   : > { %v3226_v34 = vpop.f32.mrf.mxu0  ;;  %3570 = vst [vmem:[%s5472_s15 + $0x1b0] sm:$0xff] %v3505_v56  ;;  %v2863_v38 = vadd.f32 %v2791_v21, %v5432_v63  ;;  %v2795_v9 = vpop.f32.mrf.mxu1  ;;  %3618 = vst [vmem:[%s5762_s23 + $0x58] sm:$0xff] (%p4491_p5), %v3617_v48  ;;  %v3625_v31 = vld [vmem:[%s5472_s15 + $0x58] sm:$0xff] (%p4491_p5)  ;;  %v3627_v44 = vld [vmem:[%s5472_s15 + $0x60] sm:$0xff] (%p4491_p5) }
 0x2a6   : > { %3571 = vst.msk [vmem:[%s5472_s15 + $0x1b8] sm:$0xff] %vm3516_vm1, %v3506_v45  ;;  %v3507_v55 = vmax.f32 %v3443_v6, 0.0  ;;  %v3444_v47 = vadd.f32 %v5463_v49, %v3368_v11  ;;  %v3369_v53 = vmul.f32 %v5453_v39, %v3293_v57  ;;  %v2864_v23 = vadd.f32 %v2795_v9, %v6012_v7  ;;  %3624 = vst [vmem:[%s5762_s23 + $0x90] sm:$0xff] (%p4491_p5), %v3623_v22  ;;  %v3629_v14 = vld [vmem:[%s5472_s15 + $0x68] sm:$0xff] (%p4491_p5)  ;;  %v3633_v56 = vld [vmem:[%s5472_s15 + $0x78] sm:$0xff] (%p4491_p5) }
 0x2a7   : > { %v3228_v62 = vpop.f32.mrf.mxu0  ;;  %v3294_v25 = vadd.f32 %v3222_v16, %v2863_v38  ;;  %v2797_v2 = vpop.f32.mrf.mxu1  ;;  %3626 = vst [vmem:[%s5762_s23 + $0x98] sm:$0xff] (%p4491_p5), %v3625_v31  ;;  %v3631_v16 = vld [vmem:[%s5472_s15 + $0x70] sm:$0xff] (%p4491_p5)  ;;  %3628 = vst [vmem:[%s5762_s23 + $0xc0] sm:$0xff] (%p4491_p5), %v3627_v44  ;;  %v3635_v21 = vld [vmem:[%s5472_s15 + $0x80] sm:$0xff] (%p4491_p5) }
 0x2a8   : > { %3572 = vst [vmem:[%s5472_s15 + $0x1c0] sm:$0xff] %v3507_v55  ;;  %v3508_v40 = vmax.f32 %v3444_v47, 0.0  ;;  %v3445_v43 = vadd.f32 %v5455_v12, %v3369_v53  ;;  %v3295_v63 = vadd.f32 %v3226_v34, %v2864_v23  ;;  %v2865_v24 = vadd.f32 %v2797_v2, %v6013_v10  ;;  %3630 = vst [vmem:[%s5762_s23 + $0xc8] sm:$0xff] (%p4491_p5), %v3629_v14  ;;  %v3637_v45 = vld [vmem:[%s5472_s15 + $0x88] sm:$0xff] (%p4491_p5)  ;;  %v3639_v6 = vld [vmem:[%s5472_s15 + $0x90] sm:$0xff] (%p4491_p5) }
 0x2a9   : > { %v3370_v29 = vmul.f32 %v5458_v15, %v3294_v25  ;;  %v2799_v28 = vpop.f32.mrf.mxu1  ;;  %v3230_v27 = vpop.f32.mrf.mxu0  ;;  %3632 = vst [vmem:[%s5762_s23 + $0xd0] sm:$0xff] (%p4491_p5), %v3631_v16  ;;  %3634 = vst [vmem:[%s5762_s23 + $0xd8] sm:$0xff] (%p4491_p5), %v3633_v56  ;;  %v3641_v11 = vld [vmem:[%s5472_s15 + $0x98] sm:$0xff] (%p4491_p5)  ;;  %v3643_v57 = vld [vmem:[%s5472_s15 + $0xa0] sm:$0xff] (%p4491_p5) }
 0x2aa   : > { %3573 = vst.msk [vmem:[%s5472_s15 + $0x1c8] sm:$0xff] %vm3516_vm1, %v3508_v40  ;;  %v3509_v33 = vmax.f32 %v3445_v43, 0.0  ;;  %v3371_v36 = vmul.f32 %v5453_v39, %v3295_v63  ;;  %v3296_v4 = vadd.f32 %v3228_v62, %v2865_v24  ;;  %v2866_v35 = vadd.f32 %v2799_v28, %v6014_v13  ;;  %3636 = vst [vmem:[%s5762_s23 + $0x100] sm:$0xff] (%p4491_p5), %v3635_v21  ;;  %v3645_v34 = vld [vmem:[%s5472_s15 + $0xa8] sm:$0xff] (%p4491_p5)  ;;  %v3647_v38 = vld [vmem:[%s5472_s15 + $0xb0] sm:$0xff] (%p4491_p5) }
 0x2ab   : > { %v3446_v30 = vadd.f32 %v5463_v49, %v3370_v29  ;;  %v2801_v52 = vpop.f32.mrf.mxu1  ;;  %v3232_v50 = vpop.f32.mrf.mxu0  ;;  %3638 = vst [vmem:[%s5762_s23 + $0x108] sm:$0xff] (%p4491_p5), %v3637_v45  ;;  %3640 = vst [vmem:[%s5762_s23 + $0x110] sm:$0xff] (%p4491_p5), %v3639_v6  ;;  %v3649_v9 = vld [vmem:[%s5472_s15 + $0xb8] sm:$0xff] (%p4491_p5)  ;;  %v3651_v55 = vld [vmem:[%s5472_s15 + $0xc0] sm:$0xff] (%p4491_p5) }
 0x2ac   : > { %3574 = vst [vmem:[%s5472_s15 + $0x1d0] sm:$0xff] %v3509_v33  ;;  %v3447_v5 = vadd.f32 %v5455_v12, %v3371_v36  ;;  %v3372_v8 = vmul.f32 %v5458_v15, %v3296_v4  ;;  %v3297_v41 = vadd.f32 %v3230_v27, %v2866_v35  ;;  %v2867_v60 = vadd.f32 %v2801_v52, %v6015_v58  ;;  %v3653_v47 = vld [vmem:[%s5472_s15 + $0xc8] sm:$0xff] (%p4491_p5)  ;;  %v3655_v53 = vld [vmem:[%s5472_s15 + $0xd0] sm:$0xff] (%p4491_p5)  ;;  %v3657_v7 = vld [vmem:[%s5472_s15 + $0xd8] sm:$0xff] (%p4491_p5) }
 0x2ad   : > { %v3510_v61 = vmax.f32 %v3446_v30, 0.0  ;;  %3642 = vst [vmem:[%s5762_s23 + $0x118] sm:$0xff] (%p4491_p5), %v3641_v11  ;;  %3644 = vst [vmem:[%s5762_s23 + $0x140] sm:$0xff] (%p4491_p5), %v3643_v57  ;;  %v3659_v23 = vld [vmem:[%s5472_s15 + $0xe0] sm:$0xff] (%p4491_p5)  ;;  %v3661_v62 = vld [vmem:[%s5472_s15 + $0xe8] sm:$0xff] (%p4491_p5) }
 0x2ae   : > { %v3511_v59 = vmax.f32 %v3447_v5, 0.0  ;;  %v3448_v3 = vadd.f32 %v5463_v49, %v3372_v8  ;;  %v3373_v37 = vmul.f32 %v5453_v39, %v3297_v41  ;;  %v3298_v46 = vadd.f32 %v3232_v50, %v2867_v60  ;;  %v3605_v39 = vld [vmem:[%s5472_s15 + $0x8] sm:$0xff] (%p4491_p5)  ;;  %3646 = vst [vmem:[%s5762_s23 + $0x148] sm:$0xff] (%p4491_p5), %v3645_v34  ;;  %3648 = vst [vmem:[%s5762_s23 + $0x150] sm:$0xff] (%p4491_p5), %v3647_v38  ;;  %v3663_v25 = vld [vmem:[%s5472_s15 + $0xf0] sm:$0xff] (%p4491_p5) }
 0x2af   : > { %3575 = vst.msk [vmem:[%s5472_s15 + $0x1d8] sm:$0xff] %vm3516_vm1, %v3510_v61  ;;  %3606 = vst [vmem:[%s5762_s23 + $0x8] sm:$0xff] (%p4491_p5), %v3605_v39  ;;  %v3665_v2 = vld [vmem:[%s5472_s15 + $0xf8] sm:$0xff] (%p4491_p5)  ;;  %v3667_v40 = vld [vmem:[%s5472_s15 + $0x100] sm:$0xff] (%p4491_p5) }
 0x2b0   : > { %3576 = vst [vmem:[%s5472_s15 + $0x1e0] sm:$0xff] %v3511_v59  ;;  %v3512_v26 = vmax.f32 %v3448_v3, 0.0  ;;  %v3449_v54 = vadd.f32 %v5455_v12, %v3373_v37  ;;  %v3374_v17 = vmul.f32 %v5458_v15, %v3298_v46  ;;  %v3607_v12 = vld [vmem:[%s5472_s15 + $0x10] sm:$0xff] (%p4491_p5)  ;;  %v3609_v15 = vld [vmem:[%s5472_s15 + $0x18] sm:$0xff] (%p4491_p5)  ;;  %3650 = vst [vmem:[%s5762_s23 + $0x158] sm:$0xff] (%p4491_p5), %v3649_v9 }
 0x2b1   : > { %3608 = vst [vmem:[%s5762_s23 + $0x10] sm:$0xff] (%p4491_p5), %v3607_v12  ;;  %3610 = vst [vmem:[%s5762_s23 + $0x18] sm:$0xff] (%p4491_p5), %v3609_v15  ;;  %v3669_v43 = vld [vmem:[%s5472_s15 + $0x108] sm:$0xff] (%p4491_p5)  ;;  %v3671_v63 = vld [vmem:[%s5472_s15 + $0x110] sm:$0xff] (%p4491_p5) }
 0x2b2   : > { %3577 = vst.msk [vmem:[%s5472_s15 + $0x1e8] sm:$0xff] %vm3516_vm1, %v3512_v26  ;;  %v3513_v18 = vmax.f32 %v3449_v54, 0.0  ;;  %v3450_v42 = vadd.f32 %v5463_v49, %v3374_v17  ;;  %3586 = sbr.rel (!%p4491_p5) target bundleno = 712 (0x2c8), region = 81  ;;  %v3603_v49 = vld [vmem:[%s5472_s15] sm:$0xff] (%p4491_p5)  ;;  %3652 = vst [vmem:[%s5762_s23 + $0x180] sm:$0xff] (%p4491_p5), %v3651_v55  ;;  %v3673_v10 = vld [vmem:[%s5472_s15 + $0x118] sm:$0xff] (%p4491_p5) }
 0x2b3   : > { %3604 = vst [vmem:[%s5762_s23] sm:$0xff] (%p4491_p5), %v3603_v49  ;;  %3654 = vst [vmem:[%s5762_s23 + $0x188] sm:$0xff] (%p4491_p5), %v3653_v47  ;;  %v3675_v24 = vld [vmem:[%s5472_s15 + $0x120] sm:$0xff] (%p4491_p5)  ;;  %v3677_v29 = vld [vmem:[%s5472_s15 + $0x128] sm:$0xff] (%p4491_p5) }
 0x2b4   : > { %3578 = vst [vmem:[%s5472_s15 + $0x1f0] sm:$0xff] %v3513_v18  ;;  %v3514_v51 = vmax.f32 %v3450_v42, 0.0  ;;  %3656 = vst [vmem:[%s5762_s23 + $0x190] sm:$0xff] (%p4491_p5), %v3655_v53  ;;  %v3679_v28 = vld [vmem:[%s5472_s15 + $0x130] sm:$0xff] (%p4491_p5)  ;;  %v3681_v27 = vld [vmem:[%s5472_s15 + $0x138] sm:$0xff] (%p4491_p5) }
 0x2b5   : > { %3658 = vst [vmem:[%s5762_s23 + $0x198] sm:$0xff] (%p4491_p5), %v3657_v7  ;;  %3660 = vst [vmem:[%s5762_s23 + $0x1c0] sm:$0xff] (%p4491_p5), %v3659_v23  ;;  %v3683_v33 = vld [vmem:[%s5472_s15 + $0x140] sm:$0xff] (%p4491_p5)  ;;  %v3685_v36 = vld [vmem:[%s5472_s15 + $0x148] sm:$0xff] (%p4491_p5) }
 0x2b6   : > { %3579 = vst.msk [vmem:[%s5472_s15 + $0x1f8] sm:$0xff] %vm3516_vm1, %v3514_v51  ;;  %3662 = vst [vmem:[%s5762_s23 + $0x1c8] sm:$0xff] (%p4491_p5), %v3661_v62  ;;  %v3687_v4 = vld [vmem:[%s5472_s15 + $0x150] sm:$0xff] (%p4491_p5)  ;;  %v3689_v13 = vld [vmem:[%s5472_s15 + $0x158] sm:$0xff] (%p4491_p5) }
 0x2b7   : > { %3664 = vst [vmem:[%s5762_s23 + $0x1d0] sm:$0xff] %v3663_v25  ;;  %3666 = vst [vmem:[%s5762_s23 + $0x1d8] sm:$0xff] %v3665_v2  ;;  %v3691_v35 = vld [vmem:[%s5472_s15 + $0x160] sm:$0xff]  ;;  %v3693_v30 = vld [vmem:[%s5472_s15 + $0x168] sm:$0xff] }
 0x2b8   : > { %3668 = vst [vmem:[%s5762_s23 + $0x200] sm:$0xff] %v3667_v40  ;;  %3670 = vst [vmem:[%s5762_s23 + $0x208] sm:$0xff] %v3669_v43  ;;  %v3695_v52 = vld [vmem:[%s5472_s15 + $0x170] sm:$0xff]  ;;  %v3697_v5 = vld [vmem:[%s5472_s15 + $0x178] sm:$0xff] }
 0x2b9   : > { %3672 = vst [vmem:[%s5762_s23 + $0x210] sm:$0xff] %v3671_v63  ;;  %3674 = vst [vmem:[%s5762_s23 + $0x218] sm:$0xff] %v3673_v10  ;;  %v3699_v8 = vld [vmem:[%s5472_s15 + $0x180] sm:$0xff]  ;;  %v3701_v41 = vld [vmem:[%s5472_s15 + $0x188] sm:$0xff] }
 0x2ba   : > { %3676 = vst [vmem:[%s5762_s23 + $0x240] sm:$0xff] %v3675_v24  ;;  %3678 = vst [vmem:[%s5762_s23 + $0x248] sm:$0xff] %v3677_v29  ;;  %v3703_v58 = vld [vmem:[%s5472_s15 + $0x190] sm:$0xff]  ;;  %v3705_v60 = vld [vmem:[%s5472_s15 + $0x198] sm:$0xff] }
 0x2bb   : > { %3680 = vst [vmem:[%s5762_s23 + $0x250] sm:$0xff] %v3679_v28  ;;  %3682 = vst [vmem:[%s5762_s23 + $0x258] sm:$0xff] %v3681_v27  ;;  %v3707_v61 = vld [vmem:[%s5472_s15 + $0x1a0] sm:$0xff]  ;;  %v3709_v50 = vld [vmem:[%s5472_s15 + $0x1a8] sm:$0xff] }
 0x2bc   : > { %3684 = vst [vmem:[%s5762_s23 + $0x280] sm:$0xff] %v3683_v33  ;;  %3686 = vst [vmem:[%s5762_s23 + $0x288] sm:$0xff] %v3685_v36  ;;  %v3711_v59 = vld [vmem:[%s5472_s15 + $0x1b0] sm:$0xff]  ;;  %v3713_v3 = vld [vmem:[%s5472_s15 + $0x1b8] sm:$0xff] }
 0x2bd   : > { %3688 = vst [vmem:[%s5762_s23 + $0x290] sm:$0xff] %v3687_v4  ;;  %3690 = vst [vmem:[%s5762_s23 + $0x298] sm:$0xff] %v3689_v13  ;;  %v3715_v37 = vld [vmem:[%s5472_s15 + $0x1c0] sm:$0xff]  ;;  %v3717_v46 = vld [vmem:[%s5472_s15 + $0x1c8] sm:$0xff] }
 0x2be   : > { %3692 = vst [vmem:[%s5762_s23 + $0x2c0] sm:$0xff] %v3691_v35  ;;  %3694 = vst [vmem:[%s5762_s23 + $0x2c8] sm:$0xff] %v3693_v30  ;;  %v3719_v26 = vld [vmem:[%s5472_s15 + $0x1d0] sm:$0xff]  ;;  %v3721_v54 = vld [vmem:[%s5472_s15 + $0x1d8] sm:$0xff] }
 0x2bf   : > { %3696 = vst [vmem:[%s5762_s23 + $0x2d0] sm:$0xff] %v3695_v52  ;;  %3698 = vst [vmem:[%s5762_s23 + $0x2d8] sm:$0xff] %v3697_v5  ;;  %v3723_v17 = vld [vmem:[%s5472_s15 + $0x1e0] sm:$0xff]  ;;  %v3725_v18 = vld [vmem:[%s5472_s15 + $0x1e8] sm:$0xff] }
 0x2c0   : > { %3700 = vst [vmem:[%s5762_s23 + $0x300] sm:$0xff] %v3699_v8  ;;  %3702 = vst [vmem:[%s5762_s23 + $0x308] sm:$0xff] %v3701_v41  ;;  %v3727_v42 = vld [vmem:[%s5472_s15 + $0x1f0] sm:$0xff]  ;;  %v3729_v51 = vld [vmem:[%s5472_s15 + $0x1f8] sm:$0xff] }
 0x2c1   : > { %3704 = vst [vmem:[%s5762_s23 + $0x310] sm:$0xff] %v3703_v58  ;;  %3706 = vst [vmem:[%s5762_s23 + $0x318] sm:$0xff] %v3705_v60 }
 0x2c2   : > { %3708 = vst [vmem:[%s5762_s23 + $0x340] sm:$0xff] %v3707_v61  ;;  %3710 = vst [vmem:[%s5762_s23 + $0x348] sm:$0xff] %v3709_v50 }
 0x2c3   : > { %3712 = vst [vmem:[%s5762_s23 + $0x350] sm:$0xff] %v3711_v59  ;;  %3714 = vst [vmem:[%s5762_s23 + $0x358] sm:$0xff] %v3713_v3 }
 0x2c4   : > { %3716 = vst [vmem:[%s5762_s23 + $0x380] sm:$0xff] %v3715_v37  ;;  %3718 = vst [vmem:[%s5762_s23 + $0x388] sm:$0xff] %v3717_v46 }
 0x2c5   : > { %3720 = vst [vmem:[%s5762_s23 + $0x390] sm:$0xff] %v3719_v26  ;;  %3722 = vst [vmem:[%s5762_s23 + $0x398] sm:$0xff] %v3721_v54 }
 0x2c6   : > { %3724 = vst [vmem:[%s5762_s23 + $0x3c0] sm:$0xff] %v3723_v17  ;;  %3726 = vst [vmem:[%s5762_s23 + $0x3c8] sm:$0xff] %v3725_v18 }
 0x2c7   : > { %3728 = vst [vmem:[%s5762_s23 + $0x3d0] sm:$0xff] %v3727_v42  ;;  %3730 = vst [vmem:[%s5762_s23 + $0x3d8] sm:$0xff] %v3729_v51 }
 0x2c8 PF: > { %p11_p10 = scmp.ge.s32.totalorder %s4478_s19, 4   ;;  %s6016_s15 = smov %s4429_s16 }
 0x2c9   : > { %s6017_s16 = smov %s4489_s22  ;;  %s6018_s17 = smov %s4478_s19 }
 0x2ca   :  { %13 = sbr.rel (!%p11_p10) target bundleno = 2 (0x2), region = 147 }

// kernel: inception_c_forward.15
= control target key start
LH: loop header
LB: loop body
LE: loop exit
PB: predicated region body
PF: predicated region fallthrough
CT: control target
= control target key end

     0   :  { %s1967_s12 = smov 0   ;;  %s2867_s0 = inlined_call_operand.vmem [shape: f32[2,18,18,192], index: 0, kind: input, shape index: {}]   ;;  %s2868_s1 = inlined_call_operand.vmem [shape: f32[1,192], index: 1, kind: input, shape index: {}]   ;;  %s2869_s2 = inlined_call_operand.vmem [shape: f32[1,192], index: 2, kind: input, shape index: {}]   ;;  %s2870_s3 = inlined_call_operand.vmem [shape: f32[2,16,16,192], index: 3, kind: output, shape index: {}]  }
   0x1 LB: > { %s1727_s13 = sadd.s32 4294967295, %s1945_s12   ;;  %p1731_p0 = scmp.ge.s32.totalorder %s1945_s12, 1  ;;  %s1945_s12 = sphi %s1967_s12, %s13_s12  }
   0x2   : > { %p137_p1 = scmp.lt.s32.totalorder %s1945_s12, 3 }
   0x4   : > { %p138_p2 = pnand %p1731_p0, %p137_p1 }
   0x5   : > { %p161_p3 = scmp.lt.s32.totalorder (!%p138_p2), %s1727_s13, 1 }
   0x6   : > { %141 = sbr.rel (%p138_p2) target bundleno = 253 (0xfd), region = 32 }
   0xb   : > { %v1393_v0 = vlaneseq  ;;  %s2872_s13 = smov (!%p161_p3, %s1727_s13), 1  ;;  %v1391_v3 = vld [vmem:[%s2868_s1] sm:$0x3]  ;;  %vm749_vm0 = vcmask 1046528   ;;  %vm1038_vm1 = vcmask 1045504   ;;  %vm1608_vm2 = vcmask 523264  }
   0xc   : > { %s1930_s14 = smul.u32 864, %s2872_s13  ;;  %v1467_v5 = vld [vmem:[%s2869_s2] sm:$0x3]  ;;  %s1929_s22 = sshll.u32 %s2872_s13, 9 }
   0xd   : > { %v1394_v1 = vshrl.u32 %v1393_v0, 7  ;;  %s2078_s25 = scalar_lea.vmem %s2870_s3, %s1929_s22 }
   0xe   : > { %s1984_s19 = scalar_lea.vmem %s2867_s0, %s1930_s14 }
   0xf   : > { %v1395_v2 = vsub.s32 0, %v1394_v1  ;;  %v1399_v4 = vsub.s32 1, %v1394_v1  ;;  %v171_v6 = vld [vmem:[%s1984_s19] sm:$0xff]  ;;  %v173_v7 = vld [vmem:[%s1984_s19 + $0x10] sm:$0xff]  ;;  %v172_v18 = vld [vmem:[%s1984_s19 + $0x8] sm:$0xff] }
  0x10   : > { %v1735_v8 = vld [vmem:[%s1984_s19 + $0x30] sm:$0xff]  ;;  %v1737_v9 = vld [vmem:[%s1984_s19 + $0x40] sm:$0xff]  ;;  %v174_v19 = vld [vmem:[%s1984_s19 + $0x18] sm:$0xff] }
  0x11   : > { %v364_v10 = vadd.f32 %v1735_v8, %v171_v6  ;;  %v1994_v11 = vld [vmem:[%s1984_s19 + $0x60] sm:$0xff]  ;;  %v1997_v12 = vld [vmem:[%s1984_s19 + $0x70] sm:$0xff]  ;;  %v1999_v13 = vrot.slane %v1391_v3, %v1395_v2  ;;  %v366_v14 = vadd.f32 %v1737_v9, %v173_v7  ;;  %v2001_v15 = vrot.slane %v1391_v3, %v1399_v4  ;;  %v1736_v20 = vld [vmem:[%s1984_s19 + $0x38] sm:$0xff] }
  0x12   : > { %v2003_v16 = vrot.slane %v1467_v5, %v1395_v2  ;;  %v2005_v17 = vrot.slane %v1467_v5, %v1399_v4  ;;  %v1738_v22 = vld [vmem:[%s1984_s19 + $0x48] sm:$0xff]  ;;  %v365_v23 = vadd.f32 %v1736_v20, %v172_v18  ;;  %v2016_v25 = vld [vmem:[%s1984_s19 + $0x78] sm:$0xff]  ;;  %v370_v26 = vadd.f32 %v1994_v11, %v1735_v8  ;;  %v175_v30 = vld [vmem:[%s1984_s19 + $0x20] sm:$0x3] }
  0x13   : > { %v557_v21 = vadd.f32 %v1994_v11, %v364_v10  ;;  %v2013_v24 = vld [vmem:[%s1984_s19 + $0x68] sm:$0xff]  ;;  %v372_v27 = vadd.f32 %v1997_v12, %v1737_v9  ;;  %v559_v28 = vadd.f32 %v1997_v12, %v366_v14  ;;  %v367_v29 = vadd.f32 %v1738_v22, %v174_v19  ;;  %v1739_v31 = vld [vmem:[%s1984_s19 + $0x50] sm:$0x3]  ;;  %v1835_v32 = vld [vmem:[%s1984_s19 + $0x80] sm:$0x3] }
  0x14   : > { %v371_v33 = vadd.f32 %v2013_v24, %v1736_v20  ;;  %v373_v34 = vadd.f32 %v2016_v25, %v1738_v22  ;;  %v558_v37 = vadd.f32 %v2013_v24, %v365_v23  ;;  %v368_v38 = vadd.f32 %v1739_v31, %v175_v30  ;;  %v176_v39 = vld [vmem:[%s1984_s19 + $0x28] sm:$0x3]  ;;  %v1740_v40 = vld [vmem:[%s1984_s19 + $0x58] sm:$0x3]  ;;  %v2032_v46 = vld [vmem:[%s1984_s19 + $0x90] sm:$0xff] }
  0x15   : > { %v750_v35 = vrot.slane %v557_v21, 1  ;;  %v1039_v36 = vrot.slane %v557_v21, 2  ;;  %v751_v41 = vrot.slane %v559_v28, 1  ;;  %v1040_v42 = vrot.slane %v559_v28, 2  ;;  %v1836_v45 = vld [vmem:[%s1984_s19 + $0x88] sm:$0x3] }
  0x16   : > { %v560_v43 = vadd.f32 %v2016_v25, %v367_v29  ;;  %v369_v44 = vadd.f32 %v1740_v40, %v176_v39  ;;  %v753_v47 = vrot.slane %v558_v37, 1  ;;  %v1042_v48 = vrot.slane %v558_v37, 2  ;;  %v2038_v59 = vld [vmem:[%s1984_s19 + $0xa0] sm:$0xff]  ;;  %v2060_v29 = vld [vmem:[%s1984_s19 + $0xa8] sm:$0xff] }
  0x17   : > { %v561_v49 = vadd.f32 %v1835_v32, %v368_v38  ;;  %v563_v50 = vadd.f32 %v2032_v46, %v370_v26  ;;  %v752_v51 = vsel %vm749_vm0, %v750_v35, %v751_v41  ;;  %v1041_v52 = vsel %vm1038_vm1, %v1039_v36, %v1040_v42  ;;  %v181_v36 = vld [vmem:[%s1984_s19 + $0x50] sm:$0x3] }
  0x18   : > { %v754_v53 = vrot.slane %v560_v43, 1  ;;  %v1043_v54 = vrot.slane %v560_v43, 2  ;;  %v974_v55 = vadd.f32 %v752_v51, %v557_v21  ;;  %v562_v58 = vadd.f32 %v1836_v45, %v369_v44 }
  0x19   : > { %v756_v56 = vrot.slane %v561_v49, 1  ;;  %v1045_v57 = vrot.slane %v561_v49, 2  ;;  %v2043_v62 = vadd.f32 %v2038_v59, %v372_v27  ;;  %v760_v63 = vrot.slane %v563_v50, 1 }
  0x1a   : > { %v755_v60 = vsel %vm749_vm0, %v753_v47, %v754_v53  ;;  %v1044_v61 = vsel %vm1038_vm1, %v1042_v48, %v1043_v54  ;;  %v1263_v0 = vadd.f32 %v1041_v52, %v974_v55  ;;  %v758_v5 = vrot.slane %v562_v58, 1  ;;  %v1746_v47 = vld [vmem:[%s1984_s19 + $0x88] sm:$0x3] }
  0x1b   : > { %v975_v1 = vadd.f32 %v755_v60, %v558_v37  ;;  %v757_v2 = vsel %vm749_vm0, %v751_v41, %v756_v56  ;;  %v1046_v3 = vsel %vm1038_vm1, %v1040_v42, %v1045_v57  ;;  %v1047_v6 = vrot.slane %v562_v58, 2  ;;  %v1745_v41 = vld [vmem:[%s1984_s19 + $0x80] sm:$0x3]  ;;  %v1841_v42 = vld [vmem:[%s1984_s19 + $0xb0] sm:$0x3] }
  0x1c   : > { %v976_v4 = vadd.f32 %v757_v2, %v559_v28  ;;  %v761_v7 = vrot.slane %v2043_v62, 1  ;;  %v1327_v8 = vmul.f32 0.11111111, %v1263_v0  ;;  %v1049_v10 = vrot.slane %v563_v50, 2  ;;  %v2057_v28 = vld [vmem:[%s1984_s19 + $0x98] sm:$0xff] }
  0x1d   : > { %v1264_v9 = vadd.f32 %v1044_v61, %v975_v1  ;;  %v1050_v14 = vrot.slane %v2043_v62, 2  ;;  %v759_v19 = vsel %vm749_vm0, %v754_v53, %v758_v5  ;;  %v1048_v20 = vsel %vm1038_vm1, %v1043_v54, %v1047_v6  ;;  %v1842_v61 = vld [vmem:[%s1984_s19 + $0xb8] sm:$0x3] }
  0x1e   : > { %v1265_v18 = vadd.f32 %v1046_v3, %v976_v4  ;;  %v762_v21 = vsel %vm749_vm0, %v760_v63, %v761_v7  ;;  %v1403_v22 = vmul.f32 %v1999_v13, %v1327_v8  ;;  %v977_v26 = vadd.f32 %v759_v19, %v560_v43  ;;  %v182_v43 = vld [vmem:[%s1984_s19 + $0x58] sm:$0x3]  ;;  %v2102_v19 = vld [vmem:[%s1984_s19 + $0xc0] sm:$0xff] }
  0x1f   : > { %v1328_v23 = vmul.f32 0.11111111, %v1264_v9  ;;  %v978_v27 = vadd.f32 %v762_v21, %v563_v50  ;;  %v1051_v31 = vsel %vm1038_vm1, %v1049_v10, %v1050_v14  ;;  %v564_v32 = vadd.f32 %v2057_v28, %v371_v33 }
  0x20   : > { %v1329_v30 = vmul.f32 0.11111111, %v1265_v18  ;;  %v2067_v35 = vadd.f32 %v2060_v29, %v373_v34  ;;  %v1479_v37 = vadd.f32 %v2003_v16, %v1403_v22  ;;  %v1266_v39 = vadd.f32 %v1048_v20, %v977_v26 }
  0x21   : > { %v1404_v38 = vmul.f32 %v2001_v15, %v1328_v23  ;;  %v1267_v40 = vadd.f32 %v1051_v31, %v978_v27  ;;  %v763_v34 = vrot.slane %v564_v32, 1  ;;  %v1052_v45 = vrot.slane %v564_v32, 2 }
  0x22   : > { %v1405_v33 = vmul.f32 %v1999_v13, %v1329_v30  ;;  %v764_v44 = vrot.slane %v2067_v35, 1  ;;  %v1543_v48 = vmax.f32 %v1479_v37, 0.0  ;;  %v1330_v50 = vmul.f32 0.11111111, %v1266_v39 }
  0x23   : > { %v1480_v49 = vadd.f32 %v2005_v17, %v1404_v38  ;;  %v1331_v51 = vmul.f32 0.11111111, %v1267_v40  ;;  %v1053_v54 = vrot.slane %v2067_v35, 2  ;;  %v374_v55 = vadd.f32 %v1745_v41, %v181_v36  ;;  %v1751_v38 = vld [vmem:[%s1984_s19 + $0xb0] sm:$0x3] }
  0x24   : > { %v1481_v52 = vadd.f32 %v2003_v16, %v1405_v33  ;;  %v765_v53 = vsel %vm749_vm0, %v763_v34, %v764_v44  ;;  %1607 = vst [vmem:[%s2078_s25] sm:$0xff] %v1543_v48  ;;  %v1406_v57 = vmul.f32 %v2001_v15, %v1330_v50  ;;  %v375_v2 = vadd.f32 %v1746_v47, %v182_v43  ;;  %v2129_v34 = vld [vmem:[%s1984_s19 + $0xc8] sm:$0xff] }
  0x25   : > { %v1544_v56 = vmax.f32 %v1480_v49, 0.0  ;;  %v1407_v58 = vmul.f32 %v1999_v13, %v1331_v51  ;;  %v979_v60 = vadd.f32 %v765_v53, %v564_v32  ;;  %v1054_v0 = vsel %vm1038_vm1, %v1052_v45, %v1053_v54  ;;  %v1847_v49 = vld [vmem:[%s1984_s19 + $0xe0] sm:$0x3] }
  0x26   : > { %v1545_v63 = vmax.f32 %v1481_v52, 0.0  ;;  %v567_v1 = vadd.f32 %v1841_v42, %v374_v55  ;;  %v1482_v3 = vadd.f32 %v2005_v17, %v1406_v57  ;;  %v376_v6 = vadd.f32 %v2032_v46, %v1994_v11 }
  0x27   : > { %1609 = vst.msk [vmem:[%s2078_s25 + $0x8] sm:$0xff] %vm1608_vm2, %v1544_v56  ;;  %v1483_v4 = vadd.f32 %v2003_v16, %v1407_v58  ;;  %v1268_v5 = vadd.f32 %v1054_v0, %v979_v60  ;;  %v568_v10 = vadd.f32 %v1842_v61, %v375_v2  ;;  %v378_v18 = vadd.f32 %v2038_v59, %v1997_v12  ;;  %v2112_v12 = vld [vmem:[%s1984_s19 + $0xd0] sm:$0xff]  ;;  %v1848_v0 = vld [vmem:[%s1984_s19 + $0xe8] sm:$0x3] }
  0x28   : > { %1610 = vst [vmem:[%s2078_s25 + $0x10] sm:$0xff] %v1545_v63  ;;  %v766_v8 = vrot.slane %v567_v1, 1  ;;  %v1055_v9 = vrot.slane %v567_v1, 2  ;;  %v1546_v20 = vmax.f32 %v1482_v3, 0.0  ;;  %v569_v23 = vadd.f32 %v2102_v19, %v376_v6 }
  0x29   : > { %v1547_v21 = vmax.f32 %v1483_v4, 0.0  ;;  %v1332_v22 = vmul.f32 0.11111111, %v1268_v5  ;;  %v768_v27 = vrot.slane %v568_v10, 1  ;;  %v1057_v30 = vrot.slane %v568_v10, 2 }
  0x2a   : > { %v767_v11 = vsel %vm749_vm0, %v761_v7, %v766_v8  ;;  %v1056_v26 = vsel %vm1038_vm1, %v1050_v14, %v1055_v9  ;;  %1611 = vst.msk [vmem:[%s2078_s25 + $0x18] sm:$0xff] %vm1608_vm2, %v1546_v20  ;;  %v571_v36 = vadd.f32 %v2112_v12, %v378_v18  ;;  %v770_v37 = vrot.slane %v569_v23, 1  ;;  %v187_v7 = vld [vmem:[%s1984_s19 + $0x80] sm:$0x3] }
  0x2b   : > { %1612 = vst [vmem:[%s2078_s25 + $0x20] sm:$0xff] %v1547_v21  ;;  %v1408_v31 = vmul.f32 %v2001_v15, %v1332_v22  ;;  %v980_v32 = vadd.f32 %v767_v11, %v2043_v62  ;;  %v769_v14 = vsel %vm749_vm0, %v764_v44, %v768_v27  ;;  %v1058_v39 = vsel %vm1038_vm1, %v1053_v54, %v1057_v30  ;;  %v1752_v54 = vld [vmem:[%s1984_s19 + $0xb8] sm:$0x3] }
  0x2c   : > { %v1059_v40 = vrot.slane %v569_v23, 2  ;;  %v377_v41 = vadd.f32 %v2057_v28, %v2013_v24  ;;  %v981_v43 = vadd.f32 %v769_v14, %v2067_v35  ;;  %v771_v33 = vrot.slane %v571_v36, 1  ;;  %v188_v24 = vld [vmem:[%s1984_s19 + $0x88] sm:$0x3]  ;;  %v2138_v35 = vld [vmem:[%s1984_s19 + $0xd8] sm:$0xff] }
  0x2d   : > { %v1484_v42 = vadd.f32 %v2005_v17, %v1408_v31  ;;  %v1269_v62 = vadd.f32 %v1056_v26, %v980_v32  ;;  %v1060_v45 = vrot.slane %v571_v36, 2  ;;  %v379_v44 = vadd.f32 %v2060_v29, %v2016_v25 }
  0x2e   : > { %v570_v47 = vadd.f32 %v2129_v34, %v377_v41  ;;  %v380_v48 = vadd.f32 %v1751_v38, %v187_v7  ;;  %v1270_v52 = vadd.f32 %v1058_v39, %v981_v43  ;;  %v772_v53 = vsel %vm749_vm0, %v770_v37, %v771_v33 }
  0x2f   : > { %v1548_v50 = vmax.f32 %v1484_v42, 0.0  ;;  %v1333_v51 = vmul.f32 0.11111111, %v1269_v62  ;;  %v982_v55 = vadd.f32 %v772_v53, %v569_v23  ;;  %v1061_v56 = vsel %vm1038_vm1, %v1059_v40, %v1060_v45  ;;  %v2163_v42 = vld [vmem:[%s1984_s19 + $0xf0] sm:$0xff] }
  0x30   : > { %v572_v57 = vadd.f32 %v2138_v35, %v379_v44  ;;  %v773_v25 = vrot.slane %v570_v47, 1  ;;  %v1334_v60 = vmul.f32 0.11111111, %v1270_v52  ;;  %v1062_v61 = vrot.slane %v570_v47, 2  ;;  %v193_v44 = vld [vmem:[%s1984_s19 + $0xb0] sm:$0x3] }
  0x31   : > { %1613 = vst.msk [vmem:[%s2078_s25 + $0x28] sm:$0xff] %vm1608_vm2, %v1548_v50  ;;  %v1409_v58 = vmul.f32 %v1999_v13, %v1333_v51  ;;  %v573_v63 = vadd.f32 %v1847_v49, %v380_v48  ;;  %v1271_v1 = vadd.f32 %v1061_v56, %v982_v55  ;;  %v381_v4 = vadd.f32 %v1752_v54, %v188_v24  ;;  %v1757_v24 = vld [vmem:[%s1984_s19 + $0xe0] sm:$0x3] }
  0x32   : > { %v774_v2 = vrot.slane %v572_v57, 1  ;;  %v1063_v3 = vrot.slane %v572_v57, 2  ;;  %v1410_v6 = vmul.f32 %v2001_v15, %v1334_v60  ;;  %v382_v14 = vadd.f32 %v2102_v19, %v2032_v46  ;;  %v2187_v60 = vld [vmem:[%s1984_s19 + $0x108] sm:$0xff] }
  0x33   : > { %v1485_v5 = vadd.f32 %v2003_v16, %v1409_v58  ;;  %v776_v8 = vrot.slane %v573_v63, 1  ;;  %v1065_v9 = vrot.slane %v573_v63, 2  ;;  %v1335_v10 = vmul.f32 0.11111111, %v1271_v1 }
  0x34   : > { %v775_v18 = vsel %vm749_vm0, %v773_v25, %v774_v2  ;;  %v1064_v20 = vsel %vm1038_vm1, %v1062_v61, %v1063_v3  ;;  %v574_v21 = vadd.f32 %v1848_v0, %v381_v4  ;;  %v1486_v23 = vadd.f32 %v2005_v17, %v1410_v6  ;;  %v2183_v25 = vld [vmem:[%s1984_s19 + $0xf8] sm:$0xff] }
  0x35   : > { %v1549_v22 = vmax.f32 %v1485_v5, 0.0  ;;  %v983_v11 = vadd.f32 %v775_v18, %v570_v47  ;;  %v777_v26 = vsel %vm749_vm0, %v771_v33, %v776_v8  ;;  %v1411_v27 = vmul.f32 %v1999_v13, %v1335_v10  ;;  %v194_v4 = vld [vmem:[%s1984_s19 + $0xb8] sm:$0x3]  ;;  %v1758_v5 = vld [vmem:[%s1984_s19 + $0xe8] sm:$0x3] }
  0x36   : > { %v984_v30 = vadd.f32 %v777_v26, %v571_v36  ;;  %v1066_v31 = vsel %vm1038_vm1, %v1060_v45, %v1065_v9  ;;  %v778_v32 = vrot.slane %v574_v21, 1  ;;  %v1550_v37 = vmax.f32 %v1486_v23, 0.0  ;;  %v2169_v45 = vld [vmem:[%s1984_s19 + $0x100] sm:$0xff] }
  0x37   : > { %1614 = vst [vmem:[%s2078_s25 + $0x30] sm:$0xff] %v1549_v22  ;;  %v1272_v7 = vadd.f32 %v1064_v20, %v983_v11  ;;  %v1067_v38 = vrot.slane %v574_v21, 2  ;;  %v1487_v39 = vadd.f32 %v2003_v16, %v1411_v27  ;;  %v384_v36 = vadd.f32 %v2112_v12, %v2038_v59 }
  0x38   : > { %v1273_v40 = vadd.f32 %v1066_v31, %v984_v30  ;;  %v779_v41 = vsel %vm749_vm0, %v774_v2, %v778_v32  ;;  %1615 = vst.msk [vmem:[%s2078_s25 + $0x38] sm:$0xff] %vm1608_vm2, %v1550_v37  ;;  %v575_v46 = vadd.f32 %v2163_v42, %v382_v14  ;;  %v383_v49 = vadd.f32 %v2129_v34, %v2057_v28  ;;  %v1854_v30 = vld [vmem:[%s1984_s19 + $0x118] sm:$0x3] }
  0x39   : > { %v1336_v62 = vmul.f32 0.11111111, %v1272_v7  ;;  %v985_v43 = vadd.f32 %v779_v41, %v572_v57  ;;  %v1068_v33 = vsel %vm1038_vm1, %v1063_v3, %v1067_v38  ;;  %v1551_v47 = vmax.f32 %v1487_v39, 0.0  ;;  %v2210_v41 = vld [vmem:[%s1984_s19 + $0x120] sm:$0xff] }
  0x3a   : > { %v1337_v48 = vmul.f32 0.11111111, %v1273_v40  ;;  %v577_v59 = vadd.f32 %v2169_v45, %v384_v36  ;;  %v780_v52 = vrot.slane %v575_v46, 1  ;;  %v1069_v53 = vrot.slane %v575_v46, 2  ;;  %v2213_v36 = vld [vmem:[%s1984_s19 + $0x130] sm:$0xff] }
  0x3b   : > { %v1412_v50 = vmul.f32 %v2001_v15, %v1336_v62  ;;  %v1274_v51 = vadd.f32 %v1068_v33, %v985_v43  ;;  %1616 = vst [vmem:[%s2078_s25 + $0x40] sm:$0xff] %v1551_v47  ;;  %v385_v57 = vadd.f32 %v2138_v35, %v2060_v29  ;;  %v576_v61 = vadd.f32 %v2183_v25, %v383_v49  ;;  %v1853_v29 = vld [vmem:[%s1984_s19 + $0x110] sm:$0x3] }
  0x3c   : > { %v1413_v54 = vmul.f32 %v1999_v13, %v1337_v48  ;;  %v781_v55 = vrot.slane %v577_v59, 1  ;;  %v1070_v56 = vrot.slane %v577_v59, 2  ;;  %v386_v63 = vadd.f32 %v1757_v24, %v193_v44 }
  0x3d   : > { %v1488_v28 = vadd.f32 %v2005_v17, %v1412_v50  ;;  %v1338_v58 = vmul.f32 0.11111111, %v1274_v51  ;;  %v578_v3 = vadd.f32 %v2187_v60, %v385_v57  ;;  %v783_v10 = vrot.slane %v576_v61, 1 }
  0x3e   : > { %v1489_v0 = vadd.f32 %v2003_v16, %v1413_v54  ;;  %v782_v1 = vsel %vm749_vm0, %v780_v52, %v781_v55  ;;  %v1071_v2 = vsel %vm1038_vm1, %v1069_v53, %v1070_v56  ;;  %v1072_v21 = vrot.slane %v576_v61, 2 }
  0x3f   : > { %v1552_v6 = vmax.f32 %v1488_v28, 0.0  ;;  %v1414_v8 = vmul.f32 %v2001_v15, %v1338_v58  ;;  %v986_v9 = vadd.f32 %v782_v1, %v575_v46  ;;  %v784_v20 = vrot.slane %v578_v3, 1  ;;  %v199_v28 = vld [vmem:[%s1984_s19 + $0xe0] sm:$0x3]  ;;  %v200_v1 = vld [vmem:[%s1984_s19 + $0xe8] sm:$0x3] }
  0x40   : > { %v1553_v18 = vmax.f32 %v1489_v0, 0.0  ;;  %v1073_v22 = vrot.slane %v578_v3, 2  ;;  %v579_v26 = vadd.f32 %v1853_v29, %v386_v63  ;;  %v387_v27 = vadd.f32 %v1758_v5, %v194_v4 }
  0x41   : > { %1617 = vst.msk [vmem:[%s2078_s25 + $0x48] sm:$0xff] %vm1608_vm2, %v1552_v6  ;;  %v1490_v23 = vadd.f32 %v2005_v17, %v1414_v8  ;;  %v1275_v11 = vadd.f32 %v1071_v2, %v986_v9  ;;  %v785_v31 = vsel %vm749_vm0, %v783_v10, %v784_v20  ;;  %v388_v37 = vadd.f32 %v2163_v42, %v2102_v19  ;;  %v1764_v2 = vld [vmem:[%s1984_s19 + $0x118] sm:$0x3]  ;;  %v2240_v8 = vld [vmem:[%s1984_s19 + $0x128] sm:$0xff] }
  0x42   : > { %1618 = vst [vmem:[%s2078_s25 + $0x50] sm:$0xff] %v1553_v18  ;;  %v1074_v32 = vsel %vm1038_vm1, %v1072_v21, %v1073_v22  ;;  %v390_v7 = vadd.f32 %v2169_v45, %v2112_v12  ;;  %v987_v39 = vadd.f32 %v785_v31, %v576_v61  ;;  %v786_v40 = vrot.slane %v579_v26, 1 }
  0x43   : > { %v1554_v38 = vmax.f32 %v1490_v23, 0.0  ;;  %v1339_v14 = vmul.f32 0.11111111, %v1275_v11  ;;  %v1075_v62 = vrot.slane %v579_v26, 2  ;;  %v580_v43 = vadd.f32 %v1854_v30, %v387_v27  ;;  %v1859_v11 = vld [vmem:[%s1984_s19 + $0x140] sm:$0x3] }
  0x44   : > { %v581_v33 = vadd.f32 %v2210_v41, %v388_v37  ;;  %v2217_v46 = vadd.f32 %v2213_v36, %v390_v7  ;;  %v1276_v12 = vadd.f32 %v1074_v32, %v987_v39  ;;  %v787_v44 = vsel %vm749_vm0, %v781_v55, %v786_v40  ;;  %v1860_v26 = vld [vmem:[%s1984_s19 + $0x148] sm:$0x3] }
  0x45   : > { %1619 = vst.msk [vmem:[%s2078_s25 + $0x58] sm:$0xff] %vm1608_vm2, %v1554_v38  ;;  %v1415_v19 = vmul.f32 %v1999_v13, %v1339_v14  ;;  %v389_v47 = vadd.f32 %v2183_v25, %v2129_v34  ;;  %v988_v48 = vadd.f32 %v787_v44, %v577_v59  ;;  %v1076_v49 = vsel %vm1038_vm1, %v1070_v56, %v1075_v62  ;;  %v1763_v56 = vld [vmem:[%s1984_s19 + $0x110] sm:$0x3] }
  0x46   : > { %v788_v24 = vrot.slane %v580_v43, 1  ;;  %v1077_v50 = vrot.slane %v580_v43, 2  ;;  %v1340_v52 = vmul.f32 0.11111111, %v1276_v12  ;;  %v790_v53 = vrot.slane %v581_v33, 1 }
  0x47   : > { %v1491_v51 = vadd.f32 %v2003_v16, %v1415_v19  ;;  %v791_v54 = vrot.slane %v2217_v46, 1  ;;  %v1277_v57 = vadd.f32 %v1076_v49, %v988_v48  ;;  %v1079_v59 = vrot.slane %v581_v33, 2 }
  0x48   : > { %v789_v55 = vsel %vm749_vm0, %v784_v20, %v788_v24  ;;  %v1078_v34 = vsel %vm1038_vm1, %v1073_v22, %v1077_v50  ;;  %v1416_v61 = vmul.f32 %v2001_v15, %v1340_v52  ;;  %v1080_v5 = vrot.slane %v2217_v46, 2 }
  0x49   : > { %v1555_v58 = vmax.f32 %v1491_v51, 0.0  ;;  %v989_v63 = vadd.f32 %v789_v55, %v578_v3  ;;  %v792_v0 = vsel %vm749_vm0, %v790_v53, %v791_v54  ;;  %v1341_v29 = vmul.f32 0.11111111, %v1277_v57  ;;  %v2245_v3 = vld [vmem:[%s1984_s19 + $0x138] sm:$0xff] }
  0x4a   : > { %v990_v4 = vadd.f32 %v792_v0, %v581_v33  ;;  %v391_v6 = vadd.f32 %v2187_v60, %v2138_v35  ;;  %v1492_v9 = vadd.f32 %v2005_v17, %v1416_v61  ;;  %v582_v18 = vadd.f32 %v2240_v8, %v389_v47  ;;  %v2273_v61 = vld [vmem:[%s1984_s19 + $0x150] sm:$0xff] }
  0x4b   : > { %1620 = vst [vmem:[%s2078_s25 + $0x60] sm:$0xff] %v1555_v58  ;;  %v1278_v10 = vadd.f32 %v1078_v34, %v989_v63  ;;  %v392_v20 = vadd.f32 %v1763_v56, %v199_v28  ;;  %v1417_v21 = vmul.f32 %v1999_v13, %v1341_v29  ;;  %v1081_v22 = vsel %vm1038_vm1, %v1079_v59, %v1080_v5 }
  0x4c   : > { %v584_v23 = vadd.f32 %v2245_v3, %v391_v6  ;;  %v393_v35 = vadd.f32 %v1764_v2, %v200_v1  ;;  %v1556_v27 = vmax.f32 %v1492_v9, 0.0  ;;  %v1279_v31 = vadd.f32 %v1081_v22, %v990_v4  ;;  %v1769_v6 = vld [vmem:[%s1984_s19 + $0x140] sm:$0x3] }
  0x4d   : > { %v1342_v30 = vmul.f32 0.11111111, %v1278_v10  ;;  %v793_v32 = vrot.slane %v582_v18, 1  ;;  %v1493_v37 = vadd.f32 %v2003_v16, %v1417_v21  ;;  %v1082_v38 = vrot.slane %v582_v18, 2  ;;  %v2291_v21 = vld [vmem:[%s1984_s19 + $0x158] sm:$0xff] }
  0x4e   : > { %v794_v7 = vrot.slane %v584_v23, 1  ;;  %v1083_v14 = vrot.slane %v584_v23, 2  ;;  %1621 = vst.msk [vmem:[%s2078_s25 + $0x68] sm:$0xff] %vm1608_vm2, %v1556_v27  ;;  %v1343_v40 = vmul.f32 0.11111111, %v1279_v31  ;;  %v585_v62 = vadd.f32 %v1859_v11, %v392_v20 }
  0x4f   : > { %v1418_v39 = vmul.f32 %v2001_v15, %v1342_v30  ;;  %v586_v43 = vadd.f32 %v1860_v26, %v393_v35  ;;  %v1557_v33 = vmax.f32 %v1493_v37, 0.0  ;;  %v394_v44 = vadd.f32 %v2210_v41, %v2163_v42  ;;  %v1865_v31 = vld [vmem:[%s1984_s19 + $0x170] sm:$0x3] }
  0x50   : > { %v795_v19 = vsel %vm749_vm0, %v793_v32, %v794_v7  ;;  %v1084_v12 = vsel %vm1038_vm1, %v1082_v38, %v1083_v14  ;;  %v1419_v48 = vmul.f32 %v1999_v13, %v1343_v40  ;;  %v796_v24 = vrot.slane %v585_v62, 1 }
  0x51   : > { %v1494_v47 = vadd.f32 %v2005_v17, %v1418_v39  ;;  %v991_v49 = vadd.f32 %v795_v19, %v582_v18  ;;  %1622 = vst [vmem:[%s2078_s25 + $0x70] sm:$0xff] %v1557_v33  ;;  %v1085_v50 = vrot.slane %v585_v62, 2  ;;  %v798_v51 = vrot.slane %v586_v43, 1  ;;  %v1770_v39 = vld [vmem:[%s1984_s19 + $0x148] sm:$0x3] }
  0x52   : > { %v1087_v52 = vrot.slane %v586_v43, 2  ;;  %v396_v53 = vadd.f32 %v2213_v36, %v2169_v45  ;;  %v1495_v55 = vadd.f32 %v2003_v16, %v1419_v48  ;;  %v797_v34 = vsel %vm749_vm0, %v791_v54, %v796_v24  ;;  %v2278_v54 = vld [vmem:[%s1984_s19 + $0x160] sm:$0xff]  ;;  %v1866_v48 = vld [vmem:[%s1984_s19 + $0x178] sm:$0x3] }
  0x53   : > { %v1558_v57 = vmax.f32 %v1494_v47, 0.0  ;;  %v1280_v42 = vadd.f32 %v1084_v12, %v991_v49  ;;  %v992_v59 = vadd.f32 %v797_v34, %v2217_v46  ;;  %v1086_v28 = vsel %vm1038_vm1, %v1080_v5, %v1085_v50  ;;  %v205_v5 = vld [vmem:[%s1984_s19 + $0x110] sm:$0x3] }
  0x54   : > { %v799_v56 = vsel %vm749_vm0, %v794_v7, %v798_v51  ;;  %v1088_v58 = vsel %vm1038_vm1, %v1083_v14, %v1087_v52  ;;  %v1559_v45 = vmax.f32 %v1495_v55, 0.0  ;;  %v587_v46 = vadd.f32 %v2273_v61, %v394_v44  ;;  %v206_v14 = vld [vmem:[%s1984_s19 + $0x118] sm:$0x3] }
  0x55   : > { %1623 = vst.msk [vmem:[%s2078_s25 + $0x78] sm:$0xff] %vm1608_vm2, %v1558_v57  ;;  %v1344_v63 = vmul.f32 0.11111111, %v1280_v42  ;;  %v993_v0 = vadd.f32 %v799_v56, %v584_v23  ;;  %v1281_v1 = vadd.f32 %v1086_v28, %v992_v59  ;;  %v589_v2 = vadd.f32 %v2278_v54, %v396_v53 }
  0x56   : > { %v395_v29 = vadd.f32 %v2240_v8, %v2183_v25  ;;  %v397_v4 = vadd.f32 %v2245_v3, %v2187_v60  ;;  %1624 = vst [vmem:[%s2078_s25 + $0x80] sm:$0xff] %v1559_v45  ;;  %v800_v18 = vrot.slane %v587_v46, 1  ;;  %v1089_v20 = vrot.slane %v587_v46, 2  ;;  %v2294_v25 = vld [vmem:[%s1984_s19 + $0x168] sm:$0xff] }
  0x57   : > { %v1420_v9 = vmul.f32 %v2001_v15, %v1344_v63  ;;  %v1282_v10 = vadd.f32 %v1088_v58, %v993_v0  ;;  %v1345_v22 = vmul.f32 0.11111111, %v1281_v1  ;;  %v801_v23 = vrot.slane %v589_v2, 1 }
  0x58   : > { %v1090_v11 = vrot.slane %v589_v2, 2  ;;  %v588_v60 = vadd.f32 %v2291_v21, %v395_v29  ;;  %v590_v27 = vadd.f32 %v2294_v25, %v397_v4  ;;  %v398_v30 = vadd.f32 %v1769_v6, %v205_v5  ;;  %v2324_v4 = vld [vmem:[%s1984_s19 + $0x180] sm:$0xff]  ;;  %v2327_v5 = vld [vmem:[%s1984_s19 + $0x190] sm:$0xff] }
  0x59   : > { %v1496_v35 = vadd.f32 %v2005_v17, %v1420_v9  ;;  %v1346_v26 = vmul.f32 0.11111111, %v1282_v10  ;;  %v1421_v32 = vmul.f32 %v1999_v13, %v1345_v22  ;;  %v802_v37 = vsel %vm749_vm0, %v800_v18, %v801_v23 }
  0x5a   : > { %v1091_v7 = vsel %vm1038_vm1, %v1089_v20, %v1090_v11  ;;  %v803_v38 = vrot.slane %v588_v60, 1  ;;  %v994_v43 = vadd.f32 %v802_v37, %v587_v46  ;;  %v804_v33 = vrot.slane %v590_v27, 1 }
  0x5b   : > { %v1560_v40 = vmax.f32 %v1496_v35, 0.0  ;;  %v1422_v62 = vmul.f32 %v2001_v15, %v1346_v26  ;;  %v1497_v19 = vadd.f32 %v2003_v16, %v1421_v32  ;;  %v1092_v12 = vrot.slane %v588_v60, 2  ;;  %v211_v35 = vld [vmem:[%s1984_s19 + $0x140] sm:$0x3]  ;;  %v1775_v26 = vld [vmem:[%s1984_s19 + $0x170] sm:$0x3] }
  0x5c   : > { %v1093_v44 = vrot.slane %v590_v27, 2  ;;  %v591_v47 = vadd.f32 %v1865_v31, %v398_v30  ;;  %v1283_v24 = vadd.f32 %v1091_v7, %v994_v43  ;;  %v805_v50 = vsel %vm749_vm0, %v803_v38, %v804_v33 }
  0x5d   : > { %1625 = vst.msk [vmem:[%s2078_s25 + $0x88] sm:$0xff] %vm1608_vm2, %v1560_v40  ;;  %v1498_v49 = vadd.f32 %v2005_v17, %v1422_v62  ;;  %v399_v51 = vadd.f32 %v1770_v39, %v206_v14  ;;  %v1561_v52 = vmax.f32 %v1497_v19, 0.0  ;;  %v995_v53 = vadd.f32 %v805_v50, %v588_v60  ;;  %v2347_v14 = vld [vmem:[%s1984_s19 + $0x188] sm:$0xff] }
  0x5e   : > { %v1094_v57 = vsel %vm1038_vm1, %v1092_v12, %v1093_v44  ;;  %v806_v55 = vrot.slane %v591_v47, 1  ;;  %v1347_v34 = vmul.f32 0.11111111, %v1283_v24  ;;  %v1095_v59 = vrot.slane %v591_v47, 2  ;;  %v212_v19 = vld [vmem:[%s1984_s19 + $0x148] sm:$0x3] }
  0x5f   : > { %v1562_v42 = vmax.f32 %v1498_v49, 0.0  ;;  %v592_v28 = vadd.f32 %v1866_v48, %v399_v51  ;;  %1626 = vst [vmem:[%s2078_s25 + $0x90] sm:$0xff] %v1561_v52  ;;  %v1284_v56 = vadd.f32 %v1094_v57, %v995_v53  ;;  %v400_v45 = vadd.f32 %v2273_v61, %v2210_v41  ;;  %v1776_v12 = vld [vmem:[%s1984_s19 + $0x178] sm:$0x3] }
  0x60   : > { %v807_v58 = vsel %vm749_vm0, %v801_v23, %v806_v55  ;;  %v402_v63 = vadd.f32 %v2278_v54, %v2213_v36  ;;  %v1423_v0 = vmul.f32 %v1999_v13, %v1347_v34  ;;  %v1096_v1 = vsel %vm1038_vm1, %v1090_v11, %v1095_v59  ;;  %v2358_v49 = vld [vmem:[%s1984_s19 + $0x198] sm:$0xff]  ;;  %v1872_v34 = vld [vmem:[%s1984_s19 + $0x1a8] sm:$0x3] }
  0x61   : > { %1627 = vst.msk [vmem:[%s2078_s25 + $0x98] sm:$0xff] %vm1608_vm2, %v1562_v42  ;;  %v996_v46 = vadd.f32 %v807_v58, %v589_v2  ;;  %v808_v29 = vrot.slane %v592_v28, 1  ;;  %v1348_v6 = vmul.f32 0.11111111, %v1284_v56  ;;  %v1097_v9 = vrot.slane %v592_v28, 2 }
  0x62   : > { %v593_v41 = vadd.f32 %v2324_v4, %v400_v45  ;;  %v2331_v36 = vadd.f32 %v2327_v5, %v402_v63  ;;  %v1499_v10 = vadd.f32 %v2003_v16, %v1423_v0  ;;  %v401_v20 = vadd.f32 %v2291_v21, %v2240_v8 }
  0x63   : > { %v1285_v18 = vadd.f32 %v1096_v1, %v996_v46  ;;  %v809_v2 = vsel %vm749_vm0, %v804_v33, %v808_v29  ;;  %v1424_v22 = vmul.f32 %v2001_v15, %v1348_v6  ;;  %v1098_v11 = vsel %vm1038_vm1, %v1093_v44, %v1097_v9  ;;  %v1871_v33 = vld [vmem:[%s1984_s19 + $0x1a0] sm:$0x3] }
  0x64   : > { %v997_v23 = vadd.f32 %v809_v2, %v590_v27  ;;  %v810_v60 = vrot.slane %v593_v41, 1  ;;  %v1563_v30 = vmax.f32 %v1499_v10, 0.0  ;;  %v811_v32 = vrot.slane %v2331_v36, 1 }
  0x65   : > { %v1349_v31 = vmul.f32 0.11111111, %v1285_v18  ;;  %v1099_v37 = vrot.slane %v593_v41, 2  ;;  %v1500_v7 = vadd.f32 %v2005_v17, %v1424_v22  ;;  %v1100_v38 = vrot.slane %v2331_v36, 2 }
  0x66   : > { %v1286_v8 = vadd.f32 %v1098_v11, %v997_v23  ;;  %v403_v27 = vadd.f32 %v2294_v25, %v2245_v3  ;;  %1628 = vst [vmem:[%s2078_s25 + $0xa0] sm:$0xff] %v1563_v30  ;;  %v812_v40 = vsel %vm749_vm0, %v810_v60, %v811_v32  ;;  %v594_v62 = vadd.f32 %v2347_v14, %v401_v20  ;;  %v2379_v11 = vld [vmem:[%s1984_s19 + $0x1b0] sm:$0xff]  ;;  %v2382_v60 = vld [vmem:[%s1984_s19 + $0x1c0] sm:$0xff] }
  0x67   : > { %v1425_v39 = vmul.f32 %v1999_v13, %v1349_v31  ;;  %v404_v43 = vadd.f32 %v1775_v26, %v211_v35  ;;  %v1564_v44 = vmax.f32 %v1500_v7, 0.0  ;;  %v998_v48 = vadd.f32 %v812_v40, %v593_v41  ;;  %v217_v7 = vld [vmem:[%s1984_s19 + $0x170] sm:$0x3]  ;;  %v1781_v40 = vld [vmem:[%s1984_s19 + $0x1a0] sm:$0x3] }
  0x68   : > { %v1350_v47 = vmul.f32 0.11111111, %v1286_v8  ;;  %v1101_v3 = vsel %vm1038_vm1, %v1099_v37, %v1100_v38  ;;  %v596_v50 = vadd.f32 %v2358_v49, %v403_v27  ;;  %v813_v51 = vrot.slane %v594_v62, 1 }
  0x69   : > { %v1501_v24 = vadd.f32 %v2003_v16, %v1425_v39  ;;  %v1102_v52 = vrot.slane %v594_v62, 2  ;;  %1629 = vst.msk [vmem:[%s2078_s25 + $0xa8] sm:$0xff] %vm1608_vm2, %v1564_v44  ;;  %v1287_v57 = vadd.f32 %v1101_v3, %v998_v48  ;;  %v597_v55 = vadd.f32 %v1871_v33, %v404_v43  ;;  %v1877_v3 = vld [vmem:[%s1984_s19 + $0x1d0] sm:$0x3] }
  0x6a   : > { %v1426_v53 = vmul.f32 %v2001_v15, %v1350_v47  ;;  %v405_v42 = vadd.f32 %v1776_v12, %v212_v19  ;;  %v814_v28 = vrot.slane %v596_v50, 1  ;;  %v1103_v56 = vrot.slane %v596_v50, 2  ;;  %v2396_v12 = vld [vmem:[%s1984_s19 + $0x1b8] sm:$0xff] }
  0x6b   : > { %v1565_v59 = vmax.f32 %v1501_v24, 0.0  ;;  %v406_v58 = vadd.f32 %v2324_v4, %v2273_v61  ;;  %v1351_v63 = vmul.f32 0.11111111, %v1287_v57  ;;  %v816_v0 = vrot.slane %v597_v55, 1 }
  0x6c   : > { %v1502_v45 = vadd.f32 %v2005_v17, %v1426_v53  ;;  %v1105_v46 = vrot.slane %v597_v55, 2  ;;  %v815_v1 = vsel %vm749_vm0, %v813_v51, %v814_v28  ;;  %v1104_v29 = vsel %vm1038_vm1, %v1102_v52, %v1103_v56  ;;  %v2408_v52 = vld [vmem:[%s1984_s19 + $0x1c8] sm:$0xff] }
  0x6d   : > { %1630 = vst [vmem:[%s2078_s25 + $0xb0] sm:$0xff] %v1565_v59  ;;  %v598_v6 = vadd.f32 %v1872_v34, %v405_v42  ;;  %v408_v9 = vadd.f32 %v2327_v5, %v2278_v54  ;;  %v1427_v61 = vmul.f32 %v1999_v13, %v1351_v63  ;;  %v999_v10 = vadd.f32 %v815_v1, %v594_v62 }
  0x6e   : > { %v1566_v41 = vmax.f32 %v1502_v45, 0.0  ;;  %v817_v18 = vsel %vm749_vm0, %v811_v32, %v816_v0  ;;  %v1106_v20 = vsel %vm1038_vm1, %v1100_v38, %v1105_v46  ;;  %v599_v26 = vadd.f32 %v2379_v11, %v406_v58  ;;  %v218_v58 = vld [vmem:[%s1984_s19 + $0x178] sm:$0x3]  ;;  %v1782_v45 = vld [vmem:[%s1984_s19 + $0x1a8] sm:$0x3] }
  0x6f   : > { %v1000_v2 = vadd.f32 %v817_v18, %v2331_v36  ;;  %v818_v22 = vrot.slane %v598_v6, 1  ;;  %v1107_v23 = vrot.slane %v598_v6, 2  ;;  %v1503_v54 = vadd.f32 %v2003_v16, %v1427_v61  ;;  %v1878_v61 = vld [vmem:[%s1984_s19 + $0x1d8] sm:$0x3] }
  0x70   : > { %1631 = vst.msk [vmem:[%s2078_s25 + $0xb8] sm:$0xff] %vm1608_vm2, %v1566_v41  ;;  %v1288_v35 = vadd.f32 %v1104_v29, %v999_v10  ;;  %v601_v30 = vadd.f32 %v2382_v60, %v408_v9  ;;  %v407_v37 = vadd.f32 %v2347_v14, %v2291_v21  ;;  %v820_v39 = vrot.slane %v599_v26, 1 }
  0x71   : > { %v1289_v36 = vadd.f32 %v1106_v20, %v1000_v2  ;;  %v819_v31 = vsel %vm749_vm0, %v814_v28, %v818_v22  ;;  %v1108_v32 = vsel %vm1038_vm1, %v1103_v56, %v1107_v23  ;;  %v1567_v8 = vmax.f32 %v1503_v54, 0.0 }
  0x72   : > { %v1352_v38 = vmul.f32 0.11111111, %v1288_v35  ;;  %v1001_v27 = vadd.f32 %v819_v31, %v596_v50  ;;  %v821_v43 = vrot.slane %v601_v30, 1  ;;  %v1109_v33 = vrot.slane %v599_v26, 2 }
  0x73   : > { %v1353_v62 = vmul.f32 0.11111111, %v1289_v36  ;;  %v1110_v19 = vrot.slane %v601_v30, 2  ;;  %1632 = vst [vmem:[%s2078_s25 + $0xc0] sm:$0xff] %v1567_v8  ;;  %v409_v21 = vadd.f32 %v2358_v49, %v2294_v25  ;;  %v600_v48 = vadd.f32 %v2396_v12, %v407_v37 }
  0x74   : > { %v1428_v44 = vmul.f32 %v2001_v15, %v1352_v38  ;;  %v1290_v47 = vadd.f32 %v1108_v32, %v1001_v27  ;;  %v822_v50 = vsel %vm749_vm0, %v820_v39, %v821_v43  ;;  %v410_v53 = vadd.f32 %v1781_v40, %v217_v7 }
  0x75   : > { %v1429_v24 = vmul.f32 %v1999_v13, %v1353_v62  ;;  %v1111_v51 = vsel %vm1038_vm1, %v1109_v33, %v1110_v19  ;;  %v1002_v42 = vadd.f32 %v822_v50, %v599_v26  ;;  %v602_v25 = vadd.f32 %v2408_v52, %v409_v21 }
  0x76   : > { %v1504_v57 = vadd.f32 %v2005_v17, %v1428_v44  ;;  %v1354_v55 = vmul.f32 0.11111111, %v1290_v47  ;;  %v823_v59 = vrot.slane %v600_v48, 1  ;;  %v1112_v28 = vrot.slane %v600_v48, 2 }
  0x77   : > { %v1505_v34 = vadd.f32 %v2003_v16, %v1429_v24  ;;  %v603_v56 = vadd.f32 %v1877_v3, %v410_v53  ;;  %v1291_v46 = vadd.f32 %v1111_v51, %v1002_v42  ;;  %v824_v1 = vrot.slane %v602_v25, 1  ;;  %v2452_v51 = vld [vmem:[%s1984_s19 + $0x1e8] sm:$0xff] }
  0x78   : > { %v1568_v63 = vmax.f32 %v1504_v57, 0.0  ;;  %v1430_v0 = vmul.f32 %v2001_v15, %v1354_v55  ;;  %v1113_v6 = vrot.slane %v602_v25, 2  ;;  %v411_v20 = vadd.f32 %v1782_v45, %v218_v58  ;;  %v2458_v55 = vld [vmem:[%s1984_s19 + $0x1f8] sm:$0xff]  ;;  %v1787_v58 = vld [vmem:[%s1984_s19 + $0x1d0] sm:$0x3] }
  0x79   : > { %v1569_v29 = vmax.f32 %v1505_v34, 0.0  ;;  %v826_v9 = vrot.slane %v603_v56, 1  ;;  %v1115_v41 = vrot.slane %v603_v56, 2  ;;  %v1355_v18 = vmul.f32 0.11111111, %v1291_v46 }
  0x7a   : > { %1633 = vst.msk [vmem:[%s2078_s25 + $0xc8] sm:$0xff] %vm1608_vm2, %v1568_v63  ;;  %v1506_v10 = vadd.f32 %v2005_v17, %v1430_v0  ;;  %v825_v2 = vsel %vm749_vm0, %v823_v59, %v824_v1  ;;  %v1114_v23 = vsel %vm1038_vm1, %v1112_v28, %v1113_v6  ;;  %v604_v32 = vadd.f32 %v1878_v61, %v411_v20  ;;  %v223_v56 = vld [vmem:[%s1984_s19 + $0x1a0] sm:$0x3] }
  0x7b   : > { %1634 = vst [vmem:[%s2078_s25 + $0xd0] sm:$0xff] %v1569_v29  ;;  %v1003_v22 = vadd.f32 %v825_v2, %v600_v48  ;;  %v827_v54 = vsel %vm749_vm0, %v821_v43, %v826_v9  ;;  %v1116_v35 = vsel %vm1038_vm1, %v1110_v19, %v1115_v41  ;;  %v1431_v36 = vmul.f32 %v1999_v13, %v1355_v18  ;;  %v2439_v43 = vld [vmem:[%s1984_s19 + $0x1f0] sm:$0xff]  ;;  %v1883_v45 = vld [vmem:[%s1984_s19 + $0x200] sm:$0x3]  ;;  %v224_v29 = vld [vmem:[%s1984_s19 + $0x1a8] sm:$0x3] }
  0x7c   : > { %v1570_v26 = vmax.f32 %v1506_v10, 0.0  ;;  %v1004_v31 = vadd.f32 %v827_v54, %v601_v30  ;;  %v412_v7 = vadd.f32 %v2379_v11, %v2324_v4  ;;  %v414_v8 = vadd.f32 %v2382_v60, %v2327_v5  ;;  %v2436_v30 = vld [vmem:[%s1984_s19 + $0x1e0] sm:$0xff] }
  0x7d   : > { %v1292_v37 = vadd.f32 %v1114_v23, %v1003_v22  ;;  %v413_v38 = vadd.f32 %v2396_v12, %v2347_v14  ;;  %v1507_v27 = vadd.f32 %v2003_v16, %v1431_v36  ;;  %v828_v40 = vrot.slane %v604_v32, 1  ;;  %v1884_v23 = vld [vmem:[%s1984_s19 + $0x208] sm:$0x3] }
  0x7e   : > { %1635 = vst.msk [vmem:[%s2078_s25 + $0xd8] sm:$0xff] %vm1608_vm2, %v1570_v26  ;;  %v1293_v39 = vadd.f32 %v1116_v35, %v1004_v31  ;;  %v1117_v62 = vrot.slane %v604_v32, 2  ;;  %v605_v33 = vadd.f32 %v2436_v30, %v412_v7  ;;  %v2443_v5 = vadd.f32 %v2439_v43, %v414_v8  ;;  %v2481_v8 = vld [vmem:[%s1984_s19 + $0x210] sm:$0xff] }
  0x7f   : > { %v1356_v4 = vmul.f32 0.11111111, %v1292_v37  ;;  %v415_v14 = vadd.f32 %v2408_v52, %v2358_v49  ;;  %v1571_v19 = vmax.f32 %v1507_v27, 0.0  ;;  %v829_v47 = vsel %vm749_vm0, %v824_v1, %v828_v40 }
  0x80   : > { %v1357_v44 = vmul.f32 0.11111111, %v1293_v39  ;;  %v1118_v21 = vsel %vm1038_vm1, %v1113_v6, %v1117_v62  ;;  %v1005_v3 = vadd.f32 %v829_v47, %v602_v25  ;;  %v830_v24 = vrot.slane %v605_v33, 1  ;;  %v1788_v6 = vld [vmem:[%s1984_s19 + $0x1d8] sm:$0x3] }
  0x81   : > { %v1432_v48 = vmul.f32 %v2001_v15, %v1356_v4  ;;  %v831_v50 = vrot.slane %v2443_v5, 1  ;;  %1636 = vst [vmem:[%s2078_s25 + $0xe0] sm:$0xff] %v1571_v19  ;;  %v1119_v53 = vrot.slane %v605_v33, 2  ;;  %v1120_v57 = vrot.slane %v2443_v5, 2 }
  0x82   : > { %v1433_v49 = vmul.f32 %v1999_v13, %v1357_v44  ;;  %v606_v42 = vadd.f32 %v2452_v51, %v413_v38  ;;  %v1294_v34 = vadd.f32 %v1118_v21, %v1005_v3  ;;  %v608_v28 = vadd.f32 %v2458_v55, %v415_v14  ;;  %v2489_v14 = vld [vmem:[%s1984_s19 + $0x220] sm:$0xff] }
  0x83   : > { %v1508_v25 = vadd.f32 %v2005_v17, %v1432_v48  ;;  %v832_v59 = vsel %vm749_vm0, %v830_v24, %v831_v50  ;;  %v1121_v46 = vsel %vm1038_vm1, %v1119_v53, %v1120_v57  ;;  %v416_v22 = vadd.f32 %v1787_v58, %v223_v56 }
  0x84   : > { %v1509_v63 = vadd.f32 %v2003_v16, %v1433_v49  ;;  %v1006_v0 = vadd.f32 %v832_v59, %v605_v33  ;;  %v833_v1 = vrot.slane %v606_v42, 1  ;;  %v1358_v41 = vmul.f32 0.11111111, %v1294_v34 }
  0x85   : > { %v1572_v9 = vmax.f32 %v1508_v25, 0.0  ;;  %v834_v61 = vrot.slane %v608_v28, 1  ;;  %v1122_v10 = vrot.slane %v606_v42, 2  ;;  %v1123_v20 = vrot.slane %v608_v28, 2 }
  0x86   : > { %v1573_v18 = vmax.f32 %v1509_v63, 0.0  ;;  %v1295_v2 = vadd.f32 %v1121_v46, %v1006_v0  ;;  %v1434_v54 = vmul.f32 %v2001_v15, %v1358_v41  ;;  %v417_v26 = vadd.f32 %v1788_v6, %v224_v29  ;;  %v229_v63 = vld [vmem:[%s1984_s19 + $0x1d0] sm:$0x3]  ;;  %v1793_v0 = vld [vmem:[%s1984_s19 + $0x200] sm:$0x3]  ;;  %v2515_v6 = vld [vmem:[%s1984_s19 + $0x218] sm:$0xff] }
  0x87   : > { %1637 = vst.msk [vmem:[%s2078_s25 + $0xe8] sm:$0xff] %vm1608_vm2, %v1572_v9  ;;  %v835_v35 = vsel %vm749_vm0, %v833_v1, %v834_v61  ;;  %v418_v36 = vadd.f32 %v2436_v30, %v2379_v11  ;;  %v1124_v37 = vsel %vm1038_vm1, %v1122_v10, %v1123_v20  ;;  %v609_v7 = vadd.f32 %v1883_v45, %v416_v22  ;;  %v2518_v9 = vld [vmem:[%s1984_s19 + $0x228] sm:$0xff] }
  0x88   : > { %1638 = vst [vmem:[%s2078_s25 + $0xf0] sm:$0xff] %v1573_v18  ;;  %v1359_v31 = vmul.f32 0.11111111, %v1295_v2  ;;  %v1007_v32 = vadd.f32 %v835_v35, %v606_v42  ;;  %v1510_v38 = vadd.f32 %v2005_v17, %v1434_v54  ;;  %v610_v27 = vadd.f32 %v1884_v23, %v417_v26  ;;  %v1889_v18 = vld [vmem:[%s1984_s19 + $0x230] sm:$0x3] }
  0x89   : > { %v420_v39 = vadd.f32 %v2439_v43, %v2382_v60  ;;  %v611_v40 = vadd.f32 %v2481_v8, %v418_v36  ;;  %v836_v4 = vrot.slane %v609_v7, 1  ;;  %v1125_v33 = vrot.slane %v609_v7, 2  ;;  %v230_v2 = vld [vmem:[%s1984_s19 + $0x1d8] sm:$0x3] }
  0x8a   : > { %v1435_v62 = vmul.f32 %v1999_v13, %v1359_v31  ;;  %v1296_v11 = vadd.f32 %v1124_v37, %v1007_v32  ;;  %v1574_v19 = vmax.f32 %v1510_v38, 0.0  ;;  %v838_v44 = vrot.slane %v610_v27, 1 }
  0x8b   : > { %v1127_v47 = vrot.slane %v610_v27, 2  ;;  %v2492_v21 = vadd.f32 %v2489_v14, %v420_v39  ;;  %v837_v60 = vsel %vm749_vm0, %v831_v50, %v836_v4  ;;  %v1126_v24 = vsel %vm1038_vm1, %v1120_v57, %v1125_v33 }
  0x8c   : > { %v1511_v48 = vadd.f32 %v2003_v16, %v1435_v62  ;;  %v1360_v3 = vmul.f32 0.11111111, %v1296_v11  ;;  %1639 = vst.msk [vmem:[%s2078_s25 + $0xf8] sm:$0xff] %vm1608_vm2, %v1574_v19  ;;  %v1008_v49 = vadd.f32 %v837_v60, %v2443_v5  ;;  %v839_v53 = vsel %vm749_vm0, %v834_v61, %v838_v44  ;;  %v1890_v62 = vld [vmem:[%s1984_s19 + $0x238] sm:$0x3] }
  0x8d   : > { %v1128_v42 = vsel %vm1038_vm1, %v1123_v20, %v1127_v47  ;;  %v840_v25 = vrot.slane %v611_v40, 1  ;;  %v1009_v56 = vadd.f32 %v839_v53, %v608_v28  ;;  %v841_v50 = vrot.slane %v2492_v21, 1 }
  0x8e   : > { %v1575_v34 = vmax.f32 %v1511_v48, 0.0  ;;  %v1436_v59 = vmul.f32 %v2001_v15, %v1360_v3  ;;  %v1297_v58 = vadd.f32 %v1126_v24, %v1008_v49  ;;  %v1129_v57 = vrot.slane %v611_v40, 2 }
  0x8f   : > { %v1130_v45 = vrot.slane %v2492_v21, 2  ;;  %v419_v5 = vadd.f32 %v2452_v51, %v2396_v12  ;;  %v1298_v1 = vadd.f32 %v1128_v42, %v1009_v56  ;;  %v842_v28 = vsel %vm749_vm0, %v840_v25, %v841_v50  ;;  %v2546_v56 = vld [vmem:[%s1984_s19 + $0x240] sm:$0xff] }
  0x90   : > { %1640 = vst [vmem:[%s2078_s25 + $0x100] sm:$0xff] %v1575_v34  ;;  %v1512_v46 = vadd.f32 %v2005_v17, %v1436_v59  ;;  %v421_v29 = vadd.f32 %v2458_v55, %v2408_v52  ;;  %v1361_v41 = vmul.f32 0.11111111, %v1297_v58  ;;  %v1010_v61 = vadd.f32 %v842_v28, %v611_v40  ;;  %v1794_v52 = vld [vmem:[%s1984_s19 + $0x208] sm:$0x3]  ;;  %v2549_v58 = vld [vmem:[%s1984_s19 + $0x250] sm:$0xff] }
  0x91   : > { %v1131_v12 = vsel %vm1038_vm1, %v1129_v57, %v1130_v45  ;;  %v612_v10 = vadd.f32 %v2515_v6, %v419_v5  ;;  %v1362_v22 = vmul.f32 0.11111111, %v1298_v1  ;;  %v422_v54 = vadd.f32 %v1793_v0, %v229_v63 }
  0x92   : > { %v1576_v20 = vmax.f32 %v1512_v46, 0.0  ;;  %v614_v23 = vadd.f32 %v2518_v9, %v421_v29  ;;  %v1437_v35 = vmul.f32 %v1999_v13, %v1361_v41  ;;  %v1299_v26 = vadd.f32 %v1131_v12, %v1010_v61 }
  0x93   : > { %v843_v36 = vrot.slane %v612_v10, 1  ;;  %v1132_v31 = vrot.slane %v612_v10, 2  ;;  %v1438_v32 = vmul.f32 %v2001_v15, %v1362_v22  ;;  %v615_v38 = vadd.f32 %v1889_v18, %v422_v54  ;;  %v2565_v18 = vld [vmem:[%s1984_s19 + $0x248] sm:$0xff]  ;;  %v2572_v22 = vld [vmem:[%s1984_s19 + $0x258] sm:$0xff] }
  0x94   : > { %1641 = vst.msk [vmem:[%s2078_s25 + $0x108] sm:$0xff] %vm1608_vm2, %v1576_v20  ;;  %v844_v37 = vrot.slane %v614_v23, 1  ;;  %v1133_v7 = vrot.slane %v614_v23, 2  ;;  %v1513_v27 = vadd.f32 %v2003_v16, %v1437_v35  ;;  %v1363_v39 = vmul.f32 0.11111111, %v1299_v26 }
  0x95   : > { %v423_v40 = vadd.f32 %v1794_v52, %v230_v2  ;;  %v424_v11 = vadd.f32 %v2481_v8, %v2436_v30  ;;  %v1514_v4 = vadd.f32 %v2005_v17, %v1438_v32  ;;  %v846_v44 = vrot.slane %v615_v38, 1  ;;  %v235_v52 = vld [vmem:[%s1984_s19 + $0x200] sm:$0x3]  ;;  %v236_v32 = vld [vmem:[%s1984_s19 + $0x208] sm:$0x3] }
  0x96   : > { %v845_v33 = vsel %vm749_vm0, %v843_v36, %v844_v37  ;;  %v1134_v19 = vsel %vm1038_vm1, %v1132_v31, %v1133_v7  ;;  %v1577_v47 = vmax.f32 %v1513_v27, 0.0  ;;  %v1439_v48 = vmul.f32 %v1999_v13, %v1363_v39  ;;  %v1799_v31 = vld [vmem:[%s1984_s19 + $0x230] sm:$0x3]  ;;  %v1895_v39 = vld [vmem:[%s1984_s19 + $0x260] sm:$0x3] }
  0x97   : > { %v1011_v3 = vadd.f32 %v845_v33, %v612_v10  ;;  %v1135_v60 = vrot.slane %v615_v38, 2  ;;  %v1578_v24 = vmax.f32 %v1514_v4, 0.0  ;;  %v847_v49 = vsel %vm749_vm0, %v841_v50, %v846_v44  ;;  %v1896_v33 = vld [vmem:[%s1984_s19 + $0x268] sm:$0x3] }
  0x98   : > { %v616_v53 = vadd.f32 %v1890_v62, %v423_v40  ;;  %v426_v30 = vadd.f32 %v2489_v14, %v2439_v43  ;;  %1642 = vst [vmem:[%s2078_s25 + $0x110] sm:$0xff] %v1577_v47  ;;  %v1515_v42 = vadd.f32 %v2003_v16, %v1439_v48  ;;  %v1012_v34 = vadd.f32 %v847_v49, %v2492_v21 }
  0x99   : > { %v1300_v25 = vadd.f32 %v1134_v19, %v1011_v3  ;;  %v1136_v59 = vsel %vm1038_vm1, %v1130_v45, %v1135_v60  ;;  %1643 = vst.msk [vmem:[%s2078_s25 + $0x118] sm:$0xff] %vm1608_vm2, %v1578_v24  ;;  %v617_v43 = vadd.f32 %v2546_v56, %v424_v11  ;;  %v425_v45 = vadd.f32 %v2515_v6, %v2452_v51 }
  0x9a   : > { %v848_v50 = vrot.slane %v616_v53, 1  ;;  %v1137_v57 = vrot.slane %v616_v53, 2  ;;  %v2555_v5 = vadd.f32 %v2549_v58, %v426_v30  ;;  %v1579_v63 = vmax.f32 %v1515_v42, 0.0 }
  0x9b   : > { %v1364_v0 = vmul.f32 0.11111111, %v1300_v25  ;;  %v1301_v21 = vadd.f32 %v1136_v59, %v1012_v34  ;;  %v850_v28 = vrot.slane %v617_v43, 1  ;;  %v1139_v10 = vrot.slane %v617_v43, 2 }
  0x9c   : > { %v849_v46 = vsel %vm749_vm0, %v844_v37, %v848_v50  ;;  %v1138_v1 = vsel %vm1038_vm1, %v1133_v7, %v1137_v57  ;;  %v851_v29 = vrot.slane %v2555_v5, 1  ;;  %1644 = vst [vmem:[%s2078_s25 + $0x120] sm:$0xff] %v1579_v63  ;;  %v1140_v2 = vrot.slane %v2555_v5, 2  ;;  %v1800_v37 = vld [vmem:[%s1984_s19 + $0x238] sm:$0x3] }
  0x9d   : > { %v1440_v41 = vmul.f32 %v2001_v15, %v1364_v0  ;;  %v1365_v61 = vmul.f32 0.11111111, %v1301_v21  ;;  %v1013_v12 = vadd.f32 %v849_v46, %v614_v23  ;;  %v427_v20 = vadd.f32 %v2518_v9, %v2458_v55  ;;  %v2599_v21 = vld [vmem:[%s1984_s19 + $0x270] sm:$0xff] }
  0x9e   : > { %v852_v51 = vsel %vm749_vm0, %v850_v28, %v851_v29  ;;  %v618_v54 = vadd.f32 %v2565_v18, %v425_v45  ;;  %v1141_v7 = vsel %vm1038_vm1, %v1139_v10, %v1140_v2  ;;  %v428_v47 = vadd.f32 %v1799_v31, %v235_v52  ;;  %v241_v10 = vld [vmem:[%s1984_s19 + $0x230] sm:$0x3] }
  0x9f   : > { %v1516_v35 = vadd.f32 %v2005_v17, %v1440_v41  ;;  %v1441_v23 = vmul.f32 %v1999_v13, %v1365_v61  ;;  %v1302_v26 = vadd.f32 %v1138_v1, %v1013_v12  ;;  %v1014_v36 = vadd.f32 %v852_v51, %v617_v43 }
  0xa0   : > { %v620_v55 = vadd.f32 %v2572_v22, %v427_v20  ;;  %v853_v38 = vrot.slane %v618_v54, 1  ;;  %v1142_v27 = vrot.slane %v618_v54, 2  ;;  %v429_v48 = vadd.f32 %v1800_v37, %v236_v32 }
  0xa1   : > { %v1580_v40 = vmax.f32 %v1516_v35, 0.0  ;;  %v1517_v62 = vadd.f32 %v2003_v16, %v1441_v23  ;;  %v1366_v11 = vmul.f32 0.11111111, %v1302_v26  ;;  %v1303_v4 = vadd.f32 %v1141_v7, %v1014_v36  ;;  %v2612_v35 = vld [vmem:[%s1984_s19 + $0x280] sm:$0xff]  ;;  %v2623_v7 = vld [vmem:[%s1984_s19 + $0x278] sm:$0xff] }
  0xa2   : > { %v854_v19 = vrot.slane %v620_v55, 1  ;;  %v1143_v44 = vrot.slane %v620_v55, 2  ;;  %v430_v49 = vadd.f32 %v2546_v56, %v2481_v8  ;;  %v621_v42 = vadd.f32 %v1895_v39, %v428_v47 }
  0xa3   : > { %1645 = vst.msk [vmem:[%s2078_s25 + $0x128] sm:$0xff] %vm1608_vm2, %v1580_v40  ;;  %v1581_v3 = vmax.f32 %v1517_v62, 0.0  ;;  %v1442_v60 = vmul.f32 %v2001_v15, %v1366_v11  ;;  %v1367_v24 = vmul.f32 0.11111111, %v1303_v4  ;;  %v622_v25 = vadd.f32 %v1896_v33, %v429_v48  ;;  %v1901_v62 = vld [vmem:[%s1984_s19 + $0x290] sm:$0x3] }
  0xa4   : > { %v855_v53 = vsel %vm749_vm0, %v853_v38, %v854_v19  ;;  %v1144_v30 = vsel %vm1038_vm1, %v1142_v27, %v1143_v44  ;;  %v432_v57 = vadd.f32 %v2549_v58, %v2489_v14  ;;  %v856_v43 = vrot.slane %v621_v42, 1 }
  0xa5   : > { %1646 = vst [vmem:[%s2078_s25 + $0x130] sm:$0xff] %v1581_v3  ;;  %v1518_v34 = vadd.f32 %v2005_v17, %v1442_v60  ;;  %v1443_v59 = vmul.f32 %v1999_v13, %v1367_v24  ;;  %v1015_v50 = vadd.f32 %v855_v53, %v618_v54  ;;  %v1145_v63 = vrot.slane %v621_v42, 2 }
  0xa6   : > { %v858_v8 = vrot.slane %v622_v25, 1  ;;  %v1147_v0 = vrot.slane %v622_v25, 2  ;;  %v623_v28 = vadd.f32 %v2599_v21, %v430_v49  ;;  %v857_v41 = vsel %vm749_vm0, %v851_v29, %v856_v43  ;;  %v1805_v29 = vld [vmem:[%s1984_s19 + $0x260] sm:$0x3]  ;;  %v1902_v43 = vld [vmem:[%s1984_s19 + $0x298] sm:$0x3] }
  0xa7   : > { %v1582_v45 = vmax.f32 %v1518_v34, 0.0  ;;  %v1519_v46 = vadd.f32 %v2003_v16, %v1443_v59  ;;  %v1304_v1 = vadd.f32 %v1144_v30, %v1015_v50  ;;  %v1146_v61 = vsel %vm1038_vm1, %v1140_v2, %v1145_v63 }
  0xa8   : > { %v859_v14 = vsel %vm749_vm0, %v854_v19, %v858_v8  ;;  %v1148_v12 = vsel %vm1038_vm1, %v1143_v44, %v1147_v0  ;;  %v1016_v54 = vadd.f32 %v857_v41, %v2555_v5  ;;  %v625_v2 = vadd.f32 %v2612_v35, %v432_v57  ;;  %v1806_v44 = vld [vmem:[%s1984_s19 + $0x268] sm:$0x3] }
  0xa9   : > { %1647 = vst.msk [vmem:[%s2078_s25 + $0x138] sm:$0xff] %vm1608_vm2, %v1582_v45  ;;  %v1583_v51 = vmax.f32 %v1519_v46, 0.0  ;;  %v1368_v20 = vmul.f32 0.11111111, %v1304_v1  ;;  %v1017_v52 = vadd.f32 %v859_v14, %v620_v55  ;;  %v860_v23 = vrot.slane %v623_v28, 1  ;;  %v2626_v55 = vld [vmem:[%s1984_s19 + $0x288] sm:$0xff] }
  0xaa   : > { %v1149_v26 = vrot.slane %v623_v28, 2  ;;  %v431_v36 = vadd.f32 %v2565_v18, %v2515_v6  ;;  %v1305_v32 = vadd.f32 %v1146_v61, %v1016_v54  ;;  %v433_v5 = vadd.f32 %v2572_v22, %v2518_v9  ;;  %v242_v6 = vld [vmem:[%s1984_s19 + $0x238] sm:$0x3] }
  0xab   : > { %1648 = vst [vmem:[%s2078_s25 + $0x140] sm:$0xff] %v1583_v51  ;;  %v1444_v31 = vmul.f32 %v2001_v15, %v1368_v20  ;;  %v1306_v37 = vadd.f32 %v1148_v12, %v1017_v52  ;;  %v861_v38 = vrot.slane %v625_v2, 1  ;;  %v1150_v27 = vrot.slane %v625_v2, 2 }
  0xac   : > { %v624_v39 = vadd.f32 %v2623_v7, %v431_v36  ;;  %v434_v40 = vadd.f32 %v1805_v29, %v241_v10  ;;  %v1369_v4 = vmul.f32 0.11111111, %v1305_v32  ;;  %v626_v19 = vadd.f32 %v2626_v55, %v433_v5  ;;  %v2659_v29 = vld [vmem:[%s1984_s19 + $0x2b0] sm:$0xff] }
  0xad   : > { %v1520_v11 = vadd.f32 %v2005_v17, %v1444_v31  ;;  %v1370_v33 = vmul.f32 0.11111111, %v1306_v37  ;;  %v862_v9 = vsel %vm749_vm0, %v860_v23, %v861_v38  ;;  %v1151_v47 = vsel %vm1038_vm1, %v1149_v26, %v1150_v27 }
  0xae   : > { %v863_v48 = vrot.slane %v624_v39, 1  ;;  %v1152_v3 = vrot.slane %v624_v39, 2  ;;  %v1445_v24 = vmul.f32 %v1999_v13, %v1369_v4  ;;  %v1018_v53 = vadd.f32 %v862_v9, %v623_v28  ;;  %v2673_v4 = vld [vmem:[%s1984_s19 + $0x2a8] sm:$0xff] }
  0xaf   : > { %v1584_v60 = vmax.f32 %v1520_v11, 0.0  ;;  %v1446_v49 = vmul.f32 %v2001_v15, %v1370_v33  ;;  %v864_v30 = vrot.slane %v626_v19, 1  ;;  %v1153_v42 = vrot.slane %v626_v19, 2 }
  0xb0   : > { %v627_v25 = vadd.f32 %v1901_v62, %v434_v40  ;;  %v435_v34 = vadd.f32 %v1806_v44, %v242_v6  ;;  %v1521_v59 = vadd.f32 %v2003_v16, %v1445_v24  ;;  %v1307_v57 = vadd.f32 %v1151_v47, %v1018_v53  ;;  %v2680_v47 = vld [vmem:[%s1984_s19 + $0x2b8] sm:$0xff]  ;;  %v1811_v53 = vld [vmem:[%s1984_s19 + $0x290] sm:$0x3] }
  0xb1   : > { %1649 = vst.msk [vmem:[%s2078_s25 + $0x148] sm:$0xff] %vm1608_vm2, %v1584_v60  ;;  %v1522_v50 = vadd.f32 %v2005_v17, %v1446_v49  ;;  %v436_v63 = vadd.f32 %v2599_v21, %v2546_v56  ;;  %v865_v8 = vsel %vm749_vm0, %v863_v48, %v864_v30  ;;  %v1154_v0 = vsel %vm1038_vm1, %v1152_v3, %v1153_v42  ;;  %v2652_v56 = vld [vmem:[%s1984_s19 + $0x2a0] sm:$0xff] }
  0xb2   : > { %v866_v45 = vrot.slane %v627_v25, 1  ;;  %v1155_v46 = vrot.slane %v627_v25, 2  ;;  %v1585_v1 = vmax.f32 %v1521_v59, 0.0  ;;  %v1371_v41 = vmul.f32 0.11111111, %v1307_v57 }
  0xb3   : > { %v1586_v28 = vmax.f32 %v1522_v50, 0.0  ;;  %v1019_v61 = vadd.f32 %v865_v8, %v624_v39  ;;  %v628_v10 = vadd.f32 %v1902_v43, %v435_v34  ;;  %v438_v51 = vadd.f32 %v2612_v35, %v2549_v58  ;;  %v247_v3 = vld [vmem:[%s1984_s19 + $0x260] sm:$0x3] }
  0xb4   : > { %v867_v14 = vsel %vm749_vm0, %v861_v38, %v866_v45  ;;  %v1156_v12 = vsel %vm1038_vm1, %v1150_v27, %v1155_v46  ;;  %1650 = vst [vmem:[%s2078_s25 + $0x150] sm:$0xff] %v1585_v1  ;;  %v1447_v20 = vmul.f32 %v1999_v13, %v1371_v41  ;;  %v629_v23 = vadd.f32 %v2652_v56, %v436_v63  ;;  %v1907_v50 = vld [vmem:[%s1984_s19 + $0x2c0] sm:$0x3] }
  0xb5   : > { %1651 = vst.msk [vmem:[%s2078_s25 + $0x158] sm:$0xff] %vm1608_vm2, %v1586_v28  ;;  %v1308_v54 = vadd.f32 %v1154_v0, %v1019_v61  ;;  %v1020_v52 = vadd.f32 %v867_v14, %v625_v2  ;;  %v868_v26 = vrot.slane %v628_v10, 1  ;;  %v1157_v36 = vrot.slane %v628_v10, 2  ;;  %v1908_v0 = vld [vmem:[%s1984_s19 + $0x2c8] sm:$0x3] }
  0xb6   : > { %v2663_v31 = vadd.f32 %v2659_v29, %v438_v51  ;;  %v437_v58 = vadd.f32 %v2623_v7, %v2565_v18  ;;  %v1523_v32 = vadd.f32 %v2003_v16, %v1447_v20  ;;  %v870_v2 = vrot.slane %v629_v23, 1 }
  0xb7   : > { %v1372_v37 = vmul.f32 0.11111111, %v1308_v54  ;;  %v1309_v5 = vadd.f32 %v1156_v12, %v1020_v52  ;;  %v869_v38 = vsel %vm749_vm0, %v864_v30, %v868_v26  ;;  %v1158_v27 = vsel %vm1038_vm1, %v1153_v42, %v1157_v36  ;;  %v248_v30 = vld [vmem:[%s1984_s19 + $0x268] sm:$0x3]  ;;  %v1812_v42 = vld [vmem:[%s1984_s19 + $0x298] sm:$0x3] }
  0xb8   : > { %v871_v39 = vrot.slane %v2663_v31, 1  ;;  %v1159_v40 = vrot.slane %v629_v23, 2  ;;  %v1587_v62 = vmax.f32 %v1523_v32, 0.0  ;;  %v1021_v11 = vadd.f32 %v869_v38, %v626_v19 }
  0xb9   : > { %v1448_v6 = vmul.f32 %v2001_v15, %v1372_v37  ;;  %v1373_v18 = vmul.f32 0.11111111, %v1309_v5  ;;  %v1160_v44 = vrot.slane %v2663_v31, 2  ;;  %v439_v9 = vadd.f32 %v2626_v55, %v2572_v22  ;;  %v2708_v5 = vld [vmem:[%s1984_s19 + $0x2d0] sm:$0xff] }
  0xba   : > { %v872_v33 = vsel %vm749_vm0, %v870_v2, %v871_v39  ;;  %v630_v48 = vadd.f32 %v2673_v4, %v437_v58  ;;  %1652 = vst [vmem:[%s2078_s25 + $0x160] sm:$0xff] %v1587_v62  ;;  %v1310_v24 = vadd.f32 %v1158_v27, %v1021_v11  ;;  %v440_v1 = vadd.f32 %v1811_v53, %v247_v3  ;;  %v253_v11 = vld [vmem:[%s1984_s19 + $0x290] sm:$0x3] }
  0xbb   : > { %v1524_v60 = vadd.f32 %v2005_v17, %v1448_v6  ;;  %v1449_v19 = vmul.f32 %v1999_v13, %v1373_v18  ;;  %v1022_v49 = vadd.f32 %v872_v33, %v629_v23  ;;  %v1161_v22 = vsel %vm1038_vm1, %v1159_v40, %v1160_v44 }
  0xbc   : > { %v632_v25 = vadd.f32 %v2680_v47, %v439_v9  ;;  %v873_v34 = vrot.slane %v630_v48, 1  ;;  %v1162_v59 = vrot.slane %v630_v48, 2  ;;  %v1374_v63 = vmul.f32 0.11111111, %v1310_v24 }
  0xbd   : > { %v1588_v57 = vmax.f32 %v1524_v60, 0.0  ;;  %v1525_v43 = vadd.f32 %v2003_v16, %v1449_v19  ;;  %v1311_v8 = vadd.f32 %v1161_v22, %v1022_v49  ;;  %v441_v28 = vadd.f32 %v1812_v42, %v248_v30  ;;  %v2721_v60 = vld [vmem:[%s1984_s19 + $0x2e0] sm:$0xff]  ;;  %v2732_v22 = vld [vmem:[%s1984_s19 + $0x2d8] sm:$0xff] }
  0xbe   : > { %v874_v45 = vrot.slane %v632_v25, 1  ;;  %v1163_v46 = vrot.slane %v632_v25, 2  ;;  %v1450_v61 = vmul.f32 %v2001_v15, %v1374_v63  ;;  %v442_v12 = vadd.f32 %v2652_v56, %v2599_v21 }
  0xbf   : > { %1653 = vst.msk [vmem:[%s2078_s25 + $0x168] sm:$0xff] %vm1608_vm2, %v1588_v57  ;;  %v1589_v41 = vmax.f32 %v1525_v43, 0.0  ;;  %v1375_v14 = vmul.f32 0.11111111, %v1311_v8  ;;  %v633_v20 = vadd.f32 %v1907_v50, %v440_v1  ;;  %v634_v54 = vadd.f32 %v1908_v0, %v441_v28  ;;  %v1913_v43 = vld [vmem:[%s1984_s19 + $0x2f0] sm:$0x3] }
  0xc0   : > { %v875_v10 = vsel %vm749_vm0, %v873_v34, %v874_v45  ;;  %v1164_v51 = vsel %vm1038_vm1, %v1162_v59, %v1163_v46  ;;  %v1526_v52 = vadd.f32 %v2005_v17, %v1450_v61  ;;  %v444_v36 = vadd.f32 %v2659_v29, %v2612_v35 }
  0xc1   : > { %1654 = vst [vmem:[%s2078_s25 + $0x170] sm:$0xff] %v1589_v41  ;;  %v1451_v23 = vmul.f32 %v1999_v13, %v1375_v14  ;;  %v1023_v26 = vadd.f32 %v875_v10, %v630_v48  ;;  %v876_v58 = vrot.slane %v633_v20, 1  ;;  %v1165_v32 = vrot.slane %v633_v20, 2 }
  0xc2   : > { %v878_v21 = vrot.slane %v634_v54, 1  ;;  %v1167_v37 = vrot.slane %v634_v54, 2  ;;  %v1590_v2 = vmax.f32 %v1526_v52, 0.0  ;;  %v635_v40 = vadd.f32 %v2708_v5, %v442_v12 }
  0xc3   : > { %v1527_v38 = vadd.f32 %v2003_v16, %v1451_v23  ;;  %v1312_v27 = vadd.f32 %v1164_v51, %v1023_v26  ;;  %v877_v62 = vsel %vm749_vm0, %v871_v39, %v876_v58  ;;  %v1166_v6 = vsel %vm1038_vm1, %v1160_v44, %v1165_v32  ;;  %v1817_v39 = vld [vmem:[%s1984_s19 + $0x2c0] sm:$0x3]  ;;  %v1914_v58 = vld [vmem:[%s1984_s19 + $0x2f8] sm:$0x3] }
  0xc4   : > { %v879_v35 = vsel %vm749_vm0, %v874_v45, %v878_v21  ;;  %v1168_v18 = vsel %vm1038_vm1, %v1163_v46, %v1167_v37  ;;  %1655 = vst.msk [vmem:[%s2078_s25 + $0x178] sm:$0xff] %vm1608_vm2, %v1590_v2  ;;  %v1024_v48 = vadd.f32 %v877_v62, %v2663_v31  ;;  %v637_v44 = vadd.f32 %v2721_v60, %v444_v36  ;;  %v1818_v46 = vld [vmem:[%s1984_s19 + $0x2c8] sm:$0x3] }
  0xc5   : > { %v1591_v33 = vmax.f32 %v1527_v38, 0.0  ;;  %v1376_v9 = vmul.f32 0.11111111, %v1312_v27  ;;  %v1025_v3 = vadd.f32 %v879_v35, %v632_v25  ;;  %v880_v19 = vrot.slane %v635_v40, 1  ;;  %v2735_v25 = vld [vmem:[%s1984_s19 + $0x2e8] sm:$0xff] }
  0xc6   : > { %v1169_v24 = vrot.slane %v635_v40, 2  ;;  %v443_v49 = vadd.f32 %v2673_v4, %v2623_v7  ;;  %v1313_v30 = vadd.f32 %v1166_v6, %v1024_v48  ;;  %v445_v31 = vadd.f32 %v2680_v47, %v2626_v55  ;;  %v254_v7 = vld [vmem:[%s1984_s19 + $0x298] sm:$0x3] }
  0xc7   : > { %1656 = vst [vmem:[%s2078_s25 + $0x180] sm:$0xff] %v1591_v33  ;;  %v1452_v53 = vmul.f32 %v2001_v15, %v1376_v9  ;;  %v1314_v42 = vadd.f32 %v1168_v18, %v1025_v3  ;;  %v881_v34 = vrot.slane %v637_v44, 1  ;;  %v1170_v59 = vrot.slane %v637_v44, 2 }
  0xc8   : > { %v636_v50 = vadd.f32 %v2732_v22, %v443_v49  ;;  %v446_v57 = vadd.f32 %v1817_v39, %v253_v11  ;;  %v1377_v8 = vmul.f32 0.11111111, %v1313_v30  ;;  %v638_v45 = vadd.f32 %v2735_v25, %v445_v31  ;;  %v1917_v39 = vld [vmem:[%s1984_s19 + $0x310] sm:$0xff] }
  0xc9   : > { %v1528_v63 = vadd.f32 %v2005_v17, %v1452_v53  ;;  %v1378_v0 = vmul.f32 0.11111111, %v1314_v42  ;;  %v882_v55 = vsel %vm749_vm0, %v880_v19, %v881_v34  ;;  %v1171_v1 = vsel %vm1038_vm1, %v1169_v24, %v1170_v59 }
  0xca   : > { %v883_v28 = vrot.slane %v636_v50, 1  ;;  %v1172_v41 = vrot.slane %v636_v50, 2  ;;  %v1453_v14 = vmul.f32 %v1999_v13, %v1377_v8  ;;  %v1026_v10 = vadd.f32 %v882_v55, %v635_v40  ;;  %v2776_v8 = vld [vmem:[%s1984_s19 + $0x308] sm:$0xff] }
  0xcb   : > { %v1592_v61 = vmax.f32 %v1528_v63, 0.0  ;;  %v1454_v12 = vmul.f32 %v2001_v15, %v1378_v0  ;;  %v884_v51 = vrot.slane %v638_v45, 1  ;;  %v1173_v20 = vrot.slane %v638_v45, 2 }
  0xcc   : > { %v639_v54 = vadd.f32 %v1913_v43, %v446_v57  ;;  %v447_v52 = vadd.f32 %v1818_v46, %v254_v7  ;;  %v1529_v23 = vadd.f32 %v2003_v16, %v1453_v14  ;;  %v1315_v36 = vadd.f32 %v1171_v1, %v1026_v10  ;;  %v2783_v1 = vld [vmem:[%s1984_s19 + $0x318] sm:$0xff]  ;;  %v1823_v10 = vld [vmem:[%s1984_s19 + $0x2f0] sm:$0x3] }
  0xcd   : > { %1657 = vst.msk [vmem:[%s2078_s25 + $0x188] sm:$0xff] %vm1608_vm2, %v1592_v61  ;;  %v1530_v26 = vadd.f32 %v2005_v17, %v1454_v12  ;;  %v448_v32 = vadd.f32 %v2708_v5, %v2652_v56  ;;  %v885_v21 = vsel %vm749_vm0, %v883_v28, %v884_v51  ;;  %v1174_v37 = vsel %vm1038_vm1, %v1172_v41, %v1173_v20  ;;  %v1915_v56 = vld [vmem:[%s1984_s19 + $0x300] sm:$0xff] }
  0xce   : > { %v886_v2 = vrot.slane %v639_v54, 1  ;;  %v1175_v38 = vrot.slane %v639_v54, 2  ;;  %v1593_v27 = vmax.f32 %v1529_v23, 0.0  ;;  %v1379_v62 = vmul.f32 0.11111111, %v1315_v36 }
  0xcf   : > { %v1594_v40 = vmax.f32 %v1530_v26, 0.0  ;;  %v1027_v6 = vadd.f32 %v885_v21, %v636_v50  ;;  %v640_v11 = vadd.f32 %v1914_v58, %v447_v52  ;;  %v450_v33 = vadd.f32 %v2721_v60, %v2659_v29  ;;  %v259_v41 = vld [vmem:[%s1984_s19 + $0x2c0] sm:$0x3] }
  0xd0   : > { %v887_v35 = vsel %vm749_vm0, %v881_v34, %v886_v2  ;;  %v1176_v18 = vsel %vm1038_vm1, %v1170_v59, %v1175_v38  ;;  %1658 = vst [vmem:[%s2078_s25 + $0x190] sm:$0xff] %v1593_v27  ;;  %v1455_v9 = vmul.f32 %v1999_v13, %v1379_v62  ;;  %v641_v19 = vadd.f32 %v1915_v56, %v448_v32  ;;  %v1919_v26 = vld [vmem:[%s1984_s19 + $0x320] sm:$0x3] }
  0xd1   : > { %1659 = vst.msk [vmem:[%s2078_s25 + $0x198] sm:$0xff] %vm1608_vm2, %v1594_v40  ;;  %v1316_v48 = vadd.f32 %v1174_v37, %v1027_v6  ;;  %v1028_v3 = vadd.f32 %v887_v35, %v637_v44  ;;  %v888_v24 = vrot.slane %v640_v11, 1  ;;  %v1177_v49 = vrot.slane %v640_v11, 2  ;;  %v1920_v37 = vld [vmem:[%s1984_s19 + $0x328] sm:$0x3] }
  0xd2   : > { %v2766_v53 = vadd.f32 %v1917_v39, %v450_v33  ;;  %v449_v30 = vadd.f32 %v2732_v22, %v2673_v4  ;;  %v1531_v29 = vadd.f32 %v2003_v16, %v1455_v9  ;;  %v890_v34 = vrot.slane %v641_v19, 1 }
  0xd3   : > { %v1380_v42 = vmul.f32 0.11111111, %v1316_v48  ;;  %v1317_v31 = vadd.f32 %v1176_v18, %v1028_v3  ;;  %v889_v44 = vsel %vm749_vm0, %v884_v51, %v888_v24  ;;  %v1178_v59 = vsel %vm1038_vm1, %v1173_v20, %v1177_v49  ;;  %v260_v51 = vld [vmem:[%s1984_s19 + $0x2c8] sm:$0x3]  ;;  %v1824_v20 = vld [vmem:[%s1984_s19 + $0x2f8] sm:$0x3] }
  0xd4   : > { %v891_v50 = vrot.slane %v2766_v53, 1  ;;  %v1179_v57 = vrot.slane %v641_v19, 2  ;;  %v1595_v43 = vmax.f32 %v1531_v29, 0.0  ;;  %v1029_v63 = vadd.f32 %v889_v44, %v638_v45  ;;  %v1921_v3 = vld [vmem:[%s1984_s19 + $0x330] sm:$0xff] }
  0xd5   : > { %v1456_v7 = vmul.f32 %v2001_v15, %v1380_v42  ;;  %v1381_v4 = vmul.f32 0.11111111, %v1317_v31  ;;  %v1180_v46 = vrot.slane %v2766_v53, 2  ;;  %v451_v55 = vadd.f32 %v2735_v25, %v2680_v47 }
  0xd6   : > { %v892_v0 = vsel %vm749_vm0, %v890_v34, %v891_v50  ;;  %v642_v28 = vadd.f32 %v2776_v8, %v449_v30  ;;  %1660 = vst [vmem:[%s2078_s25 + $0x1a0] sm:$0xff] %v1595_v43  ;;  %v1318_v14 = vadd.f32 %v1178_v59, %v1029_v63  ;;  %v452_v27 = vadd.f32 %v1823_v10, %v259_v41  ;;  %v1923_v59 = vld [vmem:[%s1984_s19 + $0x340] sm:$0xff]  ;;  %v1922_v41 = vld [vmem:[%s1984_s19 + $0x338] sm:$0xff] }
  0xd7   : > { %v1532_v61 = vadd.f32 %v2005_v17, %v1456_v7  ;;  %v1457_v45 = vmul.f32 %v1999_v13, %v1381_v4  ;;  %v1030_v12 = vadd.f32 %v892_v0, %v641_v19  ;;  %v1181_v47 = vsel %vm1038_vm1, %v1179_v57, %v1180_v46  ;;  %v265_v4 = vld [vmem:[%s1984_s19 + $0x2f0] sm:$0x3] }
  0xd8   : > { %v644_v54 = vadd.f32 %v2783_v1, %v451_v55  ;;  %v893_v52 = vrot.slane %v642_v28, 1  ;;  %v1182_v23 = vrot.slane %v642_v28, 2  ;;  %v1382_v32 = vmul.f32 0.11111111, %v1318_v14 }
  0xd9   : > { %v1596_v36 = vmax.f32 %v1532_v61, 0.0  ;;  %v1533_v58 = vadd.f32 %v2003_v16, %v1457_v45  ;;  %v1319_v21 = vadd.f32 %v1181_v47, %v1030_v12  ;;  %v453_v40 = vadd.f32 %v1824_v20, %v260_v51  ;;  %v1829_v61 = vld [vmem:[%s1984_s19 + $0x320] sm:$0x3]  ;;  %v1924_v12 = vld [vmem:[%s1984_s19 + $0x348] sm:$0xff] }
  0xda   : > { %v894_v2 = vrot.slane %v644_v54, 1  ;;  %v1183_v38 = vrot.slane %v644_v54, 2  ;;  %v1458_v6 = vmul.f32 %v2001_v15, %v1382_v32  ;;  %v454_v18 = vadd.f32 %v1915_v56, %v2708_v5 }
  0xdb   : > { %1661 = vst.msk [vmem:[%s2078_s25 + $0x1a8] sm:$0xff] %vm1608_vm2, %v1596_v36  ;;  %v1597_v62 = vmax.f32 %v1533_v58, 0.0  ;;  %v1383_v35 = vmul.f32 0.11111111, %v1319_v21  ;;  %v645_v9 = vadd.f32 %v1919_v26, %v452_v27  ;;  %v646_v48 = vadd.f32 %v1920_v37, %v453_v40  ;;  %v1925_v26 = vld [vmem:[%s1984_s19 + $0x350] sm:$0x3] }
  0xdc   : > { %v895_v11 = vsel %vm749_vm0, %v893_v52, %v894_v2  ;;  %v1184_v33 = vsel %vm1038_vm1, %v1182_v23, %v1183_v38  ;;  %v1534_v19 = vadd.f32 %v2005_v17, %v1458_v6  ;;  %v456_v30 = vadd.f32 %v1917_v39, %v2721_v60  ;;  %v266_v36 = vld [vmem:[%s1984_s19 + $0x2f8] sm:$0x3]  ;;  %v1830_v21 = vld [vmem:[%s1984_s19 + $0x328] sm:$0x3] }
  0xdd   : > { %1662 = vst [vmem:[%s2078_s25 + $0x1b0] sm:$0xff] %v1597_v62  ;;  %v1459_v24 = vmul.f32 %v1999_v13, %v1383_v35  ;;  %v1031_v49 = vadd.f32 %v895_v11, %v642_v28  ;;  %v896_v29 = vrot.slane %v645_v9, 1  ;;  %v1185_v5 = vrot.slane %v645_v9, 2 }
  0xde   : > { %v898_v56 = vrot.slane %v646_v48, 1  ;;  %v1187_v42 = vrot.slane %v646_v48, 2  ;;  %v1598_v31 = vmax.f32 %v1534_v19, 0.0  ;;  %v647_v57 = vadd.f32 %v1921_v3, %v454_v18  ;;  %v1926_v3 = vld [vmem:[%s1984_s19 + $0x358] sm:$0x3] }
  0xdf   : > { %v1535_v34 = vadd.f32 %v2003_v16, %v1459_v24  ;;  %v1320_v44 = vadd.f32 %v1184_v33, %v1031_v49  ;;  %v897_v43 = vsel %vm749_vm0, %v891_v50, %v896_v29  ;;  %v1186_v7 = vsel %vm1038_vm1, %v1180_v46, %v1185_v5 }
  0xe0   : > { %v899_v60 = vsel %vm749_vm0, %v894_v2, %v898_v56  ;;  %v1188_v39 = vsel %vm1038_vm1, %v1183_v38, %v1187_v42  ;;  %1663 = vst.msk [vmem:[%s2078_s25 + $0x1b8] sm:$0xff] %vm1608_vm2, %v1598_v31  ;;  %v1032_v55 = vadd.f32 %v897_v43, %v2766_v53  ;;  %v649_v50 = vadd.f32 %v1923_v59, %v456_v30 }
  0xe1   : > { %v1599_v63 = vmax.f32 %v1535_v34, 0.0  ;;  %v1384_v0 = vmul.f32 0.11111111, %v1320_v44  ;;  %v1033_v28 = vadd.f32 %v899_v60, %v644_v54  ;;  %v900_v45 = vrot.slane %v647_v57, 1 }
  0xe2   : > { %v1189_v46 = vrot.slane %v647_v57, 2  ;;  %v455_v14 = vadd.f32 %v2776_v8, %v2732_v22  ;;  %v1321_v51 = vadd.f32 %v1186_v7, %v1032_v55  ;;  %v457_v53 = vadd.f32 %v2783_v1, %v2735_v25 }
  0xe3   : > { %1664 = vst [vmem:[%s2078_s25 + $0x1c0] sm:$0xff] %v1599_v63  ;;  %v1460_v10 = vmul.f32 %v2001_v15, %v1384_v0  ;;  %v1322_v20 = vadd.f32 %v1188_v39, %v1033_v28  ;;  %v901_v47 = vrot.slane %v649_v50, 1  ;;  %v1190_v54 = vrot.slane %v649_v50, 2 }
  0xe4   : > { %v648_v52 = vadd.f32 %v1922_v41, %v455_v14  ;;  %v458_v23 = vadd.f32 %v1829_v61, %v265_v4  ;;  %v1385_v32 = vmul.f32 0.11111111, %v1321_v51  ;;  %v650_v8 = vadd.f32 %v1924_v12, %v457_v53 }
  0xe5   : > { %v1536_v58 = vadd.f32 %v2005_v17, %v1460_v10  ;;  %v1386_v22 = vmul.f32 0.11111111, %v1322_v20  ;;  %v902_v37 = vsel %vm749_vm0, %v900_v45, %v901_v47  ;;  %v1191_v2 = vsel %vm1038_vm1, %v1189_v46, %v1190_v54 }
  0xe6   : > { %v903_v38 = vrot.slane %v648_v52, 1  ;;  %v1192_v25 = vrot.slane %v648_v52, 2  ;;  %v1461_v27 = vmul.f32 %v1999_v13, %v1385_v32  ;;  %v1034_v62 = vadd.f32 %v902_v37, %v647_v57 }
  0xe7   : > { %v1600_v1 = vmax.f32 %v1536_v58, 0.0  ;;  %v1462_v40 = vmul.f32 %v2001_v15, %v1386_v22  ;;  %v904_v6 = vrot.slane %v650_v8, 1  ;;  %v1193_v35 = vrot.slane %v650_v8, 2 }
  0xe8   : > { %v651_v18 = vadd.f32 %v1925_v26, %v458_v23  ;;  %v459_v11 = vadd.f32 %v1830_v21, %v266_v36  ;;  %v1537_v33 = vadd.f32 %v2003_v16, %v1461_v27  ;;  %v1323_v48 = vadd.f32 %v1191_v2, %v1034_v62 }
  0xe9   : > { %1665 = vst.msk [vmem:[%s2078_s25 + $0x1c8] sm:$0xff] %vm1608_vm2, %v1600_v1  ;;  %v1538_v9 = vadd.f32 %v2005_v17, %v1462_v40  ;;  %v905_v19 = vsel %vm749_vm0, %v903_v38, %v904_v6  ;;  %v1194_v24 = vsel %vm1038_vm1, %v1192_v25, %v1193_v35 }
  0xea   : > { %v906_v49 = vrot.slane %v651_v18, 1  ;;  %v1195_v30 = vrot.slane %v651_v18, 2  ;;  %v1601_v29 = vmax.f32 %v1537_v33, 0.0  ;;  %v1387_v56 = vmul.f32 0.11111111, %v1323_v48 }
  0xeb   : > { %v1602_v5 = vmax.f32 %v1538_v9, 0.0  ;;  %v1035_v42 = vadd.f32 %v905_v19, %v648_v52  ;;  %v652_v44 = vadd.f32 %v1926_v3, %v459_v11 }
  0xec   : > { %v907_v31 = vsel %vm749_vm0, %v901_v47, %v906_v49  ;;  %v1196_v34 = vsel %vm1038_vm1, %v1190_v54, %v1195_v30  ;;  %1666 = vst [vmem:[%s2078_s25 + $0x1d0] sm:$0xff] %v1601_v29  ;;  %v1463_v59 = vmul.f32 %v1999_v13, %v1387_v56 }
  0xed   : > { %1667 = vst.msk [vmem:[%s2078_s25 + $0x1d8] sm:$0xff] %vm1608_vm2, %v1602_v5  ;;  %v1324_v57 = vadd.f32 %v1194_v24, %v1035_v42  ;;  %v1036_v43 = vadd.f32 %v907_v31, %v649_v50  ;;  %v908_v7 = vrot.slane %v652_v44, 1  ;;  %v1197_v60 = vrot.slane %v652_v44, 2 }
  0xee   : > { %v1539_v39 = vadd.f32 %v2003_v16, %v1463_v59 }
  0xef   : > { %v1388_v4 = vmul.f32 0.11111111, %v1324_v57  ;;  %v1325_v63 = vadd.f32 %v1196_v34, %v1036_v43  ;;  %v909_v0 = vsel %vm749_vm0, %v904_v6, %v908_v7  ;;  %v1198_v55 = vsel %vm1038_vm1, %v1193_v35, %v1197_v60 }
  0xf0   : > { %v1603_v28 = vmax.f32 %v1539_v39, 0.0  ;;  %v1037_v45 = vadd.f32 %v909_v0, %v650_v8 }
  0xf1   : > { %v1464_v41 = vmul.f32 %v2001_v15, %v1388_v4  ;;  %v1389_v61 = vmul.f32 0.11111111, %v1325_v63 }
  0xf2   : > { %1668 = vst [vmem:[%s2078_s25 + $0x1e0] sm:$0xff] %v1603_v28  ;;  %v1326_v14 = vadd.f32 %v1198_v55, %v1037_v45 }
  0xf3   : > { %v1540_v50 = vadd.f32 %v2005_v17, %v1464_v41  ;;  %v1465_v46 = vmul.f32 %v1999_v13, %v1389_v61 }
  0xf4   : > { %v1390_v51 = vmul.f32 0.11111111, %v1326_v14 }
  0xf5   : > { %v1604_v12 = vmax.f32 %v1540_v50, 0.0  ;;  %v1541_v10 = vadd.f32 %v2003_v16, %v1465_v46 }
  0xf6   : > { %v1466_v53 = vmul.f32 %v2001_v15, %v1390_v51 }
  0xf7   : > { %1669 = vst.msk [vmem:[%s2078_s25 + $0x1e8] sm:$0xff] %vm1608_vm2, %v1604_v12  ;;  %v1605_v20 = vmax.f32 %v1541_v10, 0.0 }
  0xf8   : > { %v1542_v47 = vadd.f32 %v2005_v17, %v1466_v53 }
  0xf9   : > { %1670 = vst [vmem:[%s2078_s25 + $0x1f0] sm:$0xff] %v1605_v20 }
  0xfa   : > { %v1606_v54 = vmax.f32 %v1542_v47, 0.0 }
  0xfc   : > { %1671 = vst.msk [vmem:[%s2078_s25 + $0x1f8] sm:$0xff] %vm1608_vm2, %v1606_v54 }
  0xfd PF: > { %s13_s12 = sadd.s32 1, %s1945_s12  }
  0xfe   : > { %p10_p4 = scmp.ge.s32.totalorder %s13_s12, 4  }
 0x100   :  { %12 = sbr.rel (!%p10_p4) target bundleno = 1 (0x1), region = 64 }

</bundles_post_ra>
